<compile_context>
chip_gen: v5e
topology: v5e:2x2
jax: 0.10.0
libtpu: 0.0.40
codegen_flags: <defaults>
</compile_context>

<pallas_src>
import functools
from math import pi

import numpy as np
import jax
import jax.numpy as jnp
from jax.experimental import pallas as pl
from jax.experimental.pallas import tpu as pltpu

LANE = 128
SUBLANE = 8


def _round_up(a, b):
    return (a + b - 1) // b * b


def _cmatmul3(ar, ai, br, bi, bs):
    """Gauss/Karatsuba 3-multiply complex matmul; bf16 MXU inputs, f32 acc.

    bs = br + bi is loop-invariant and precomputed on the host."""
    a_r = ar.astype(jnp.bfloat16)
    a_i = ai.astype(jnp.bfloat16)
    a_s = (ar + ai).astype(jnp.bfloat16)
    t1 = jnp.dot(a_r, br, preferred_element_type=jnp.float32)
    t2 = jnp.dot(a_i, bi, preferred_element_type=jnp.float32)
    t3 = jnp.dot(a_s, bs, preferred_element_type=jnp.float32)
    return t1 - t2, t3 - t1 - t2


# --------------------------- main z-stepping kernel ---------------------------
def bpm_kernel(uinr_ref, uini_ref, s_ref, x_ref,
               p1r_ref, p1i_ref, p1s_ref,
               our_ref, oui_ref, *, tz, nb):
    zc = pl.program_id(1)

    # The output blocks are resident across the (inner, "arbitrary") z axis:
    # use them directly as the field accumulator (P3 pattern).
    @pl.when(zc == 0)
    def _():
        our_ref[...] = uinr_ref[...]
        oui_ref[...] = uini_ref[...]

    b1r = p1r_ref[...]
    b1i = p1i_ref[...]
    b1s = p1s_ref[...]
    s = s_ref[...]                       # (TR, NB_pad) per-row phase scales

    ur = our_ref[...]
    ui = oui_ref[...]

    # TZ slices per grid step: amortizes per-grid-step overhead and gives the
    # scheduler a long window to overlap cos/sin (EUP) with the MXU pushes.
    for zi in range(tz):
        # diffraction: u <- ifft(fft(u) * f1) == u @ P1 (dense circulant op)
        vr, vi = _cmatmul3(ur, ui, b1r, b1i, b1s)

        # refraction phase for this slice, built on the VPU (off the MXU):
        #   phase[r, :] = (k0*drz/cos(theta_{r%num})) * x[zi, r//num, :]
        # S[:, b] carries the coefficient where r//num == b (0 elsewhere), so
        # the row->batch selection is an exact f32 sum of nb rank-1 terms.
        xs = x_ref[zi]                   # (NB_pad, N_pad)
        phase = s[:, 0:1] * xs[0:1, :]
        for b in range(1, nb):
            phase = phase + s[:, b:b + 1] * xs[b:b + 1, :]
        cr = jnp.cos(phase)              # padded lanes: x == 0 -> exp = 1
        ci = jnp.sin(phase)

        ur = vr * cr - vi * ci
        ui = vr * ci + vi * cr

    our_ref[...] = ur
    oui_ref[...] = ui


# ------------------------ sensor propagation kernel ---------------------------
def sensor_kernel(ur_ref, ui_ref, p2r_ref, p2i_ref, p2s_ref, our_ref, oui_ref):
    # u @ P2 once per row tile; P2 does NOT sit in VMEM during the z loop.
    our, oui = _cmatmul3(ur_ref[...], ui_ref[...],
                         p2r_ref[...], p2i_ref[...], p2s_ref[...])
    our_ref[...] = our
    oui_ref[...] = oui


# ------------------------------ module setup ----------------------------------
def make_op_bpm_par(siz, Lx, Lz, k0, k, uin, SensorDist, padfact, thetas):
    """Deterministic construction of all OpBPM_par buffers.

    `uin` is already in (num, Nx_ext) form (the module stores transpose(uin))."""
    Nx, Nz = siz
    drx = Lx / Nx
    drz = Lz / Nz
    num = thetas.shape[0]
    cos_thetas = np.cos(thetas)

    Nx_ext = padfact * Nx
    pad_sz = (Nx_ext - Nx) // 2
    dkx_ext = 2 * pi / (Nx_ext * drx)
    kx_ext = dkx_ext * np.concatenate(
        [np.arange(Nx_ext // 2), np.arange(-(Nx_ext // 2), 0)]).astype(np.float64)
    Kxx_ext = kx_ext ** 2 + 0j
    dphi_ext = np.real(Kxx_ext / (k + np.sqrt(k ** 2 - Kxx_ext)))
    f1 = np.exp(-1j * dphi_ext * drz)
    f2 = np.exp(-1j * dphi_ext * SensorDist)

    # circulant propagation operators: right-multiplication == fft*diag*ifft
    n = np.arange(Nx_ext)
    W = np.exp(-2j * pi * np.outer(n, n) / Nx_ext)
    Winv = np.exp(2j * pi * np.outer(n, n) / Nx_ext) / Nx_ext
    P1 = W @ np.diag(f1) @ Winv
    P2 = W @ np.diag(f2) @ Winv

    return dict(
        Nx=Nx, Nz=Nz, Nx_ext=Nx_ext, pad_sz=pad_sz, num=num,
        k0=float(k0), drz=float(drz),
        cos_thetas=jnp.asarray(cos_thetas, jnp.float32),
        uin=jnp.asarray(uin, jnp.complex64),          # (num, Nx_ext)
        P1=jnp.asarray(P1, jnp.complex64),
        P2=jnp.asarray(P2, jnp.complex64),
        f1=jnp.asarray(f1, jnp.complex64),
        f2=jnp.asarray(f2, jnp.complex64),
    )


# ------------------------------ forward (Pallas) ------------------------------
def _forward_impl(x, p, single_buffer_invariants):
    Nx, Nz, Nx_ext = p["Nx"], p["Nz"], p["Nx_ext"]
    pad_sz, num = p["pad_sz"], p["num"]
    Nb = x.shape[0]
    R = Nb * num

    # lane axis -> multiple of 128 (lane-dense unmasked stores); row axis ->
    # multiple of 8.  Row tile: >= 2 "parallel" tiles once R_pad >= 256 so
    # both v7x TensorCores get work; TR grows to 512 for large R (v5e/v6e).
    N_pad = _round_up(Nx_ext, LANE)
    NB_pad = _round_up(Nb, SUBLANE)
    R_pad = _round_up(R, SUBLANE)
    if R_pad >= 1024:
        TR = 512
    elif R_pad >= 512:
        TR = 256
    elif R_pad >= 256:
        TR = 128
    else:
        TR = R_pad
    R_pad = _round_up(R_pad, TR)

    # z chunking: TZ slices per grid step (largest divisor of Nz up to 16)
    TZ = 1
    for cand in (16, 8, 4, 2):
        if Nz % cand == 0:
            TZ = cand
            break
    ZC = Nz // TZ

    # initial field (R_pad, N_pad) real/imag f32; rows are (batch, angle)
    u0 = jnp.broadcast_to(p["uin"][None], (Nb, num, Nx_ext)).reshape(R, Nx_ext)
    u0 = jnp.pad(u0, ((0, R_pad - R), (0, N_pad - Nx_ext)))
    ur0 = jnp.real(u0).astype(jnp.float32)
    ui0 = jnp.imag(u0).astype(jnp.float32)

    # un-broadcast phase source, streamed TZ z-slices per grid step:
    # (Nz, NB_pad, N_pad) with the Nx samples at the central Nx_ext lanes.
    xz = jnp.transpose(x[:, 0, :, :], (2, 0, 1)).astype(jnp.float32)  # (Nz, Nb, Nx)
    xz = jnp.pad(xz, ((0, 0), (0, NB_pad - Nb),
                      (pad_sz, N_pad - pad_sz - Nx)))

    # S[r, b] = k0*drz/cos(theta_{r%num}) if b == r//num else 0
    cos_np = np.asarray(p["cos_thetas"], np.float64)
    S = np.zeros((R_pad, NB_pad), np.float32)
    rows = np.arange(R)
    S[rows, rows // num] = (p["k0"] * p["drz"] / cos_np[rows % num]).astype(np.float32)
    S = jnp.asarray(S)

    # zero-padded propagator planes: bf16 MXU inputs + hoisted Gauss sums
    def planes(P):
        Pr = jnp.pad(jnp.real(P).astype(jnp.float32),
                     ((0, N_pad - Nx_ext), (0, N_pad - Nx_ext)))
        Pi = jnp.pad(jnp.imag(P).astype(jnp.float32),
                     ((0, N_pad - Nx_ext), (0, N_pad - Nx_ext)))
        return (Pr.astype(jnp.bfloat16), Pi.astype(jnp.bfloat16),
                (Pr + Pi).astype(jnp.bfloat16))

    p1r, p1i, p1s = planes(p["P1"])
    p2r, p2i, p2s = planes(p["P2"])

    # loop-invariant operands: single-buffer (their index_map ignores the inner
    # z axis, so double buffering buys no overlap and just doubles VMEM).
    def inv_spec(shape, imap):
        if single_buffer_invariants:
            return pl.BlockSpec(shape, imap, pipeline_mode=pl.Buffered(1))
        return pl.BlockSpec(shape, imap)

    # VMEM budget, generation-aware cap (falls back to v7x's 64 MiB per core)
    def nbytes(shape, dt):
        return int(np.prod(shape)) * jnp.dtype(dt).itemsize

    inv_bufs = 1 if single_buffer_invariants else 2
    vmem_main = (inv_bufs * (2 * nbytes((TR, N_pad), jnp.float32)      # uin r/i
                             + nbytes((TR, NB_pad), jnp.float32)       # S
                             + 3 * nbytes((N_pad, N_pad), jnp.bfloat16))  # P1
                 + 2 * nbytes((TZ, NB_pad, N_pad), jnp.float32)        # x chunk
                 + 2 * 2 * nbytes((TR, N_pad), jnp.float32))           # outputs
    vmem_sens = (2 * 2 * nbytes((TR, N_pad), jnp.float32)              # field in
                 + inv_bufs * 3 * nbytes((N_pad, N_pad), jnp.bfloat16)  # P2
                 + 2 * 2 * nbytes((TR, N_pad), jnp.float32))           # outputs
    try:
        cap = int(pltpu.get_tpu_info().vmem_capacity_bytes)
    except Exception:
        cap = 64 * 2 ** 20
    cap = max(32 * 2 ** 20, min(cap, 128 * 2 ** 20))
    vmem_limit = int(min(max(32 * 2 ** 20, 2 * max(vmem_main, vmem_sens)),
                         int(0.9 * cap)))

    row_map = lambda r, z: (r, 0)
    plane_map = lambda r, z: (0, 0)
    in_specs = [
        inv_spec((TR, N_pad), row_map),                             # uin real
        inv_spec((TR, N_pad), row_map),                             # uin imag
        inv_spec((TR, NB_pad), row_map),                            # S
        pl.BlockSpec((TZ, NB_pad, N_pad), lambda r, z: (z, 0, 0)),  # x chunk (streams)
        inv_spec((N_pad, N_pad), plane_map),                        # P1 real
        inv_spec((N_pad, N_pad), plane_map),                        # P1 imag
        inv_spec((N_pad, N_pad), plane_map),                        # P1 real+imag
    ]
    out_specs = [pl.BlockSpec((TR, N_pad), row_map),
                 pl.BlockSpec((TR, N_pad), row_map)]
    out_shape = (jax.ShapeDtypeStruct((R_pad, N_pad), jnp.float32),
                 jax.ShapeDtypeStruct((R_pad, N_pad), jnp.float32))

    fr, fi = pl.pallas_call(
        functools.partial(bpm_kernel, tz=TZ, nb=Nb),
        grid_spec=pltpu.PrefetchScalarGridSpec(
            num_scalar_prefetch=0,
            grid=(R_pad // TR, ZC),
            in_specs=in_specs,
            out_specs=out_specs,
        ),
        out_shape=out_shape,
        compiler_params=pltpu.CompilerParams(
            dimension_semantics=("parallel", "arbitrary"),
            vmem_limit_bytes=vmem_limit,
        ),
    )(ur0, ui0, S, xz, p1r, p1i, p1s)

    # sensor propagation u @ P2 as a separate row-tiled pass
    srow_map = lambda r: (r, 0)
    splane_map = lambda r: (0, 0)
    our, oui = pl.pallas_call(
        sensor_kernel,
        grid_spec=pltpu.PrefetchScalarGridSpec(
            num_scalar_prefetch=0,
            grid=(R_pad // TR,),
            in_specs=[pl.BlockSpec((TR, N_pad), srow_map),
                      pl.BlockSpec((TR, N_pad), srow_map),
                      inv_spec((N_pad, N_pad), splane_map),
                      inv_spec((N_pad, N_pad), splane_map),
                      inv_spec((N_pad, N_pad), splane_map)],
            out_specs=[pl.BlockSpec((TR, N_pad), srow_map),
                       pl.BlockSpec((TR, N_pad), srow_map)],
        ),
        out_shape=out_shape,
        compiler_params=pltpu.CompilerParams(
            dimension_semantics=("parallel",),
            vmem_limit_bytes=vmem_limit,
        ),
    )(fr, fi, p2r, p2i, p2s)

    u = (our[:R] + 1j * oui[:R]).astype(jnp.complex64).reshape(Nb, num, N_pad)
    # TODO(synk): M is a user-supplied measurement module in the PyTorch code;
    # here M is taken to be the deterministic center-crop to the Nx sensor pixels.
    return u[:, :, pad_sz:pad_sz + Nx]


def op_bpm_par_forward(x, p):
    # Prefer single-buffered loop-invariant operands (pl.Buffered(1) hint);
    # fall back to default double-buffering if this jax build rejects it.
    try:
        out = _forward_impl(x, p, single_buffer_invariants=True)
        return jax.block_until_ready(out)
    except Exception:
        return _forward_impl(x, p, single_buffer_invariants=False)


# ------------------------------ plain-JAX reference ---------------------------
def op_bpm_par_reference(x, p):
    Nx, Nz, Nx_ext = p["Nx"], p["Nz"], p["Nx_ext"]
    pad_sz, num = p["pad_sz"], p["num"]
    Nb = x.shape[0]
    xb = jnp.broadcast_to(x, (Nb, num, Nx, Nz)).astype(jnp.float32)
    phase = (p["k0"] * p["drz"]) * xb / p["cos_thetas"][None, :, None, None]
    u = jnp.broadcast_to(p["uin"][None], (Nb, num, Nx_ext)).astype(jnp.complex64)
    for z in range(Nz):
        u = jnp.fft.ifft(jnp.fft.fft(u, axis=-1) * p["f1"], axis=-1)
        ph = jnp.pad(phase[..., z], ((0, 0), (0, 0), (pad_sz, pad_sz)))
        u = u * jnp.exp(1j * ph)
    u = jnp.fft.ifft(jnp.fft.fft(u, axis=-1) * p["f2"], axis=-1)
    return u[:, :, pad_sz:pad_sz + Nx].astype(jnp.complex64)


# ---------------------------------- main --------------------------------------
if __name__ == "__main__":
    # small shapes implied by the module: Nb=2 batches, num=4 angles,
    # Nx=16 transverse pixels, Nz=8 slices, padfact=2 -> Nx_ext=32
    Nx, Nz, Nb, num, padfact = 16, 8, 2, 4, 2
    Lx, Lz = 16.0, 8.0
    k0 = 2 * pi
    k = k0 * 1.0
    SensorDist = 1.0
    thetas = np.linspace(-0.2, 0.2, num)

    drx = Lx / Nx
    Nx_ext = padfact * Nx
    rx_ext = drx * np.arange(-Nx_ext // 2 + 1, Nx_ext // 2 + 1)
    # deterministic incident plane waves, one per angle, on the extended grid
    uin = np.exp(1j * k * np.sin(thetas)[:, None] * rx_ext[None, :]).astype(np.complex64)

    params = make_op_bpm_par((Nx, Nz), Lx, Lz, k0, k, uin, SensorDist, padfact, thetas)

    key = jax.random.PRNGKey(0)
    # input refractive-index perturbation, NCHW-style (Nb, 1, Nx, Nz)
    x = 0.02 * jax.random.normal(key, (Nb, 1, Nx, Nz), dtype=jnp.float32)

    out = jax.block_until_ready(op_bpm_par_forward(x, params))
    ref = op_bpm_par_reference(x, params)
    err = float(jnp.max(jnp.abs(out - ref)))
    assert out.shape == (Nb, num, Nx), out.shape
    assert out.dtype == jnp.complex64, out.dtype
    # bf16 MXU inputs drift ~1e-2 over the Nz+1 unit-modulus operator
    # applications; genuine indexing/layout bugs show up as O(1) errors.
    assert err < 1e-1, f"max abs error vs FFT reference: {err}"
    print("KERNEL_OK")
</pallas_src>

<mosaic_0001>
module attributes {stable_mosaic.version = 11 : i64} {
  func.func @bpm_kernel(%arg0: i32, %arg1: i32, %arg2: memref<8x128xf32, #tpu.memory_space<vmem>>, %arg3: memref<8x128xf32, #tpu.memory_space<vmem>>, %arg4: memref<8x8xf32, #tpu.memory_space<vmem>>, %arg5: memref<8x8x128xf32, #tpu.memory_space<vmem>>, %arg6: memref<128x128xbf16, #tpu.memory_space<vmem>>, %arg7: memref<128x128xbf16, #tpu.memory_space<vmem>>, %arg8: memref<128x128xbf16, #tpu.memory_space<vmem>>, %arg9: memref<8x128xf32, #tpu.memory_space<vmem>>, %arg10: memref<8x128xf32, #tpu.memory_space<vmem>>) attributes {dimension_semantics = [#tpu.dimension_semantics<parallel>, #tpu.dimension_semantics<arbitrary>], iteration_bounds = array<i64: 1, 1>, scalar_prefetch = 0 : i64, scratch_operands = 0 : i64, tpu.core_type = #tpu.core_type<tc>, window_params = [{pipeline_mode = #tpu.pipeline_mode<synchronous>, transform_indices = @transform_0, window_bounds = array<i64: 8, 128>}, {pipeline_mode = #tpu.pipeline_mode<synchronous>, transform_indices = @transform_1, window_bounds = array<i64: 8, 128>}, {pipeline_mode = #tpu.pipeline_mode<synchronous>, transform_indices = @transform_2, window_bounds = array<i64: 8, 8>}, {transform_indices = @transform_3, window_bounds = array<i64: 8, 8, 128>}, {pipeline_mode = #tpu.pipeline_mode<synchronous>, transform_indices = @transform_4, window_bounds = array<i64: 128, 128>}, {pipeline_mode = #tpu.pipeline_mode<synchronous>, transform_indices = @transform_5, window_bounds = array<i64: 128, 128>}, {pipeline_mode = #tpu.pipeline_mode<synchronous>, transform_indices = @transform_6, window_bounds = array<i64: 128, 128>}, {transform_indices = @transform_7, window_bounds = array<i64: 8, 128>}, {transform_indices = @transform_8, window_bounds = array<i64: 8, 128>}]} {
    %c0_i32 = arith.constant 0 : i32
    %0 = arith.cmpi eq, %arg1, %c0_i32 : i32
    %1 = arith.extui %0 : i1 to i32
    %c0_i32_0 = arith.constant 0 : i32
    %2 = arith.cmpi ne, %1, %c0_i32_0 : i32
    scf.if %2 {
      %c0_56 = arith.constant 0 : index
      %c0_57 = arith.constant 0 : index
      %259 = vector.load %arg2[%c0_56, %c0_57] : memref<8x128xf32, #tpu.memory_space<vmem>>, vector<8x128xf32>
      %c0_58 = arith.constant 0 : index
      %c0_59 = arith.constant 0 : index
      %260 = vector.load %arg9[%c0_58, %c0_59] : memref<8x128xf32, #tpu.memory_space<vmem>>, vector<8x128xf32>
      tpu.vector_store %arg9[%c0_58, %c0_59], %259 {strides = array<i32>} : memref<8x128xf32, #tpu.memory_space<vmem>>, vector<8x128xf32>,
      %c0_60 = arith.constant 0 : index
      %c0_61 = arith.constant 0 : index
      %261 = vector.load %arg3[%c0_60, %c0_61] : memref<8x128xf32, #tpu.memory_space<vmem>>, vector<8x128xf32>
      %c0_62 = arith.constant 0 : index
      %c0_63 = arith.constant 0 : index
      %262 = vector.load %arg10[%c0_62, %c0_63] : memref<8x128xf32, #tpu.memory_space<vmem>>, vector<8x128xf32>
      tpu.vector_store %arg10[%c0_62, %c0_63], %261 {strides = array<i32>} : memref<8x128xf32, #tpu.memory_space<vmem>>, vector<8x128xf32>,
    } else {
    }
    %c0 = arith.constant 0 : index
    %c0_1 = arith.constant 0 : index
    %3 = vector.load %arg6[%c0, %c0_1] : memref<128x128xbf16, #tpu.memory_space<vmem>>, vector<128x128xbf16>
    %c0_2 = arith.constant 0 : index
    %c0_3 = arith.constant 0 : index
    %4 = vector.load %arg7[%c0_2, %c0_3] : memref<128x128xbf16, #tpu.memory_space<vmem>>, vector<128x128xbf16>
    %c0_4 = arith.constant 0 : index
    %c0_5 = arith.constant 0 : index
    %5 = vector.load %arg8[%c0_4, %c0_5] : memref<128x128xbf16, #tpu.memory_space<vmem>>, vector<128x128xbf16>
    %c0_6 = arith.constant 0 : index
    %c0_7 = arith.constant 0 : index
    %6 = vector.load %arg4[%c0_6, %c0_7] : memref<8x8xf32, #tpu.memory_space<vmem>>, vector<8x8xf32>
    %c0_8 = arith.constant 0 : index
    %c0_9 = arith.constant 0 : index
    %7 = vector.load %arg9[%c0_8, %c0_9] : memref<8x128xf32, #tpu.memory_space<vmem>>, vector<8x128xf32>
    %c0_10 = arith.constant 0 : index
    %c0_11 = arith.constant 0 : index
    %8 = vector.load %arg10[%c0_10, %c0_11] : memref<8x128xf32, #tpu.memory_space<vmem>>, vector<8x128xf32>
    %9 = arith.truncf %7 : vector<8x128xf32> to vector<8x128xbf16>
    %10 = arith.truncf %8 : vector<8x128xf32> to vector<8x128xbf16>
    %11 = arith.addf %7, %8 : vector<8x128xf32>
    %12 = arith.truncf %11 : vector<8x128xf32> to vector<8x128xbf16>
    %cst = arith.constant dense<0.000000e+00> : vector<8x128xf32>
    %13 = tpu.matmul %9, %3, %cst {dimension_numbers = #tpu.dot_dimension_numbers<[1], [0], [0], [1], [0, 0, 1, 1], [], []>} : vector<8x128xbf16>, vector<128x128xbf16>, vector<8x128xf32> -> vector<8x128xf32>
    %cst_12 = arith.constant dense<0.000000e+00> : vector<8x128xf32>
    %14 = tpu.matmul %10, %4, %cst_12 {dimension_numbers = #tpu.dot_dimension_numbers<[1], [0], [0], [1], [0, 0, 1, 1], [], []>} : vector<8x128xbf16>, vector<128x128xbf16>, vector<8x128xf32> -> vector<8x128xf32>
    %cst_13 = arith.constant dense<0.000000e+00> : vector<8x128xf32>
    %15 = tpu.matmul %12, %5, %cst_13 {dimension_numbers = #tpu.dot_dimension_numbers<[1], [0], [0], [1], [0, 0, 1, 1], [], []>} : vector<8x128xbf16>, vector<128x128xbf16>, vector<8x128xf32> -> vector<8x128xf32>
    %16 = arith.subf %13, %14 : vector<8x128xf32>
    %17 = arith.subf %15, %13 : vector<8x128xf32>
    %18 = arith.subf %17, %14 : vector<8x128xf32>
    %c0_14 = arith.constant 0 : index
    %c0_15 = arith.constant 0 : index
    %c0_16 = arith.constant 0 : index
    %19 = vector.load %arg5[%c0_14, %c0_15, %c0_16] : memref<8x8x128xf32, #tpu.memory_space<vmem>>, vector<1x8x128xf32>
    %20 = vector.shape_cast %19 : vector<1x8x128xf32> to vector<8x128xf32>
    %21 = vector.extract_strided_slice %6 {offsets = [0, 0], sizes = [8, 1], strides = [1, 1]} : vector<8x8xf32> to vector<8x1xf32>
    %22 = vector.extract_strided_slice %20 {offsets = [0, 0], sizes = [1, 128], strides = [1, 1]} : vector<8x128xf32> to vector<1x128xf32>
    %23 = vector.broadcast %21 : vector<8x1xf32> to vector<8x128xf32>
    %24 = vector.broadcast %22 : vector<1x128xf32> to vector<8x128xf32>
    %25 = arith.mulf %23, %24 : vector<8x128xf32>
    %26 = vector.extract_strided_slice %6 {offsets = [0, 1], sizes = [8, 1], strides = [1, 1]} : vector<8x8xf32> to vector<8x1xf32>
    %27 = vector.extract_strided_slice %20 {offsets = [1, 0], sizes = [1, 128], strides = [1, 1]} : vector<8x128xf32> to vector<1x128xf32>
    %28 = vector.broadcast %26 : vector<8x1xf32> to vector<8x128xf32>
    %29 = vector.broadcast %27 : vector<1x128xf32> to vector<8x128xf32>
    %30 = arith.mulf %28, %29 : vector<8x128xf32>
    %31 = arith.addf %25, %30 : vector<8x128xf32>
    %32 = math.cos %31 : vector<8x128xf32>
    %33 = math.sin %31 : vector<8x128xf32>
    %34 = arith.mulf %16, %32 : vector<8x128xf32>
    %35 = arith.mulf %18, %33 : vector<8x128xf32>
    %36 = arith.subf %34, %35 : vector<8x128xf32>
    %37 = arith.mulf %16, %33 : vector<8x128xf32>
    %38 = arith.mulf %18, %32 : vector<8x128xf32>
    %39 = arith.addf %37, %38 : vector<8x128xf32>
    %40 = arith.truncf %36 : vector<8x128xf32> to vector<8x128xbf16>
    %41 = arith.truncf %39 : vector<8x128xf32> to vector<8x128xbf16>
    %42 = arith.addf %36, %39 : vector<8x128xf32>
    %43 = arith.truncf %42 : vector<8x128xf32> to vector<8x128xbf16>
    %cst_17 = arith.constant dense<0.000000e+00> : vector<8x128xf32>
    %44 = tpu.matmul %40, %3, %cst_17 {dimension_numbers = #tpu.dot_dimension_numbers<[1], [0], [0], [1], [0, 0, 1, 1], [], []>} : vector<8x128xbf16>, vector<128x128xbf16>, vector<8x128xf32> -> vector<8x128xf32>
    %cst_18 = arith.constant dense<0.000000e+00> : vector<8x128xf32>
    %45 = tpu.matmul %41, %4, %cst_18 {dimension_numbers = #tpu.dot_dimension_numbers<[1], [0], [0], [1], [0, 0, 1, 1], [], []>} : vector<8x128xbf16>, vector<128x128xbf16>, vector<8x128xf32> -> vector<8x128xf32>
    %cst_19 = arith.constant dense<0.000000e+00> : vector<8x128xf32>
    %46 = tpu.matmul %43, %5, %cst_19 {dimension_numbers = #tpu.dot_dimension_numbers<[1], [0], [0], [1], [0, 0, 1, 1], [], []>} : vector<8x128xbf16>, vector<128x128xbf16>, vector<8x128xf32> -> vector<8x128xf32>
    %47 = arith.subf %44, %45 : vector<8x128xf32>
    %48 = arith.subf %46, %44 : vector<8x128xf32>
    %49 = arith.subf %48, %45 : vector<8x128xf32>
    %c1 = arith.constant 1 : index
    %c0_20 = arith.constant 0 : index
    %c0_21 = arith.constant 0 : index
    %50 = vector.load %arg5[%c1, %c0_20, %c0_21] : memref<8x8x128xf32, #tpu.memory_space<vmem>>, vector<1x8x128xf32>
    %51 = vector.shape_cast %50 : vector<1x8x128xf32> to vector<8x128xf32>
    %52 = vector.extract_strided_slice %6 {offsets = [0, 0], sizes = [8, 1], strides = [1, 1]} : vector<8x8xf32> to vector<8x1xf32>
    %53 = vector.extract_strided_slice %51 {offsets = [0, 0], sizes = [1, 128], strides = [1, 1]} : vector<8x128xf32> to vector<1x128xf32>
    %54 = vector.broadcast %52 : vector<8x1xf32> to vector<8x128xf32>
    %55 = vector.broadcast %53 : vector<1x128xf32> to vector<8x128xf32>
    %56 = arith.mulf %54, %55 : vector<8x128xf32>
    %57 = vector.extract_strided_slice %6 {offsets = [0, 1], sizes = [8, 1], strides = [1, 1]} : vector<8x8xf32> to vector<8x1xf32>
    %58 = vector.extract_strided_slice %51 {offsets = [1, 0], sizes = [1, 128], strides = [1, 1]} : vector<8x128xf32> to vector<1x128xf32>
    %59 = vector.broadcast %57 : vector<8x1xf32> to vector<8x128xf32>
    %60 = vector.broadcast %58 : vector<1x128xf32> to vector<8x128xf32>
    %61 = arith.mulf %59, %60 : vector<8x128xf32>
    %62 = arith.addf %56, %61 : vector<8x128xf32>
    %63 = math.cos %62 : vector<8x128xf32>
    %64 = math.sin %62 : vector<8x128xf32>
    %65 = arith.mulf %47, %63 : vector<8x128xf32>
    %66 = arith.mulf %49, %64 : vector<8x128xf32>
    %67 = arith.subf %65, %66 : vector<8x128xf32>
    %68 = arith.mulf %47, %64 : vector<8x128xf32>
    %69 = arith.mulf %49, %63 : vector<8x128xf32>
    %70 = arith.addf %68, %69 : vector<8x128xf32>
    %71 = arith.truncf %67 : vector<8x128xf32> to vector<8x128xbf16>
    %72 = arith.truncf %70 : vector<8x128xf32> to vector<8x128xbf16>
    %73 = arith.addf %67, %70 : vector<8x128xf32>
    %74 = arith.truncf %73 : vector<8x128xf32> to vector<8x128xbf16>
    %cst_22 = arith.constant dense<0.000000e+00> : vector<8x128xf32>
    %75 = tpu.matmul %71, %3, %cst_22 {dimension_numbers = #tpu.dot_dimension_numbers<[1], [0], [0], [1], [0, 0, 1, 1], [], []>} : vector<8x128xbf16>, vector<128x128xbf16>, vector<8x128xf32> -> vector<8x128xf32>
    %cst_23 = arith.constant dense<0.000000e+00> : vector<8x128xf32>
    %76 = tpu.matmul %72, %4, %cst_23 {dimension_numbers = #tpu.dot_dimension_numbers<[1], [0], [0], [1], [0, 0, 1, 1], [], []>} : vector<8x128xbf16>, vector<128x128xbf16>, vector<8x128xf32> -> vector<8x128xf32>
    %cst_24 = arith.constant dense<0.000000e+00> : vector<8x128xf32>
    %77 = tpu.matmul %74, %5, %cst_24 {dimension_numbers = #tpu.dot_dimension_numbers<[1], [0], [0], [1], [0, 0, 1, 1], [], []>} : vector<8x128xbf16>, vector<128x128xbf16>, vector<8x128xf32> -> vector<8x128xf32>
    %78 = arith.subf %75, %76 : vector<8x128xf32>
    %79 = arith.subf %77, %75 : vector<8x128xf32>
    %80 = arith.subf %79, %76 : vector<8x128xf32>
    %c2 = arith.constant 2 : index
    %c0_25 = arith.constant 0 : index
    %c0_26 = arith.constant 0 : index
    %81 = vector.load %arg5[%c2, %c0_25, %c0_26] : memref<8x8x128xf32, #tpu.memory_space<vmem>>, vector<1x8x128xf32>
    %82 = vector.shape_cast %81 : vector<1x8x128xf32> to vector<8x128xf32>
    %83 = vector.extract_strided_slice %6 {offsets = [0, 0], sizes = [8, 1], strides = [1, 1]} : vector<8x8xf32> to vector<8x1xf32>
    %84 = vector.extract_strided_slice %82 {offsets = [0, 0], sizes = [1, 128], strides = [1, 1]} : vector<8x128xf32> to vector<1x128xf32>
    %85 = vector.broadcast %83 : vector<8x1xf32> to vector<8x128xf32>
    %86 = vector.broadcast %84 : vector<1x128xf32> to vector<8x128xf32>
    %87 = arith.mulf %85, %86 : vector<8x128xf32>
    %88 = vector.extract_strided_slice %6 {offsets = [0, 1], sizes = [8, 1], strides = [1, 1]} : vector<8x8xf32> to vector<8x1xf32>
    %89 = vector.extract_strided_slice %82 {offsets = [1, 0], sizes = [1, 128], strides = [1, 1]} : vector<8x128xf32> to vector<1x128xf32>
    %90 = vector.broadcast %88 : vector<8x1xf32> to vector<8x128xf32>
    %91 = vector.broadcast %89 : vector<1x128xf32> to vector<8x128xf32>
    %92 = arith.mulf %90, %91 : vector<8x128xf32>
    %93 = arith.addf %87, %92 : vector<8x128xf32>
    %94 = math.cos %93 : vector<8x128xf32>
    %95 = math.sin %93 : vector<8x128xf32>
    %96 = arith.mulf %78, %94 : vector<8x128xf32>
    %97 = arith.mulf %80, %95 : vector<8x128xf32>
    %98 = arith.subf %96, %97 : vector<8x128xf32>
    %99 = arith.mulf %78, %95 : vector<8x128xf32>
    %100 = arith.mulf %80, %94 : vector<8x128xf32>
    %101 = arith.addf %99, %100 : vector<8x128xf32>
    %102 = arith.truncf %98 : vector<8x128xf32> to vector<8x128xbf16>
    %103 = arith.truncf %101 : vector<8x128xf32> to vector<8x128xbf16>
    %104 = arith.addf %98, %101 : vector<8x128xf32>
    %105 = arith.truncf %104 : vector<8x128xf32> to vector<8x128xbf16>
    %cst_27 = arith.constant dense<0.000000e+00> : vector<8x128xf32>
    %106 = tpu.matmul %102, %3, %cst_27 {dimension_numbers = #tpu.dot_dimension_numbers<[1], [0], [0], [1], [0, 0, 1, 1], [], []>} : vector<8x128xbf16>, vector<128x128xbf16>, vector<8x128xf32> -> vector<8x128xf32>
    %cst_28 = arith.constant dense<0.000000e+00> : vector<8x128xf32>
    %107 = tpu.matmul %103, %4, %cst_28 {dimension_numbers = #tpu.dot_dimension_numbers<[1], [0], [0], [1], [0, 0, 1, 1], [], []>} : vector<8x128xbf16>, vector<128x128xbf16>, vector<8x128xf32> -> vector<8x128xf32>
    %cst_29 = arith.constant dense<0.000000e+00> : vector<8x128xf32>
    %108 = tpu.matmul %105, %5, %cst_29 {dimension_numbers = #tpu.dot_dimension_numbers<[1], [0], [0], [1], [0, 0, 1, 1], [], []>} : vector<8x128xbf16>, vector<128x128xbf16>, vector<8x128xf32> -> vector<8x128xf32>
    %109 = arith.subf %106, %107 : vector<8x128xf32>
    %110 = arith.subf %108, %106 : vector<8x128xf32>
    %111 = arith.subf %110, %107 : vector<8x128xf32>
    %c3 = arith.constant 3 : index
    %c0_30 = arith.constant 0 : index
    %c0_31 = arith.constant 0 : index
    %112 = vector.load %arg5[%c3, %c0_30, %c0_31] : memref<8x8x128xf32, #tpu.memory_space<vmem>>, vector<1x8x128xf32>
    %113 = vector.shape_cast %112 : vector<1x8x128xf32> to vector<8x128xf32>
    %114 = vector.extract_strided_slice %6 {offsets = [0, 0], sizes = [8, 1], strides = [1, 1]} : vector<8x8xf32> to vector<8x1xf32>
    %115 = vector.extract_strided_slice %113 {offsets = [0, 0], sizes = [1, 128], strides = [1, 1]} : vector<8x128xf32> to vector<1x128xf32>
    %116 = vector.broadcast %114 : vector<8x1xf32> to vector<8x128xf32>
    %117 = vector.broadcast %115 : vector<1x128xf32> to vector<8x128xf32>
    %118 = arith.mulf %116, %117 : vector<8x128xf32>
    %119 = vector.extract_strided_slice %6 {offsets = [0, 1], sizes = [8, 1], strides = [1, 1]} : vector<8x8xf32> to vector<8x1xf32>
    %120 = vector.extract_strided_slice %113 {offsets = [1, 0], sizes = [1, 128], strides = [1, 1]} : vector<8x128xf32> to vector<1x128xf32>
    %121 = vector.broadcast %119 : vector<8x1xf32> to vector<8x128xf32>
    %122 = vector.broadcast %120 : vector<1x128xf32> to vector<8x128xf32>
    %123 = arith.mulf %121, %122 : vector<8x128xf32>
    %124 = arith.addf %118, %123 : vector<8x128xf32>
    %125 = math.cos %124 : vector<8x128xf32>
    %126 = math.sin %124 : vector<8x128xf32>
    %127 = arith.mulf %109, %125 : vector<8x128xf32>
    %128 = arith.mulf %111, %126 : vector<8x128xf32>
    %129 = arith.subf %127, %128 : vector<8x128xf32>
    %130 = arith.mulf %109, %126 : vector<8x128xf32>
    %131 = arith.mulf %111, %125 : vector<8x128xf32>
    %132 = arith.addf %130, %131 : vector<8x128xf32>
    %133 = arith.truncf %129 : vector<8x128xf32> to vector<8x128xbf16>
    %134 = arith.truncf %132 : vector<8x128xf32> to vector<8x128xbf16>
    %135 = arith.addf %129, %132 : vector<8x128xf32>
    %136 = arith.truncf %135 : vector<8x128xf32> to vector<8x128xbf16>
    %cst_32 = arith.constant dense<0.000000e+00> : vector<8x128xf32>
    %137 = tpu.matmul %133, %3, %cst_32 {dimension_numbers = #tpu.dot_dimension_numbers<[1], [0], [0], [1], [0, 0, 1, 1], [], []>} : vector<8x128xbf16>, vector<128x128xbf16>, vector<8x128xf32> -> vector<8x128xf32>
    %cst_33 = arith.constant dense<0.000000e+00> : vector<8x128xf32>
    %138 = tpu.matmul %134, %4, %cst_33 {dimension_numbers = #tpu.dot_dimension_numbers<[1], [0], [0], [1], [0, 0, 1, 1], [], []>} : vector<8x128xbf16>, vector<128x128xbf16>, vector<8x128xf32> -> vector<8x128xf32>
    %cst_34 = arith.constant dense<0.000000e+00> : vector<8x128xf32>
    %139 = tpu.matmul %136, %5, %cst_34 {dimension_numbers = #tpu.dot_dimension_numbers<[1], [0], [0], [1], [0, 0, 1, 1], [], []>} : vector<8x128xbf16>, vector<128x128xbf16>, vector<8x128xf32> -> vector<8x128xf32>
    %140 = arith.subf %137, %138 : vector<8x128xf32>
    %141 = arith.subf %139, %137 : vector<8x128xf32>
    %142 = arith.subf %141, %138 : vector<8x128xf32>
    %c4 = arith.constant 4 : index
    %c0_35 = arith.constant 0 : index
    %c0_36 = arith.constant 0 : index
    %143 = vector.load %arg5[%c4, %c0_35, %c0_36] : memref<8x8x128xf32, #tpu.memory_space<vmem>>, vector<1x8x128xf32>
    %144 = vector.shape_cast %143 : vector<1x8x128xf32> to vector<8x128xf32>
    %145 = vector.extract_strided_slice %6 {offsets = [0, 0], sizes = [8, 1], strides = [1, 1]} : vector<8x8xf32> to vector<8x1xf32>
    %146 = vector.extract_strided_slice %144 {offsets = [0, 0], sizes = [1, 128], strides = [1, 1]} : vector<8x128xf32> to vector<1x128xf32>
    %147 = vector.broadcast %145 : vector<8x1xf32> to vector<8x128xf32>
    %148 = vector.broadcast %146 : vector<1x128xf32> to vector<8x128xf32>
    %149 = arith.mulf %147, %148 : vector<8x128xf32>
    %150 = vector.extract_strided_slice %6 {offsets = [0, 1], sizes = [8, 1], strides = [1, 1]} : vector<8x8xf32> to vector<8x1xf32>
    %151 = vector.extract_strided_slice %144 {offsets = [1, 0], sizes = [1, 128], strides = [1, 1]} : vector<8x128xf32> to vector<1x128xf32>
    %152 = vector.broadcast %150 : vector<8x1xf32> to vector<8x128xf32>
    %153 = vector.broadcast %151 : vector<1x128xf32> to vector<8x128xf32>
    %154 = arith.mulf %152, %153 : vector<8x128xf32>
    %155 = arith.addf %149, %154 : vector<8x128xf32>
    %156 = math.cos %155 : vector<8x128xf32>
    %157 = math.sin %155 : vector<8x128xf32>
    %158 = arith.mulf %140, %156 : vector<8x128xf32>
    %159 = arith.mulf %142, %157 : vector<8x128xf32>
    %160 = arith.subf %158, %159 : vector<8x128xf32>
    %161 = arith.mulf %140, %157 : vector<8x128xf32>
    %162 = arith.mulf %142, %156 : vector<8x128xf32>
    %163 = arith.addf %161, %162 : vector<8x128xf32>
    %164 = arith.truncf %160 : vector<8x128xf32> to vector<8x128xbf16>
    %165 = arith.truncf %163 : vector<8x128xf32> to vector<8x128xbf16>
    %166 = arith.addf %160, %163 : vector<8x128xf32>
    %167 = arith.truncf %166 : vector<8x128xf32> to vector<8x128xbf16>
    %cst_37 = arith.constant dense<0.000000e+00> : vector<8x128xf32>
    %168 = tpu.matmul %164, %3, %cst_37 {dimension_numbers = #tpu.dot_dimension_numbers<[1], [0], [0], [1], [0, 0, 1, 1], [], []>} : vector<8x128xbf16>, vector<128x128xbf16>, vector<8x128xf32> -> vector<8x128xf32>
    %cst_38 = arith.constant dense<0.000000e+00> : vector<8x128xf32>
    %169 = tpu.matmul %165, %4, %cst_38 {dimension_numbers = #tpu.dot_dimension_numbers<[1], [0], [0], [1], [0, 0, 1, 1], [], []>} : vector<8x128xbf16>, vector<128x128xbf16>, vector<8x128xf32> -> vector<8x128xf32>
    %cst_39 = arith.constant dense<0.000000e+00> : vector<8x128xf32>
    %170 = tpu.matmul %167, %5, %cst_39 {dimension_numbers = #tpu.dot_dimension_numbers<[1], [0], [0], [1], [0, 0, 1, 1], [], []>} : vector<8x128xbf16>, vector<128x128xbf16>, vector<8x128xf32> -> vector<8x128xf32>
    %171 = arith.subf %168, %169 : vector<8x128xf32>
    %172 = arith.subf %170, %168 : vector<8x128xf32>
    %173 = arith.subf %172, %169 : vector<8x128xf32>
    %c5 = arith.constant 5 : index
    %c0_40 = arith.constant 0 : index
    %c0_41 = arith.constant 0 : index
    %174 = vector.load %arg5[%c5, %c0_40, %c0_41] : memref<8x8x128xf32, #tpu.memory_space<vmem>>, vector<1x8x128xf32>
    %175 = vector.shape_cast %174 : vector<1x8x128xf32> to vector<8x128xf32>
    %176 = vector.extract_strided_slice %6 {offsets = [0, 0], sizes = [8, 1], strides = [1, 1]} : vector<8x8xf32> to vector<8x1xf32>
    %177 = vector.extract_strided_slice %175 {offsets = [0, 0], sizes = [1, 128], strides = [1, 1]} : vector<8x128xf32> to vector<1x128xf32>
    %178 = vector.broadcast %176 : vector<8x1xf32> to vector<8x128xf32>
    %179 = vector.broadcast %177 : vector<1x128xf32> to vector<8x128xf32>
    %180 = arith.mulf %178, %179 : vector<8x128xf32>
    %181 = vector.extract_strided_slice %6 {offsets = [0, 1], sizes = [8, 1], strides = [1, 1]} : vector<8x8xf32> to vector<8x1xf32>
    %182 = vector.extract_strided_slice %175 {offsets = [1, 0], sizes = [1, 128], strides = [1, 1]} : vector<8x128xf32> to vector<1x128xf32>
    %183 = vector.broadcast %181 : vector<8x1xf32> to vector<8x128xf32>
    %184 = vector.broadcast %182 : vector<1x128xf32> to vector<8x128xf32>
    %185 = arith.mulf %183, %184 : vector<8x128xf32>
    %186 = arith.addf %180, %185 : vector<8x128xf32>
    %187 = math.cos %186 : vector<8x128xf32>
    %188 = math.sin %186 : vector<8x128xf32>
    %189 = arith.mulf %171, %187 : vector<8x128xf32>
    %190 = arith.mulf %173, %188 : vector<8x128xf32>
    %191 = arith.subf %189, %190 : vector<8x128xf32>
    %192 = arith.mulf %171, %188 : vector<8x128xf32>
    %193 = arith.mulf %173, %187 : vector<8x128xf32>
    %194 = arith.addf %192, %193 : vector<8x128xf32>
    %195 = arith.truncf %191 : vector<8x128xf32> to vector<8x128xbf16>
    %196 = arith.truncf %194 : vector<8x128xf32> to vector<8x128xbf16>
    %197 = arith.addf %191, %194 : vector<8x128xf32>
    %198 = arith.truncf %197 : vector<8x128xf32> to vector<8x128xbf16>
    %cst_42 = arith.constant dense<0.000000e+00> : vector<8x128xf32>
    %199 = tpu.matmul %195, %3, %cst_42 {dimension_numbers = #tpu.dot_dimension_numbers<[1], [0], [0], [1], [0, 0, 1, 1], [], []>} : vector<8x128xbf16>, vector<128x128xbf16>, vector<8x128xf32> -> vector<8x128xf32>
    %cst_43 = arith.constant dense<0.000000e+00> : vector<8x128xf32>
    %200 = tpu.matmul %196, %4, %cst_43 {dimension_numbers = #tpu.dot_dimension_numbers<[1], [0], [0], [1], [0, 0, 1, 1], [], []>} : vector<8x128xbf16>, vector<128x128xbf16>, vector<8x128xf32> -> vector<8x128xf32>
    %cst_44 = arith.constant dense<0.000000e+00> : vector<8x128xf32>
    %201 = tpu.matmul %198, %5, %cst_44 {dimension_numbers = #tpu.dot_dimension_numbers<[1], [0], [0], [1], [0, 0, 1, 1], [], []>} : vector<8x128xbf16>, vector<128x128xbf16>, vector<8x128xf32> -> vector<8x128xf32>
    %202 = arith.subf %199, %200 : vector<8x128xf32>
    %203 = arith.subf %201, %199 : vector<8x128xf32>
    %204 = arith.subf %203, %200 : vector<8x128xf32>
    %c6 = arith.constant 6 : index
    %c0_45 = arith.constant 0 : index
    %c0_46 = arith.constant 0 : index
    %205 = vector.load %arg5[%c6, %c0_45, %c0_46] : memref<8x8x128xf32, #tpu.memory_space<vmem>>, vector<1x8x128xf32>
    %206 = vector.shape_cast %205 : vector<1x8x128xf32> to vector<8x128xf32>
    %207 = vector.extract_strided_slice %6 {offsets = [0, 0], sizes = [8, 1], strides = [1, 1]} : vector<8x8xf32> to vector<8x1xf32>
    %208 = vector.extract_strided_slice %206 {offsets = [0, 0], sizes = [1, 128], strides = [1, 1]} : vector<8x128xf32> to vector<1x128xf32>
    %209 = vector.broadcast %207 : vector<8x1xf32> to vector<8x128xf32>
    %210 = vector.broadcast %208 : vector<1x128xf32> to vector<8x128xf32>
    %211 = arith.mulf %209, %210 : vector<8x128xf32>
    %212 = vector.extract_strided_slice %6 {offsets = [0, 1], sizes = [8, 1], strides = [1, 1]} : vector<8x8xf32> to vector<8x1xf32>
    %213 = vector.extract_strided_slice %206 {offsets = [1, 0], sizes = [1, 128], strides = [1, 1]} : vector<8x128xf32> to vector<1x128xf32>
    %214 = vector.broadcast %212 : vector<8x1xf32> to vector<8x128xf32>
    %215 = vector.broadcast %213 : vector<1x128xf32> to vector<8x128xf32>
    %216 = arith.mulf %214, %215 : vector<8x128xf32>
    %217 = arith.addf %211, %216 : vector<8x128xf32>
    %218 = math.cos %217 : vector<8x128xf32>
    %219 = math.sin %217 : vector<8x128xf32>
    %220 = arith.mulf %202, %218 : vector<8x128xf32>
    %221 = arith.mulf %204, %219 : vector<8x128xf32>
    %222 = arith.subf %220, %221 : vector<8x128xf32>
    %223 = arith.mulf %202, %219 : vector<8x128xf32>
    %224 = arith.mulf %204, %218 : vector<8x128xf32>
    %225 = arith.addf %223, %224 : vector<8x128xf32>
    %226 = arith.truncf %222 : vector<8x128xf32> to vector<8x128xbf16>
    %227 = arith.truncf %225 : vector<8x128xf32> to vector<8x128xbf16>
    %228 = arith.addf %222, %225 : vector<8x128xf32>
    %229 = arith.truncf %228 : vector<8x128xf32> to vector<8x128xbf16>
    %cst_47 = arith.constant dense<0.000000e+00> : vector<8x128xf32>
    %230 = tpu.matmul %226, %3, %cst_47 {dimension_numbers = #tpu.dot_dimension_numbers<[1], [0], [0], [1], [0, 0, 1, 1], [], []>} : vector<8x128xbf16>, vector<128x128xbf16>, vector<8x128xf32> -> vector<8x128xf32>
    %cst_48 = arith.constant dense<0.000000e+00> : vector<8x128xf32>
    %231 = tpu.matmul %227, %4, %cst_48 {dimension_numbers = #tpu.dot_dimension_numbers<[1], [0], [0], [1], [0, 0, 1, 1], [], []>} : vector<8x128xbf16>, vector<128x128xbf16>, vector<8x128xf32> -> vector<8x128xf32>
    %cst_49 = arith.constant dense<0.000000e+00> : vector<8x128xf32>
    %232 = tpu.matmul %229, %5, %cst_49 {dimension_numbers = #tpu.dot_dimension_numbers<[1], [0], [0], [1], [0, 0, 1, 1], [], []>} : vector<8x128xbf16>, vector<128x128xbf16>, vector<8x128xf32> -> vector<8x128xf32>
    %233 = arith.subf %230, %231 : vector<8x128xf32>
    %234 = arith.subf %232, %230 : vector<8x128xf32>
    %235 = arith.subf %234, %231 : vector<8x128xf32>
    %c7 = arith.constant 7 : index
    %c0_50 = arith.constant 0 : index
    %c0_51 = arith.constant 0 : index
    %236 = vector.load %arg5[%c7, %c0_50, %c0_51] : memref<8x8x128xf32, #tpu.memory_space<vmem>>, vector<1x8x128xf32>
    %237 = vector.shape_cast %236 : vector<1x8x128xf32> to vector<8x128xf32>
    %238 = vector.extract_strided_slice %6 {offsets = [0, 0], sizes = [8, 1], strides = [1, 1]} : vector<8x8xf32> to vector<8x1xf32>
    %239 = vector.extract_strided_slice %237 {offsets = [0, 0], sizes = [1, 128], strides = [1, 1]} : vector<8x128xf32> to vector<1x128xf32>
    %240 = vector.broadcast %238 : vector<8x1xf32> to vector<8x128xf32>
    %241 = vector.broadcast %239 : vector<1x128xf32> to vector<8x128xf32>
    %242 = arith.mulf %240, %241 : vector<8x128xf32>
    %243 = vector.extract_strided_slice %6 {offsets = [0, 1], sizes = [8, 1], strides = [1, 1]} : vector<8x8xf32> to vector<8x1xf32>
    %244 = vector.extract_strided_slice %237 {offsets = [1, 0], sizes = [1, 128], strides = [1, 1]} : vector<8x128xf32> to vector<1x128xf32>
    %245 = vector.broadcast %243 : vector<8x1xf32> to vector<8x128xf32>
    %246 = vector.broadcast %244 : vector<1x128xf32> to vector<8x128xf32>
    %247 = arith.mulf %245, %246 : vector<8x128xf32>
    %248 = arith.addf %242, %247 : vector<8x128xf32>
    %249 = math.cos %248 : vector<8x128xf32>
    %250 = math.sin %248 : vector<8x128xf32>
    %251 = arith.mulf %233, %249 : vector<8x128xf32>
    %252 = arith.mulf %235, %250 : vector<8x128xf32>
    %253 = arith.subf %251, %252 : vector<8x128xf32>
    %254 = arith.mulf %233, %250 : vector<8x128xf32>
    %255 = arith.mulf %235, %249 : vector<8x128xf32>
    %256 = arith.addf %254, %255 : vector<8x128xf32>
    %c0_52 = arith.constant 0 : index
    %c0_53 = arith.constant 0 : index
    %257 = vector.load %arg9[%c0_52, %c0_53] : memref<8x128xf32, #tpu.memory_space<vmem>>, vector<8x128xf32>
    tpu.vector_store %arg9[%c0_52, %c0_53], %253 {strides = array<i32>} : memref<8x128xf32, #tpu.memory_space<vmem>>, vector<8x128xf32>,
    %c0_54 = arith.constant 0 : index
    %c0_55 = arith.constant 0 : index
    %258 = vector.load %arg10[%c0_54, %c0_55] : memref<8x128xf32, #tpu.memory_space<vmem>>, vector<8x128xf32>
    tpu.vector_store %arg10[%c0_54, %c0_55], %256 {strides = array<i32>} : memref<8x128xf32, #tpu.memory_space<vmem>>, vector<8x128xf32>,
    return
  }
  func.func @transform_0(%arg0: i32, %arg1: i32) -> (i32, i32) {
    %c0_i32 = arith.constant 0 : i32
    %c0_i32_0 = arith.constant 0 : i32
    return %arg0, %c0_i32 : i32, i32
  }
  func.func @transform_1(%arg0: i32, %arg1: i32) -> (i32, i32) {
    %c0_i32 = arith.constant 0 : i32
    %c0_i32_0 = arith.constant 0 : i32
    return %arg0, %c0_i32 : i32, i32
  }
  func.func @transform_2(%arg0: i32, %arg1: i32) -> (i32, i32) {
    %c0_i32 = arith.constant 0 : i32
    %c0_i32_0 = arith.constant 0 : i32
    return %arg0, %c0_i32 : i32, i32
  }
  func.func @transform_3(%arg0: i32, %arg1: i32) -> (i32, i32, i32) {
    %c0_i32 = arith.constant 0 : i32
    %c0_i32_0 = arith.constant 0 : i32
    %c0_i32_1 = arith.constant 0 : i32
    return %arg1, %c0_i32, %c0_i32_0 : i32, i32, i32
  }
  func.func @transform_4(%arg0: i32, %arg1: i32) -> (i32, i32) {
    %c0_i32 = arith.constant 0 : i32
    %c0_i32_0 = arith.constant 0 : i32
    %c0_i32_1 = arith.constant 0 : i32
    return %c0_i32, %c0_i32_0 : i32, i32
  }
  func.func @transform_5(%arg0: i32, %arg1: i32) -> (i32, i32) {
    %c0_i32 = arith.constant 0 : i32
    %c0_i32_0 = arith.constant 0 : i32
    %c0_i32_1 = arith.constant 0 : i32
    return %c0_i32, %c0_i32_0 : i32, i32
  }
  func.func @transform_6(%arg0: i32, %arg1: i32) -> (i32, i32) {
    %c0_i32 = arith.constant 0 : i32
    %c0_i32_0 = arith.constant 0 : i32
    %c0_i32_1 = arith.constant 0 : i32
    return %c0_i32, %c0_i32_0 : i32, i32
  }
  func.func @transform_7(%arg0: i32, %arg1: i32) -> (i32, i32) {
    %c0_i32 = arith.constant 0 : i32
    %c0_i32_0 = arith.constant 0 : i32
    return %arg0, %c0_i32 : i32, i32
  }
  func.func @transform_8(%arg0: i32, %arg1: i32) -> (i32, i32) {
    %c0_i32 = arith.constant 0 : i32
    %c0_i32_0 = arith.constant 0 : i32
    return %arg0, %c0_i32 : i32, i32
  }
}

module attributes {stable_mosaic.version = 11 : i64} {
  func.func @bpm_kernel(%arg0: i32, %arg1: i32, %arg2: memref<8x128xf32, #tpu.memory_space<vmem>>, %arg3: memref<8x128xf32, #tpu.memory_space<vmem>>, %arg4: memref<8x8xf32, #tpu.memory_space<vmem>>, %arg5: memref<8x8x128xf32, #tpu.memory_space<vmem>>, %arg6: memref<128x128xbf16, #tpu.memory_space<vmem>>, %arg7: memref<128x128xbf16, #tpu.memory_space<vmem>>, %arg8: memref<128x128xbf16, #tpu.memory_space<vmem>>, %arg9: memref<8x128xf32, #tpu.memory_space<vmem>>, %arg10: memref<8x128xf32, #tpu.memory_space<vmem>>) attributes {dimension_semantics = [#tpu.dimension_semantics<parallel>, #tpu.dimension_semantics<arbitrary>], iteration_bounds = array<i64: 1, 1>, scalar_prefetch = 0 : i64, scratch_operands = 0 : i64, tpu.core_type = #tpu.core_type<tc>, window_params = [{transform_indices = @transform_0, window_bounds = array<i64: 8, 128>}, {transform_indices = @transform_1, window_bounds = array<i64: 8, 128>}, {transform_indices = @transform_2, window_bounds = array<i64: 8, 8>}, {transform_indices = @transform_3, window_bounds = array<i64: 8, 8, 128>}, {pipeline_mode = #tpu.pipeline_mode<synchronous>, transform_indices = @transform_4, window_bounds = array<i64: 128, 128>}, {pipeline_mode = #tpu.pipeline_mode<synchronous>, transform_indices = @transform_5, window_bounds = array<i64: 128, 128>}, {pipeline_mode = #tpu.pipeline_mode<synchronous>, transform_indices = @transform_6, window_bounds = array<i64: 128, 128>}, {transform_indices = @transform_7, window_bounds = array<i64: 8, 128>}, {transform_indices = @transform_8, window_bounds = array<i64: 8, 128>}]} {
    %c0_i32 = arith.constant 0 : i32
    %0 = arith.cmpi eq, %arg1, %c0_i32 : i32
    %1 = arith.extui %0 : i1 to i32
    %c0_i32_0 = arith.constant 0 : i32
    %2 = arith.cmpi ne, %1, %c0_i32_0 : i32
    scf.if %2 {
      %c0_56 = arith.constant 0 : index
      %c0_57 = arith.constant 0 : index
      %259 = vector.load %arg2[%c0_56, %c0_57] : memref<8x128xf32, #tpu.memory_space<vmem>>, vector<8x128xf32>
      %c0_58 = arith.constant 0 : index
      %c0_59 = arith.constant 0 : index
      %260 = vector.load %arg9[%c0_58, %c0_59] : memref<8x128xf32, #tpu.memory_space<vmem>>, vector<8x128xf32>
      tpu.vector_store %arg9[%c0_58, %c0_59], %259 {strides = array<i32>} : memref<8x128xf32, #tpu.memory_space<vmem>>, vector<8x128xf32>,
      %c0_60 = arith.constant 0 : index
      %c0_61 = arith.constant 0 : index
      %261 = vector.load %arg3[%c0_60, %c0_61] : memref<8x128xf32, #tpu.memory_space<vmem>>, vector<8x128xf32>
      %c0_62 = arith.constant 0 : index
      %c0_63 = arith.constant 0 : index
      %262 = vector.load %arg10[%c0_62, %c0_63] : memref<8x128xf32, #tpu.memory_space<vmem>>, vector<8x128xf32>
      tpu.vector_store %arg10[%c0_62, %c0_63], %261 {strides = array<i32>} : memref<8x128xf32, #tpu.memory_space<vmem>>, vector<8x128xf32>,
    } else {
    }
    %c0 = arith.constant 0 : index
    %c0_1 = arith.constant 0 : index
    %3 = vector.load %arg6[%c0, %c0_1] : memref<128x128xbf16, #tpu.memory_space<vmem>>, vector<128x128xbf16>
    %c0_2 = arith.constant 0 : index
    %c0_3 = arith.constant 0 : index
    %4 = vector.load %arg7[%c0_2, %c0_3] : memref<128x128xbf16, #tpu.memory_space<vmem>>, vector<128x128xbf16>
    %c0_4 = arith.constant 0 : index
    %c0_5 = arith.constant 0 : index
    %5 = vector.load %arg8[%c0_4, %c0_5] : memref<128x128xbf16, #tpu.memory_space<vmem>>, vector<128x128xbf16>
    %c0_6 = arith.constant 0 : index
    %c0_7 = arith.constant 0 : index
    %6 = vector.load %arg4[%c0_6, %c0_7] : memref<8x8xf32, #tpu.memory_space<vmem>>, vector<8x8xf32>
    %c0_8 = arith.constant 0 : index
    %c0_9 = arith.constant 0 : index
    %7 = vector.load %arg9[%c0_8, %c0_9] : memref<8x128xf32, #tpu.memory_space<vmem>>, vector<8x128xf32>
    %c0_10 = arith.constant 0 : index
    %c0_11 = arith.constant 0 : index
    %8 = vector.load %arg10[%c0_10, %c0_11] : memref<8x128xf32, #tpu.memory_space<vmem>>, vector<8x128xf32>
    %9 = arith.truncf %7 : vector<8x128xf32> to vector<8x128xbf16>
    %10 = arith.truncf %8 : vector<8x128xf32> to vector<8x128xbf16>
    %11 = arith.addf %7, %8 : vector<8x128xf32>
    %12 = arith.truncf %11 : vector<8x128xf32> to vector<8x128xbf16>
    %cst = arith.constant dense<0.000000e+00> : vector<8x128xf32>
    %13 = tpu.matmul %9, %3, %cst {dimension_numbers = #tpu.dot_dimension_numbers<[1], [0], [0], [1], [0, 0, 1, 1], [], []>} : vector<8x128xbf16>, vector<128x128xbf16>, vector<8x128xf32> -> vector<8x128xf32>
    %cst_12 = arith.constant dense<0.000000e+00> : vector<8x128xf32>
    %14 = tpu.matmul %10, %4, %cst_12 {dimension_numbers = #tpu.dot_dimension_numbers<[1], [0], [0], [1], [0, 0, 1, 1], [], []>} : vector<8x128xbf16>, vector<128x128xbf16>, vector<8x128xf32> -> vector<8x128xf32>
    %cst_13 = arith.constant dense<0.000000e+00> : vector<8x128xf32>
    %15 = tpu.matmul %12, %5, %cst_13 {dimension_numbers = #tpu.dot_dimension_numbers<[1], [0], [0], [1], [0, 0, 1, 1], [], []>} : vector<8x128xbf16>, vector<128x128xbf16>, vector<8x128xf32> -> vector<8x128xf32>
    %16 = arith.subf %13, %14 : vector<8x128xf32>
    %17 = arith.subf %15, %13 : vector<8x128xf32>
    %18 = arith.subf %17, %14 : vector<8x128xf32>
    %c0_14 = arith.constant 0 : index
    %c0_15 = arith.constant 0 : index
    %c0_16 = arith.constant 0 : index
    %19 = vector.load %arg5[%c0_14, %c0_15, %c0_16] : memref<8x8x128xf32, #tpu.memory_space<vmem>>, vector<1x8x128xf32>
    %20 = vector.shape_cast %19 : vector<1x8x128xf32> to vector<8x128xf32>
    %21 = vector.extract_strided_slice %6 {offsets = [0, 0], sizes = [8, 1], strides = [1, 1]} : vector<8x8xf32> to vector<8x1xf32>
    %22 = vector.extract_strided_slice %20 {offsets = [0, 0], sizes = [1, 128], strides = [1, 1]} : vector<8x128xf32> to vector<1x128xf32>
    %23 = vector.broadcast %21 : vector<8x1xf32> to vector<8x128xf32>
    %24 = vector.broadcast %22 : vector<1x128xf32> to vector<8x128xf32>
    %25 = arith.mulf %23, %24 : vector<8x128xf32>
    %26 = vector.extract_strided_slice %6 {offsets = [0, 1], sizes = [8, 1], strides = [1, 1]} : vector<8x8xf32> to vector<8x1xf32>
    %27 = vector.extract_strided_slice %20 {offsets = [1, 0], sizes = [1, 128], strides = [1, 1]} : vector<8x128xf32> to vector<1x128xf32>
    %28 = vector.broadcast %26 : vector<8x1xf32> to vector<8x128xf32>
    %29 = vector.broadcast %27 : vector<1x128xf32> to vector<8x128xf32>
    %30 = arith.mulf %28, %29 : vector<8x128xf32>
    %31 = arith.addf %25, %30 : vector<8x128xf32>
    %32 = math.cos %31 : vector<8x128xf32>
    %33 = math.sin %31 : vector<8x128xf32>
    %34 = arith.mulf %16, %32 : vector<8x128xf32>
    %35 = arith.mulf %18, %33 : vector<8x128xf32>
    %36 = arith.subf %34, %35 : vector<8x128xf32>
    %37 = arith.mulf %16, %33 : vector<8x128xf32>
    %38 = arith.mulf %18, %32 : vector<8x128xf32>
    %39 = arith.addf %37, %38 : vector<8x128xf32>
    %40 = arith.truncf %36 : vector<8x128xf32> to vector<8x128xbf16>
    %41 = arith.truncf %39 : vector<8x128xf32> to vector<8x128xbf16>
    %42 = arith.addf %36, %39 : vector<8x128xf32>
    %43 = arith.truncf %42 : vector<8x128xf32> to vector<8x128xbf16>
    %cst_17 = arith.constant dense<0.000000e+00> : vector<8x128xf32>
    %44 = tpu.matmul %40, %3, %cst_17 {dimension_numbers = #tpu.dot_dimension_numbers<[1], [0], [0], [1], [0, 0, 1, 1], [], []>} : vector<8x128xbf16>, vector<128x128xbf16>, vector<8x128xf32> -> vector<8x128xf32>
    %cst_18 = arith.constant dense<0.000000e+00> : vector<8x128xf32>
    %45 = tpu.matmul %41, %4, %cst_18 {dimension_numbers = #tpu.dot_dimension_numbers<[1], [0], [0], [1], [0, 0, 1, 1], [], []>} : vector<8x128xbf16>, vector<128x128xbf16>, vector<8x128xf32> -> vector<8x128xf32>
    %cst_19 = arith.constant dense<0.000000e+00> : vector<8x128xf32>
    %46 = tpu.matmul %43, %5, %cst_19 {dimension_numbers = #tpu.dot_dimension_numbers<[1], [0], [0], [1], [0, 0, 1, 1], [], []>} : vector<8x128xbf16>, vector<128x128xbf16>, vector<8x128xf32> -> vector<8x128xf32>
    %47 = arith.subf %44, %45 : vector<8x128xf32>
    %48 = arith.subf %46, %44 : vector<8x128xf32>
    %49 = arith.subf %48, %45 : vector<8x128xf32>
    %c1 = arith.constant 1 : index
    %c0_20 = arith.constant 0 : index
    %c0_21 = arith.constant 0 : index
    %50 = vector.load %arg5[%c1, %c0_20, %c0_21] : memref<8x8x128xf32, #tpu.memory_space<vmem>>, vector<1x8x128xf32>
    %51 = vector.shape_cast %50 : vector<1x8x128xf32> to vector<8x128xf32>
    %52 = vector.extract_strided_slice %6 {offsets = [0, 0], sizes = [8, 1], strides = [1, 1]} : vector<8x8xf32> to vector<8x1xf32>
    %53 = vector.extract_strided_slice %51 {offsets = [0, 0], sizes = [1, 128], strides = [1, 1]} : vector<8x128xf32> to vector<1x128xf32>
    %54 = vector.broadcast %52 : vector<8x1xf32> to vector<8x128xf32>
    %55 = vector.broadcast %53 : vector<1x128xf32> to vector<8x128xf32>
    %56 = arith.mulf %54, %55 : vector<8x128xf32>
    %57 = vector.extract_strided_slice %6 {offsets = [0, 1], sizes = [8, 1], strides = [1, 1]} : vector<8x8xf32> to vector<8x1xf32>
    %58 = vector.extract_strided_slice %51 {offsets = [1, 0], sizes = [1, 128], strides = [1, 1]} : vector<8x128xf32> to vector<1x128xf32>
    %59 = vector.broadcast %57 : vector<8x1xf32> to vector<8x128xf32>
    %60 = vector.broadcast %58 : vector<1x128xf32> to vector<8x128xf32>
    %61 = arith.mulf %59, %60 : vector<8x128xf32>
    %62 = arith.addf %56, %61 : vector<8x128xf32>
    %63 = math.cos %62 : vector<8x128xf32>
    %64 = math.sin %62 : vector<8x128xf32>
    %65 = arith.mulf %47, %63 : vector<8x128xf32>
    %66 = arith.mulf %49, %64 : vector<8x128xf32>
    %67 = arith.subf %65, %66 : vector<8x128xf32>
    %68 = arith.mulf %47, %64 : vector<8x128xf32>
    %69 = arith.mulf %49, %63 : vector<8x128xf32>
    %70 = arith.addf %68, %69 : vector<8x128xf32>
    %71 = arith.truncf %67 : vector<8x128xf32> to vector<8x128xbf16>
    %72 = arith.truncf %70 : vector<8x128xf32> to vector<8x128xbf16>
    %73 = arith.addf %67, %70 : vector<8x128xf32>
    %74 = arith.truncf %73 : vector<8x128xf32> to vector<8x128xbf16>
    %cst_22 = arith.constant dense<0.000000e+00> : vector<8x128xf32>
    %75 = tpu.matmul %71, %3, %cst_22 {dimension_numbers = #tpu.dot_dimension_numbers<[1], [0], [0], [1], [0, 0, 1, 1], [], []>} : vector<8x128xbf16>, vector<128x128xbf16>, vector<8x128xf32> -> vector<8x128xf32>
    %cst_23 = arith.constant dense<0.000000e+00> : vector<8x128xf32>
    %76 = tpu.matmul %72, %4, %cst_23 {dimension_numbers = #tpu.dot_dimension_numbers<[1], [0], [0], [1], [0, 0, 1, 1], [], []>} : vector<8x128xbf16>, vector<128x128xbf16>, vector<8x128xf32> -> vector<8x128xf32>
    %cst_24 = arith.constant dense<0.000000e+00> : vector<8x128xf32>
    %77 = tpu.matmul %74, %5, %cst_24 {dimension_numbers = #tpu.dot_dimension_numbers<[1], [0], [0], [1], [0, 0, 1, 1], [], []>} : vector<8x128xbf16>, vector<128x128xbf16>, vector<8x128xf32> -> vector<8x128xf32>
    %78 = arith.subf %75, %76 : vector<8x128xf32>
    %79 = arith.subf %77, %75 : vector<8x128xf32>
    %80 = arith.subf %79, %76 : vector<8x128xf32>
    %c2 = arith.constant 2 : index
    %c0_25 = arith.constant 0 : index
    %c0_26 = arith.constant 0 : index
    %81 = vector.load %arg5[%c2, %c0_25, %c0_26] : memref<8x8x128xf32, #tpu.memory_space<vmem>>, vector<1x8x128xf32>
    %82 = vector.shape_cast %81 : vector<1x8x128xf32> to vector<8x128xf32>
    %83 = vector.extract_strided_slice %6 {offsets = [0, 0], sizes = [8, 1], strides = [1, 1]} : vector<8x8xf32> to vector<8x1xf32>
    %84 = vector.extract_strided_slice %82 {offsets = [0, 0], sizes = [1, 128], strides = [1, 1]} : vector<8x128xf32> to vector<1x128xf32>
    %85 = vector.broadcast %83 : vector<8x1xf32> to vector<8x128xf32>
    %86 = vector.broadcast %84 : vector<1x128xf32> to vector<8x128xf32>
    %87 = arith.mulf %85, %86 : vector<8x128xf32>
    %88 = vector.extract_strided_slice %6 {offsets = [0, 1], sizes = [8, 1], strides = [1, 1]} : vector<8x8xf32> to vector<8x1xf32>
    %89 = vector.extract_strided_slice %82 {offsets = [1, 0], sizes = [1, 128], strides = [1, 1]} : vector<8x128xf32> to vector<1x128xf32>
    %90 = vector.broadcast %88 : vector<8x1xf32> to vector<8x128xf32>
    %91 = vector.broadcast %89 : vector<1x128xf32> to vector<8x128xf32>
    %92 = arith.mulf %90, %91 : vector<8x128xf32>
    %93 = arith.addf %87, %92 : vector<8x128xf32>
    %94 = math.cos %93 : vector<8x128xf32>
    %95 = math.sin %93 : vector<8x128xf32>
    %96 = arith.mulf %78, %94 : vector<8x128xf32>
    %97 = arith.mulf %80, %95 : vector<8x128xf32>
    %98 = arith.subf %96, %97 : vector<8x128xf32>
    %99 = arith.mulf %78, %95 : vector<8x128xf32>
    %100 = arith.mulf %80, %94 : vector<8x128xf32>
    %101 = arith.addf %99, %100 : vector<8x128xf32>
    %102 = arith.truncf %98 : vector<8x128xf32> to vector<8x128xbf16>
    %103 = arith.truncf %101 : vector<8x128xf32> to vector<8x128xbf16>
    %104 = arith.addf %98, %101 : vector<8x128xf32>
    %105 = arith.truncf %104 : vector<8x128xf32> to vector<8x128xbf16>
    %cst_27 = arith.constant dense<0.000000e+00> : vector<8x128xf32>
    %106 = tpu.matmul %102, %3, %cst_27 {dimension_numbers = #tpu.dot_dimension_numbers<[1], [0], [0], [1], [0, 0, 1, 1], [], []>} : vector<8x128xbf16>, vector<128x128xbf16>, vector<8x128xf32> -> vector<8x128xf32>
    %cst_28 = arith.constant dense<0.000000e+00> : vector<8x128xf32>
    %107 = tpu.matmul %103, %4, %cst_28 {dimension_numbers = #tpu.dot_dimension_numbers<[1], [0], [0], [1], [0, 0, 1, 1], [], []>} : vector<8x128xbf16>, vector<128x128xbf16>, vector<8x128xf32> -> vector<8x128xf32>
    %cst_29 = arith.constant dense<0.000000e+00> : vector<8x128xf32>
    %108 = tpu.matmul %105, %5, %cst_29 {dimension_numbers = #tpu.dot_dimension_numbers<[1], [0], [0], [1], [0, 0, 1, 1], [], []>} : vector<8x128xbf16>, vector<128x128xbf16>, vector<8x128xf32> -> vector<8x128xf32>
    %109 = arith.subf %106, %107 : vector<8x128xf32>
    %110 = arith.subf %108, %106 : vector<8x128xf32>
    %111 = arith.subf %110, %107 : vector<8x128xf32>
    %c3 = arith.constant 3 : index
    %c0_30 = arith.constant 0 : index
    %c0_31 = arith.constant 0 : index
    %112 = vector.load %arg5[%c3, %c0_30, %c0_31] : memref<8x8x128xf32, #tpu.memory_space<vmem>>, vector<1x8x128xf32>
    %113 = vector.shape_cast %112 : vector<1x8x128xf32> to vector<8x128xf32>
    %114 = vector.extract_strided_slice %6 {offsets = [0, 0], sizes = [8, 1], strides = [1, 1]} : vector<8x8xf32> to vector<8x1xf32>
    %115 = vector.extract_strided_slice %113 {offsets = [0, 0], sizes = [1, 128], strides = [1, 1]} : vector<8x128xf32> to vector<1x128xf32>
    %116 = vector.broadcast %114 : vector<8x1xf32> to vector<8x128xf32>
    %117 = vector.broadcast %115 : vector<1x128xf32> to vector<8x128xf32>
    %118 = arith.mulf %116, %117 : vector<8x128xf32>
    %119 = vector.extract_strided_slice %6 {offsets = [0, 1], sizes = [8, 1], strides = [1, 1]} : vector<8x8xf32> to vector<8x1xf32>
    %120 = vector.extract_strided_slice %113 {offsets = [1, 0], sizes = [1, 128], strides = [1, 1]} : vector<8x128xf32> to vector<1x128xf32>
    %121 = vector.broadcast %119 : vector<8x1xf32> to vector<8x128xf32>
    %122 = vector.broadcast %120 : vector<1x128xf32> to vector<8x128xf32>
    %123 = arith.mulf %121, %122 : vector<8x128xf32>
    %124 = arith.addf %118, %123 : vector<8x128xf32>
    %125 = math.cos %124 : vector<8x128xf32>
    %126 = math.sin %124 : vector<8x128xf32>
    %127 = arith.mulf %109, %125 : vector<8x128xf32>
    %128 = arith.mulf %111, %126 : vector<8x128xf32>
    %129 = arith.subf %127, %128 : vector<8x128xf32>
    %130 = arith.mulf %109, %126 : vector<8x128xf32>
    %131 = arith.mulf %111, %125 : vector<8x128xf32>
    %132 = arith.addf %130, %131 : vector<8x128xf32>
    %133 = arith.truncf %129 : vector<8x128xf32> to vector<8x128xbf16>
    %134 = arith.truncf %132 : vector<8x128xf32> to vector<8x128xbf16>
    %135 = arith.addf %129, %132 : vector<8x128xf32>
    %136 = arith.truncf %135 : vector<8x128xf32> to vector<8x128xbf16>
    %cst_32 = arith.constant dense<0.000000e+00> : vector<8x128xf32>
    %137 = tpu.matmul %133, %3, %cst_32 {dimension_numbers = #tpu.dot_dimension_numbers<[1], [0], [0], [1], [0, 0, 1, 1], [], []>} : vector<8x128xbf16>, vector<128x128xbf16>, vector<8x128xf32> -> vector<8x128xf32>
    %cst_33 = arith.constant dense<0.000000e+00> : vector<8x128xf32>
    %138 = tpu.matmul %134, %4, %cst_33 {dimension_numbers = #tpu.dot_dimension_numbers<[1], [0], [0], [1], [0, 0, 1, 1], [], []>} : vector<8x128xbf16>, vector<128x128xbf16>, vector<8x128xf32> -> vector<8x128xf32>
    %cst_34 = arith.constant dense<0.000000e+00> : vector<8x128xf32>
    %139 = tpu.matmul %136, %5, %cst_34 {dimension_numbers = #tpu.dot_dimension_numbers<[1], [0], [0], [1], [0, 0, 1, 1], [], []>} : vector<8x128xbf16>, vector<128x128xbf16>, vector<8x128xf32> -> vector<8x128xf32>
    %140 = arith.subf %137, %138 : vector<8x128xf32>
    %141 = arith.subf %139, %137 : vector<8x128xf32>
    %142 = arith.subf %141, %138 : vector<8x128xf32>
    %c4 = arith.constant 4 : index
    %c0_35 = arith.constant 0 : index
    %c0_36 = arith.constant 0 : index
    %143 = vector.load %arg5[%c4, %c0_35, %c0_36] : memref<8x8x128xf32, #tpu.memory_space<vmem>>, vector<1x8x128xf32>
    %144 = vector.shape_cast %143 : vector<1x8x128xf32> to vector<8x128xf32>
    %145 = vector.extract_strided_slice %6 {offsets = [0, 0], sizes = [8, 1], strides = [1, 1]} : vector<8x8xf32> to vector<8x1xf32>
    %146 = vector.extract_strided_slice %144 {offsets = [0, 0], sizes = [1, 128], strides = [1, 1]} : vector<8x128xf32> to vector<1x128xf32>
    %147 = vector.broadcast %145 : vector<8x1xf32> to vector<8x128xf32>
    %148 = vector.broadcast %146 : vector<1x128xf32> to vector<8x128xf32>
    %149 = arith.mulf %147, %148 : vector<8x128xf32>
    %150 = vector.extract_strided_slice %6 {offsets = [0, 1], sizes = [8, 1], strides = [1, 1]} : vector<8x8xf32> to vector<8x1xf32>
    %151 = vector.extract_strided_slice %144 {offsets = [1, 0], sizes = [1, 128], strides = [1, 1]} : vector<8x128xf32> to vector<1x128xf32>
    %152 = vector.broadcast %150 : vector<8x1xf32> to vector<8x128xf32>
    %153 = vector.broadcast %151 : vector<1x128xf32> to vector<8x128xf32>
    %154 = arith.mulf %152, %153 : vector<8x128xf32>
    %155 = arith.addf %149, %154 : vector<8x128xf32>
    %156 = math.cos %155 : vector<8x128xf32>
    %157 = math.sin %155 : vector<8x128xf32>
    %158 = arith.mulf %140, %156 : vector<8x128xf32>
    %159 = arith.mulf %142, %157 : vector<8x128xf32>
    %160 = arith.subf %158, %159 : vector<8x128xf32>
    %161 = arith.mulf %140, %157 : vector<8x128xf32>
    %162 = arith.mulf %142, %156 : vector<8x128xf32>
    %163 = arith.addf %161, %162 : vector<8x128xf32>
    %164 = arith.truncf %160 : vector<8x128xf32> to vector<8x128xbf16>
    %165 = arith.truncf %163 : vector<8x128xf32> to vector<8x128xbf16>
    %166 = arith.addf %160, %163 : vector<8x128xf32>
    %167 = arith.truncf %166 : vector<8x128xf32> to vector<8x128xbf16>
    %cst_37 = arith.constant dense<0.000000e+00> : vector<8x128xf32>
    %168 = tpu.matmul %164, %3, %cst_37 {dimension_numbers = #tpu.dot_dimension_numbers<[1], [0], [0], [1], [0, 0, 1, 1], [], []>} : vector<8x128xbf16>, vector<128x128xbf16>, vector<8x128xf32> -> vector<8x128xf32>
    %cst_38 = arith.constant dense<0.000000e+00> : vector<8x128xf32>
    %169 = tpu.matmul %165, %4, %cst_38 {dimension_numbers = #tpu.dot_dimension_numbers<[1], [0], [0], [1], [0, 0, 1, 1], [], []>} : vector<8x128xbf16>, vector<128x128xbf16>, vector<8x128xf32> -> vector<8x128xf32>
    %cst_39 = arith.constant dense<0.000000e+00> : vector<8x128xf32>
    %170 = tpu.matmul %167, %5, %cst_39 {dimension_numbers = #tpu.dot_dimension_numbers<[1], [0], [0], [1], [0, 0, 1, 1], [], []>} : vector<8x128xbf16>, vector<128x128xbf16>, vector<8x128xf32> -> vector<8x128xf32>
    %171 = arith.subf %168, %169 : vector<8x128xf32>
    %172 = arith.subf %170, %168 : vector<8x128xf32>
    %173 = arith.subf %172, %169 : vector<8x128xf32>
    %c5 = arith.constant 5 : index
    %c0_40 = arith.constant 0 : index
    %c0_41 = arith.constant 0 : index
    %174 = vector.load %arg5[%c5, %c0_40, %c0_41] : memref<8x8x128xf32, #tpu.memory_space<vmem>>, vector<1x8x128xf32>
    %175 = vector.shape_cast %174 : vector<1x8x128xf32> to vector<8x128xf32>
    %176 = vector.extract_strided_slice %6 {offsets = [0, 0], sizes = [8, 1], strides = [1, 1]} : vector<8x8xf32> to vector<8x1xf32>
    %177 = vector.extract_strided_slice %175 {offsets = [0, 0], sizes = [1, 128], strides = [1, 1]} : vector<8x128xf32> to vector<1x128xf32>
    %178 = vector.broadcast %176 : vector<8x1xf32> to vector<8x128xf32>
    %179 = vector.broadcast %177 : vector<1x128xf32> to vector<8x128xf32>
    %180 = arith.mulf %178, %179 : vector<8x128xf32>
    %181 = vector.extract_strided_slice %6 {offsets = [0, 1], sizes = [8, 1], strides = [1, 1]} : vector<8x8xf32> to vector<8x1xf32>
    %182 = vector.extract_strided_slice %175 {offsets = [1, 0], sizes = [1, 128], strides = [1, 1]} : vector<8x128xf32> to vector<1x128xf32>
    %183 = vector.broadcast %181 : vector<8x1xf32> to vector<8x128xf32>
    %184 = vector.broadcast %182 : vector<1x128xf32> to vector<8x128xf32>
    %185 = arith.mulf %183, %184 : vector<8x128xf32>
    %186 = arith.addf %180, %185 : vector<8x128xf32>
    %187 = math.cos %186 : vector<8x128xf32>
    %188 = math.sin %186 : vector<8x128xf32>
    %189 = arith.mulf %171, %187 : vector<8x128xf32>
    %190 = arith.mulf %173, %188 : vector<8x128xf32>
    %191 = arith.subf %189, %190 : vector<8x128xf32>
    %192 = arith.mulf %171, %188 : vector<8x128xf32>
    %193 = arith.mulf %173, %187 : vector<8x128xf32>
    %194 = arith.addf %192, %193 : vector<8x128xf32>
    %195 = arith.truncf %191 : vector<8x128xf32> to vector<8x128xbf16>
    %196 = arith.truncf %194 : vector<8x128xf32> to vector<8x128xbf16>
    %197 = arith.addf %191, %194 : vector<8x128xf32>
    %198 = arith.truncf %197 : vector<8x128xf32> to vector<8x128xbf16>
    %cst_42 = arith.constant dense<0.000000e+00> : vector<8x128xf32>
    %199 = tpu.matmul %195, %3, %cst_42 {dimension_numbers = #tpu.dot_dimension_numbers<[1], [0], [0], [1], [0, 0, 1, 1], [], []>} : vector<8x128xbf16>, vector<128x128xbf16>, vector<8x128xf32> -> vector<8x128xf32>
    %cst_43 = arith.constant dense<0.000000e+00> : vector<8x128xf32>
    %200 = tpu.matmul %196, %4, %cst_43 {dimension_numbers = #tpu.dot_dimension_numbers<[1], [0], [0], [1], [0, 0, 1, 1], [], []>} : vector<8x128xbf16>, vector<128x128xbf16>, vector<8x128xf32> -> vector<8x128xf32>
    %cst_44 = arith.constant dense<0.000000e+00> : vector<8x128xf32>
    %201 = tpu.matmul %198, %5, %cst_44 {dimension_numbers = #tpu.dot_dimension_numbers<[1], [0], [0], [1], [0, 0, 1, 1], [], []>} : vector<8x128xbf16>, vector<128x128xbf16>, vector<8x128xf32> -> vector<8x128xf32>
    %202 = arith.subf %199, %200 : vector<8x128xf32>
    %203 = arith.subf %201, %199 : vector<8x128xf32>
    %204 = arith.subf %203, %200 : vector<8x128xf32>
    %c6 = arith.constant 6 : index
    %c0_45 = arith.constant 0 : index
    %c0_46 = arith.constant 0 : index
    %205 = vector.load %arg5[%c6, %c0_45, %c0_46] : memref<8x8x128xf32, #tpu.memory_space<vmem>>, vector<1x8x128xf32>
    %206 = vector.shape_cast %205 : vector<1x8x128xf32> to vector<8x128xf32>
    %207 = vector.extract_strided_slice %6 {offsets = [0, 0], sizes = [8, 1], strides = [1, 1]} : vector<8x8xf32> to vector<8x1xf32>
    %208 = vector.extract_strided_slice %206 {offsets = [0, 0], sizes = [1, 128], strides = [1, 1]} : vector<8x128xf32> to vector<1x128xf32>
    %209 = vector.broadcast %207 : vector<8x1xf32> to vector<8x128xf32>
    %210 = vector.broadcast %208 : vector<1x128xf32> to vector<8x128xf32>
    %211 = arith.mulf %209, %210 : vector<8x128xf32>
    %212 = vector.extract_strided_slice %6 {offsets = [0, 1], sizes = [8, 1], strides = [1, 1]} : vector<8x8xf32> to vector<8x1xf32>
    %213 = vector.extract_strided_slice %206 {offsets = [1, 0], sizes = [1, 128], strides = [1, 1]} : vector<8x128xf32> to vector<1x128xf32>
    %214 = vector.broadcast %212 : vector<8x1xf32> to vector<8x128xf32>
    %215 = vector.broadcast %213 : vector<1x128xf32> to vector<8x128xf32>
    %216 = arith.mulf %214, %215 : vector<8x128xf32>
    %217 = arith.addf %211, %216 : vector<8x128xf32>
    %218 = math.cos %217 : vector<8x128xf32>
    %219 = math.sin %217 : vector<8x128xf32>
    %220 = arith.mulf %202, %218 : vector<8x128xf32>
    %221 = arith.mulf %204, %219 : vector<8x128xf32>
    %222 = arith.subf %220, %221 : vector<8x128xf32>
    %223 = arith.mulf %202, %219 : vector<8x128xf32>
    %224 = arith.mulf %204, %218 : vector<8x128xf32>
    %225 = arith.addf %223, %224 : vector<8x128xf32>
    %226 = arith.truncf %222 : vector<8x128xf32> to vector<8x128xbf16>
    %227 = arith.truncf %225 : vector<8x128xf32> to vector<8x128xbf16>
    %228 = arith.addf %222, %225 : vector<8x128xf32>
    %229 = arith.truncf %228 : vector<8x128xf32> to vector<8x128xbf16>
    %cst_47 = arith.constant dense<0.000000e+00> : vector<8x128xf32>
    %230 = tpu.matmul %226, %3, %cst_47 {dimension_numbers = #tpu.dot_dimension_numbers<[1], [0], [0], [1], [0, 0, 1, 1], [], []>} : vector<8x128xbf16>, vector<128x128xbf16>, vector<8x128xf32> -> vector<8x128xf32>
    %cst_48 = arith.constant dense<0.000000e+00> : vector<8x128xf32>
    %231 = tpu.matmul %227, %4, %cst_48 {dimension_numbers = #tpu.dot_dimension_numbers<[1], [0], [0], [1], [0, 0, 1, 1], [], []>} : vector<8x128xbf16>, vector<128x128xbf16>, vector<8x128xf32> -> vector<8x128xf32>
    %cst_49 = arith.constant dense<0.000000e+00> : vector<8x128xf32>
    %232 = tpu.matmul %229, %5, %cst_49 {dimension_numbers = #tpu.dot_dimension_numbers<[1], [0], [0], [1], [0, 0, 1, 1], [], []>} : vector<8x128xbf16>, vector<128x128xbf16>, vector<8x128xf32> -> vector<8x128xf32>
    %233 = arith.subf %230, %231 : vector<8x128xf32>
    %234 = arith.subf %232, %230 : vector<8x128xf32>
    %235 = arith.subf %234, %231 : vector<8x128xf32>
    %c7 = arith.constant 7 : index
    %c0_50 = arith.constant 0 : index
    %c0_51 = arith.constant 0 : index
    %236 = vector.load %arg5[%c7, %c0_50, %c0_51] : memref<8x8x128xf32, #tpu.memory_space<vmem>>, vector<1x8x128xf32>
    %237 = vector.shape_cast %236 : vector<1x8x128xf32> to vector<8x128xf32>
    %238 = vector.extract_strided_slice %6 {offsets = [0, 0], sizes = [8, 1], strides = [1, 1]} : vector<8x8xf32> to vector<8x1xf32>
    %239 = vector.extract_strided_slice %237 {offsets = [0, 0], sizes = [1, 128], strides = [1, 1]} : vector<8x128xf32> to vector<1x128xf32>
    %240 = vector.broadcast %238 : vector<8x1xf32> to vector<8x128xf32>
    %241 = vector.broadcast %239 : vector<1x128xf32> to vector<8x128xf32>
    %242 = arith.mulf %240, %241 : vector<8x128xf32>
    %243 = vector.extract_strided_slice %6 {offsets = [0, 1], sizes = [8, 1], strides = [1, 1]} : vector<8x8xf32> to vector<8x1xf32>
    %244 = vector.extract_strided_slice %237 {offsets = [1, 0], sizes = [1, 128], strides = [1, 1]} : vector<8x128xf32> to vector<1x128xf32>
    %245 = vector.broadcast %243 : vector<8x1xf32> to vector<8x128xf32>
    %246 = vector.broadcast %244 : vector<1x128xf32> to vector<8x128xf32>
    %247 = arith.mulf %245, %246 : vector<8x128xf32>
    %248 = arith.addf %242, %247 : vector<8x128xf32>
    %249 = math.cos %248 : vector<8x128xf32>
    %250 = math.sin %248 : vector<8x128xf32>
    %251 = arith.mulf %233, %249 : vector<8x128xf32>
    %252 = arith.mulf %235, %250 : vector<8x128xf32>
    %253 = arith.subf %251, %252 : vector<8x128xf32>
    %254 = arith.mulf %233, %250 : vector<8x128xf32>
    %255 = arith.mulf %235, %249 : vector<8x128xf32>
    %256 = arith.addf %254, %255 : vector<8x128xf32>
    %c0_52 = arith.constant 0 : index
    %c0_53 = arith.constant 0 : index
    %257 = vector.load %arg9[%c0_52, %c0_53] : memref<8x128xf32, #tpu.memory_space<vmem>>, vector<8x128xf32>
    tpu.vector_store %arg9[%c0_52, %c0_53], %253 {strides = array<i32>} : memref<8x128xf32, #tpu.memory_space<vmem>>, vector<8x128xf32>,
    %c0_54 = arith.constant 0 : index
    %c0_55 = arith.constant 0 : index
    %258 = vector.load %arg10[%c0_54, %c0_55] : memref<8x128xf32, #tpu.memory_space<vmem>>, vector<8x128xf32>
    tpu.vector_store %arg10[%c0_54, %c0_55], %256 {strides = array<i32>} : memref<8x128xf32, #tpu.memory_space<vmem>>, vector<8x128xf32>,
    return
  }
  func.func @transform_0(%arg0: i32, %arg1: i32) -> (i32, i32) {
    %c0_i32 = arith.constant 0 : i32
    %c0_i32_0 = arith.constant 0 : i32
    return %arg0, %c0_i32 : i32, i32
  }
  func.func @transform_1(%arg0: i32, %arg1: i32) -> (i32, i32) {
    %c0_i32 = arith.constant 0 : i32
    %c0_i32_0 = arith.constant 0 : i32
    return %arg0, %c0_i32 : i32, i32
  }
  func.func @transform_2(%arg0: i32, %arg1: i32) -> (i32, i32) {
    %c0_i32 = arith.constant 0 : i32
    %c0_i32_0 = arith.constant 0 : i32
    return %arg0, %c0_i32 : i32, i32
  }
  func.func @transform_3(%arg0: i32, %arg1: i32) -> (i32, i32, i32) {
    %c0_i32 = arith.constant 0 : i32
    %c0_i32_0 = arith.constant 0 : i32
    %c0_i32_1 = arith.constant 0 : i32
    return %arg1, %c0_i32, %c0_i32_0 : i32, i32, i32
  }
  func.func @transform_4(%arg0: i32, %arg1: i32) -> (i32, i32) {
    %c0_i32 = arith.constant 0 : i32
    %c0_i32_0 = arith.constant 0 : i32
    %c0_i32_1 = arith.constant 0 : i32
    return %c0_i32, %c0_i32_0 : i32, i32
  }
  func.func @transform_5(%arg0: i32, %arg1: i32) -> (i32, i32) {
    %c0_i32 = arith.constant 0 : i32
    %c0_i32_0 = arith.constant 0 : i32
    %c0_i32_1 = arith.constant 0 : i32
    return %c0_i32, %c0_i32_0 : i32, i32
  }
  func.func @transform_6(%arg0: i32, %arg1: i32) -> (i32, i32) {
    %c0_i32 = arith.constant 0 : i32
    %c0_i32_0 = arith.constant 0 : i32
    %c0_i32_1 = arith.constant 0 : i32
    return %c0_i32, %c0_i32_0 : i32, i32
  }
  func.func @transform_7(%arg0: i32, %arg1: i32) -> (i32, i32) {
    %c0_i32 = arith.constant 0 : i32
    %c0_i32_0 = arith.constant 0 : i32
    return %arg0, %c0_i32 : i32, i32
  }
  func.func @transform_8(%arg0: i32, %arg1: i32) -> (i32, i32) {
    %c0_i32 = arith.constant 0 : i32
    %c0_i32_0 = arith.constant 0 : i32
    return %arg0, %c0_i32 : i32, i32
  }
}

</mosaic_0001>

<bundles_post_ra>
// kernel: tpu_custom_call.1
= control target key start
LH: loop header
LB: loop body
LE: loop exit
PB: predicated region body
PF: predicated region fallthrough
CT: control target
= control target key end

     0   :  { %14 = vsyncpa [#allocation3], 0  ;;  %s5060_s0 = inlined_call_operand.hbm [shape: f32[8,128], index: 0, kind: input, shape index: {}]   ;;  %s5061_s1 = inlined_call_operand.hbm [shape: f32[8,128], index: 1, kind: input, shape index: {}]   ;;  %s5062_s2 = inlined_call_operand.hbm [shape: f32[8,8], index: 2, kind: input, shape index: {}]   ;;  %s5063_s3 = inlined_call_operand.hbm [shape: f32[8,8,128], index: 3, kind: input, shape index: {}]   ;;  %s5064_s4 = inlined_call_operand.hbm [shape: bf16[128,128], index: 4, kind: input, shape index: {}]   ;;  %s5065_s5 = inlined_call_operand.hbm [shape: bf16[128,128], index: 5, kind: input, shape index: {}]   ;;  %s5066_s6 = inlined_call_operand.hbm [shape: bf16[128,128], index: 6, kind: input, shape index: {}]   ;;  %s5067_s7 = inlined_call_operand.hbm [shape: f32[8,128], index: 7, kind: output, shape index: {0}]   ;;  %s5068_s8 = inlined_call_operand.hbm [shape: f32[8,128], index: 8, kind: output, shape index: {1}]  }
   0x1   :  { %15 = vsyncpa [#allocation6], 0 }
   0x2   :  { %16 = vsyncpa [#allocation9], 0 }
   0x3   :  { %17 = vsyncpa [#allocation12], 0 }
   0x4   :  { %18 = vsyncpa [#allocation4], 0  ;;  %s36_s29 = sshll.u32 %s5061_s1, 4  ;;  %s37_s29 = int_to_ptr.hbm [resolvable:$true] %s36_s29 }
   0x5   :  { %19 = vsyncpa [#allocation16], 0  ;;  %s3777_s30 = smov [#allocation5]   ;;  %s57_s12 = sshll.u32 %s5063_s3, 4  ;;  %s58_s12 = int_to_ptr.hbm [resolvable:$true] %s57_s12 }
   0x6   :  { %s38_s9 = sshll.u32 %s3777_s30, 4  ;;  %s3778_s13 = smov [#allocation8]   ;;  %s39_s9 = int_to_ptr.vmem [resolvable:$true] %s38_s9 }
   0x7   :  { %41 = dma.hbm_to_vmem [thread:$0]  %s37_s29, 128, %s39_s9, [#allocation6]  }
   0x8   :  { %s59_s14 = sshll.u32 %s3778_s13, 4  ;;  %s3779_s15 = smov 128   ;;  %s60_s14 = int_to_ptr.vmem [resolvable:$true] %s59_s14 }
   0x9   :  { %s3780_s16 = smov 8   ;;  %s83_s1 = sshll.u32 %s5065_s5, 4  ;;  %s84_s1 = int_to_ptr.hbm [resolvable:$true] %s83_s1 }
   0xa   :  { %65 = dma.hbm_to_vmem [thread:$0]  %s58_s12, 1024, %s60_s14, [#allocation9], %s3779_s15, %s3779_s15, %s3780_s16  }
   0xb   :  { %s3781_s19 = smov [#allocation11]   ;;  %s25_s3 = sshll.u32 %s5060_s0, 4  ;;  %s26_s3 = int_to_ptr.hbm [resolvable:$true] %s25_s3 }
   0xc   :  { %s85_s20 = sshll.u32 %s3781_s19, 4  ;;  %s3782_s23 = smov 64   ;;  %s86_s20 = int_to_ptr.vmem [resolvable:$true] %s85_s20 }
   0xd   :  { %s3783_s24 = smov 4   ;;  %s3784_s25 = smov [#allocation2]  }
   0xe   :  { %91 = dma.hbm_to_vmem [thread:$0]  %s84_s1, 1024, %s86_s20, [#allocation12], %s3782_s23, %s3782_s23, %s3783_s24  }
   0xf   :  { %s27_s26 = sshll.u32 %s3784_s25, 4  ;;  %s47_s29 = sshll.u32 %s5062_s2, 4  ;;  %s28_s26 = int_to_ptr.vmem [resolvable:$true] %s27_s26  ;;  %s48_s29 = int_to_ptr.hbm [resolvable:$true] %s47_s29 }
  0x10   :  { %30 = dma.hbm_to_vmem [thread:$0]  %s26_s3, 128, %s28_s26, [#allocation3]  }
  0x11   :  { %s70_s9 = sshll.u32 %s5064_s4, 4  ;;  %s3785_s10 = smov [#allocation7]   ;;  %s71_s9 = int_to_ptr.hbm [resolvable:$true] %s70_s9 }
  0x12   :  { %s49_s11 = sshll.u32 %s3785_s10, 4  ;;  %s3786_s0 = smov [#allocation10]   ;;  %s50_s11 = int_to_ptr.vmem [resolvable:$true] %s49_s11 }
  0x13   :  { %52 = dma.hbm_to_vmem [thread:$0]  %s48_s29, 128, %s50_s11, [#allocation6]  }
  0x14   :  { %s72_s12 = sshll.u32 %s3786_s0, 4  ;;  %s96_s15 = sshll.u32 %s5066_s6, 4  ;;  %s73_s12 = int_to_ptr.vmem [resolvable:$true] %s72_s12  ;;  %s97_s15 = int_to_ptr.hbm [resolvable:$true] %s96_s15 }
  0x15   :  { %78 = dma.hbm_to_vmem [thread:$0]  %s71_s9, 1024, %s73_s12, [#allocation9], %s3782_s23, %s3782_s23, %s3783_s24  }
  0x16   :  { %s3787_s2 = smov [#allocation13]  }
  0x17   :  { %s98_s16 = sshll.u32 %s3787_s2, 4  ;;  %s99_s16 = int_to_ptr.vmem [resolvable:$true] %s98_s16 }
  0x18   :  { %104 = dma.hbm_to_vmem [thread:$0]  %s97_s15, 1024, %s99_s16, [#allocation12], %s3782_s23, %s3782_s23, %s3783_s24  }
  0x19   :  { %3765 = dma.done.wait [#allocation3], 128  }
  0x1a   :  { %3766 = vsyncadd [#allocation3], 4294967168 }
  0x1b   :  { %3767 = dma.done.wait [#allocation6], 256  }
  0x1c   :  { %3768 = vsyncadd [#allocation6], 4294967040 }
  0x1d   :  { %3769 = dma.done.wait [#allocation9], 2048  }
  0x1e   :  { %3770 = vsyncadd [#allocation9], 4294965248 }
  0x1f   :  { %3771 = dma.done.wait [#allocation12], 2048  }
  0x20   :  { %3772 = vsyncadd [#allocation12], 4294965248  ;;  %v5080_v0 = vmov 0   ;;  %v189_v1 = vld [vmem:[#allocation7] sm:$0xff]  ;;  %v3872_v5 = vld [vmem:[#allocation13 + $0x30] sm:$0xff]  ;;  %v3789_v11 = vmov 1  }
  0x21   :  { %3515 = vset.pattern.permute.xlu0 %v5080_v0  ;;  %v3865_v2 = vld [vmem:[#allocation13 + $0x38] sm:$0xff]  ;;  %v3876_v6 = vld [vmem:[#allocation10 + $0x30] sm:$0xff]  ;;  %v3882_v8 = vld [vmem:[#allocation13 + $0x28] sm:$0xff]  ;;  %s3796_s4 = smov [#allocation14]   ;;  %s3297_s1 = sshll.u32 %s5067_s7, 4  ;;  %s3298_s1 = int_to_ptr.hbm [resolvable:$true] %s3297_s1 }
  0x22   :  { %385 = vperm.xlu0 %3515, %v189_v1   ;;  %v3867_v3 = vld [vmem:[#allocation10 + $0x38] sm:$0xff]  ;;  %366 = vmatpush.bf16.msra.mxu2 %v3865_v2  ;;  %v3878_v7 = vld [vmem:[#allocation11 + $0x30] sm:$0xff]  ;;  %v3886_v9 = vld [vmem:[#allocation10 + $0x28] sm:$0xff]  ;;  %s3295_s6 = sshll.u32 %s3796_s4, 4  ;;  %s3797_s19 = smov [#allocation15]   ;;  %s3296_s6 = int_to_ptr.vmem [resolvable:$true] %s3295_s6 }
  0x23   :  { %v3869_v4 = vld [vmem:[#allocation11 + $0x38] sm:$0xff]  ;;  %244 = vmatpush.bf16.msra.mxu0 %v3867_v3  ;;  %716 = vmatpush.bf16.msra.mxu3 %v3867_v3  ;;  %v3888_v10 = vld [vmem:[#allocation11 + $0x28] sm:$0xff]  ;;  %v3892_v12 = vld [vmem:[#allocation13 + $0x20] sm:$0xff]  ;;  %s3306_s20 = sshll.u32 %s3797_s19, 4  ;;  %s3308_s3 = sshll.u32 %s5068_s8, 4  ;;  %s3307_s20 = int_to_ptr.vmem [resolvable:$true] %s3306_s20  ;;  %s3309_s3 = int_to_ptr.hbm [resolvable:$true] %s3308_s3 }
  0x24   :  { %305 = vmatpush.bf16.msra.mxu1 %v3869_v4  ;;  %v3896_v13 = vld [vmem:[#allocation10 + $0x20] sm:$0xff]  ;;  %v3902_v15 = vld [vmem:[#allocation13 + $0x18] sm:$0xff]  ;;  %v3912_v18 = vld [vmem:[#allocation13 + $0x10] sm:$0xff] }
  0x25   :  { %v3898_v14 = vld [vmem:[#allocation11 + $0x20] sm:$0xff]  ;;  %v3906_v16 = vld [vmem:[#allocation10 + $0x18] sm:$0xff]  ;;  %v3916_v19 = vld [vmem:[#allocation10 + $0x10] sm:$0xff] }
  0x26   :  { %367 = vmatpush.bf16.msra.mxu2 %v3872_v5  ;;  %v3908_v17 = vld [vmem:[#allocation11 + $0x18] sm:$0xff]  ;;  %v3918_v20 = vld [vmem:[#allocation11 + $0x10] sm:$0xff]  ;;  %v3922_v21 = vld [vmem:[#allocation13 + $0x8] sm:$0xff] }
  0x27   :  { %245 = vmatpush.bf16.msra.mxu0 %v3876_v6  ;;  %717 = vmatpush.bf16.msra.mxu3 %v3876_v6  ;;  %v137_v22 = vld [vmem:[#allocation2] sm:$0xff]  ;;  %v139_v23 = vld [vmem:[#allocation5] sm:$0xff]  ;;  %v3932_v27 = vld [vmem:[#allocation13] sm:$0xff] }
  0x28   :  { %306 = vmatpush.bf16.msra.mxu1 %v3878_v7  ;;  %v3926_v24 = vld [vmem:[#allocation10 + $0x8] sm:$0xff]  ;;  %v194_v26 = vadd.f32 %v139_v23, %v137_v22  ;;  %v3936_v28 = vld [vmem:[#allocation10] sm:$0xff]  ;;  %v192_v31 = vpack.c.bf16 %v137_v22, %v137_v22  ;;  %v193_v32 = vpack.c.bf16 %v139_v23, %v139_v23  ;;  %v1127_v36 = vld [vmem:[#allocation8 + $0x10] sm:$0xff] }
  0x29   :  { %v3928_v25 = vld [vmem:[#allocation11 + $0x8] sm:$0xff]  ;;  %v3938_v29 = vld [vmem:[#allocation11] sm:$0xff]  ;;  %v1495_v37 = vld [vmem:[#allocation8 + $0x18] sm:$0xff]  ;;  %v1128_v44 = vperm.slane %v1127_v36, 0  ;;  %v1130_v52 = vperm.slane %v1127_v36, 1 }
  0x2a   :  { %3516 = vset.pattern.permute.xlu0 %v3789_v11  ;;  %368 = vmatpush.bf16.msra.mxu2 %v3882_v8  ;;  %v195_v30 = vpack.c.bf16 %v194_v26, %v194_v26  ;;  %v382_v34 = vld [vmem:[#allocation8] sm:$0xff]  ;;  %v759_v35 = vld [vmem:[#allocation8 + $0x8] sm:$0xff]  ;;  %v2599_v40 = vld [vmem:[#allocation8 + $0x30] sm:$0xff]  ;;  %v1496_v45 = vperm.slane %v1495_v37, 0  ;;  %v1498_v53 = vperm.slane %v1495_v37, 1 }
  0x2b   :  { %391 = vperm.xlu0 %3516, %v189_v1   ;;  %246 = vmatpush.bf16.msra.mxu0 %v3886_v9  ;;  %v1863_v38 = vld [vmem:[#allocation8 + $0x20] sm:$0xff]  ;;  %v2231_v39 = vld [vmem:[#allocation8 + $0x28] sm:$0xff]  ;;  %v2967_v41 = vld [vmem:[#allocation8 + $0x38] sm:$0xff]  ;;  %v388_v42 = vperm.slane %v382_v34, 0  ;;  %v760_v43 = vperm.slane %v759_v35, 0  ;;  %v2600_v48 = vperm.slane %v2599_v40, 0 }
  0x2c   :  { %307 = vmatpush.bf16.msra.mxu1 %v3888_v10  ;;  %718 = vmatpush.bf16.msra.mxu3 %v3886_v9  ;;  %v1864_v46 = vperm.slane %v1863_v38, 0  ;;  %v2232_v47 = vperm.slane %v2231_v39, 0  ;;  %v2968_v49 = vperm.slane %v2967_v41, 0  ;;  %v394_v50 = vperm.slane %v382_v34, 1 }
  0x2d   :  { %v762_v51 = vperm.slane %v759_v35, 1  ;;  %v1866_v54 = vperm.slane %v1863_v38, 1  ;;  %v2234_v55 = vperm.slane %v2231_v39, 1  ;;  %v2602_v56 = vperm.slane %v2599_v40, 1 }
  0x2e   :  { %369 = vmatpush.bf16.msra.mxu2 %v3892_v12  ;;  %v2970_v57 = vperm.slane %v2967_v41, 1 }
  0x2f   :  { %247 = vmatpush.bf16.msra.mxu0 %v3896_v13 }
  0x30   :  { %308 = vmatpush.bf16.msra.mxu1 %v3898_v14  ;;  %719 = vmatpush.bf16.msra.mxu3 %v3896_v13 }
  0x32   :  { %370 = vmatpush.bf16.msra.mxu2 %v3902_v15 }
  0x33   :  { %248 = vmatpush.bf16.msra.mxu0 %v3906_v16 }
  0x34   :  { %309 = vmatpush.bf16.msra.mxu1 %v3908_v17  ;;  %720 = vmatpush.bf16.msra.mxu3 %v3906_v16 }
  0x36   :  { %371 = vmatpush.bf16.msra.mxu2 %v3912_v18 }
  0x37   :  { %249 = vmatpush.bf16.msra.mxu0 %v3916_v19 }
  0x38   :  { %310 = vmatpush.bf16.msra.mxu1 %v3918_v20  ;;  %721 = vmatpush.bf16.msra.mxu3 %v3916_v19 }
  0x3a   :  { %372 = vmatpush.bf16.msra.mxu2 %v3922_v21 }
  0x3b   :  { %250 = vmatpush.bf16.msra.mxu0 %v3926_v24 }
  0x3c   :  { %311 = vmatpush.bf16.msra.mxu1 %v3928_v25  ;;  %722 = vmatpush.bf16.msra.mxu3 %v3926_v24 }
  0x3e   :  { %373 = vmatpush.bf16.msra.mxu2 %v3932_v27 }
  0x3f   :  { %251 = vmatpush.bf16.msra.mxu0 %v3936_v28 }
  0x40   :  { %312 = vmatpush.bf16.msra.mxu1 %v3938_v29  ;;  %723 = vmatpush.bf16.msra.mxu3 %v3936_v28 }
  0x41   :  { %374 = vmatmul.bf16.vlgmr.msra.gmra.mxu2 %v195_v30 }
  0x42   :  { %252 = vmatmul.bf16.vlgmr.msra.gmra.mxu0 %v192_v31  ;;  %1084 = vmatpush.bf16.msrb.mxu2 %v3867_v3 }
  0x43   :  { %729 = vmatpush.bf16.msrb.mxu0 %v3869_v4  ;;  %313 = vmatmul.bf16.vlgmr.msra.gmra.mxu1 %v193_v32 }
  0x44   :  { %742 = vmatpush.bf16.msrb.mxu1 %v3865_v2  ;;  %1097 = vmatpush.bf16.msrb.mxu3 %v3869_v4 }
  0x46   :  { %1085 = vmatpush.bf16.msrb.mxu2 %v3876_v6 }
  0x47   :  { %730 = vmatpush.bf16.msrb.mxu0 %v3878_v7 }
  0x48   :  { %743 = vmatpush.bf16.msrb.mxu1 %v3872_v5  ;;  %1098 = vmatpush.bf16.msrb.mxu3 %v3878_v7 }
  0x4a   :  { %1086 = vmatpush.bf16.msrb.mxu2 %v3886_v9 }
  0x4b   :  { %731 = vmatpush.bf16.msrb.mxu0 %v3888_v10 }
  0x4c   :  { %744 = vmatpush.bf16.msrb.mxu1 %v3882_v8  ;;  %1099 = vmatpush.bf16.msrb.mxu3 %v3888_v10 }
  0x4e   :  { %1087 = vmatpush.bf16.msrb.mxu2 %v3896_v13 }
  0x4f   :  { %732 = vmatpush.bf16.msrb.mxu0 %v3898_v14 }
  0x50   :  { %745 = vmatpush.bf16.msrb.mxu1 %v3892_v12  ;;  %1100 = vmatpush.bf16.msrb.mxu3 %v3898_v14 }
  0x52   :  { %1088 = vmatpush.bf16.msrb.mxu2 %v3906_v16 }
  0x53   :  { %733 = vmatpush.bf16.msrb.mxu0 %v3908_v17 }
  0x54   :  { %746 = vmatpush.bf16.msrb.mxu1 %v3902_v15  ;;  %1101 = vmatpush.bf16.msrb.mxu3 %v3908_v17 }
  0x56   :  { %1089 = vmatpush.bf16.msrb.mxu2 %v3916_v19 }
  0x57   :  { %734 = vmatpush.bf16.msrb.mxu0 %v3918_v20 }
  0x58   :  { %747 = vmatpush.bf16.msrb.mxu1 %v3912_v18  ;;  %1102 = vmatpush.bf16.msrb.mxu3 %v3918_v20 }
  0x5a   :  { %1090 = vmatpush.bf16.msrb.mxu2 %v3926_v24 }
  0x5b   :  { %735 = vmatpush.bf16.msrb.mxu0 %v3928_v25 }
  0x5c   :  { %748 = vmatpush.bf16.msrb.mxu1 %v3922_v21  ;;  %1103 = vmatpush.bf16.msrb.mxu3 %v3928_v25 }
  0x5e   :  { %1091 = vmatpush.bf16.msrb.mxu2 %v3936_v28 }
  0x5f   :  { %736 = vmatpush.bf16.msrb.mxu0 %v3938_v29 }
  0x60   :  { %749 = vmatpush.bf16.msrb.mxu1 %v3932_v27  ;;  %1104 = vmatpush.bf16.msrb.mxu3 %v3938_v29 }
  0x62   :  { %1465 = vmatpush.bf16.msra.mxu2 %v3869_v4 }
  0x63   :  { %1110 = vmatpush.bf16.msra.mxu0 %v3865_v2 }
  0x64   :  { %1452 = vmatpush.bf16.msra.mxu1 %v3867_v3 }
  0x66   :  { %1466 = vmatpush.bf16.msra.mxu2 %v3878_v7 }
  0x67   :  { %1111 = vmatpush.bf16.msra.mxu0 %v3872_v5 }
  0x68   :  { %1453 = vmatpush.bf16.msra.mxu1 %v3876_v6 }
  0x6a   :  { %1467 = vmatpush.bf16.msra.mxu2 %v3888_v10 }
  0x6b   :  { %1112 = vmatpush.bf16.msra.mxu0 %v3882_v8 }
  0x6c   :  { %1454 = vmatpush.bf16.msra.mxu1 %v3886_v9 }
  0x6e   :  { %1468 = vmatpush.bf16.msra.mxu2 %v3898_v14 }
  0x6f   :  { %1113 = vmatpush.bf16.msra.mxu0 %v3892_v12 }
  0x70   :  { %1455 = vmatpush.bf16.msra.mxu1 %v3896_v13 }
  0x72   :  { %1469 = vmatpush.bf16.msra.mxu2 %v3908_v17 }
  0x73   :  { %1114 = vmatpush.bf16.msra.mxu0 %v3902_v15 }
  0x74   :  { %1456 = vmatpush.bf16.msra.mxu1 %v3906_v16 }
  0x76   :  { %1470 = vmatpush.bf16.msra.mxu2 %v3918_v20 }
  0x77   :  { %1115 = vmatpush.bf16.msra.mxu0 %v3912_v18 }
  0x78   :  { %1457 = vmatpush.bf16.msra.mxu1 %v3916_v19 }
  0x7a   :  { %1471 = vmatpush.bf16.msra.mxu2 %v3928_v25 }
  0x7b   :  { %1116 = vmatpush.bf16.msra.mxu0 %v3922_v21 }
  0x7c   :  { %1458 = vmatpush.bf16.msra.mxu1 %v3926_v24 }
  0x7e   :  { %1472 = vmatpush.bf16.msra.mxu2 %v3938_v29 }
  0x7f   :  { %1117 = vmatpush.bf16.msra.mxu0 %v3932_v27 }
  0x80   :  { %1459 = vmatpush.bf16.msra.mxu1 %v3936_v28 }
  0x94   :  { %v386_v33 = vpop.permute.xlu0 %385 }
  0x95   :  { %v389_v58 = vmul.f32 %v388_v42, %v386_v33  ;;  %v761_v59 = vmul.f32 %v760_v43, %v386_v33  ;;  %v1129_v60 = vmul.f32 %v1128_v44, %v386_v33  ;;  %v1497_v61 = vmul.f32 %v1496_v45, %v386_v33 }
  0x96   :  { %v1865_v62 = vmul.f32 %v1864_v46, %v386_v33  ;;  %v2233_v63 = vmul.f32 %v2232_v47, %v386_v33  ;;  %v2601_v1 = vmul.f32 %v2600_v48, %v386_v33  ;;  %v2969_v11 = vmul.f32 %v2968_v49, %v386_v33 }
  0x9d   :  { %v392_v22 = vpop.permute.xlu0 %391 }
  0x9e   :  { %v395_v23 = vmul.f32 %v394_v50, %v392_v22  ;;  %v763_v26 = vmul.f32 %v762_v51, %v392_v22  ;;  %v1131_v30 = vmul.f32 %v1130_v52, %v392_v22  ;;  %v1499_v31 = vmul.f32 %v1498_v53, %v392_v22 }
  0x9f   :  { %v1867_v32 = vmul.f32 %v1866_v54, %v392_v22  ;;  %v2235_v34 = vmul.f32 %v2234_v55, %v392_v22  ;;  %v2603_v35 = vmul.f32 %v2602_v56, %v392_v22  ;;  %v2971_v36 = vmul.f32 %v2970_v57, %v392_v22 }
  0xa0   :  { %v4001_v37 = vadd.f32 %v395_v23, %v389_v58  ;;  %v4003_v38 = vadd.f32 %v763_v26, %v761_v59  ;;  %v4005_v39 = vadd.f32 %v1131_v30, %v1129_v60  ;;  %v4007_v40 = vadd.f32 %v1499_v31, %v1497_v61 }
  0xa1   :  { %v4009_v41 = vadd.f32 %v1867_v32, %v1865_v62  ;;  %v4011_v33 = vadd.f32 %v2235_v34, %v2233_v63  ;;  %v4013_v42 = vadd.f32 %v2603_v35, %v2601_v1  ;;  %v4015_v43 = vadd.f32 %v2971_v36, %v2969_v11 }
  0xa2   :  { %5114 = vst [vmem:[#allocation23_spill] sm:$0xff] %v4003_v38  ;;  %v400_v44 = vand.u32 2139095040, %v4001_v37  ;;  %v5069_v50 = vand.u32 2147483647, %v4001_v37  ;;  %v5088_v53 = vmov 683565275  }
  0xa3   :  { %5115 = vst [vmem:[#allocation24_spill] sm:$0xff] %v4007_v40  ;;  %v5070_v56 = vmov 2475754826   ;;  %v5074_v59 = vmov 2131351028  }
  0xa4   :  { %5116 = vst [vmem:[#allocation25_spill] sm:$0xff] %v4009_v41  ;;  %v401_v45 = vshrl.u32 %v400_v44, 23  ;;  %v404_v55 = vand.u32 8388607, %v5069_v50  ;;  %v5072_v62 = vmov 2102212464  }
  0xa5   :  { %5117 = vst [vmem:[#allocation26_spill] sm:$0xff] %v4011_v33  ;;  %v5076_v11 = vmov 920167782   ;;  %v5078_v35 = vmov 1326507024  }
  0xa6   :  { %5118 = vst [vmem:[#allocation27_spill] sm:$0xff] %v4013_v42  ;;  %v3422_v46 = vadd.s32 4294967169, %v401_v45  ;;  %v405_v23 = vor.u32 8388608, %v404_v55 }
  0xa7   :  { %5119 = vst [vmem:[#allocation28_spill] sm:$0xff] %v4015_v43  ;;  %v5120_v43 = vmov 0  }
  0xa8   :  { %v407_v47 = vadd.s32 1, %v3422_v46 }
  0xaa   :  { %vm408_vm0 = vcmp.gt.s32.totalorder %v407_v47, 0 }
  0xab   :  { %v409_v48 = vsel %vm408_vm0, %v407_v47, 0  ;;  %vm399_vm0 = vcmp.lt.s32.totalorder %v4001_v37, 0 }
  0xac   :  { %v411_v49 = vand.u32 31, %v409_v48  ;;  %v4019_v52 = vshrl.u32 %v409_v48, 5  ;;  %v4042_v48 = vshll.u32 %v405_v23, 8 }
  0xae   :  { %v412_v51 = vsub.s32 32, %v411_v49  ;;  %v414_v54 = vshll.u32 %v5088_v53, %v411_v49  ;;  %v417_v58 = vshll.u32 %v5070_v56, %v411_v49  ;;  %v420_v60 = vshll.u32 %v5074_v59, %v411_v49 }
  0xaf   :  { %v423_v1 = vshll.u32 %v5072_v62, %v411_v49  ;;  %v426_v30 = vshll.u32 %v5076_v11, %v411_v49  ;;  %vm429_vm1 = vcmp.lt.s32.totalorder %v4019_v52, 1  ;;  %vm432_vm2 = vcmp.lt.s32.totalorder %v4019_v52, 4 }
  0xb0   :  { %v415_v57 = vshrl.u32 %v5070_v56, %v412_v51  ;;  %v418_v61 = vshrl.u32 %v5074_v59, %v412_v51  ;;  %v421_v63 = vshrl.u32 %v5072_v62, %v412_v51  ;;  %v424_v22 = vshrl.u32 %v5076_v11, %v412_v51 }
  0xb1   :  { %v427_v36 = vshrl.u32 %v5078_v35, %v412_v51  ;;  %vm431_vm3 = vcmp.lt.s32.totalorder %v4019_v52, 3  ;;  %vm430_vm4 = vcmp.lt.s32.totalorder %v4019_v52, 2 }
  0xb2   :  { %v416_v26 = vor.u32 %v415_v57, %v414_v54  ;;  %v419_v31 = vor.u32 %v418_v61, %v417_v58  ;;  %v422_v32 = vor.u32 %v421_v63, %v420_v60  ;;  %v425_v34 = vor.u32 %v424_v22, %v423_v1 }
  0xb3   :  { %v428_v44 = vor.u32 %v427_v36, %v426_v30  ;;  %v446_v58 = vand.u32 65535, %v4042_v48  ;;  %v447_v61 = vshrl.u32 %v4042_v48, 16 }
  0xb4   :  { %v437_v45 = vsel %vm429_vm1, %v416_v26, %v419_v31  ;;  %v438_v46 = vsel %vm432_vm2, %v425_v34, 920167782  ;;  %v441_v47 = vsel %vm429_vm1, %v419_v31, %v422_v32  ;;  %v434_v41 = vsel %vm432_vm2, %v422_v32, 2102212464 }
  0xb5   :  { %v439_v49 = vsel %vm431_vm3, %v422_v32, %v438_v46  ;;  %v442_v54 = vsel %vm432_vm2, %v428_v44, 1326507024  ;;  %v435_v32 = vsel %vm431_vm3, %v419_v31, %v434_v41 }
  0xb6   :  { %v440_v55 = vsel %vm430_vm4, %v437_v45, %v439_v49  ;;  %v443_v57 = vsel %vm431_vm3, %v425_v34, %v442_v54  ;;  %v768_v49 = vand.u32 2139095040, %v4003_v38  ;;  %vm540_vm3 = vweird.f32 %v4001_v37 }
  0xb7   :  { %v444_v60 = vsel %vm430_vm4, %v441_v47, %v443_v57  ;;  %v470_v63 = vand.u32 65535, %v440_v55  ;;  %v471_v1 = vshrl.u32 %v440_v55, 16  ;;  %v413_v47 = vshrl.u32 %v5088_v53, %v412_v51 }
  0xb8   :  { %v448_v22 = vand.u32 65535, %v444_v60  ;;  %v449_v23 = vshrl.u32 %v444_v60, 16 }
  0xb9   :  { %v473_v30 = vmul.u32 %v471_v1, %v446_v58  ;;  %v474_v36 = vmul.u32 %v470_v63, %v447_v61  ;;  %v472_v54 = vmul.u32 %v470_v63, %v446_v58  ;;  %v475_v59 = vmul.u32 %v471_v1, %v447_v61 }
  0xba   :  { %v451_v50 = vmul.u32 %v449_v23, %v446_v58  ;;  %v452_v45 = vmul.u32 %v448_v22, %v447_v61  ;;  %v450_v57 = vmul.u32 %v448_v22, %v446_v58  ;;  %v453_v55 = vmul.u32 %v449_v23, %v447_v61 }
  0xbb   :  { %v476_v56 = vshll.u32 %v473_v30, 16  ;;  %v478_v11 = vshll.u32 %v474_v36, 16  ;;  %v477_v1 = vshrl.u32 %v473_v30, 16 }
  0xbc   :  { %v454_v62 = vshll.u32 %v451_v50, 16  ;;  %v456_v35 = vshll.u32 %v452_v45, 16 }
  0xbd   :  { %vm480_vm5 = vc.u32 %v472_v54, %v476_v56  ;;  %v482_v60 = vadd.s32 %v476_v56, %v472_v54  ;;  %v433_v56 = vsel %vm429_vm1, %v413_v47, %v416_v26  ;;  %v455_v54 = vshrl.u32 %v451_v50, 16 }
  0xbe   :  { %vm458_vm6 = vc.u32 %v450_v57, %v454_v62  ;;  %v460_v0 = vadd.s32 %v454_v62, %v450_v57  ;;  %v481_v42 = vsel %vm480_vm5, 1, %v5120_v43  ;;  %v436_v26 = vsel %vm430_vm4, %v433_v56, %v435_v32 }
  0xbf   :  { %v253_v44 = vpop.f32.mrf.mxu0  ;;  %v459_v63 = vsel %vm458_vm6, 1, %v5120_v43  ;;  %v483_v40 = vadd.s32 %v481_v42, %v475_v59  ;;  %vm484_vm7 = vc.u32 %v482_v60, %v478_v11 }
  0xc0   :  { %v314_v46 = vpop.f32.mrf.mxu1  ;;  %v461_v58 = vadd.s32 %v459_v63, %v453_v55  ;;  %vm462_vm8 = vc.u32 %v460_v0, %v456_v35  ;;  %v485_v61 = vsel %vm484_vm7, 1, %v5120_v43  ;;  %v457_v35 = vshrl.u32 %v452_v45, 16 }
  0xc1   :  { %v4058_v34 = vsub.f32 %v253_v44, %v314_v46  ;;  %v463_v62 = vsel %vm462_vm8, 1, %v5120_v43  ;;  %v487_v22 = vadd.s32 %v485_v61, %v483_v40  ;;  %v769_v55 = vshrl.u32 %v768_v49, 23 }
  0xc2   :  { %v465_v42 = vadd.s32 %v463_v62, %v461_v58  ;;  %v486_v40 = vadd.s32 %v482_v60, %v478_v11 }
  0xc3   :  { %v488_v0 = vadd.s32 %v487_v22, %v477_v1  ;;  %v3428_v41 = vadd.s32 4294967169, %v769_v55 }
  0xc4   :  { %v375_v33 = vpop.f32.mrf.mxu2  ;;  %v466_v57 = vadd.s32 %v465_v42, %v455_v54 }
  0xc5   :  { %v380_v51 = vsub.f32 %v375_v33, %v253_v44  ;;  %v479_v44 = vshrl.u32 %v474_v36, 16  ;;  %v775_v36 = vadd.s32 1, %v3428_v41  ;;  %v5124_v41 = vmov 2102212464  }
  0xc6   :  { %v467_v30 = vadd.s32 %v466_v57, %v457_v35  ;;  %v5122_v57 = vmov 920167782  }
  0xc7   :  { %v4069_v23 = vsub.f32 %v380_v51, %v314_v46  ;;  %v255_v59 = vpop.f32.mrf.mxu0  ;;  %v489_v47 = vadd.s32 %v488_v0, %v479_v44  ;;  %v490_v51 = vmul.u32 %v4042_v48, %v436_v26  ;;  %vm776_vm10 = vcmp.gt.s32.totalorder %v775_v36, 0 }
  0xc8   :  { %v316_v33 = vpop.f32.mrf.mxu1  ;;  %vm492_vm9 = vc.u32 %v467_v30, %v486_v40  ;;  %v777_v49 = vsel %vm776_vm10, %v775_v36, 0  ;;  %v491_v32 = vadd.s32 %v486_v40, %v467_v30  ;;  %v5121_v0 = vmov 1326507024  }
  0xc9   :  { %v493_v46 = vadd.s32 1, %v489_v47  ;;  %v779_v60 = vand.u32 31, %v777_v49  ;;  %v4085_v26 = vshrl.u32 %v777_v49, 5  ;;  %v5123_v30 = vmov 2131351028  }
  0xca   :  { %v5125_v36 = vmov 2475754826  }
  0xcb   :  { %v494_v50 = vsel %vm492_vm9, %v493_v46, %v489_v47  ;;  %v4079_v48 = vsub.s32 32, %v779_v60  ;;  %v785_v49 = vshll.u32 %v5125_v36, %v779_v60  ;;  %vm800_vm13 = vcmp.lt.s32.totalorder %v4085_v26, 4 }
  0xcc   :  { %v377_v63 = vpop.f32.mrf.mxu2  ;;  %v495_v31 = vadd.s32 %v494_v50, %v490_v51  ;;  %v5087_v51 = vand.u32 2147483647, %v4003_v38  ;;  %vm797_vm14 = vcmp.lt.s32.totalorder %v4085_v26, 1  ;;  %vm799_vm15 = vcmp.lt.s32.totalorder %v4085_v26, 3 }
  0xcd   :  { %v795_v35 = vshrl.u32 %v5121_v0, %v4079_v48  ;;  %v792_v55 = vshrl.u32 %v5122_v57, %v4079_v48  ;;  %v794_v63 = vshll.u32 %v5122_v57, %v779_v60  ;;  %v786_v40 = vshrl.u32 %v5123_v30, %v4079_v48 }
  0xce   :  { %v496_v58 = vadd.s32 536870912, %v495_v31  ;;  %v789_v50 = vshrl.u32 %v5124_v41, %v4079_v48  ;;  %vm798_vm2 = vcmp.lt.s32.totalorder %v4085_v26, 2 }
  0xd0   :  { %v4076_v61 = vshrl.u32 %v496_v58, 30 }
  0xd2   :  { %v498_v45 = vshll.u32 %v4076_v61, 30 }
  0xd4   :  { %v499_v52 = vsub.s32 %v495_v31, %v498_v45  ;;  %v791_v31 = vshll.u32 %v5124_v41, %v779_v60  ;;  %v783_v45 = vshrl.u32 %v5125_v36, %v4079_v48 }
  0xd6   :  { %vm500_vm11 = vcmp.lt.s32.totalorder %v499_v52, 0  ;;  %v501_v56 = vsub.s32 0, %v499_v52 }
  0xd8   :  { %v502_v11 = vsel %vm500_vm11, %v501_v56, %v499_v52  ;;  %v788_v56 = vshll.u32 %v5123_v30, %v779_v60 }
  0xd9   :  { %v503_v62 = vclz %v502_v11  ;;  %v793_v11 = vor.u32 %v792_v55, %v791_v31 }
  0xdb   :  { %v3423_v1 = vadd.s32 4294967294, %v503_v62 }
  0xdd   :  { %vm3424_vm12 = vcmp.lt.s32.totalorder %v3423_v1, 0 }
  0xde   :  { %v506_v22 = vsel %vm3424_vm12, 0, %v3423_v1 }
  0xdf   :  { %v507_v54 = vsub.s32 32, %v506_v22  ;;  %v511_v42 = vsub.s32 4294967266, %v506_v22  ;;  %v508_v59 = vshll.u32 %v499_v52, %v506_v22  ;;  %v796_v52 = vor.u32 %v795_v35, %v794_v63 }
  0xe0   :  { %v782_v22 = vshll.u32 %v5088_v53, %v779_v60  ;;  %v806_v35 = vsel %vm800_vm13, %v793_v11, 920167782  ;;  %v5126_v63 = vand.u32 2147483647, %v4001_v37 }
  0xe1   :  { %v509_v33 = vshrl.u32 %v491_v32, %v507_v54  ;;  %v512_v44 = vadd.s32 127, %v511_v42  ;;  %v772_v32 = vand.u32 8388607, %v5087_v51  ;;  %v4101_v54 = vor.u32 %v786_v40, %v785_v49 }
  0xe2   :  { %v4103_v42 = vor.u32 %v789_v50, %v788_v56  ;;  %vm4123_vm1 = vcmp.le.f32.partialorder %v5126_v63, 0.7853982 }
  0xe3   :  { %v510_v47 = vor.u32 %v509_v33, %v508_v59  ;;  %v513_v46 = vshll.u32 %v512_v44, 23  ;;  %v4106_v33 = vor.u32 %v783_v45, %v782_v22  ;;  %v810_v44 = vsel %vm800_vm13, %v796_v52, 1326507024 }
  0xe4   :  { %v773_v60 = vor.u32 8388608, %v772_v32  ;;  %v521_v45 = vsub.s32 4, %v4076_v61 }
  0xe5   :  { %v514_v58 = vor.u32 4788187, %v513_v46  ;;  %v517_v1 = vcvt.s32.f32 %v510_v47  ;;  %v809_v47 = vsel %vm797_vm14, %v4101_v54, %v4103_v42  ;;  %v811_v46 = vsel %vm799_vm15, %v793_v11, %v810_v44 }
  0xe6   :  { %v805_v31 = vsel %vm797_vm14, %v4106_v33, %v4101_v54  ;;  %v812_v56 = vsel %vm798_vm2, %v809_v47, %v811_v46  ;;  %v522_v32 = vsel %vm399_vm0, %v521_v45, %v4076_v61 }
  0xe7   :  { %v515_v62 = vand.u32 2147483647, %v514_v58  ;;  %v807_v58 = vsel %vm799_vm15, %v4103_v42, %v806_v35  ;;  %v524_v47 = vsel %vm4123_vm1, 0, %v522_v32 }
  0xe8   :  { %v808_v11 = vsel %vm798_vm2, %v805_v31, %v807_v58  ;;  %v816_v31 = vand.u32 65535, %v812_v56  ;;  %v695_v45 = vadd.s32 3, %v524_v47  ;;  %v541_v30 = vand.u32 3, %v524_v47 }
  0xe9   :  { %v518_v59 = vmul.f32 %v517_v1, %v515_v62  ;;  %v4145_v62 = vshll.u32 %v773_v60, 8  ;;  %v838_v58 = vand.u32 65535, %v808_v11 }
  0xea   :  { %vm542_vm4 = vcmp.lt.s32.totalorder %v541_v30, 2  ;;  %vm543_vm6 = vcmp.eq.s32.totalorder %v541_v30, 0  ;;  %vm546_vm8 = vcmp.eq.s32.totalorder %v541_v30, 2 }
  0xeb   :  { %v519_v55 = vxor.u32 2147483648, %v518_v59  ;;  %v814_v63 = vand.u32 65535, %v4145_v62  ;;  %v815_v36 = vshrl.u32 %v4145_v62, 16 }
  0xed   :  { %v520_v50 = vsel %vm399_vm0, %v519_v55, %v518_v59  ;;  %v817_v59 = vshrl.u32 %v812_v56, 16  ;;  %v839_v55 = vshrl.u32 %v808_v11, 16  ;;  %v4158_v41 = vmul.u32 %v816_v31, %v815_v36 }
  0xee   :  { %v523_v52 = vsel %vm4123_vm1, %v4001_v37, %v520_v50  ;;  %v4161_v32 = vmul.u32 %v838_v58, %v815_v36  ;;  %v840_v57 = vmul.u32 %v838_v58, %v814_v63 }
  0xef   :  { %v525_v49 = vmul.f32 %v523_v52, %v523_v52  ;;  %v4153_v60 = vmul.u32 %v817_v59, %v814_v63  ;;  %v4156_v61 = vmul.u32 %v839_v55, %v814_v63 }
  0xf1   :  { %v526_v1 = vmul.f32 -0.001358992, %v525_v49  ;;  %v533_v22 = vmul.f32 -0.00019511016, %v525_v49  ;;  %v822_v40 = vshll.u32 %v4153_v60, 16  ;;  %v844_v11 = vshll.u32 %v4156_v61, 16 }
  0xf3   :  { %v527_v44 = vadd.f32 0.041655596, %v526_v1  ;;  %v534_v35 = vadd.f32 0.008332121, %v533_v22  ;;  %vm848_vm7 = vc.u32 %v840_v57, %v844_v11 }
  0xf5   :  { %v528_v46 = vmul.f32 %v527_v44, %v525_v49  ;;  %v535_v50 = vmul.f32 %v534_v35, %v525_v49  ;;  %v696_v35 = vand.u32 3, %v695_v45  ;;  %v850_v45 = vadd.s32 %v844_v11, %v840_v57 }
  0xf7   :  { %v529_v51 = vadd.f32 -0.4999988, %v528_v46  ;;  %v536_v53 = vadd.f32 -0.16666654, %v535_v50  ;;  %v818_v46 = vmul.u32 %v816_v31, %v814_v63  ;;  %v821_v50 = vmul.u32 %v817_v59, %v815_v36 }
  0xf8   :  { %vm697_vm9 = vcmp.lt.s32.totalorder %v696_v35, 2  ;;  %vm698_vm10 = vcmp.eq.s32.totalorder %v696_v35, 0  ;;  %vm701_vm11 = vcmp.eq.s32.totalorder %v696_v35, 2 }
  0xf9   :  { %v530_v1 = vmul.f32 %v529_v51, %v525_v49  ;;  %v537_v22 = vmul.f32 %v536_v53, %v525_v49  ;;  %v824_v53 = vshll.u32 %v4158_v41, 16  ;;  %v843_v49 = vmul.u32 %v839_v55, %v815_v36 }
  0xfa   :  { %vm4166_vm5 = vc.u32 %v818_v46, %v822_v40 }
  0xfb   :  { %v531_v56 = vadd.f32 1.0, %v530_v1  ;;  %v538_v44 = vadd.f32 1.0, %v537_v22  ;;  %v828_v1 = vadd.s32 %v822_v40, %v818_v46  ;;  %v846_v22 = vshll.u32 %v4161_v32, 16 }
  0xfc   :  { %v827_v58 = vsel %vm4166_vm5, 1, %v5120_v43  ;;  %v849_v40 = vsel %vm848_vm7, 1, %v5120_v43 }
  0xfd   :  { %v539_v0 = vmul.f32 %v538_v44, %v523_v52  ;;  %v547_v51 = vxor.u32 2147483648, %v531_v56  ;;  %vm830_vm12 = vc.u32 %v828_v1, %v824_v53  ;;  %vm852_vm0 = vc.u32 %v850_v45, %v846_v22 }
  0xfe   :  { %v851_v11 = vadd.s32 %v849_v40, %v843_v49  ;;  %v853_v47 = vsel %vm852_vm0, 1, %v5120_v43 }
  0xff   :  { %v544_v38 = vxor.u32 2147483648, %v539_v0  ;;  %v548_v59 = vsel %vm546_vm8, %v547_v51, %v539_v0  ;;  %v703_v36 = vsel %vm701_vm11, %v547_v51, %v539_v0  ;;  %v829_v51 = vadd.s32 %v827_v58, %v821_v50 }
 0x100   :  { %v855_v1 = vadd.s32 %v853_v47, %v851_v11 }
 0x101   :  { %v545_v52 = vsel %vm543_vm6, %v531_v56, %v544_v38  ;;  %v700_v63 = vsel %vm698_vm10, %v531_v56, %v544_v38 }
 0x102   :  { %v549_v55 = vsel %vm542_vm4, %v545_v52, %v548_v59  ;;  %v704_v31 = vsel %vm697_vm9, %v700_v63, %v703_v36  ;;  %v831_v52 = vsel %vm830_vm12, 1, %v5120_v43 }
 0x103   :  { %v550_v57 = vsel %vm540_vm3, nan, %v549_v55  ;;  %v705_v44 = vsel %vm540_vm3, nan, %v704_v31  ;;  %v833_v36 = vadd.s32 %v831_v52, %v829_v51  ;;  %v847_v55 = vshrl.u32 %v4161_v32, 16 }
 0x104   :  { %v706_v38 = vmul.f32 %v550_v57, %v4058_v34  ;;  %v707_v0 = vmul.f32 %v705_v44, %v4069_v23  ;;  %v709_v30 = vmul.f32 %v705_v44, %v4058_v34  ;;  %v710_v56 = vmul.f32 %v550_v57, %v4069_v23  ;;  %v5132_v44 = vld [vmem:[#allocation23_spill] sm:$0xff] }
 0x105   :  { %v845_v34 = vshrl.u32 %v4156_v61, 16  ;;  %v823_v23 = vshrl.u32 %v4153_v60, 16  ;;  %v825_v31 = vshrl.u32 %v4158_v41, 16  ;;  %v5131_v60 = vmov 683565275  }
 0x106   :  { %v711_v35 = vadd.f32 %v710_v56, %v709_v30  ;;  %v708_v46 = vsub.f32 %v706_v38, %v707_v0  ;;  %v781_v61 = vshrl.u32 %v5131_v60, %v4079_v48  ;;  %v854_v41 = vadd.s32 %v850_v45, %v846_v22 }
 0x107   :  { %v856_v50 = vadd.s32 %v855_v1, %v845_v34  ;;  %v834_v49 = vadd.s32 %v833_v36, %v823_v23  ;;  %vm767_vm1 = vcmp.lt.s32.totalorder %v5132_v44, 0  ;;  %v5133_v0 = vand.u32 2147483647, %v5132_v44 }
 0x108   :  { %v712_v37 = vpack.c.bf16 %v708_v46, %v708_v46  ;;  %v713_v59 = vpack.c.bf16 %v711_v35, %v711_v35  ;;  %v714_v53 = vadd.f32 %v711_v35, %v708_v46  ;;  %v1133_v23 = vand.u32 2147483647, %v4005_v39 }
 0x109   :  { %vm4237_vm3 = vcmp.le.f32.partialorder %v5133_v0, 0.7853982 }
 0x10a   :  { %724 = vmatmul.bf16.vlgmr.msra.gmra.mxu3 %v712_v37  ;;  %737 = vmatmul.bf16.vlgmr.msrb.gmra.mxu0 %v713_v59  ;;  %v715_v63 = vpack.c.bf16 %v714_v53, %v714_v53  ;;  %v5136_v37 = vmov 1326507024   ;;  %v5137_v53 = vmov 920167782  }
 0x10b   :  { %1478 = vmatpush.bf16.msra.mxu3 %v3865_v2  ;;  %1820 = vmatpush.bf16.msrb.mxu0 %v3867_v3  ;;  %v802_v2 = vsel %vm800_vm13, %v4103_v42, 2102212464  ;;  %v857_v3 = vadd.s32 %v856_v50, %v847_v55  ;;  %v5138_v50 = vmov 2131351028   ;;  %v5139_v55 = vmov 2102212464  }
 0x10c   :  { %750 = vmatmul.bf16.vlgmr.msrb.gmra.mxu1 %v715_v63 }
 0x10d   :  { %1833 = vmatpush.bf16.msrb.mxu1 %v3869_v4  ;;  %v835_v4 = vadd.s32 %v834_v49, %v825_v31  ;;  %v861_v42 = vadd.s32 1, %v857_v3 }
 0x10f   :  { %1479 = vmatpush.bf16.msra.mxu3 %v3872_v5  ;;  %1821 = vmatpush.bf16.msrb.mxu0 %v3876_v6  ;;  %v801_v5 = vsel %vm797_vm14, %v781_v61, %v4106_v33  ;;  %v803_v6 = vsel %vm799_vm15, %v4101_v54, %v802_v2  ;;  %vm860_vm13 = vc.u32 %v835_v4, %v854_v41  ;;  %v5140_v61 = vmov 2475754826  }
 0x111   :  { %1834 = vmatpush.bf16.msrb.mxu1 %v3878_v7  ;;  %v804_v7 = vsel %vm798_vm2, %v801_v5, %v803_v6 }
 0x113   :  { %1480 = vmatpush.bf16.msra.mxu3 %v3882_v8  ;;  %1822 = vmatpush.bf16.msrb.mxu0 %v3886_v9  ;;  %v862_v8 = vsel %vm860_vm13, %v861_v42, %v857_v3  ;;  %v858_v9 = vmul.u32 %v4145_v62, %v804_v7 }
 0x115   :  { %1835 = vmatpush.bf16.msrb.mxu1 %v3888_v10  ;;  %v863_v48 = vadd.s32 %v862_v8, %v858_v9  ;;  %v1140_v9 = vand.u32 8388607, %v1133_v23 }
 0x117   :  { %1481 = vmatpush.bf16.msra.mxu3 %v3892_v12  ;;  %1823 = vmatpush.bf16.msrb.mxu0 %v3896_v13  ;;  %v864_v10 = vadd.s32 536870912, %v863_v48 }
 0x119   :  { %1836 = vmatpush.bf16.msrb.mxu1 %v3898_v14  ;;  %v4224_v12 = vshrl.u32 %v864_v10, 30 }
 0x11b   :  { %1482 = vmatpush.bf16.msra.mxu3 %v3902_v15  ;;  %1824 = vmatpush.bf16.msrb.mxu0 %v3906_v16  ;;  %v866_v13 = vshll.u32 %v4224_v12, 30 }
 0x11d   :  { %1837 = vmatpush.bf16.msrb.mxu1 %v3908_v17  ;;  %v867_v14 = vsub.s32 %v863_v48, %v866_v13 }
 0x11f   :  { %1483 = vmatpush.bf16.msra.mxu3 %v3912_v18  ;;  %1825 = vmatpush.bf16.msrb.mxu0 %v3916_v19  ;;  %v869_v15 = vsub.s32 0, %v867_v14  ;;  %vm868_vm14 = vcmp.lt.s32.totalorder %v867_v14, 0 }
 0x121   :  { %1838 = vmatpush.bf16.msrb.mxu1 %v3918_v20  ;;  %v870_v16 = vsel %vm868_vm14, %v869_v15, %v867_v14 }
 0x122   :  { %v871_v17 = vclz %v870_v16  ;;  %v889_v16 = vsub.s32 4, %v4224_v12 }
 0x123   :  { %1484 = vmatpush.bf16.msra.mxu3 %v3922_v21  ;;  %1826 = vmatpush.bf16.msrb.mxu0 %v3926_v24 }
 0x124   :  { %v3429_v18 = vadd.s32 4294967294, %v871_v17 }
 0x125   :  { %1839 = vmatpush.bf16.msrb.mxu1 %v3928_v25  ;;  %v859_v25 = vadd.s32 %v854_v41, %v835_v4 }
 0x126   :  { %vm3430_vm15 = vcmp.lt.s32.totalorder %v3429_v18, 0 }
 0x127   :  { %1485 = vmatpush.bf16.msra.mxu3 %v3932_v27  ;;  %1827 = vmatpush.bf16.msrb.mxu0 %v3936_v28  ;;  %v874_v19 = vsel %vm3430_vm15, 0, %v3429_v18  ;;  %v1136_v28 = vand.u32 2139095040, %v4005_v39  ;;  %vm908_vm15 = vweird.f32 %v5132_v44 }
 0x128   :  { %v879_v20 = vsub.s32 4294967266, %v874_v19  ;;  %v875_v24 = vsub.s32 32, %v874_v19  ;;  %v876_v54 = vshll.u32 %v867_v14, %v874_v19  ;;  %v1141_v19 = vor.u32 8388608, %v1140_v9 }
 0x129   :  { %1840 = vmatpush.bf16.msrb.mxu1 %v3938_v29  ;;  %v1137_v29 = vshrl.u32 %v1136_v28, 23 }
 0x12a   :  { %v880_v21 = vadd.s32 127, %v879_v20  ;;  %v877_v27 = vshrl.u32 %v859_v25, %v875_v24 }
 0x12b   :  { %v3434_v45 = vadd.s32 4294967169, %v1137_v29 }
 0x12c   :  { %v881_v26 = vshll.u32 %v880_v21, 23  ;;  %v878_v62 = vor.u32 %v877_v27, %v876_v54  ;;  %v890_v27 = vsel %vm767_vm1, %v889_v16, %v4224_v12 }
 0x12d   :  { %v1143_v40 = vadd.s32 1, %v3434_v45  ;;  %v892_v29 = vsel %vm4237_vm3, 0, %v890_v27 }
 0x12e   :  { %v882_v33 = vor.u32 4788187, %v881_v26  ;;  %v885_v22 = vcvt.s32.f32 %v878_v62  ;;  %v4301_v62 = vshll.u32 %v1141_v19, 8 }
 0x12f   :  { %vm1144_vm2 = vcmp.gt.s32.totalorder %v1143_v40, 0 }
 0x130   :  { %v883_v32 = vand.u32 2147483647, %v882_v33  ;;  %v1145_v56 = vsel %vm1144_vm2, %v1143_v40, 0  ;;  %v1063_v40 = vadd.s32 3, %v892_v29  ;;  %v1182_v12 = vand.u32 65535, %v4301_v62 }
 0x131   :  { %v1147_v35 = vand.u32 31, %v1145_v56  ;;  %v4250_v63 = vshrl.u32 %v1145_v56, 5  ;;  %v1183_v0 = vshrl.u32 %v4301_v62, 16 }
 0x132   :  { %v886_v58 = vmul.f32 %v885_v22, %v883_v32 }
 0x133   :  { %v4244_v47 = vsub.s32 32, %v1147_v35  ;;  %v1162_v34 = vshll.u32 %v5137_v53, %v1147_v35  ;;  %v1159_v2 = vshll.u32 %v5139_v55, %v1147_v35  ;;  %v1153_v6 = vshll.u32 %v5140_v61, %v1147_v35 }
 0x134   :  { %v887_v57 = vxor.u32 2147483648, %v886_v58  ;;  %v1156_v41 = vshll.u32 %v5138_v50, %v1147_v35  ;;  %v1150_v8 = vshll.u32 %v5131_v60, %v1147_v35  ;;  %vm1168_vm4 = vcmp.lt.s32.totalorder %v4250_v63, 4 }
 0x135   :  { %v1163_v59 = vshrl.u32 %v5136_v37, %v4244_v47  ;;  %v1160_v1 = vshrl.u32 %v5137_v53, %v4244_v47  ;;  %v1154_v49 = vshrl.u32 %v5138_v50, %v4244_v47  ;;  %v1157_v31 = vshrl.u32 %v5139_v55, %v4244_v47 }
 0x136   :  { %v888_v38 = vsel %vm767_vm1, %v887_v57, %v886_v58  ;;  %v1151_v4 = vshrl.u32 %v5140_v61, %v4244_v47  ;;  %vm1165_vm5 = vcmp.lt.s32.totalorder %v4250_v63, 1  ;;  %vm1167_vm6 = vcmp.lt.s32.totalorder %v4250_v63, 3 }
 0x137   :  { %v891_v11 = vsel %vm4237_vm3, %v5132_v44, %v888_v38  ;;  %v1164_v5 = vor.u32 %v1163_v59, %v1162_v34  ;;  %v1161_v42 = vor.u32 %v1160_v1, %v1159_v2  ;;  %v4266_v48 = vor.u32 %v1154_v49, %v1153_v6 }
 0x138   :  { %v893_v46 = vmul.f32 %v891_v11, %v891_v11  ;;  %v4268_v10 = vor.u32 %v1157_v31, %v1156_v41  ;;  %v4271_v14 = vor.u32 %v1151_v4, %v1150_v8  ;;  %vm1166_vm7 = vcmp.lt.s32.totalorder %v4250_v63, 2  ;;  %v4398_v63 = vld [vmem:[#allocation10 + $0x18] sm:$0xff] }
 0x139   :  { %v1178_v15 = vsel %vm1168_vm4, %v1164_v5, 1326507024  ;;  %v1174_v17 = vsel %vm1168_vm4, %v1161_v42, 920167782  ;;  %v1064_v59 = vand.u32 3, %v1063_v40 }
 0x13a   :  { %v901_v51 = vmul.f32 -0.00019511016, %v893_v46  ;;  %v894_v36 = vmul.f32 -0.001358992, %v893_v46  ;;  %v1177_v20 = vsel %vm1165_vm5, %v4266_v48, %v4268_v10  ;;  %v1179_v21 = vsel %vm1167_vm6, %v1161_v42, %v1178_v15 }
 0x13b   :  { %v1173_v25 = vsel %vm1165_vm5, %v4271_v14, %v4266_v48  ;;  %v1175_v26 = vsel %vm1167_vm6, %v4268_v10, %v1174_v17  ;;  %v1180_v54 = vsel %vm1166_vm7, %v1177_v20, %v1179_v21  ;;  %vm1066_vm11 = vcmp.eq.s32.totalorder %v1064_v59, 0 }
 0x13c   :  { %v902_v52 = vadd.f32 0.008332121, %v901_v51  ;;  %v895_v7 = vadd.f32 0.041655596, %v894_v36  ;;  %v1176_v33 = vsel %vm1166_vm7, %v1173_v25, %v1175_v26  ;;  %v1185_v22 = vshrl.u32 %v1180_v54, 16 }
 0x13d   :  { %v1207_v58 = vshrl.u32 %v1176_v33, 16  ;;  %v1184_v57 = vand.u32 65535, %v1180_v54  ;;  %v909_v51 = vand.u32 3, %v892_v29  ;;  %vm1065_vm12 = vcmp.lt.s32.totalorder %v1064_v59, 2 }
 0x13e   :  { %v903_v3 = vmul.f32 %v902_v52, %v893_v46  ;;  %v896_v18 = vmul.f32 %v895_v7, %v893_v46  ;;  %v4307_v56 = vmul.u32 %v1185_v22, %v1182_v12  ;;  %vm1069_vm0 = vcmp.eq.s32.totalorder %v1064_v59, 2 }
 0x13f   :  { %v4309_v52 = vmul.u32 %v1207_v58, %v1182_v12  ;;  %v4311_v30 = vmul.u32 %v1184_v57, %v1183_v0  ;;  %vm910_vm8 = vcmp.lt.s32.totalorder %v909_v51, 2  ;;  %vm911_vm9 = vcmp.eq.s32.totalorder %v909_v51, 0 }
 0x140   :  { %v904_v13 = vadd.f32 -0.16666654, %v903_v3  ;;  %v897_v28 = vadd.f32 -0.4999988, %v896_v18  ;;  %v1190_v34 = vshll.u32 %v4307_v56, 16  ;;  %vm914_vm10 = vcmp.eq.s32.totalorder %v909_v51, 2 }
 0x141   :  { %v1212_v2 = vshll.u32 %v4309_v52, 16  ;;  %v1192_v3 = vshll.u32 %v4311_v30, 16  ;;  %v1189_v21 = vmul.u32 %v1185_v22, %v1183_v0 }
 0x142   :  { %v905_v24 = vmul.f32 %v904_v13, %v893_v46  ;;  %v898_v45 = vmul.f32 %v897_v28, %v893_v46  ;;  %v1206_v46 = vand.u32 65535, %v1176_v33 }
 0x144   :  { %v906_v32 = vadd.f32 1.0, %v905_v24  ;;  %v899_v35 = vadd.f32 1.0, %v898_v45  ;;  %v1208_v6 = vmul.u32 %v1206_v46, %v1182_v12  ;;  %v4316_v41 = vmul.u32 %v1206_v46, %v1183_v0 }
 0x146   :  { %v907_v38 = vmul.f32 %v906_v32, %v891_v11  ;;  %v915_v31 = vxor.u32 2147483648, %v899_v35  ;;  %v1186_v11 = vmul.u32 %v1184_v57, %v1182_v12  ;;  %vm1216_vm14 = vc.u32 %v1208_v6, %v1212_v2 }
 0x147   :  { %v4322_v15 = vadd.s32 %v1212_v2, %v1208_v6  ;;  %v1214_v24 = vshll.u32 %v4316_v41, 16  ;;  %v1217_v28 = vsel %vm1216_vm14, 1, %v5120_v43  ;;  %v1211_v32 = vmul.u32 %v1207_v58, %v1183_v0  ;;  %v4344_v2 = vld [vmem:[#allocation10 + $0x38] sm:$0xff] }
 0x148   :  { %v912_v36 = vxor.u32 2147483648, %v907_v38  ;;  %vm4318_vm13 = vc.u32 %v1186_v11, %v1190_v34  ;;  %v1196_v7 = vadd.s32 %v1190_v34, %v1186_v11  ;;  %v916_v9 = vsel %vm914_vm10, %v915_v31, %v907_v38  ;;  %v4341_v11 = vld [vmem:[#allocation13 + $0x38] sm:$0xff] }
 0x149   :  { %v1071_v13 = vsel %vm1069_vm0, %v915_v31, %v907_v38  ;;  %v1195_v26 = vsel %vm4318_vm13, 1, %v5120_v43  ;;  %vm1220_vm2 = vc.u32 %v4322_v15, %v1214_v24  ;;  %v1219_v12 = vadd.s32 %v1217_v28, %v1211_v32  ;;  %v4401_v28 = vld [vmem:[#allocation11 + $0x18] sm:$0xff]  ;;  %v4413_v32 = vld [vmem:[#allocation13 + $0x8] sm:$0xff] }
 0x14a   :  { %v913_v4 = vsel %vm911_vm9, %v899_v35, %v912_v36  ;;  %v1068_v5 = vsel %vm1066_vm11, %v899_v35, %v912_v36  ;;  %vm4330_vm1 = vc.u32 %v1196_v7, %v1192_v3  ;;  %v1197_v35 = vadd.s32 %v1195_v26, %v1189_v21  ;;  %v4355_v7 = vld [vmem:[#allocation10 + $0x30] sm:$0xff]  ;;  %v4391_v26 = vld [vmem:[#allocation11 + $0x20] sm:$0xff] }
 0x14b   :  { %v917_v18 = vsel %vm910_vm8, %v913_v4, %v916_v9  ;;  %v1072_v19 = vsel %vm1065_vm12, %v1068_v5, %v1071_v13  ;;  %v1221_v51 = vsel %vm1220_vm2, 1, %v5120_v43  ;;  %v1213_v31 = vshrl.u32 %v4309_v52, 16  ;;  %v4348_v5 = vld [vmem:[#allocation11 + $0x38] sm:$0xff]  ;;  %v4352_v52 = vld [vmem:[#allocation13 + $0x30] sm:$0xff] }
 0x14c   :  { %v918_v54 = vsel %vm908_vm15, nan, %v917_v18  ;;  %v1073_v33 = vsel %vm908_vm15, nan, %v1072_v19  ;;  %v1223_v0 = vadd.s32 %v1221_v51, %v1219_v12  ;;  %v1191_v3 = vshrl.u32 %v4307_v56, 16  ;;  %v4362_v13 = vld [vmem:[#allocation11 + $0x30] sm:$0xff]  ;;  %v4370_v18 = vld [vmem:[#allocation10 + $0x28] sm:$0xff]  ;;  %v4427_v12 = vld [vmem:[#allocation10] sm:$0xff] }
 0x14d   :  { %v1215_v42 = vshrl.u32 %v4316_v41, 16  ;;  %v1170_v56 = vsel %vm1168_vm4, %v4268_v10, 2102212464  ;;  %v1149_v41 = vshrl.u32 %v5131_v60, %v4244_v47  ;;  %v1222_v19 = vadd.s32 %v4322_v15, %v1214_v24  ;;  %v4395_v24 = vld [vmem:[#allocation13 + $0x18] sm:$0xff]  ;;  %5146 = vst [vmem:[#allocation29_spill] sm:$0xff] %v4427_v12 }
 0x14e   :  { %v1224_v4 = vadd.s32 %v1223_v0, %v1213_v31  ;;  %vm4440_vm8 = vcmp.le.f32.partialorder %v1133_v23, 0.7853982 }
 0x14f   :  { %v1169_v10 = vsel %vm1165_vm5, %v1149_v41, %v4271_v14  ;;  %v4388_v14 = vld [vmem:[#allocation10 + $0x20] sm:$0xff] }
 0x150   :  { %v1225_v9 = vadd.s32 %v1224_v4, %v1215_v42  ;;  %v5148_v4 = vld [vmem:[#allocation24_spill] sm:$0xff] }
 0x152   :  { %v1229_v47 = vadd.s32 1, %v1225_v9 }
 0x187   :  { %v738_v1 = vpop.f32.mrf.mxu0 }
 0x189   :  { %v751_v49 = vpop.f32.mrf.mxu1 }
 0x18d   :  { %v725_v8 = vpop.f32.mrf.mxu3 }
 0x18e   :  { %v755_v16 = vsub.f32 %v725_v8, %v738_v1  ;;  %v756_v17 = vsub.f32 %v751_v49, %v725_v8  ;;  %v1193_v8 = vshrl.u32 %v4311_v30, 16  ;;  %v1171_v30 = vsel %vm1167_vm6, %v4266_v48, %v1170_v56 }
 0x18f   :  { %v740_v20 = vpop.f32.mrf.mxu0  ;;  %v1172_v21 = vsel %vm1166_vm7, %v1169_v10, %v1171_v30  ;;  %vm1135_vm6 = vcmp.lt.s32.totalorder %v4005_v39, 0 }
 0x190   :  { %v757_v25 = vsub.f32 %v756_v17, %v738_v1  ;;  %v1074_v44 = vmul.f32 %v918_v54, %v755_v16  ;;  %v1077_v45 = vmul.f32 %v1073_v33, %v755_v16  ;;  %v1199_v1 = vsel %vm4330_vm1, 1, %v5120_v43  ;;  %v4367_v17 = vld [vmem:[#allocation13 + $0x28] sm:$0xff] }
 0x191   :  { %v753_v29 = vpop.f32.mrf.mxu1  ;;  %v1201_v49 = vadd.s32 %v1199_v1, %v1197_v35  ;;  %v4380_v20 = vld [vmem:[#allocation11 + $0x28] sm:$0xff]  ;;  %v1226_v15 = vmul.u32 %v4301_v62, %v1172_v21 }
 0x192   :  { %v1075_v22 = vmul.f32 %v1073_v33, %v757_v25  ;;  %v1078_v40 = vmul.f32 %v918_v54, %v757_v25  ;;  %v4385_v25 = vld [vmem:[#allocation13 + $0x20] sm:$0xff]  ;;  %v4404_v54 = vld [vmem:[#allocation13 + $0x10] sm:$0xff] }
 0x193   :  { %v1202_v6 = vadd.s32 %v1201_v49, %v1191_v3  ;;  %v4407_v33 = vld [vmem:[#allocation10 + $0x10] sm:$0xff] }
 0x194   :  { %v1076_v57 = vsub.f32 %v1074_v44, %v1075_v22  ;;  %v1079_v38 = vadd.f32 %v1078_v40, %v1077_v45  ;;  %v4410_v29 = vld [vmem:[#allocation11 + $0x10] sm:$0xff]  ;;  %v4416_v44 = vld [vmem:[#allocation10 + $0x8] sm:$0xff]  ;;  %v4424_v40 = vld [vmem:[#allocation13] sm:$0xff] }
 0x195   :  { %v727_v59 = vpop.f32.mrf.mxu3  ;;  %v1203_v16 = vadd.s32 %v1202_v6, %v1193_v8  ;;  %v4421_v45 = vld [vmem:[#allocation11 + $0x8] sm:$0xff]  ;;  %5145 = vst [vmem:[#allocation23_spill] sm:$0xff] %v4424_v40  ;;  %v1504_v6 = vand.u32 2139095040, %v5148_v4 }
 0x196   :  { %v1082_v36 = vadd.f32 %v1079_v38, %v1076_v57  ;;  %v1080_v46 = vpack.c.bf16 %v1076_v57, %v1076_v57  ;;  %v1081_v58 = vpack.c.bf16 %v1079_v38, %v1079_v38  ;;  %v4431_v38 = vld [vmem:[#allocation11] sm:$0xff] }
 0x197   :  { %vm1228_vm3 = vc.u32 %v1203_v16, %v1222_v19  ;;  %5147 = vst [vmem:[#allocation30_spill] sm:$0xff] %v4431_v38  ;;  %v1227_v49 = vadd.s32 %v1222_v19, %v1203_v16 }
 0x198   :  { %1092 = vmatmul.bf16.vlgmr.msrb.gmra.mxu2 %v1080_v46  ;;  %1105 = vmatmul.bf16.vlgmr.msrb.gmra.mxu3 %v1081_v58  ;;  %v1083_v34 = vpack.c.bf16 %v1082_v36, %v1082_v36  ;;  %v1230_v48 = vsel %vm1228_vm3, %v1229_v47, %v1225_v9  ;;  %v1505_v9 = vshrl.u32 %v1504_v6, 23 }
 0x199   :  { %1846 = vmatpush.bf16.msrb.mxu2 %v4341_v11  ;;  %2188 = vmatpush.bf16.msrb.mxu3 %v4344_v2  ;;  %v1231_v27 = vadd.s32 %v1230_v48, %v1226_v15 }
 0x19a   :  { %1118 = vmatmul.bf16.vlgmr.msra.gmra.mxu0 %v1083_v34  ;;  %v3440_v30 = vadd.s32 4294967169, %v1505_v9 }
 0x19b   :  { %2201 = vmatpush.bf16.msra.mxu0 %v4348_v5  ;;  %v1232_v62 = vadd.s32 536870912, %v1231_v27 }
 0x19c   :  { %v1511_v21 = vadd.s32 1, %v3440_v30 }
 0x19d   :  { %1847 = vmatpush.bf16.msrb.mxu2 %v4352_v52  ;;  %2189 = vmatpush.bf16.msrb.mxu3 %v4355_v7  ;;  %v4419_v22 = vshrl.u32 %v1232_v62, 30 }
 0x19e   :  { %vm1512_vm7 = vcmp.gt.s32.totalorder %v1511_v21, 0 }
 0x19f   :  { %2202 = vmatpush.bf16.msra.mxu0 %v4362_v13  ;;  %v1234_v57 = vshll.u32 %v4419_v22, 30  ;;  %v1513_v15 = vsel %vm1512_vm7, %v1511_v21, 0 }
 0x1a0   :  { %v1515_v62 = vand.u32 31, %v1513_v15 }
 0x1a1   :  { %1848 = vmatpush.bf16.msrb.mxu2 %v4367_v17  ;;  %2190 = vmatpush.bf16.msrb.mxu3 %v4370_v18  ;;  %v1235_v35 = vsub.s32 %v1231_v27, %v1234_v57 }
 0x1a3   :  { %2203 = vmatpush.bf16.msra.mxu0 %v4380_v20  ;;  %v1237_v51 = vsub.s32 0, %v1235_v35  ;;  %vm1236_vm4 = vcmp.lt.s32.totalorder %v1235_v35, 0 }
 0x1a5   :  { %1849 = vmatpush.bf16.msrb.mxu2 %v4385_v25  ;;  %2191 = vmatpush.bf16.msrb.mxu3 %v4388_v14  ;;  %v1238_v59 = vsel %vm1236_vm4, %v1237_v51, %v1235_v35  ;;  %v4447_v51 = vsub.s32 32, %v1515_v62 }
 0x1a6   :  { %v1239_v1 = vclz %v1238_v59 }
 0x1a7   :  { %2204 = vmatpush.bf16.msra.mxu0 %v4391_v26  ;;  %v1528_v23 = vshrl.u32 %v5137_v53, %v4447_v51  ;;  %v1519_v6 = vshrl.u32 %v5140_v61, %v4447_v51 }
 0x1a8   :  { %v3435_v36 = vadd.s32 4294967294, %v1239_v1  ;;  %v1531_v1 = vshrl.u32 %v5136_v37, %v4447_v51 }
 0x1a9   :  { %1850 = vmatpush.bf16.msrb.mxu2 %v4395_v24  ;;  %2192 = vmatpush.bf16.msrb.mxu3 %v4398_v63 }
 0x1aa   :  { %vm3436_vm5 = vcmp.lt.s32.totalorder %v3435_v36, 0 }
 0x1ab   :  { %2205 = vmatpush.bf16.msra.mxu0 %v4401_v28  ;;  %v1242_v46 = vsel %vm3436_vm5, 0, %v3435_v36  ;;  %v4453_v36 = vshrl.u32 %v1513_v15, 5  ;;  %vm1276_vm5 = vweird.f32 %v4005_v39 }
 0x1ac   :  { %v1247_v58 = vsub.s32 4294967266, %v1242_v46  ;;  %v1243_v34 = vsub.s32 32, %v1242_v46  ;;  %v1244_v42 = vshll.u32 %v1235_v35, %v1242_v46 }
 0x1ad   :  { %1851 = vmatpush.bf16.msrb.mxu2 %v4404_v54  ;;  %2193 = vmatpush.bf16.msrb.mxu3 %v4407_v33  ;;  %vm1536_vm9 = vcmp.lt.s32.totalorder %v4453_v36, 4  ;;  %vm1533_vm10 = vcmp.lt.s32.totalorder %v4453_v36, 1  ;;  %vm1535_vm11 = vcmp.lt.s32.totalorder %v4453_v36, 3  ;;  %vm1534_vm12 = vcmp.lt.s32.totalorder %v4453_v36, 2 }
 0x1ae   :  { %v1248_v0 = vadd.s32 127, %v1247_v58  ;;  %v1245_v3 = vshrl.u32 %v1227_v49, %v1243_v34  ;;  %v1530_v58 = vshll.u32 %v5137_v53, %v1515_v62  ;;  %v1522_v34 = vshrl.u32 %v5138_v50, %v4447_v51 }
 0x1af   :  { %2206 = vmatpush.bf16.msra.mxu0 %v4410_v29  ;;  %v1525_v49 = vshrl.u32 %v5139_v55, %v4447_v51 }
 0x1b0   :  { %v1249_v31 = vshll.u32 %v1248_v0, 23  ;;  %v1246_v56 = vor.u32 %v1245_v3, %v1244_v42  ;;  %v5096_v0 = vand.u32 2147483647, %v5148_v4  ;;  %v1532_v42 = vor.u32 %v1531_v1, %v1530_v58 }
 0x1b1   :  { %1852 = vmatpush.bf16.msrb.mxu2 %v4413_v32  ;;  %2194 = vmatpush.bf16.msrb.mxu3 %v4416_v44 }
 0x1b2   :  { %v1250_v8 = vor.u32 4788187, %v1249_v31  ;;  %v1253_v10 = vcvt.s32.f32 %v1246_v56  ;;  %v1527_v31 = vshll.u32 %v5139_v55, %v1515_v62  ;;  %v1524_v56 = vshll.u32 %v5138_v50, %v1515_v62 }
 0x1b3   :  { %2207 = vmatpush.bf16.msra.mxu0 %v4421_v45  ;;  %v1508_v30 = vand.u32 8388607, %v5096_v0  ;;  %v1546_v15 = vsel %vm1536_vm9, %v1532_v42, 1326507024 }
 0x1b4   :  { %v1251_v41 = vand.u32 2147483647, %v1250_v8  ;;  %v1521_v8 = vshll.u32 %v5140_v61, %v1515_v62  ;;  %v1529_v9 = vor.u32 %v1528_v23, %v1527_v31  ;;  %v4471_v21 = vor.u32 %v1525_v49, %v1524_v56 }
 0x1b5   :  { %1853 = vmatpush.bf16.msrb.mxu2 %v4424_v40  ;;  %2195 = vmatpush.bf16.msrb.mxu3 %v4427_v12  ;;  %v1509_v1 = vor.u32 8388608, %v1508_v30 }
 0x1b6   :  { %v1254_v47 = vmul.f32 %v1253_v10, %v1251_v41  ;;  %v1518_v10 = vshll.u32 %v5131_v60, %v1515_v62  ;;  %v1542_v62 = vsel %vm1536_vm9, %v1529_v9, 920167782 }
 0x1b7   :  { %2208 = vmatpush.bf16.msra.mxu0 %v4431_v38  ;;  %v1543_v49 = vsel %vm1535_vm11, %v4471_v21, %v1542_v62 }
 0x1b8   :  { %v1255_v48 = vxor.u32 2147483648, %v1254_v47 }
 0x1ba   :  { %v1256_v16 = vsel %vm1135_vm6, %v1255_v48, %v1254_v47  ;;  %v4469_v47 = vor.u32 %v1522_v34, %v1521_v8  ;;  %v4504_v8 = vshll.u32 %v1509_v1, 8 }
 0x1bb   :  { %v1259_v27 = vsel %vm4440_vm8, %v4005_v39, %v1256_v16  ;;  %v4474_v16 = vor.u32 %v1519_v6, %v1518_v10 }
 0x1bc   :  { %v1261_v57 = vmul.f32 %v1259_v27, %v1259_v27  ;;  %v1545_v23 = vsel %vm1533_vm10, %v4469_v47, %v4471_v21 }
 0x1bd   :  { %v1541_v34 = vsel %vm1533_vm10, %v4474_v16, %v4469_v47 }
 0x1be   :  { %v1269_v35 = vmul.f32 -0.00019511016, %v1261_v57  ;;  %v1262_v46 = vmul.f32 -0.001358992, %v1261_v57  ;;  %v1544_v42 = vsel %vm1534_vm12, %v1541_v34, %v1543_v49 }
 0x1bf   :  { %v1575_v30 = vshrl.u32 %v1544_v42, 16  ;;  %v1574_v49 = vand.u32 65535, %v1544_v42 }
 0x1c0   :  { %v1270_v59 = vadd.f32 0.008332121, %v1269_v35  ;;  %v1263_v41 = vadd.f32 0.041655596, %v1262_v46  ;;  %v1257_v35 = vsub.s32 4, %v4419_v22  ;;  %v1547_v46 = vsel %vm1535_vm11, %v1529_v9, %v1546_v15 }
 0x1c1   :  { %v1548_v6 = vsel %vm1534_vm12, %v1545_v23, %v1547_v46 }
 0x1c2   :  { %v1271_v3 = vmul.f32 %v1270_v59, %v1261_v57  ;;  %v1264_v59 = vmul.f32 %v1263_v41, %v1261_v57  ;;  %v1258_v31 = vsel %vm1135_vm6, %v1257_v35, %v4419_v22  ;;  %v1553_v41 = vshrl.u32 %v1548_v6, 16 }
 0x1c3   :  { %v1260_v56 = vsel %vm4440_vm8, 0, %v1258_v31  ;;  %v1550_v22 = vand.u32 65535, %v4504_v8  ;;  %v1552_v1 = vand.u32 65535, %v1548_v6 }
 0x1c4   :  { %v1272_v48 = vadd.f32 -0.16666654, %v1271_v3  ;;  %v1265_v3 = vadd.f32 -0.4999988, %v1264_v59  ;;  %v1277_v23 = vand.u32 3, %v1260_v56 }
 0x1c5   :  { %v4509_v35 = vmul.u32 %v1553_v41, %v1550_v22  ;;  %v4511_v59 = vmul.u32 %v1575_v30, %v1550_v22 }
 0x1c6   :  { %v1273_v58 = vmul.f32 %v1272_v48, %v1261_v57  ;;  %v1266_v10 = vmul.f32 %v1265_v3, %v1261_v57  ;;  %v1431_v48 = vadd.s32 3, %v1260_v56  ;;  %v1551_v57 = vshrl.u32 %v4504_v8, 16 }
 0x1c7   :  { %v1558_v19 = vshll.u32 %v4509_v35, 16  ;;  %v1580_v3 = vshll.u32 %v4511_v59, 16  ;;  %vm1278_vm0 = vcmp.lt.s32.totalorder %v1277_v23, 2  ;;  %vm1279_vm13 = vcmp.eq.s32.totalorder %v1277_v23, 0 }
 0x1c8   :  { %v1274_v9 = vadd.f32 1.0, %v1273_v58  ;;  %v1267_v62 = vadd.f32 1.0, %v1266_v10  ;;  %v1432_v46 = vand.u32 3, %v1431_v48  ;;  %vm1282_vm15 = vcmp.eq.s32.totalorder %v1277_v23, 2 }
 0x1c9   :  { %v1576_v56 = vmul.u32 %v1574_v49, %v1550_v22  ;;  %v4516_v6 = vmul.u32 %v1552_v1, %v1551_v57  ;;  %v4518_v61 = vmul.u32 %v1574_v49, %v1551_v57  ;;  %v1579_v39 = vmul.u32 %v1575_v30, %v1551_v57 }
 0x1ca   :  { %v1275_v15 = vmul.f32 %v1274_v9, %v1259_v27  ;;  %v1283_v31 = vxor.u32 2147483648, %v1267_v62  ;;  %vm1434_vm14 = vcmp.eq.s32.totalorder %v1432_v46, 0  ;;  %v1554_v27 = vmul.u32 %v1552_v1, %v1550_v22 }
 0x1cb   :  { %vm1433_vm1 = vcmp.lt.s32.totalorder %v1432_v46, 2  ;;  %vm1437_vm2 = vcmp.eq.s32.totalorder %v1432_v46, 2  ;;  %vm1584_vm4 = vc.u32 %v1576_v56, %v1580_v3  ;;  %v1586_v22 = vadd.s32 %v1580_v3, %v1576_v56 }
 0x1cc   :  { %v1280_v34 = vxor.u32 2147483648, %v1275_v15  ;;  %vm1562_vm3 = vc.u32 %v1554_v27, %v1558_v19  ;;  %v1284_v0 = vsel %vm1282_vm15, %v1283_v31, %v1275_v15  ;;  %v1439_v50 = vsel %vm1437_vm2, %v1283_v31, %v1275_v15 }
 0x1cd   :  { %v1560_v46 = vshll.u32 %v4516_v6, 16  ;;  %v1563_v1 = vsel %vm1562_vm3, 1, %v5120_v43  ;;  %v1582_v49 = vshll.u32 %v4518_v61, 16  ;;  %v1559_v30 = vshrl.u32 %v4509_v35, 16 }
 0x1ce   :  { %v1281_v9 = vsel %vm1279_vm13, %v1267_v62, %v1280_v34  ;;  %v1436_v10 = vsel %vm1434_vm14, %v1267_v62, %v1280_v34  ;;  %v1564_v34 = vadd.s32 %v1558_v19, %v1554_v27  ;;  %v1517_v35 = vshrl.u32 %v5131_v60, %v4447_v51 }
 0x1cf   :  { %v1285_v53 = vsel %vm1278_vm0, %v1281_v9, %v1284_v0  ;;  %v1440_v4 = vsel %vm1433_vm1, %v1436_v10, %v1439_v50  ;;  %v1557_v9 = vmul.u32 %v1553_v41, %v1551_v57  ;;  %vm1588_vm6 = vc.u32 %v1586_v22, %v1582_v49 }
 0x1d0   :  { %v1286_v38 = vsel %vm1276_vm5, nan, %v1285_v53  ;;  %v1441_v12 = vsel %vm1276_vm5, nan, %v1440_v4  ;;  %vm1566_vm7 = vc.u32 %v1564_v34, %v1560_v46  ;;  %v1581_v41 = vshrl.u32 %v4511_v59, 16 }
 0x1d1   :  { %v1565_v19 = vadd.s32 %v1563_v1, %v1557_v9  ;;  %v1583_v46 = vshrl.u32 %v4518_v61, 16  ;;  %v1561_v1 = vshrl.u32 %v4516_v6, 16  ;;  %v1538_v59 = vsel %vm1536_vm9, %v4471_v21, 2102212464 }
 0x1d2   :  { %v1537_v61 = vsel %vm1533_vm10, %v1517_v35, %v4474_v16  ;;  %v1539_v6 = vsel %vm1535_vm11, %v4469_v47, %v1538_v59  ;;  %v1590_v21 = vadd.s32 %v1586_v22, %v1582_v49  ;;  %v5152_v49 = vld [vmem:[#allocation30_spill] sm:$0xff]  ;;  %v5154_v59 = vld [vmem:[#allocation24_spill] sm:$0xff] }
 0x1d3   :  { %v1540_v51 = vsel %vm1534_vm12, %v1537_v61, %v1539_v6  ;;  %vm1503_vm11 = vcmp.lt.s32.totalorder %v5154_v59, 0 }
 0x1d4   :  { %v1594_v16 = vmul.u32 %v4504_v8, %v1540_v51  ;;  %v5151_v8 = vld [vmem:[#allocation29_spill] sm:$0xff] }
 0x217   :  { %v1119_v58 = vpop.f32.mrf.mxu0 }
 0x21b   :  { %v1093_v42 = vpop.f32.mrf.mxu2  ;;  %v1106_v48 = vpop.f32.mrf.mxu3 }
 0x21c   :  { %v1124_v55 = vsub.f32 %v1119_v58, %v1093_v42  ;;  %v1123_v37 = vsub.f32 %v1093_v42, %v1106_v48  ;;  %v1585_v58 = vsel %vm1584_vm4, 1, %v5120_v43 }
 0x21d   :  { %v1587_v53 = vadd.s32 %v1585_v58, %v1579_v39 }
 0x21e   :  { %v1125_v62 = vsub.f32 %v1124_v55, %v1106_v48  ;;  %v1442_v31 = vmul.f32 %v1286_v38, %v1123_v37  ;;  %v1445_v0 = vmul.f32 %v1441_v12, %v1123_v37  ;;  %v1589_v48 = vsel %vm1588_vm6, 1, %v5120_v43 }
 0x21f   :  { %v1121_v15 = vpop.f32.mrf.mxu0 }
 0x220   :  { %v1443_v23 = vmul.f32 %v1441_v12, %v1125_v62  ;;  %v1446_v50 = vmul.f32 %v1286_v38, %v1125_v62  ;;  %v1567_v15 = vsel %vm1566_vm7, 1, %v5120_v43  ;;  %v1591_v12 = vadd.s32 %v1589_v48, %v1587_v53 }
 0x221   :  { %v1569_v38 = vadd.s32 %v1567_v15, %v1565_v19 }
 0x222   :  { %v1444_v55 = vsub.f32 %v1442_v31, %v1443_v23  ;;  %v1447_v3 = vadd.f32 %v1446_v50, %v1445_v0  ;;  %v1592_v57 = vadd.s32 %v1591_v12, %v1581_v41  ;;  %v5153_v12 = vld [vmem:[#allocation25_spill] sm:$0xff] }
 0x223   :  { %v1095_v10 = vpop.f32.mrf.mxu2  ;;  %v1108_v56 = vpop.f32.mrf.mxu3  ;;  %v1570_v62 = vadd.s32 %v1569_v38, %v1559_v30  ;;  %v1872_v38 = vand.u32 2139095040, %v5153_v12 }
 0x224   :  { %v1450_v4 = vadd.f32 %v1447_v3, %v1444_v55  ;;  %v1448_v27 = vpack.c.bf16 %v1444_v55, %v1444_v55  ;;  %v1449_v42 = vpack.c.bf16 %v1447_v3, %v1447_v3  ;;  %v1593_v34 = vadd.s32 %v1592_v57, %v1583_v46 }
 0x225   :  { %v1571_v58 = vadd.s32 %v1570_v62, %v1561_v1  ;;  %v1873_v57 = vshrl.u32 %v1872_v38, 23 }
 0x226   :  { %1460 = vmatmul.bf16.vlgmr.msra.gmra.mxu1 %v1448_v27  ;;  %1473 = vmatmul.bf16.vlgmr.msra.gmra.mxu2 %v1449_v42  ;;  %v1451_v37 = vpack.c.bf16 %v1450_v4, %v1450_v4  ;;  %v1597_v31 = vadd.s32 1, %v1593_v34 }
 0x227   :  { %2214 = vmatpush.bf16.msra.mxu1 %v4341_v11  ;;  %2556 = vmatpush.bf16.msra.mxu2 %v4344_v2  ;;  %vm1596_vm8 = vc.u32 %v1571_v58, %v1590_v21  ;;  %v1595_v4 = vadd.s32 %v1590_v21, %v1571_v58  ;;  %v3446_v46 = vadd.s32 4294967169, %v1873_v57  ;;  %v5155_v58 = vand.u32 2147483647, %v5154_v59 }
 0x228   :  { %1486 = vmatmul.bf16.vlgmr.msra.gmra.mxu3 %v1451_v37  ;;  %v1598_v23 = vsel %vm1596_vm8, %v1597_v31, %v1593_v34  ;;  %vm1644_vm8 = vweird.f32 %v5154_v59 }
 0x229   :  { %2569 = vmatpush.bf16.msra.mxu3 %v4348_v5  ;;  %v1599_v47 = vadd.s32 %v1598_v23, %v1594_v16  ;;  %v1879_v34 = vadd.s32 1, %v3446_v46  ;;  %vm4579_vm12 = vcmp.le.f32.partialorder %v5155_v58, 0.7853982 }
 0x22b   :  { %2215 = vmatpush.bf16.msra.mxu1 %v4352_v52  ;;  %2557 = vmatpush.bf16.msra.mxu2 %v4355_v7  ;;  %v1600_v36 = vadd.s32 536870912, %v1599_v47  ;;  %vm1880_vm0 = vcmp.gt.s32.totalorder %v1879_v34, 0 }
 0x22c   :  { %v1881_v31 = vsel %vm1880_vm0, %v1879_v34, 0 }
 0x22d   :  { %2570 = vmatpush.bf16.msra.mxu3 %v4362_v13  ;;  %v4567_v22 = vshrl.u32 %v1600_v36, 30  ;;  %v1883_v51 = vand.u32 31, %v1881_v31 }
 0x22f   :  { %2216 = vmatpush.bf16.msra.mxu1 %v4367_v17  ;;  %2558 = vmatpush.bf16.msra.mxu2 %v4370_v18  ;;  %v1602_v0 = vshll.u32 %v4567_v22, 30  ;;  %v1625_v57 = vsub.s32 4, %v4567_v22 }
 0x231   :  { %2571 = vmatpush.bf16.msra.mxu3 %v4380_v20  ;;  %v1603_v50 = vsub.s32 %v1599_v47, %v1602_v0  ;;  %v4586_v47 = vsub.s32 32, %v1883_v51 }
 0x233   :  { %2217 = vmatpush.bf16.msra.mxu1 %v4385_v25  ;;  %2559 = vmatpush.bf16.msra.mxu2 %v4388_v14  ;;  %v1605_v9 = vsub.s32 0, %v1603_v50  ;;  %vm1604_vm9 = vcmp.lt.s32.totalorder %v1603_v50, 0 }
 0x235   :  { %2572 = vmatpush.bf16.msra.mxu3 %v4391_v26  ;;  %v1606_v39 = vsel %vm1604_vm9, %v1605_v9, %v1603_v50 }
 0x236   :  { %v1607_v55 = vclz %v1606_v39  ;;  %v5159_v39 = vmov 1326507024  }
 0x237   :  { %2218 = vmatpush.bf16.msra.mxu1 %v4395_v24  ;;  %2560 = vmatpush.bf16.msra.mxu2 %v4398_v63 }
 0x238   :  { %v3441_v3 = vadd.s32 4294967294, %v1607_v55  ;;  %v1899_v55 = vshrl.u32 %v5159_v39, %v4586_v47 }
 0x239   :  { %2573 = vmatpush.bf16.msra.mxu3 %v4401_v28 }
 0x23a   :  { %vm3442_vm10 = vcmp.lt.s32.totalorder %v3441_v3, 0 }
 0x23b   :  { %2219 = vmatpush.bf16.msra.mxu1 %v4404_v54  ;;  %2561 = vmatpush.bf16.msra.mxu2 %v4407_v33  ;;  %v1610_v10 = vsel %vm3442_vm10, 0, %v3441_v3 }
 0x23c   :  { %v1615_v56 = vsub.s32 4294967266, %v1610_v10  ;;  %v1611_v53 = vsub.s32 32, %v1610_v10  ;;  %v1612_v48 = vshll.u32 %v1603_v50, %v1610_v10  ;;  %v5158_v50 = vmov 920167782  }
 0x23d   :  { %2574 = vmatpush.bf16.msra.mxu3 %v4410_v29  ;;  %v1896_v9 = vshrl.u32 %v5158_v50, %v4586_v47  ;;  %v5107_v10 = vand.u32 2147483647, %v5153_v12 }
 0x23e   :  { %v1616_v19 = vadd.s32 127, %v1615_v56  ;;  %v1613_v42 = vshrl.u32 %v1595_v4, %v1611_v53  ;;  %v5160_v56 = vmov 2102212464   ;;  %v1898_v53 = vshll.u32 %v5158_v50, %v1883_v51 }
 0x23f   :  { %2220 = vmatpush.bf16.msra.mxu1 %v4413_v32  ;;  %2562 = vmatpush.bf16.msra.mxu2 %v4416_v44  ;;  %v4595_v4 = vshrl.u32 %v1881_v31, 5 }
 0x240   :  { %v1617_v27 = vshll.u32 %v1616_v19, 23  ;;  %v1614_v37 = vor.u32 %v1613_v42, %v1612_v48  ;;  %v1895_v19 = vshll.u32 %v5160_v56, %v1883_v51  ;;  %v5162_v48 = vmov 2131351028  }
 0x241   :  { %2575 = vmatpush.bf16.msra.mxu3 %v4421_v45  ;;  %vm1904_vm13 = vcmp.lt.s32.totalorder %v4595_v4, 4  ;;  %vm1901_vm14 = vcmp.lt.s32.totalorder %v4595_v4, 1  ;;  %vm1903_vm15 = vcmp.lt.s32.totalorder %v4595_v4, 3  ;;  %vm1902_vm1 = vcmp.lt.s32.totalorder %v4595_v4, 2 }
 0x242   :  { %v1618_v15 = vor.u32 4788187, %v1617_v27  ;;  %v1621_v30 = vcvt.s32.f32 %v1614_v37  ;;  %v5161_v27 = vmov 2475754826   ;;  %v1893_v37 = vshrl.u32 %v5160_v56, %v4586_v47 }
 0x243   :  { %2221 = vmatpush.bf16.msra.mxu1 %v4424_v40  ;;  %2563 = vmatpush.bf16.msra.mxu2 %v5151_v8  ;;  %v1887_v42 = vshrl.u32 %v5161_v27, %v4586_v47  ;;  %v1889_v46 = vshll.u32 %v5161_v27, %v1883_v51 }
 0x244   :  { %v1619_v41 = vand.u32 2147483647, %v1618_v15  ;;  %v1890_v15 = vshrl.u32 %v5162_v48, %v4586_v47 }
 0x245   :  { %2576 = vmatpush.bf16.msra.mxu3 %v5152_v49 }
 0x246   :  { %v1622_v62 = vmul.f32 %v1621_v30, %v1619_v41  ;;  %v1897_v41 = vor.u32 %v1896_v9, %v1895_v19  ;;  %v1900_v30 = vor.u32 %v1899_v55, %v1898_v53  ;;  %v4611_v31 = vor.u32 %v1890_v15, %v1889_v46 }
 0x248   :  { %v1623_v1 = vxor.u32 2147483648, %v1622_v62 }
 0x24a   :  { %v1624_v35 = vsel %vm1503_vm11, %v1623_v1, %v1622_v62  ;;  %v1886_v62 = vshll.u32 %v5131_v60, %v1883_v51  ;;  %v1892_v1 = vshll.u32 %v5162_v48, %v1883_v51  ;;  %v1626_v51 = vsel %vm1503_vm11, %v1625_v57, %v4567_v22 }
 0x24b   :  { %v1627_v6 = vsel %vm4579_vm12, %v5154_v59, %v1624_v35  ;;  %v1876_v35 = vand.u32 8388607, %v5107_v10 }
 0x24c   :  { %v1629_v21 = vmul.f32 %v1627_v6, %v1627_v6  ;;  %v4609_v58 = vor.u32 %v1887_v42, %v1886_v62  ;;  %v1628_v42 = vsel %vm4579_vm12, 0, %v1626_v51 }
 0x24d   :  { %v1877_v55 = vor.u32 8388608, %v1876_v35  ;;  %v1799_v57 = vadd.s32 3, %v1628_v42  ;;  %v1645_v35 = vand.u32 3, %v1628_v42 }
 0x24e   :  { %v1637_v23 = vmul.f32 -0.00019511016, %v1629_v21  ;;  %v1630_v36 = vmul.f32 -0.001358992, %v1629_v21 }
 0x24f   :  { %v4647_v62 = vshll.u32 %v1877_v55, 8  ;;  %vm1647_vm2 = vcmp.eq.s32.totalorder %v1645_v35, 0  ;;  %vm1646_vm4 = vcmp.lt.s32.totalorder %v1645_v35, 2  ;;  %vm1650_vm5 = vcmp.eq.s32.totalorder %v1645_v35, 2 }
 0x250   :  { %v1638_v16 = vadd.f32 0.008332121, %v1637_v23  ;;  %v1631_v3 = vadd.f32 0.041655596, %v1630_v36  ;;  %v4613_v23 = vor.u32 %v1893_v37, %v1892_v1  ;;  %v1910_v36 = vsel %vm1904_vm13, %v1897_v41, 920167782 }
 0x252   :  { %v1639_v0 = vmul.f32 %v1638_v16, %v1629_v21  ;;  %v1632_v34 = vmul.f32 %v1631_v3, %v1629_v21  ;;  %v1909_v3 = vsel %vm1901_vm14, %v4609_v58, %v4611_v31  ;;  %v1911_v19 = vsel %vm1903_vm15, %v4613_v23, %v1910_v36 }
 0x253   :  { %v1913_v22 = vsel %vm1901_vm14, %v4611_v31, %v4613_v23 }
 0x254   :  { %v1640_v38 = vadd.f32 -0.16666654, %v1639_v0  ;;  %v1914_v0 = vsel %vm1904_vm13, %v1900_v30, 1326507024  ;;  %v1633_v9 = vadd.f32 -0.4999988, %v1632_v34 }
 0x255   :  { %v1915_v53 = vsel %vm1903_vm15, %v1897_v41, %v1914_v0 }
 0x256   :  { %v1641_v16 = vmul.f32 %v1640_v38, %v1629_v21  ;;  %v1634_v37 = vmul.f32 %v1633_v9, %v1629_v21  ;;  %v1912_v38 = vsel %vm1902_vm1, %v1909_v3, %v1911_v19  ;;  %v4645_v30 = vsel %vm1902_vm1, %v1913_v22, %v1915_v53 }
 0x257   :  { %v1921_v41 = vshrl.u32 %v4645_v30, 16  ;;  %v1943_v1 = vshrl.u32 %v1912_v38, 16  ;;  %v1918_v21 = vand.u32 65535, %v4647_v62  ;;  %v1942_v36 = vand.u32 65535, %v1912_v38 }
 0x258   :  { %v1642_v15 = vadd.f32 1.0, %v1641_v16  ;;  %v1635_v34 = vadd.f32 1.0, %v1634_v37  ;;  %v1800_v16 = vand.u32 3, %v1799_v57  ;;  %v1920_v51 = vand.u32 65535, %v4645_v30 }
 0x259   :  { %v4652_v9 = vmul.u32 %v1921_v41, %v1918_v21  ;;  %v4654_v3 = vmul.u32 %v1943_v1, %v1918_v21  ;;  %v1944_v19 = vmul.u32 %v1942_v36, %v1918_v21 }
 0x25a   :  { %v1643_v46 = vmul.f32 %v1642_v15, %v1627_v6  ;;  %v1651_v55 = vxor.u32 2147483648, %v1635_v34  ;;  %vm1802_vm3 = vcmp.eq.s32.totalorder %v1800_v16, 0  ;;  %v1919_v6 = vshrl.u32 %v4647_v62, 16 }
 0x25b   :  { %v1922_v15 = vmul.u32 %v1920_v51, %v1918_v21  ;;  %vm1805_vm6 = vcmp.eq.s32.totalorder %v1800_v16, 2  ;;  %v1926_v37 = vshll.u32 %v4652_v9, 16  ;;  %v1948_v38 = vshll.u32 %v4654_v3, 16 }
 0x25c   :  { %v1648_v0 = vxor.u32 2147483648, %v1643_v46  ;;  %v1652_v30 = vsel %vm1650_vm5, %v1651_v55, %v1643_v46  ;;  %vm1801_vm7 = vcmp.lt.s32.totalorder %v1800_v16, 2  ;;  %v1807_v57 = vsel %vm1805_vm6, %v1651_v55, %v1643_v46 }
 0x25d   :  { %v4659_v56 = vmul.u32 %v1942_v36, %v1919_v6  ;;  %vm1930_vm9 = vc.u32 %v1922_v15, %v1926_v37  ;;  %vm1952_vm10 = vc.u32 %v1944_v19, %v1948_v38  ;;  %v1954_v21 = vadd.s32 %v1948_v38, %v1944_v19 }
 0x25e   :  { %v1649_v53 = vsel %vm1647_vm2, %v1635_v34, %v1648_v0  ;;  %v1804_v42 = vsel %vm1802_vm3, %v1635_v34, %v1648_v0  ;;  %v1924_v34 = vmul.u32 %v1920_v51, %v1919_v6  ;;  %v1932_v8 = vadd.s32 %v1926_v37, %v1922_v15 }
 0x25f   :  { %v1653_v50 = vsel %vm1646_vm4, %v1649_v53, %v1652_v30  ;;  %v1808_v39 = vsel %vm1801_vm7, %v1804_v42, %v1807_v57  ;;  %v1950_v46 = vshll.u32 %v4659_v56, 16  ;;  %v1953_v59 = vsel %vm1952_vm10, 1, %v5120_v43 }
 0x260   :  { %v1654_v0 = vsel %vm1644_vm8, nan, %v1653_v50  ;;  %v1809_v49 = vsel %vm1644_vm8, nan, %v1808_v39  ;;  %v1928_v53 = vshll.u32 %v1924_v34, 16  ;;  %v1947_v51 = vmul.u32 %v1943_v1, %v1919_v6 }
 0x261   :  { %vm1956_vm11 = vc.u32 %v1954_v21, %v1950_v46  ;;  %v1925_v50 = vmul.u32 %v1921_v41, %v1919_v6  ;;  %v1927_v6 = vshrl.u32 %v4652_v9, 16 }
 0x262   :  { %vm1934_vm12 = vc.u32 %v1932_v8, %v1928_v53  ;;  %v1955_v15 = vadd.s32 %v1953_v59, %v1947_v51  ;;  %v1949_v8 = vshrl.u32 %v4654_v3, 16 }
 0x263   :  { %v1935_v37 = vsel %vm1934_vm12, 1, %v5120_v43 }
 0x2a3   :  { %v1461_v61 = vpop.f32.mrf.mxu1 }
 0x2a9   :  { %v1474_v22 = vpop.f32.mrf.mxu2 }
 0x2aa   :  { %v1491_v48 = vsub.f32 %v1461_v61, %v1474_v22 }
 0x2ab   :  { %v1463_v10 = vpop.f32.mrf.mxu1  ;;  %v1487_v27 = vpop.f32.mrf.mxu3 }
 0x2ac   :  { %v1492_v12 = vsub.f32 %v1487_v27, %v1461_v61  ;;  %v1810_v10 = vmul.f32 %v1654_v0, %v1491_v48  ;;  %v1813_v16 = vmul.f32 %v1809_v49, %v1491_v48  ;;  %v1931_v27 = vsel %vm1930_vm9, 1, %v5120_v43 }
 0x2ad   :  { %v1933_v48 = vadd.s32 %v1931_v27, %v1925_v50 }
 0x2ae   :  { %v1493_v35 = vsub.f32 %v1492_v12, %v1474_v22 }
 0x2af   :  { %v1937_v41 = vadd.s32 %v1935_v37, %v1933_v48  ;;  %v5171_v37 = vmov 1326507024  }
 0x2b0   :  { %v1811_v36 = vmul.f32 %v1809_v49, %v1493_v35  ;;  %v1814_v55 = vmul.f32 %v1654_v0, %v1493_v35  ;;  %v1957_v49 = vsel %vm1956_vm11, 1, %v5120_v43  ;;  %v5166_v35 = vld [vmem:[#allocation26_spill] sm:$0xff] }
 0x2b1   :  { %v1476_v40 = vpop.f32.mrf.mxu2  ;;  %v1959_v1 = vadd.s32 %v1957_v49, %v1955_v15  ;;  %v1938_v30 = vadd.s32 %v1937_v41, %v1927_v6  ;;  %v5172_v41 = vmov 920167782  }
 0x2b2   :  { %v1812_v61 = vsub.f32 %v1810_v10, %v1811_v36  ;;  %v1815_v12 = vadd.f32 %v1814_v55, %v1813_v16 }
 0x2b3   :  { %v1489_v19 = vpop.f32.mrf.mxu3  ;;  %v1960_v38 = vadd.s32 %v1959_v1, %v1949_v8 }
 0x2b4   :  { %v1816_v39 = vpack.c.bf16 %v1812_v61, %v1812_v61  ;;  %v1817_v22 = vpack.c.bf16 %v1815_v12, %v1815_v12  ;;  %v1818_v42 = vadd.f32 %v1815_v12, %v1812_v61  ;;  %v5167_v12 = vld [vmem:[#allocation25_spill] sm:$0xff] }
 0x2b5   :  { %v5168_v19 = vand.u32 2147483647, %v5167_v12 }
 0x2b6   :  { %1828 = vmatmul.bf16.vlgmr.msrb.gmra.mxu0 %v1816_v39  ;;  %1841 = vmatmul.bf16.vlgmr.msrb.gmra.mxu1 %v1817_v22  ;;  %v1819_v40 = vpack.c.bf16 %v1818_v42, %v1818_v42 }
 0x2b7   :  { %2582 = vmatpush.bf16.msrb.mxu0 %v4341_v11  ;;  %2924 = vmatpush.bf16.msrb.mxu1 %v4344_v2  ;;  %v1951_v11 = vshrl.u32 %v4659_v56, 16  ;;  %v1929_v2 = vshrl.u32 %v1924_v34, 16  ;;  %vm4717_vm2 = vcmp.le.f32.partialorder %v5168_v19, 0.7853982 }
 0x2b8   :  { %1854 = vmatmul.bf16.vlgmr.msrb.gmra.mxu2 %v1819_v40 }
 0x2b9   :  { %2937 = vmatpush.bf16.msrb.mxu2 %v4348_v5  ;;  %v1906_v5 = vsel %vm1904_vm13, %v4613_v23, 2102212464  ;;  %v1961_v9 = vadd.s32 %v1960_v38, %v1951_v11  ;;  %v2237_v11 = vand.u32 2147483647, %v5166_v35 }
 0x2bb   :  { %2583 = vmatpush.bf16.msrb.mxu0 %v4352_v52  ;;  %2925 = vmatpush.bf16.msrb.mxu1 %v4355_v7  ;;  %v1885_v52 = vshrl.u32 %v5131_v60, %v4586_v47  ;;  %v1939_v7 = vadd.s32 %v1938_v30, %v1929_v2  ;;  %v1965_v56 = vadd.s32 1, %v1961_v9  ;;  %v5173_v2 = vmov 2131351028  }
 0x2bd   :  { %2938 = vmatpush.bf16.msrb.mxu2 %v4362_v13  ;;  %v1905_v13 = vsel %vm1901_vm14, %v1885_v52, %v4609_v58 }
 0x2bf   :  { %2584 = vmatpush.bf16.msrb.mxu0 %v4367_v17  ;;  %2926 = vmatpush.bf16.msrb.mxu1 %v4370_v18  ;;  %v1907_v17 = vsel %vm1903_vm15, %v4611_v31, %v1906_v5  ;;  %v1958_v18 = vadd.s32 %v1954_v21, %v1950_v46  ;;  %v2240_v21 = vand.u32 2139095040, %v5166_v35  ;;  %vm1871_vm15 = vcmp.lt.s32.totalorder %v5167_v12, 0 }
 0x2c1   :  { %2939 = vmatpush.bf16.msrb.mxu2 %v4380_v20  ;;  %vm1964_vm0 = vc.u32 %v1939_v7, %v1958_v18  ;;  %v1908_v20 = vsel %vm1902_vm1, %v1905_v13, %v1907_v17  ;;  %v1963_v3 = vadd.s32 %v1958_v18, %v1939_v7  ;;  %v2241_v16 = vshrl.u32 %v2240_v21, 23 }
 0x2c2   :  { %v1966_v47 = vsel %vm1964_vm0, %v1965_v56, %v1961_v9  ;;  %v1962_v58 = vmul.u32 %v4647_v62, %v1908_v20  ;;  %v5174_v9 = vmov 2102212464   ;;  %v5175_v17 = vmov 2475754826  }
 0x2c3   :  { %2585 = vmatpush.bf16.msrb.mxu0 %v4385_v25  ;;  %2927 = vmatpush.bf16.msrb.mxu1 %v4388_v14  ;;  %v3452_v53 = vadd.s32 4294967169, %v2241_v16 }
 0x2c4   :  { %v1967_v31 = vadd.s32 %v1966_v47, %v1962_v58 }
 0x2c5   :  { %2940 = vmatpush.bf16.msrb.mxu2 %v4391_v26  ;;  %v5163_v26 = vld [vmem:[#allocation23_spill] sm:$0xff]  ;;  %v2247_v59 = vadd.s32 1, %v3452_v53 }
 0x2c6   :  { %v1968_v25 = vadd.s32 536870912, %v1967_v31 }
 0x2c7   :  { %2586 = vmatpush.bf16.msrb.mxu0 %v4395_v24  ;;  %2928 = vmatpush.bf16.msrb.mxu1 %v4398_v63  ;;  %v5164_v24 = vld [vmem:[#allocation29_spill] sm:$0xff]  ;;  %v5165_v63 = vld [vmem:[#allocation30_spill] sm:$0xff]  ;;  %vm2248_vm1 = vcmp.gt.s32.totalorder %v2247_v59, 0 }
 0x2c8   :  { %v4705_v14 = vshrl.u32 %v1968_v25, 30  ;;  %v2249_v39 = vsel %vm2248_vm1, %v2247_v59, 0 }
 0x2c9   :  { %2941 = vmatpush.bf16.msrb.mxu2 %v4401_v28  ;;  %v2251_v42 = vand.u32 31, %v2249_v39  ;;  %v4730_v6 = vshrl.u32 %v2249_v39, 5 }
 0x2ca   :  { %v1970_v28 = vshll.u32 %v4705_v14, 30 }
 0x2cb   :  { %2587 = vmatpush.bf16.msrb.mxu0 %v4404_v54  ;;  %2929 = vmatpush.bf16.msrb.mxu1 %v4407_v33  ;;  %v4724_v49 = vsub.s32 32, %v2251_v42  ;;  %v2266_v30 = vshll.u32 %v5172_v41, %v2251_v42  ;;  %v2263_v7 = vshll.u32 %v5174_v9, %v2251_v42  ;;  %v2257_v20 = vshll.u32 %v5175_v17, %v2251_v42 }
 0x2cc   :  { %v1971_v54 = vsub.s32 %v1967_v31, %v1970_v28  ;;  %v2260_v47 = vshll.u32 %v5173_v2, %v2251_v42  ;;  %v2254_v25 = vshll.u32 %v5131_v60, %v2251_v42  ;;  %vm2272_vm3 = vcmp.lt.s32.totalorder %v4730_v6, 4 }
 0x2cd   :  { %2942 = vmatpush.bf16.msrb.mxu2 %v4410_v29  ;;  %v2267_v1 = vshrl.u32 %v5171_v37, %v4724_v49  ;;  %v2264_v8 = vshrl.u32 %v5172_v41, %v4724_v49  ;;  %v2258_v5 = vshrl.u32 %v5173_v2, %v4724_v49  ;;  %v2261_v52 = vshrl.u32 %v5174_v9, %v4724_v49 }
 0x2ce   :  { %v1973_v33 = vsub.s32 0, %v1971_v54  ;;  %vm1972_vm13 = vcmp.lt.s32.totalorder %v1971_v54, 0  ;;  %v2255_v18 = vshrl.u32 %v5175_v17, %v4724_v49  ;;  %vm2269_vm4 = vcmp.lt.s32.totalorder %v4730_v6, 1 }
 0x2cf   :  { %2588 = vmatpush.bf16.msrb.mxu0 %v4413_v32  ;;  %2930 = vmatpush.bf16.msrb.mxu1 %v4416_v44  ;;  %v2268_v56 = vor.u32 %v2267_v1, %v2266_v30  ;;  %v2265_v58 = vor.u32 %v2264_v8, %v2263_v7  ;;  %vm2271_vm5 = vcmp.lt.s32.totalorder %v4730_v6, 3  ;;  %vm2270_vm6 = vcmp.lt.s32.totalorder %v4730_v6, 2 }
 0x2d0   :  { %v1974_v29 = vsel %vm1972_vm13, %v1973_v33, %v1971_v54 }
 0x2d1   :  { %2943 = vmatpush.bf16.msrb.mxu2 %v4421_v45  ;;  %v1975_v4 = vclz %v1974_v29  ;;  %v2282_v33 = vsel %vm2272_vm3, %v2268_v56, 1326507024  ;;  %v1993_v29 = vsub.s32 4, %v4705_v14 }
 0x2d3   :  { %2589 = vmatpush.bf16.msrb.mxu0 %v5163_v26  ;;  %2931 = vmatpush.bf16.msrb.mxu1 %v5164_v24  ;;  %v3447_v32 = vadd.s32 4294967294, %v1975_v4  ;;  %v2244_v26 = vand.u32 8388607, %v2237_v11  ;;  %v4746_v24 = vor.u32 %v2258_v5, %v2257_v20  ;;  %v2278_v4 = vsel %vm2272_vm3, %v2265_v58, 920167782 }
 0x2d5   :  { %2944 = vmatpush.bf16.msrb.mxu2 %v5165_v63  ;;  %vm3448_vm14 = vcmp.lt.s32.totalorder %v3447_v32, 0  ;;  %v4748_v63 = vor.u32 %v2261_v52, %v2260_v47 }
 0x2d6   :  { %v1978_v44 = vsel %vm3448_vm14, 0, %v3447_v32  ;;  %vm2012_vm14 = vweird.f32 %v5167_v12 }
 0x2d7   :  { %v1983_v23 = vsub.s32 4294967266, %v1978_v44  ;;  %v1979_v62 = vsub.s32 32, %v1978_v44  ;;  %v1980_v0 = vshll.u32 %v1971_v54, %v1978_v44  ;;  %v4751_v54 = vor.u32 %v2255_v18, %v2254_v25 }
 0x2d8   :  { %v2245_v44 = vor.u32 8388608, %v2244_v26 }
 0x2d9   :  { %v1984_v45 = vadd.s32 127, %v1983_v23  ;;  %v1981_v34 = vshrl.u32 %v1963_v3, %v1979_v62  ;;  %v2281_v23 = vsel %vm2269_vm4, %v4746_v24, %v4748_v63  ;;  %v2277_v3 = vsel %vm2269_vm4, %v4751_v54, %v4746_v24 }
 0x2db   :  { %v1985_v57 = vshll.u32 %v1984_v45, 23  ;;  %v1982_v10 = vor.u32 %v1981_v34, %v1980_v0  ;;  %v2283_v45 = vsel %vm2271_vm5, %v2265_v58, %v2282_v33  ;;  %v1994_v34 = vsel %vm1871_vm15, %v1993_v29, %v4705_v14 }
 0x2dc   :  { %v2284_v0 = vsel %vm2270_vm6, %v2281_v23, %v2283_v45  ;;  %v1996_v16 = vsel %vm4717_vm2, 0, %v1994_v34 }
 0x2dd   :  { %v1986_v46 = vor.u32 4788187, %v1985_v57  ;;  %v1989_v55 = vcvt.s32.f32 %v1982_v10  ;;  %v2279_v57 = vsel %vm2271_vm5, %v4748_v63, %v2278_v4  ;;  %v4781_v10 = vshll.u32 %v2245_v44, 8 }
 0x2de   :  { %v2167_v59 = vadd.s32 3, %v1996_v16  ;;  %v2013_v8 = vand.u32 3, %v1996_v16 }
 0x2df   :  { %v1987_v36 = vand.u32 2147483647, %v1986_v46  ;;  %v2280_v46 = vsel %vm2270_vm6, %v2277_v3, %v2279_v57  ;;  %v2286_v14 = vand.u32 65535, %v4781_v10  ;;  %v2287_v30 = vshrl.u32 %v4781_v10, 16 }
 0x2e0   :  { %v2168_v50 = vand.u32 3, %v2167_v59  ;;  %vm2014_vm7 = vcmp.lt.s32.totalorder %v2013_v8, 2  ;;  %vm2015_vm8 = vcmp.eq.s32.totalorder %v2013_v8, 0  ;;  %vm2018_vm10 = vcmp.eq.s32.totalorder %v2013_v8, 2 }
 0x2e1   :  { %v1990_v27 = vmul.f32 %v1989_v55, %v1987_v36  ;;  %v2289_v55 = vshrl.u32 %v2284_v0, 16 }
 0x2e2   :  { %vm2170_vm9 = vcmp.eq.s32.totalorder %v2168_v50, 0  ;;  %vm2169_vm11 = vcmp.lt.s32.totalorder %v2168_v50, 2  ;;  %vm2173_vm12 = vcmp.eq.s32.totalorder %v2168_v50, 2 }
 0x2e3   :  { %v1991_v61 = vxor.u32 2147483648, %v1990_v27  ;;  %v4786_v39 = vmul.u32 %v2289_v55, %v2286_v14  ;;  %v2293_v45 = vmul.u32 %v2289_v55, %v2287_v30 }
 0x2e5   :  { %v1992_v51 = vsel %vm1871_vm15, %v1991_v61, %v1990_v27  ;;  %v2311_v27 = vshrl.u32 %v2280_v46, 16 }
 0x2e6   :  { %v1995_v22 = vsel %vm4717_vm2, %v5167_v12, %v1992_v51 }
 0x2e7   :  { %v1997_v15 = vmul.f32 %v1995_v22, %v1995_v22  ;;  %v4788_v1 = vmul.u32 %v2311_v27, %v2286_v14 }
 0x2e9   :  { %v2005_v48 = vmul.f32 -0.00019511016, %v1997_v15  ;;  %v1998_v38 = vmul.f32 -0.001358992, %v1997_v15 }
 0x2eb   :  { %v2006_v40 = vadd.f32 0.008332121, %v2005_v48  ;;  %v1999_v31 = vadd.f32 0.041655596, %v1998_v38  ;;  %v2288_v48 = vand.u32 65535, %v2284_v0 }
 0x2ed   :  { %v2007_v13 = vmul.f32 %v2006_v40, %v1997_v15  ;;  %v2000_v32 = vmul.f32 %v1999_v31, %v1997_v15  ;;  %v2310_v40 = vand.u32 65535, %v2280_v46  ;;  %v2290_v52 = vmul.u32 %v2288_v48, %v2286_v14 }
 0x2ef   :  { %v2008_v28 = vadd.f32 -0.16666654, %v2007_v13  ;;  %v2001_v21 = vadd.f32 -0.4999988, %v2000_v32  ;;  %v2312_v7 = vmul.u32 %v2310_v40, %v2286_v14  ;;  %v4793_v13 = vmul.u32 %v2288_v48, %v2287_v30 }
 0x2f0   :  { %v4795_v20 = vmul.u32 %v2310_v40, %v2287_v30 }
 0x2f1   :  { %v2009_v62 = vmul.f32 %v2008_v28, %v1997_v15  ;;  %v2002_v53 = vmul.f32 %v2001_v21, %v1997_v15  ;;  %v2294_v15 = vshll.u32 %v4786_v39, 16  ;;  %v2315_v21 = vmul.u32 %v2311_v27, %v2287_v30 }
 0x2f2   :  { %v2318_v3 = vshll.u32 %v4795_v20, 16 }
 0x2f3   :  { %v2010_v36 = vadd.f32 1.0, %v2009_v62  ;;  %v2003_v42 = vadd.f32 1.0, %v2002_v53  ;;  %vm4797_vm0 = vc.u32 %v2290_v52, %v2294_v15  ;;  %v2300_v25 = vadd.s32 %v2294_v15, %v2290_v52 }
 0x2f4   :  { %v2296_v62 = vshll.u32 %v4793_v13, 16  ;;  %v2299_v34 = vsel %vm4797_vm0, 1, %v5120_v43  ;;  %v2317_v15 = vshrl.u32 %v4788_v1, 16  ;;  %v2295_v52 = vshrl.u32 %v4786_v39, 16 }
 0x2f5   :  { %v2011_v61 = vmul.f32 %v2010_v36, %v1995_v22  ;;  %v2019_v5 = vxor.u32 2147483648, %v2003_v42  ;;  %v2316_v22 = vshll.u32 %v4788_v1, 16  ;;  %v2253_v1 = vshrl.u32 %v5131_v60, %v4724_v49 }
 0x2f6   :  { %vm2302_vm15 = vc.u32 %v2300_v25, %v2296_v62 }
 0x2f7   :  { %v2016_v38 = vxor.u32 2147483648, %v2011_v61  ;;  %v2020_v26 = vsel %vm2018_vm10, %v2019_v5, %v2011_v61  ;;  %v2175_v28 = vsel %vm2173_vm12, %v2019_v5, %v2011_v61  ;;  %vm2320_vm13 = vc.u32 %v2312_v7, %v2316_v22  ;;  %v3541_v5 = vld [vmem:[#allocation13 + $0x38] sm:$0xff] }
 0x2f8   :  { %v2322_v29 = vadd.s32 %v2316_v22, %v2312_v7  ;;  %v2321_v0 = vsel %vm2320_vm13, 1, %v5120_v43  ;;  %v2303_v48 = vsel %vm2302_vm15, 1, %v5120_v43  ;;  %v2273_v39 = vsel %vm2269_vm4, %v2253_v1, %v4751_v54 }
 0x2f9   :  { %v2017_v18 = vsel %vm2015_vm8, %v2003_v42, %v2016_v38  ;;  %v2172_v56 = vsel %vm2170_vm9, %v2003_v42, %v2016_v38  ;;  %v2323_v59 = vadd.s32 %v2321_v0, %v2315_v21 }
 0x2fa   :  { %v2021_v32 = vsel %vm2014_vm7, %v2017_v18, %v2020_v26  ;;  %v2176_v44 = vsel %vm2169_vm11, %v2172_v56, %v2175_v28  ;;  %vm2324_vm1 = vc.u32 %v2322_v29, %v2318_v3  ;;  %v2319_v18 = vshrl.u32 %v4795_v20, 16  ;;  %v3542_v56 = vld [vmem:[#allocation13 + $0x30] sm:$0xff]  ;;  %v3543_v26 = vld [vmem:[#allocation13 + $0x28] sm:$0xff] }
 0x2fb   :  { %v2022_v46 = vsel %vm2012_vm14, nan, %v2021_v32  ;;  %v2177_v16 = vsel %vm2012_vm14, nan, %v2176_v44  ;;  %v3545_v32 = vld [vmem:[#allocation13 + $0x18] sm:$0xff]  ;;  %vm4838_vm7 = vcmp.le.f32.partialorder %v2237_v11, 0.7853982 }
 0x333   :  { %v1829_v51 = vpop.f32.mrf.mxu0  ;;  %v1842_v19 = vpop.f32.mrf.mxu1 }
 0x334   :  { %v1859_v4 = vsub.f32 %v1829_v51, %v1842_v19 }
 0x336   :  { %v2178_v36 = vmul.f32 %v2022_v46, %v1859_v4  ;;  %v2181_v53 = vmul.f32 %v2177_v16, %v1859_v4 }
 0x33b   :  { %v1831_v47 = vpop.f32.mrf.mxu0  ;;  %v1844_v58 = vpop.f32.mrf.mxu1 }
 0x33c   :  { %v1855_v33 = vpop.f32.mrf.mxu2  ;;  %v2297_v47 = vshrl.u32 %v4793_v13, 16  ;;  %v2274_v58 = vsel %vm2272_vm3, %v4748_v63, 2102212464  ;;  %v2326_v13 = vadd.s32 %v2322_v29, %v2318_v3  ;;  %v3548_v29 = vld [vmem:[#allocation13] sm:$0xff] }
 0x33d   :  { %v1860_v23 = vsub.f32 %v1855_v33, %v1829_v51  ;;  %v2301_v51 = vadd.s32 %v2299_v34, %v2293_v45  ;;  %v2275_v20 = vsel %vm2271_vm5, %v4746_v24, %v2274_v58  ;;  %v3544_v33 = vld [vmem:[#allocation13 + $0x20] sm:$0xff]  ;;  %v3547_v45 = vld [vmem:[#allocation13 + $0x8] sm:$0xff]  ;;  %vm2239_vm5 = vcmp.lt.s32.totalorder %v5166_v35, 0 }
 0x33e   :  { %v2276_v63 = vsel %vm2270_vm6, %v2273_v39, %v2275_v20 }
 0x33f   :  { %v1861_v57 = vsub.f32 %v1860_v23, %v1842_v19  ;;  %v2325_v19 = vsel %vm2324_vm1, 1, %v5120_v43  ;;  %v2305_v30 = vadd.s32 %v2303_v48, %v2301_v51  ;;  %v2330_v4 = vmul.u32 %v4781_v10, %v2276_v63  ;;  %v3546_v23 = vld [vmem:[#allocation13 + $0x10] sm:$0xff] }
 0x340   :  { %v2327_v50 = vadd.s32 %v2325_v19, %v2323_v59 }
 0x341   :  { %v2179_v12 = vmul.f32 %v2177_v16, %v1861_v57  ;;  %v2182_v55 = vmul.f32 %v2022_v46, %v1861_v57  ;;  %v2306_v22 = vadd.s32 %v2305_v30, %v2295_v52 }
 0x342   :  { %v2328_v7 = vadd.s32 %v2327_v50, %v2317_v15 }
 0x343   :  { %v2180_v14 = vsub.f32 %v2178_v36, %v2179_v12  ;;  %v2183_v61 = vadd.f32 %v2182_v55, %v2181_v53  ;;  %v2307_v25 = vadd.s32 %v2306_v22, %v2297_v47  ;;  %v5178_v55 = vld [vmem:[#allocation27_spill] sm:$0xff] }
 0x344   :  { %v1857_v42 = vpop.f32.mrf.mxu2  ;;  %v2329_v31 = vadd.s32 %v2328_v7, %v2319_v18  ;;  %v2608_v59 = vand.u32 2139095040, %v5178_v55 }
 0x345   :  { %v2184_v27 = vpack.c.bf16 %v2180_v14, %v2180_v14  ;;  %v2185_v40 = vpack.c.bf16 %v2183_v61, %v2183_v61  ;;  %v2186_v8 = vadd.f32 %v2183_v61, %v2180_v14  ;;  %vm2332_vm2 = vc.u32 %v2307_v25, %v2326_v13 }
 0x346   :  { %v2333_v28 = vadd.s32 1, %v2329_v31  ;;  %v2331_v36 = vadd.s32 %v2326_v13, %v2307_v25  ;;  %v2609_v19 = vshrl.u32 %v2608_v59, 23  ;;  %v2605_v25 = vand.u32 2147483647, %v5178_v55 }
 0x347   :  { %2196 = vmatmul.bf16.vlgmr.msrb.gmra.mxu3 %v2184_v27  ;;  %2209 = vmatmul.bf16.vlgmr.msra.gmra.mxu0 %v2185_v40  ;;  %v2187_v38 = vpack.c.bf16 %v2186_v8, %v2186_v8 }
 0x348   :  { %2950 = vmatpush.bf16.msrb.mxu3 %v3541_v5  ;;  %v2334_v49 = vsel %vm2332_vm2, %v2333_v28, %v2329_v31  ;;  %v3458_v27 = vadd.s32 4294967169, %v2609_v19 }
 0x349   :  { %2222 = vmatmul.bf16.vlgmr.msra.gmra.mxu1 %v2187_v38  ;;  %v2335_v44 = vadd.s32 %v2334_v49, %v2330_v4 }
 0x34a   :  { %v2615_v8 = vadd.s32 1, %v3458_v27 }
 0x34b   :  { %v2336_v54 = vadd.s32 536870912, %v2335_v44 }
 0x34c   :  { %2951 = vmatpush.bf16.msrb.mxu3 %v3542_v56  ;;  %vm2616_vm6 = vcmp.gt.s32.totalorder %v2615_v8, 0 }
 0x34d   :  { %v4829_v24 = vshrl.u32 %v2336_v54, 30  ;;  %v2617_v15 = vsel %vm2616_vm6, %v2615_v8, 0 }
 0x34e   :  { %v2619_v52 = vand.u32 31, %v2617_v15  ;;  %v4851_v58 = vshrl.u32 %v2617_v15, 5 }
 0x34f   :  { %v2338_v6 = vshll.u32 %v4829_v24, 30 }
 0x350   :  { %2952 = vmatpush.bf16.msrb.mxu3 %v3543_v26  ;;  %v4845_v18 = vsub.s32 32, %v2619_v52  ;;  %v2634_v1 = vshll.u32 %v5172_v41, %v2619_v52  ;;  %v2631_v20 = vshll.u32 %v5174_v9, %v2619_v52  ;;  %v2628_v49 = vshll.u32 %v5173_v2, %v2619_v52 }
 0x351   :  { %v2339_v62 = vsub.s32 %v2335_v44, %v2338_v6  ;;  %v2622_v44 = vshll.u32 %v5131_v60, %v2619_v52  ;;  %vm2640_vm8 = vcmp.lt.s32.totalorder %v4851_v58, 4  ;;  %vm2637_vm9 = vcmp.lt.s32.totalorder %v4851_v58, 1 }
 0x352   :  { %v2635_v47 = vshrl.u32 %v5171_v37, %v4845_v18  ;;  %v2632_v11 = vshrl.u32 %v5172_v41, %v4845_v18  ;;  %v2626_v26 = vshrl.u32 %v5173_v2, %v4845_v18  ;;  %v2629_v39 = vshrl.u32 %v5174_v9, %v4845_v18 }
 0x353   :  { %v2341_v3 = vsub.s32 0, %v2339_v62  ;;  %vm2340_vm3 = vcmp.lt.s32.totalorder %v2339_v62, 0  ;;  %v2623_v28 = vshrl.u32 %v5175_v17, %v4845_v18  ;;  %vm2639_vm10 = vcmp.lt.s32.totalorder %v4851_v58, 3 }
 0x354   :  { %2953 = vmatpush.bf16.msrb.mxu3 %v3544_v33  ;;  %v2636_v63 = vor.u32 %v2635_v47, %v2634_v1  ;;  %v2625_v33 = vshll.u32 %v5175_v17, %v2619_v52  ;;  %v2633_v4 = vor.u32 %v2632_v11, %v2631_v20  ;;  %vm2638_vm11 = vcmp.lt.s32.totalorder %v4851_v58, 2 }
 0x355   :  { %v2342_v57 = vsel %vm2340_vm3, %v2341_v3, %v2339_v62  ;;  %v4872_v6 = vor.u32 %v2623_v28, %v2622_v44  ;;  %v2361_v3 = vsub.s32 4, %v4829_v24 }
 0x356   :  { %v2343_v34 = vclz %v2342_v57  ;;  %v4867_v54 = vor.u32 %v2626_v26, %v2625_v33  ;;  %v2646_v57 = vsel %vm2640_vm8, %v2633_v4, 920167782 }
 0x358   :  { %2954 = vmatpush.bf16.msrb.mxu3 %v3545_v32  ;;  %v3453_v10 = vadd.s32 4294967294, %v2343_v34 }
 0x35a   :  { %vm3454_vm4 = vcmp.lt.s32.totalorder %v3453_v10, 0 }
 0x35b   :  { %v2346_v21 = vsel %vm3454_vm4, 0, %v3453_v10  ;;  %vm2380_vm4 = vweird.f32 %v5166_v35 }
 0x35c   :  { %2955 = vmatpush.bf16.msrb.mxu3 %v3546_v23  ;;  %v2351_v0 = vsub.s32 4294967266, %v2346_v21  ;;  %v2347_v16 = vsub.s32 32, %v2346_v21  ;;  %v2348_v14 = vshll.u32 %v2339_v62, %v2346_v21  ;;  %v2612_v23 = vand.u32 8388607, %v2605_v25 }
 0x35d   :  { %v2650_v62 = vsel %vm2640_vm8, %v2636_v63, 1326507024 }
 0x35e   :  { %v2352_v46 = vadd.s32 127, %v2351_v0  ;;  %v2349_v12 = vshrl.u32 %v2331_v36, %v2347_v16  ;;  %v2613_v10 = vor.u32 8388608, %v2612_v23  ;;  %v2651_v0 = vsel %vm2639_vm10, %v2633_v4, %v2650_v62 }
 0x35f   :  { %v2645_v16 = vsel %vm2637_vm9, %v4872_v6, %v4867_v54 }
 0x360   :  { %2956 = vmatpush.bf16.msrb.mxu3 %v3547_v45  ;;  %v2353_v53 = vshll.u32 %v2352_v46, 23  ;;  %v2350_v51 = vor.u32 %v2349_v12, %v2348_v14  ;;  %v4869_v45 = vor.u32 %v2629_v39, %v2628_v49 }
 0x362   :  { %v2354_v61 = vor.u32 4788187, %v2353_v53  ;;  %v2357_v48 = vcvt.s32.f32 %v2350_v51  ;;  %v2649_v21 = vsel %vm2637_vm9, %v4867_v54, %v4869_v45  ;;  %v2647_v36 = vsel %vm2639_vm10, %v4869_v45, %v2646_v57 }
 0x363   :  { %v2362_v53 = vsel %vm2239_vm5, %v2361_v3, %v4829_v24  ;;  %v2652_v59 = vsel %vm2638_vm11, %v2649_v21, %v2651_v0  ;;  %v2648_v14 = vsel %vm2638_vm11, %v2645_v16, %v2647_v36 }
 0x364   :  { %2957 = vmatpush.bf16.msrb.mxu3 %v3548_v29  ;;  %v2355_v42 = vand.u32 2147483647, %v2354_v61  ;;  %v4902_v61 = vshll.u32 %v2613_v10, 8  ;;  %v2364_v51 = vsel %vm4838_vm7, 0, %v2362_v53  ;;  %v2679_v27 = vshrl.u32 %v2648_v14, 16 }
 0x365   :  { %v2656_v15 = vand.u32 65535, %v2652_v59  ;;  %v2678_v52 = vand.u32 65535, %v2648_v14 }
 0x366   :  { %v2358_v40 = vmul.f32 %v2357_v48, %v2355_v42  ;;  %v2657_v42 = vshrl.u32 %v2652_v59, 16  ;;  %v2654_v24 = vand.u32 65535, %v4902_v61 }
 0x368   :  { %v2359_v50 = vxor.u32 2147483648, %v2358_v40  ;;  %v2658_v39 = vmul.u32 %v2656_v15, %v2654_v24  ;;  %v2680_v20 = vmul.u32 %v2678_v52, %v2654_v24 }
 0x36a   :  { %v2360_v38 = vsel %vm2239_vm5, %v2359_v50, %v2358_v40  ;;  %v2535_v40 = vadd.s32 3, %v2364_v51  ;;  %v4907_v50 = vmul.u32 %v2657_v42, %v2654_v24 }
 0x36b   :  { %v2363_v5 = vsel %vm4838_vm7, %v5166_v35, %v2360_v38 }
 0x36c   :  { %v2365_v7 = vmul.f32 %v2363_v5, %v2363_v5  ;;  %v2536_v47 = vand.u32 3, %v2535_v40 }
 0x36e   :  { %v2373_v22 = vmul.f32 -0.00019511016, %v2365_v7  ;;  %v2366_v31 = vmul.f32 -0.001358992, %v2365_v7  ;;  %vm2538_vm13 = vcmp.eq.s32.totalorder %v2536_v47, 0  ;;  %vm2537_vm15 = vcmp.lt.s32.totalorder %v2536_v47, 2 }
 0x36f   :  { %vm2541_vm1 = vcmp.eq.s32.totalorder %v2536_v47, 2 }
 0x370   :  { %v2374_v56 = vadd.f32 0.008332121, %v2373_v22  ;;  %v2367_v32 = vadd.f32 0.041655596, %v2366_v31  ;;  %v4909_v22 = vmul.u32 %v2679_v27, %v2654_v24  ;;  %v2655_v31 = vshrl.u32 %v4902_v61, 16 }
 0x372   :  { %v2375_v13 = vmul.f32 %v2374_v56, %v2365_v7  ;;  %v2368_v34 = vmul.f32 %v2367_v32, %v2365_v7  ;;  %v2381_v56 = vand.u32 3, %v2364_v51  ;;  %v2682_v33 = vmul.u32 %v2678_v52, %v2655_v31 }
 0x373   :  { %v2661_v21 = vmul.u32 %v2657_v42, %v2655_v31  ;;  %v2683_v53 = vmul.u32 %v2679_v27, %v2655_v31 }
 0x374   :  { %v2376_v29 = vadd.f32 -0.16666654, %v2375_v13  ;;  %v2369_v12 = vadd.f32 -0.4999988, %v2368_v34  ;;  %vm2382_vm12 = vcmp.lt.s32.totalorder %v2381_v56, 2  ;;  %vm2383_vm0 = vcmp.eq.s32.totalorder %v2381_v56, 0 }
 0x375   :  { %v2660_v13 = vmul.u32 %v2656_v15, %v2655_v31  ;;  %vm2386_vm14 = vcmp.eq.s32.totalorder %v2381_v56, 2 }
 0x376   :  { %v2377_v46 = vmul.f32 %v2376_v29, %v2365_v7  ;;  %v2370_v48 = vmul.f32 %v2369_v12, %v2365_v7  ;;  %v2662_v7 = vshll.u32 %v4907_v50, 16 }
 0x377   :  { %v2664_v0 = vshll.u32 %v2660_v13, 16 }
 0x378   :  { %v2378_v19 = vadd.f32 1.0, %v2377_v46  ;;  %v2371_v38 = vadd.f32 1.0, %v2370_v48  ;;  %vm4914_vm2 = vc.u32 %v2658_v39, %v2662_v7  ;;  %v2668_v4 = vadd.s32 %v2662_v7, %v2658_v39 }
 0x379   :  { %v2686_v46 = vshll.u32 %v2682_v33, 16  ;;  %v2667_v36 = vsel %vm4914_vm2, 1, %v5120_v43 }
 0x37a   :  { %v2379_v8 = vmul.f32 %v2378_v19, %v2363_v5  ;;  %v2387_v26 = vxor.u32 2147483648, %v2371_v38  ;;  %v2684_v5 = vshll.u32 %v4909_v22, 16  ;;  %vm2670_vm5 = vc.u32 %v2668_v4, %v2664_v0 }
 0x37b   :  { %v2671_v27 = vsel %vm2670_vm5, 1, %v5120_v43  ;;  %v2621_v4 = vshrl.u32 %v5131_v60, %v4845_v18 }
 0x37c   :  { %v2384_v30 = vxor.u32 2147483648, %v2379_v8  ;;  %v2388_v44 = vsel %vm2386_vm14, %v2387_v26, %v2379_v8  ;;  %v2543_v23 = vsel %vm2541_vm1, %v2387_v26, %v2379_v8  ;;  %vm2688_vm3 = vc.u32 %v2680_v20, %v2684_v5 }
 0x37d   :  { %v2690_v29 = vadd.s32 %v2684_v5, %v2680_v20  ;;  %v2689_v12 = vsel %vm2688_vm3, 1, %v5120_v43  ;;  %v2663_v26 = vshrl.u32 %v4907_v50, 16  ;;  %v2687_v5 = vshrl.u32 %v2682_v33, 16 }
 0x37e   :  { %v2385_v28 = vsel %vm2383_vm0, %v2371_v38, %v2384_v30  ;;  %v2540_v63 = vsel %vm2538_vm13, %v2371_v38, %v2384_v30  ;;  %v2691_v42 = vadd.s32 %v2689_v12, %v2683_v53  ;;  %v2669_v38 = vadd.s32 %v2667_v36, %v2661_v21  ;;  %v5183_v53 = vld [vmem:[#allocation28_spill] sm:$0xff] }
 0x37f   :  { %v2389_v57 = vsel %vm2382_vm12, %v2385_v28, %v2388_v44  ;;  %v2544_v34 = vsel %vm2537_vm15, %v2540_v63, %v2543_v23  ;;  %vm2692_vm6 = vc.u32 %v2690_v29, %v2686_v46  ;;  %v2665_v28 = vshrl.u32 %v2660_v13, 16 }
 0x380   :  { %v2390_v59 = vsel %vm2380_vm4, nan, %v2389_v57  ;;  %v2545_v14 = vsel %vm2380_vm4, nan, %v2544_v34  ;;  %v2693_v15 = vsel %vm2692_vm6, 1, %v5120_v43  ;;  %v2673_v7 = vadd.s32 %v2671_v27, %v2669_v38 }
 0x381   :  { %v2695_v30 = vadd.s32 %v2693_v15, %v2691_v42  ;;  %v2642_v63 = vsel %vm2640_vm8, %v4869_v45, 2102212464  ;;  %v2694_v44 = vadd.s32 %v2690_v29, %v2686_v46  ;;  %v2976_v12 = vand.u32 2139095040, %v5183_v53 }
 0x382   :  { %v2674_v20 = vadd.s32 %v2673_v7, %v2663_v26  ;;  %v2643_v50 = vsel %vm2639_vm10, %v4867_v54, %v2642_v63  ;;  %vm2607_vm10 = vcmp.lt.s32.totalorder %v5178_v55, 0  ;;  %vm4951_vm12 = vcmp.le.f32.partialorder %v2605_v25, 0.7853982 }
 0x3c4   :  { %v2210_v11 = vpop.f32.mrf.mxu0 }
 0x3c6   :  { %v2223_v1 = vpop.f32.mrf.mxu1 }
 0x3ca   :  { %v2197_v32 = vpop.f32.mrf.mxu3 }
 0x3cb   :  { %v2227_v62 = vsub.f32 %v2197_v32, %v2210_v11  ;;  %v2228_v3 = vsub.f32 %v2223_v1, %v2197_v32  ;;  %v2685_v1 = vshrl.u32 %v4909_v22, 16  ;;  %v2675_v32 = vadd.s32 %v2674_v20, %v2665_v28 }
 0x3cc   :  { %v2212_v10 = vpop.f32.mrf.mxu0  ;;  %v2641_v22 = vsel %vm2637_vm9, %v2621_v4, %v4872_v6  ;;  %v2973_v20 = vand.u32 2147483647, %v5183_v53 }
 0x3cd   :  { %v2229_v16 = vsub.f32 %v2228_v3, %v2210_v11  ;;  %v2546_v19 = vmul.f32 %v2390_v59, %v2227_v62  ;;  %v2549_v35 = vmul.f32 %v2545_v14, %v2227_v62  ;;  %v2696_v39 = vadd.s32 %v2695_v30, %v2685_v1 }
 0x3ce   :  { %v2225_v51 = vpop.f32.mrf.mxu1  ;;  %vm2700_vm7 = vc.u32 %v2675_v32, %v2694_v44  ;;  %v2644_v13 = vsel %vm2638_vm11, %v2641_v22, %v2643_v50 }
 0x3cf   :  { %v2547_v48 = vmul.f32 %v2545_v14, %v2229_v16  ;;  %v2550_v40 = vmul.f32 %v2390_v59, %v2229_v16  ;;  %v2697_v49 = vadd.s32 %v2696_v39, %v2687_v5  ;;  %v2698_v23 = vmul.u32 %v4902_v61, %v2644_v13 }
 0x3d0   :  { %v2699_v16 = vadd.s32 %v2694_v44, %v2675_v32 }
 0x3d1   :  { %v2548_v24 = vsub.f32 %v2546_v19, %v2547_v48  ;;  %v2551_v8 = vadd.f32 %v2550_v40, %v2549_v35  ;;  %v2701_v33 = vadd.s32 1, %v2697_v49  ;;  %v2977_v19 = vshrl.u32 %v2976_v12, 23 }
 0x3d2   :  { %v2199_v52 = vpop.f32.mrf.mxu3 }
 0x3d3   :  { %v2554_v56 = vadd.f32 %v2551_v8, %v2548_v24  ;;  %v2552_v47 = vpack.c.bf16 %v2548_v24, %v2548_v24  ;;  %v2553_v11 = vpack.c.bf16 %v2551_v8, %v2551_v8  ;;  %v2702_v45 = vsel %vm2700_vm7, %v2701_v33, %v2697_v49 }
 0x3d4   :  { %v2703_v62 = vadd.s32 %v2702_v45, %v2698_v23  ;;  %v3464_v40 = vadd.s32 4294967169, %v2977_v19  ;;  %v2980_v33 = vand.u32 8388607, %v2973_v20 }
 0x3d5   :  { %2564 = vmatmul.bf16.vlgmr.msra.gmra.mxu2 %v2552_v47  ;;  %2577 = vmatmul.bf16.vlgmr.msra.gmra.mxu3 %v2553_v11  ;;  %v2555_v31 = vpack.c.bf16 %v2554_v56, %v2554_v56 }
 0x3d6   :  { %v2704_v18 = vadd.s32 536870912, %v2703_v62  ;;  %v2983_v24 = vadd.s32 1, %v3464_v40 }
 0x3d7   :  { %2590 = vmatmul.bf16.vlgmr.msrb.gmra.mxu0 %v2555_v31 }
 0x3d8   :  { %v4942_v3 = vshrl.u32 %v2704_v18, 30  ;;  %vm2984_vm11 = vcmp.gt.s32.totalorder %v2983_v24, 0 }
 0x3d9   :  { %v2985_v52 = vsel %vm2984_vm11, %v2983_v24, 0 }
 0x3da   :  { %v2706_v57 = vshll.u32 %v4942_v3, 30  ;;  %v2987_v56 = vand.u32 31, %v2985_v52  ;;  %v4964_v1 = vshrl.u32 %v2985_v52, 5 }
 0x3dc   :  { %v2707_v6 = vsub.s32 %v2703_v62, %v2706_v57  ;;  %v4958_v30 = vsub.s32 32, %v2987_v56  ;;  %v3002_v39 = vshll.u32 %v5172_v41, %v2987_v56  ;;  %v2999_v63 = vshll.u32 %v5174_v9, %v2987_v56 }
 0x3dd   :  { %v2993_v32 = vshll.u32 %v5175_v17, %v2987_v56  ;;  %v2996_v22 = vshll.u32 %v5173_v2, %v2987_v56  ;;  %v2990_v44 = vshll.u32 %v5131_v60, %v2987_v56  ;;  %vm3008_vm0 = vcmp.lt.s32.totalorder %v4964_v1, 4 }
 0x3de   :  { %v2709_v34 = vsub.s32 0, %v2707_v6  ;;  %vm2708_vm8 = vcmp.lt.s32.totalorder %v2707_v6, 0  ;;  %v3003_v7 = vshrl.u32 %v5171_v37, %v4958_v30  ;;  %v3000_v25 = vshrl.u32 %v5172_v41, %v4958_v30 }
 0x3df   :  { %v2994_v5 = vshrl.u32 %v5173_v2, %v4958_v30  ;;  %v2997_v28 = vshrl.u32 %v5174_v9, %v4958_v30  ;;  %v2991_v37 = vshrl.u32 %v5175_v17, %v4958_v30  ;;  %v2729_v2 = vsub.s32 4, %v4942_v3 }
 0x3e0   :  { %v2710_v10 = vsel %vm2708_vm8, %v2709_v34, %v2707_v6  ;;  %v3004_v4 = vor.u32 %v3003_v7, %v3002_v39  ;;  %v3001_v41 = vor.u32 %v3000_v25, %v2999_v63  ;;  %vm3005_vm13 = vcmp.lt.s32.totalorder %v4964_v1, 1 }
 0x3e1   :  { %v2711_v54 = vclz %v2710_v10  ;;  %v4980_v13 = vor.u32 %v2994_v5, %v2993_v32  ;;  %v4982_v45 = vor.u32 %v2997_v28, %v2996_v22  ;;  %v4985_v23 = vor.u32 %v2991_v37, %v2990_v44 }
 0x3e2   :  { %v3018_v17 = vsel %vm3008_vm0, %v3004_v4, 1326507024  ;;  %v3014_v62 = vsel %vm3008_vm0, %v3001_v41, 920167782  ;;  %vm3007_vm14 = vcmp.lt.s32.totalorder %v4964_v1, 3  ;;  %v2981_v57 = vor.u32 8388608, %v2980_v33 }
 0x3e3   :  { %v3459_v29 = vadd.s32 4294967294, %v2711_v54  ;;  %v3019_v34 = vsel %vm3007_vm14, %v3001_v41, %v3018_v17  ;;  %v3013_v54 = vsel %vm3005_vm13, %v4985_v23, %v4980_v13  ;;  %vm3006_vm15 = vcmp.lt.s32.totalorder %v4964_v1, 2 }
 0x3e5   :  { %vm3460_vm9 = vcmp.lt.s32.totalorder %v3459_v29, 0 }
 0x3e6   :  { %v2714_v21 = vsel %vm3460_vm9, 0, %v3459_v29  ;;  %v3015_v29 = vsel %vm3007_vm14, %v4982_v45, %v3014_v62  ;;  %vm2748_vm9 = vweird.f32 %v5178_v55 }
 0x3e7   :  { %v2719_v0 = vsub.s32 4294967266, %v2714_v21  ;;  %v2715_v46 = vsub.s32 32, %v2714_v21  ;;  %v2716_v59 = vshll.u32 %v2707_v6, %v2714_v21  ;;  %v3017_v6 = vsel %vm3005_vm13, %v4980_v13, %v4982_v45 }
 0x3e8   :  { %v2730_v21 = vsel %vm2607_vm10, %v2729_v2, %v4942_v3 }
 0x3e9   :  { %v2720_v58 = vadd.s32 127, %v2719_v0  ;;  %v2717_v61 = vshrl.u32 %v2699_v16, %v2715_v46  ;;  %v3016_v46 = vsel %vm3006_vm15, %v3013_v54, %v3015_v29  ;;  %v5015_v16 = vshll.u32 %v2981_v57, 8 }
 0x3ea   :  { %v3046_v52 = vand.u32 65535, %v3016_v46 }
 0x3eb   :  { %v2721_v36 = vshll.u32 %v2720_v58, 23  ;;  %v2718_v51 = vor.u32 %v2717_v61, %v2716_v59  ;;  %v3020_v58 = vsel %vm3006_vm15, %v3017_v6, %v3019_v34  ;;  %v3022_v3 = vand.u32 65535, %v5015_v16 }
 0x3ec   :  { %v3025_v12 = vshrl.u32 %v3020_v58, 16 }
 0x3ed   :  { %v2722_v14 = vor.u32 4788187, %v2721_v36  ;;  %v2725_v35 = vcvt.s32.f32 %v2718_v51  ;;  %v2732_v36 = vsel %vm4951_vm12, 0, %v2730_v21 }
 0x3ee   :  { %v2903_v51 = vadd.s32 3, %v2732_v36 }
 0x3ef   :  { %v2723_v48 = vand.u32 2147483647, %v2722_v14  ;;  %v3047_v14 = vshrl.u32 %v3016_v46, 16 }
 0x3f0   :  { %v2904_v24 = vand.u32 3, %v2903_v51 }
 0x3f1   :  { %v2726_v42 = vmul.f32 %v2725_v35, %v2723_v48  ;;  %v5020_v48 = vmul.u32 %v3025_v12, %v3022_v3  ;;  %v5022_v40 = vmul.u32 %v3047_v14, %v3022_v3 }
 0x3f2   :  { %vm2906_vm3 = vcmp.eq.s32.totalorder %v2904_v24, 0  ;;  %vm2905_vm5 = vcmp.lt.s32.totalorder %v2904_v24, 2  ;;  %vm2909_vm6 = vcmp.eq.s32.totalorder %v2904_v24, 2 }
 0x3f3   :  { %v2727_v8 = vxor.u32 2147483648, %v2726_v42  ;;  %v3030_v15 = vshll.u32 %v5020_v48, 16 }
 0x3f5   :  { %v2728_v38 = vsel %vm2607_vm10, %v2727_v8, %v2726_v42  ;;  %v2749_v42 = vand.u32 3, %v2732_v36  ;;  %v3024_v8 = vand.u32 65535, %v3020_v58 }
 0x3f6   :  { %v2731_v27 = vsel %vm4951_vm12, %v5178_v55, %v2728_v38 }
 0x3f7   :  { %v2733_v47 = vmul.f32 %v2731_v27, %v2731_v27  ;;  %vm2750_vm1 = vcmp.lt.s32.totalorder %v2749_v42, 2  ;;  %vm2751_vm2 = vcmp.eq.s32.totalorder %v2749_v42, 0  ;;  %vm2754_vm4 = vcmp.eq.s32.totalorder %v2749_v42, 2 }
 0x3f9   :  { %v2741_v11 = vmul.f32 -0.00019511016, %v2733_v47  ;;  %v2734_v26 = vmul.f32 -0.001358992, %v2733_v47 }
 0x3fb   :  { %v2742_v31 = vadd.f32 0.008332121, %v2741_v11  ;;  %v2735_v50 = vadd.f32 0.041655596, %v2734_v26  ;;  %v3048_v26 = vmul.u32 %v3046_v52, %v3022_v3 }
 0x3fd   :  { %v2743_v49 = vmul.f32 %v2742_v31, %v2733_v47  ;;  %v2736_v18 = vmul.f32 %v2735_v50, %v2733_v47  ;;  %v3052_v31 = vshll.u32 %v5022_v40, 16 }
 0x3ff   :  { %v2744_v9 = vadd.f32 -0.16666654, %v2743_v49  ;;  %v2737_v0 = vadd.f32 -0.4999988, %v2736_v18  ;;  %vm3056_vm8 = vc.u32 %v3048_v26, %v3052_v31  ;;  %v3058_v50 = vadd.s32 %v3052_v31, %v3048_v26 }
 0x400   :  { %v3057_v6 = vsel %vm3056_vm8, 1, %v5120_v43 }
 0x401   :  { %v2745_v10 = vmul.f32 %v2744_v9, %v2733_v47  ;;  %v2738_v59 = vmul.f32 %v2737_v0, %v2733_v47  ;;  %v3023_v47 = vshrl.u32 %v5015_v16, 16 }
 0x403   :  { %v2746_v61 = vadd.f32 1.0, %v2745_v10  ;;  %v2739_v35 = vadd.f32 1.0, %v2738_v59  ;;  %v3028_v39 = vmul.u32 %v3024_v8, %v3023_v47  ;;  %v3050_v37 = vmul.u32 %v3046_v52, %v3023_v47 }
 0x404   :  { %v3029_v21 = vmul.u32 %v3025_v12, %v3023_v47  ;;  %v3051_v0 = vmul.u32 %v3047_v14, %v3023_v47  ;;  %v3010_v47 = vsel %vm3008_vm0, %v4982_v45, 2102212464 }
 0x405   :  { %v2747_v19 = vmul.f32 %v2746_v61, %v2731_v27  ;;  %v2755_v11 = vxor.u32 2147483648, %v2739_v35  ;;  %v3026_v27 = vmul.u32 %v3024_v8, %v3022_v3  ;;  %v3032_v33 = vshll.u32 %v3028_v39, 16 }
 0x406   :  { %v3054_v57 = vshll.u32 %v3050_v37, 16  ;;  %v3059_v59 = vadd.s32 %v3057_v6, %v3051_v0  ;;  %v3053_v8 = vshrl.u32 %v5022_v40, 16 }
 0x407   :  { %v2752_v38 = vxor.u32 2147483648, %v2747_v19  ;;  %vm3034_vm7 = vc.u32 %v3026_v27, %v3030_v15  ;;  %v2756_v63 = vsel %vm2754_vm4, %v2755_v11, %v2747_v19  ;;  %v2911_v49 = vsel %vm2909_vm6, %v2755_v11, %v2747_v19 }
 0x408   :  { %v3035_v9 = vsel %vm3034_vm7, 1, %v5120_v43  ;;  %v3036_v17 = vadd.s32 %v3030_v15, %v3026_v27  ;;  %vm3060_vm10 = vc.u32 %v3058_v50, %v3054_v57  ;;  %v3033_v11 = vshrl.u32 %v3028_v39, 16 }
 0x409   :  { %v2753_v7 = vsel %vm2751_vm2, %v2739_v35, %v2752_v38  ;;  %v2908_v25 = vsel %vm2906_vm3, %v2739_v35, %v2752_v38  ;;  %v3037_v61 = vadd.s32 %v3035_v9, %v3029_v21  ;;  %v3061_v35 = vsel %vm3060_vm10, 1, %v5120_v43 }
 0x40a   :  { %v2757_v22 = vsel %vm2750_vm1, %v2753_v7, %v2756_v63  ;;  %v2912_v41 = vsel %vm2905_vm5, %v2908_v25, %v2911_v49  ;;  %vm3038_vm11 = vc.u32 %v3036_v17, %v3032_v33  ;;  %v3063_v12 = vadd.s32 %v3061_v35, %v3059_v59 }
 0x40b   :  { %v2758_v2 = vsel %vm2748_vm9, nan, %v2757_v22  ;;  %v2913_v62 = vsel %vm2748_vm9, nan, %v2912_v41  ;;  %v3039_v42 = vsel %vm3038_vm11, 1, %v5120_v43  ;;  %v3031_v38 = vshrl.u32 %v5020_v48, 16 }
 0x40c   :  { %v3041_v14 = vadd.s32 %v3039_v42, %v3037_v61  ;;  %v3064_v52 = vadd.s32 %v3063_v12, %v3053_v8  ;;  %v2989_v43 = vshrl.u32 %v5131_v60, %v4958_v30  ;;  %v3011_v48 = vsel %vm3007_vm14, %v4980_v13, %v3010_v47 }
 0x40d   :  { %v3062_v40 = vadd.s32 %v3058_v50, %v3054_v57  ;;  %vm2975_vm14 = vcmp.lt.s32.totalorder %v5183_v53, 0  ;;  %vm3116_vm7 = vweird.f32 %v5183_v53 }
 0x40e   :  { %v3042_v15 = vadd.s32 %v3041_v14, %v3031_v38  ;;  %v3009_v7 = vsel %vm3005_vm13, %v2989_v43, %v4985_v23 }
 0x40f   :  { %v3012_v26 = vsel %vm3006_vm15, %v3009_v7, %v3011_v48  ;;  %vm2974_vm15 = vcmp.le.f32.partialorder %v2973_v20, 0.7853982 }
 0x410   :  { %v3043_v27 = vadd.s32 %v3042_v15, %v3033_v11  ;;  %v3066_v39 = vmul.u32 %v5015_v16, %v3012_v26 }
 0x412   :  { %vm3068_vm12 = vc.u32 %v3043_v27, %v3062_v40  ;;  %v3067_v1 = vadd.s32 %v3062_v40, %v3043_v27 }
 0x454   :  { %v2591_v56 = vpop.f32.mrf.mxu0 }
 0x458   :  { %v2565_v5 = vpop.f32.mrf.mxu2  ;;  %v2578_v28 = vpop.f32.mrf.mxu3 }
 0x459   :  { %v2596_v4 = vsub.f32 %v2591_v56, %v2565_v5  ;;  %v2595_v32 = vsub.f32 %v2565_v5, %v2578_v28  ;;  %v3055_v56 = vshrl.u32 %v3050_v37, 16 }
 0x45b   :  { %v2597_v44 = vsub.f32 %v2596_v4, %v2578_v28  ;;  %v2914_v34 = vmul.f32 %v2758_v2, %v2595_v32  ;;  %v2917_v54 = vmul.f32 %v2913_v62, %v2595_v32  ;;  %v3065_v31 = vadd.s32 %v3064_v52, %v3055_v56 }
 0x45c   :  { %v2593_v18 = vpop.f32.mrf.mxu0 }
 0x45d   :  { %v2915_v10 = vmul.f32 %v2913_v62, %v2597_v44  ;;  %v2918_v29 = vmul.f32 %v2758_v2, %v2597_v44  ;;  %v3069_v25 = vadd.s32 1, %v3065_v31 }
 0x45f   :  { %v2916_v55 = vsub.f32 %v2914_v34, %v2915_v10  ;;  %v2919_v58 = vadd.f32 %v2918_v29, %v2917_v54  ;;  %v3070_v45 = vsel %vm3068_vm12, %v3069_v25, %v3065_v31 }
 0x460   :  { %v2567_v46 = vpop.f32.mrf.mxu2  ;;  %v2580_v36 = vpop.f32.mrf.mxu3  ;;  %v3071_v5 = vadd.s32 %v3070_v45, %v3066_v39 }
 0x461   :  { %v2922_v51 = vadd.f32 %v2919_v58, %v2916_v55  ;;  %v2920_v3 = vpack.c.bf16 %v2916_v55, %v2916_v55  ;;  %v2921_v19 = vpack.c.bf16 %v2919_v58, %v2919_v58 }
 0x462   :  { %v3072_v60 = vadd.s32 536870912, %v3071_v5 }
 0x463   :  { %2932 = vmatmul.bf16.vlgmr.msrb.gmra.mxu1 %v2920_v3  ;;  %2945 = vmatmul.bf16.vlgmr.msrb.gmra.mxu2 %v2921_v19  ;;  %v2923_v24 = vpack.c.bf16 %v2922_v51, %v2922_v51 }
 0x464   :  { %v3073_v30 = vshrl.u32 %v3072_v60, 30 }
 0x465   :  { %2958 = vmatmul.bf16.vlgmr.msrb.gmra.mxu3 %v2923_v24 }
 0x466   :  { %v3074_v28 = vshll.u32 %v3073_v30, 30  ;;  %v3097_v58 = vsub.s32 4, %v3073_v30 }
 0x468   :  { %v3075_v63 = vsub.s32 %v3071_v5, %v3074_v28  ;;  %v3098_v61 = vsel %vm2975_vm14, %v3097_v58, %v3073_v30 }
 0x469   :  { %v3100_v51 = vsel %vm2974_vm15, 0, %v3098_v61 }
 0x46a   :  { %v3077_v49 = vsub.s32 0, %v3075_v63  ;;  %vm3076_vm0 = vcmp.lt.s32.totalorder %v3075_v63, 0  ;;  %v3271_v35 = vadd.s32 3, %v3100_v51  ;;  %v3117_v12 = vand.u32 3, %v3100_v51 }
 0x46c   :  { %v3078_v23 = vsel %vm3076_vm0, %v3077_v49, %v3075_v63  ;;  %v3272_v14 = vand.u32 3, %v3271_v35  ;;  %vm3119_vm1 = vcmp.eq.s32.totalorder %v3117_v12, 0  ;;  %vm3122_vm3 = vcmp.eq.s32.totalorder %v3117_v12, 2 }
 0x46d   :  { %v3079_v37 = vclz %v3078_v23  ;;  %vm3118_vm5 = vcmp.lt.s32.totalorder %v3117_v12, 2 }
 0x46e   :  { %vm3274_vm2 = vcmp.eq.s32.totalorder %v3272_v14, 0  ;;  %vm3277_vm4 = vcmp.eq.s32.totalorder %v3272_v14, 2  ;;  %vm3273_vm6 = vcmp.lt.s32.totalorder %v3272_v14, 2 }
 0x46f   :  { %v3465_v4 = vadd.s32 4294967294, %v3079_v37 }
 0x471   :  { %vm3466_vm13 = vcmp.lt.s32.totalorder %v3465_v4, 0 }
 0x472   :  { %v3082_v13 = vsel %vm3466_vm13, 0, %v3465_v4 }
 0x473   :  { %v3087_v32 = vsub.s32 4294967266, %v3082_v13  ;;  %v3083_v41 = vsub.s32 32, %v3082_v13  ;;  %v3084_v33 = vshll.u32 %v3075_v63, %v3082_v13 }
 0x475   :  { %v3088_v22 = vadd.s32 127, %v3087_v32  ;;  %v3085_v44 = vshrl.u32 %v3067_v1, %v3083_v41 }
 0x477   :  { %v3089_v50 = vshll.u32 %v3088_v22, 23  ;;  %v3086_v9 = vor.u32 %v3085_v44, %v3084_v33 }
 0x479   :  { %v3090_v16 = vor.u32 4788187, %v3089_v50  ;;  %v3093_v2 = vcvt.s32.f32 %v3086_v9 }
 0x47b   :  { %v3091_v17 = vand.u32 2147483647, %v3090_v16 }
 0x47d   :  { %v3094_v62 = vmul.f32 %v3093_v2, %v3091_v17 }
 0x47f   :  { %v3095_v18 = vxor.u32 2147483648, %v3094_v62 }
 0x481   :  { %v3096_v57 = vsel %vm2975_vm14, %v3095_v18, %v3094_v62 }
 0x482   :  { %v3099_v6 = vsel %vm2974_vm15, %v5183_v53, %v3096_v57 }
 0x483   :  { %v3101_v34 = vmul.f32 %v3099_v6, %v3099_v6 }
 0x485   :  { %v3109_v10 = vmul.f32 -0.00019511016, %v3101_v34  ;;  %v3102_v29 = vmul.f32 -0.001358992, %v3101_v34 }
 0x487   :  { %v3110_v54 = vadd.f32 0.008332121, %v3109_v10  ;;  %v3103_v0 = vadd.f32 0.041655596, %v3102_v29 }
 0x489   :  { %v3111_v21 = vmul.f32 %v3110_v54, %v3101_v34  ;;  %v3104_v46 = vmul.f32 %v3103_v0, %v3101_v34 }
 0x48b   :  { %v3112_v55 = vadd.f32 -0.16666654, %v3111_v21  ;;  %v3105_v59 = vadd.f32 -0.4999988, %v3104_v46 }
 0x48d   :  { %v3113_v36 = vmul.f32 %v3112_v55, %v3101_v34  ;;  %v3106_v19 = vmul.f32 %v3105_v59, %v3101_v34 }
 0x48f   :  { %v3114_v3 = vadd.f32 1.0, %v3113_v36  ;;  %v3107_v24 = vadd.f32 1.0, %v3106_v19 }
 0x491   :  { %v3115_v42 = vmul.f32 %v3114_v3, %v3099_v6  ;;  %v3123_v38 = vxor.u32 2147483648, %v3107_v24 }
 0x493   :  { %v3120_v8 = vxor.u32 2147483648, %v3115_v42  ;;  %v3124_v11 = vsel %vm3122_vm3, %v3123_v38, %v3115_v42  ;;  %v3279_v47 = vsel %vm3277_vm4, %v3123_v38, %v3115_v42 }
 0x495   :  { %v3121_v15 = vsel %vm3119_vm1, %v3107_v24, %v3120_v8  ;;  %v3276_v56 = vsel %vm3274_vm2, %v3107_v24, %v3120_v8 }
 0x496   :  { %v3125_v7 = vsel %vm3118_vm5, %v3121_v15, %v3124_v11  ;;  %v3280_v48 = vsel %vm3273_vm6, %v3276_v56, %v3279_v47 }
 0x497   :  { %v3126_v26 = vsel %vm3116_vm7, nan, %v3125_v7  ;;  %v3281_v45 = vsel %vm3116_vm7, nan, %v3280_v48 }
 0x4e0   :  { %v2933_v20 = vpop.f32.mrf.mxu1 }
 0x4e6   :  { %v2946_v52 = vpop.f32.mrf.mxu2 }
 0x4e7   :  { %v2963_v27 = vsub.f32 %v2933_v20, %v2946_v52 }
 0x4e8   :  { %v2935_v31 = vpop.f32.mrf.mxu1  ;;  %v2959_v43 = vpop.f32.mrf.mxu3 }
 0x4e9   :  { %v2964_v40 = vsub.f32 %v2959_v43, %v2933_v20  ;;  %v3282_v39 = vmul.f32 %v3126_v26, %v2963_v27  ;;  %v3285_v5 = vmul.f32 %v3281_v45, %v2963_v27 }
 0x4eb   :  { %v2965_v25 = vsub.f32 %v2964_v40, %v2946_v52 }
 0x4ed   :  { %v3283_v60 = vmul.f32 %v3281_v45, %v2965_v25  ;;  %v3286_v30 = vmul.f32 %v3126_v26, %v2965_v25 }
 0x4ee   :  { %v2948_v53 = vpop.f32.mrf.mxu2 }
 0x4ef   :  { %v3284_v28 = vsub.f32 %v3282_v39, %v3283_v60  ;;  %v3287_v63 = vadd.f32 %v3286_v30, %v3285_v5 }
 0x4f0   :  { %v2961_v49 = vpop.f32.mrf.mxu3 }
 0x4f1   :  { %3288 = vst [vmem:[#allocation14] sm:$0xff] %v3284_v28 }
 0x4f2   :  { %3289 = vst [vmem:[#allocation15] sm:$0xff] %v3287_v63  ;;  %3300 = dma.vmem_to_hbm [thread:$0]  %s3296_s6, 128, %s3298_s1, [#allocation4]  }
 0x4f3   :  { %3311 = dma.vmem_to_hbm [thread:$0]  %s3307_s20, 128, %s3309_s3, [#allocation16]  }
 0x4f4   :  { %3773 = dma.done.wait [#allocation4], 128  }
 0x4f5   :  { %3774 = vsyncadd [#allocation4], 4294967168 }
 0x4f6   :  { %3775 = dma.done.wait [#allocation16], 128  }
 0x4f7   :  { %3776 = vsyncadd [#allocation16], 4294967168 }
 0x4f8   :  { %3320 = vsyncpa [#allocation3], 1 }
 0x4f9   :  { %3321 = vsyncpa [#allocation6], 1 }
 0x4fa   :  { %3322 = vsyncpa [#allocation9], 1 }
 0x4fb   :  { %3323 = vsyncpa [#allocation12], 1 }
 0x4fc   :  { %3324 = vsyncpa [#allocation4], 1 }
 0x4fd   :  { %3325 = vsyncpa [#allocation16], 1 }

// kernel: tpu_custom_call.1
= control target key start
LH: loop header
LB: loop body
LE: loop exit
PB: predicated region body
PF: predicated region fallthrough
CT: control target
= control target key end

     0   :  { %14 = vsyncpa [#allocation3], 0  ;;  %s5060_s0 = inlined_call_operand.hbm [shape: f32[8,128], index: 0, kind: input, shape index: {}]   ;;  %s5061_s1 = inlined_call_operand.hbm [shape: f32[8,128], index: 1, kind: input, shape index: {}]   ;;  %s5062_s2 = inlined_call_operand.hbm [shape: f32[8,8], index: 2, kind: input, shape index: {}]   ;;  %s5063_s3 = inlined_call_operand.hbm [shape: f32[8,8,128], index: 3, kind: input, shape index: {}]   ;;  %s5064_s4 = inlined_call_operand.hbm [shape: bf16[128,128], index: 4, kind: input, shape index: {}]   ;;  %s5065_s5 = inlined_call_operand.hbm [shape: bf16[128,128], index: 5, kind: input, shape index: {}]   ;;  %s5066_s6 = inlined_call_operand.hbm [shape: bf16[128,128], index: 6, kind: input, shape index: {}]   ;;  %s5067_s7 = inlined_call_operand.hbm [shape: f32[8,128], index: 7, kind: output, shape index: {0}]   ;;  %s5068_s8 = inlined_call_operand.hbm [shape: f32[8,128], index: 8, kind: output, shape index: {1}]  }
   0x1   :  { %15 = vsyncpa [#allocation6], 0 }
   0x2   :  { %16 = vsyncpa [#allocation9], 0 }
   0x3   :  { %17 = vsyncpa [#allocation12], 0 }
   0x4   :  { %18 = vsyncpa [#allocation4], 0  ;;  %s36_s29 = sshll.u32 %s5061_s1, 4  ;;  %s37_s29 = int_to_ptr.hbm [resolvable:$true] %s36_s29 }
   0x5   :  { %19 = vsyncpa [#allocation16], 0  ;;  %s3777_s30 = smov [#allocation5]   ;;  %s57_s12 = sshll.u32 %s5063_s3, 4  ;;  %s58_s12 = int_to_ptr.hbm [resolvable:$true] %s57_s12 }
   0x6   :  { %s38_s9 = sshll.u32 %s3777_s30, 4  ;;  %s3778_s13 = smov [#allocation8]   ;;  %s39_s9 = int_to_ptr.vmem [resolvable:$true] %s38_s9 }
   0x7   :  { %41 = dma.hbm_to_vmem [thread:$0]  %s37_s29, 128, %s39_s9, [#allocation6]  }
   0x8   :  { %s59_s14 = sshll.u32 %s3778_s13, 4  ;;  %s3779_s15 = smov 128   ;;  %s60_s14 = int_to_ptr.vmem [resolvable:$true] %s59_s14 }
   0x9   :  { %s3780_s16 = smov 8   ;;  %s83_s1 = sshll.u32 %s5065_s5, 4  ;;  %s84_s1 = int_to_ptr.hbm [resolvable:$true] %s83_s1 }
   0xa   :  { %65 = dma.hbm_to_vmem [thread:$0]  %s58_s12, 1024, %s60_s14, [#allocation9], %s3779_s15, %s3779_s15, %s3780_s16  }
   0xb   :  { %s3781_s19 = smov [#allocation11]   ;;  %s25_s3 = sshll.u32 %s5060_s0, 4  ;;  %s26_s3 = int_to_ptr.hbm [resolvable:$true] %s25_s3 }
   0xc   :  { %s85_s20 = sshll.u32 %s3781_s19, 4  ;;  %s3782_s23 = smov 64   ;;  %s86_s20 = int_to_ptr.vmem [resolvable:$true] %s85_s20 }
   0xd   :  { %s3783_s24 = smov 4   ;;  %s3784_s25 = smov [#allocation2]  }
   0xe   :  { %91 = dma.hbm_to_vmem [thread:$0]  %s84_s1, 1024, %s86_s20, [#allocation12], %s3782_s23, %s3782_s23, %s3783_s24  }
   0xf   :  { %s27_s26 = sshll.u32 %s3784_s25, 4  ;;  %s47_s29 = sshll.u32 %s5062_s2, 4  ;;  %s28_s26 = int_to_ptr.vmem [resolvable:$true] %s27_s26  ;;  %s48_s29 = int_to_ptr.hbm [resolvable:$true] %s47_s29 }
  0x10   :  { %30 = dma.hbm_to_vmem [thread:$0]  %s26_s3, 128, %s28_s26, [#allocation3]  }
  0x11   :  { %s70_s9 = sshll.u32 %s5064_s4, 4  ;;  %s3785_s10 = smov [#allocation7]   ;;  %s71_s9 = int_to_ptr.hbm [resolvable:$true] %s70_s9 }
  0x12   :  { %s49_s11 = sshll.u32 %s3785_s10, 4  ;;  %s3786_s0 = smov [#allocation10]   ;;  %s50_s11 = int_to_ptr.vmem [resolvable:$true] %s49_s11 }
  0x13   :  { %52 = dma.hbm_to_vmem [thread:$0]  %s48_s29, 128, %s50_s11, [#allocation6]  }
  0x14   :  { %s72_s12 = sshll.u32 %s3786_s0, 4  ;;  %s96_s15 = sshll.u32 %s5066_s6, 4  ;;  %s73_s12 = int_to_ptr.vmem [resolvable:$true] %s72_s12  ;;  %s97_s15 = int_to_ptr.hbm [resolvable:$true] %s96_s15 }
  0x15   :  { %78 = dma.hbm_to_vmem [thread:$0]  %s71_s9, 1024, %s73_s12, [#allocation9], %s3782_s23, %s3782_s23, %s3783_s24  }
  0x16   :  { %s3787_s2 = smov [#allocation13]  }
  0x17   :  { %s98_s16 = sshll.u32 %s3787_s2, 4  ;;  %s99_s16 = int_to_ptr.vmem [resolvable:$true] %s98_s16 }
  0x18   :  { %104 = dma.hbm_to_vmem [thread:$0]  %s97_s15, 1024, %s99_s16, [#allocation12], %s3782_s23, %s3782_s23, %s3783_s24  }
  0x19   :  { %3765 = dma.done.wait [#allocation3], 128  }
  0x1a   :  { %3766 = vsyncadd [#allocation3], 4294967168 }
  0x1b   :  { %3767 = dma.done.wait [#allocation6], 256  }
  0x1c   :  { %3768 = vsyncadd [#allocation6], 4294967040 }
  0x1d   :  { %3769 = dma.done.wait [#allocation9], 2048  }
  0x1e   :  { %3770 = vsyncadd [#allocation9], 4294965248 }
  0x1f   :  { %3771 = dma.done.wait [#allocation12], 2048  }
  0x20   :  { %3772 = vsyncadd [#allocation12], 4294965248  ;;  %v5080_v0 = vmov 0   ;;  %v189_v1 = vld [vmem:[#allocation7] sm:$0xff]  ;;  %v3872_v5 = vld [vmem:[#allocation13 + $0x30] sm:$0xff]  ;;  %v3789_v11 = vmov 1  }
  0x21   :  { %3515 = vset.pattern.permute.xlu0 %v5080_v0  ;;  %v3865_v2 = vld [vmem:[#allocation13 + $0x38] sm:$0xff]  ;;  %v3876_v6 = vld [vmem:[#allocation10 + $0x30] sm:$0xff]  ;;  %v3882_v8 = vld [vmem:[#allocation13 + $0x28] sm:$0xff]  ;;  %s3796_s4 = smov [#allocation14]   ;;  %s3297_s1 = sshll.u32 %s5067_s7, 4  ;;  %s3298_s1 = int_to_ptr.hbm [resolvable:$true] %s3297_s1 }
  0x22   :  { %385 = vperm.xlu0 %3515, %v189_v1   ;;  %v3867_v3 = vld [vmem:[#allocation10 + $0x38] sm:$0xff]  ;;  %366 = vmatpush.bf16.msra.mxu2 %v3865_v2  ;;  %v3878_v7 = vld [vmem:[#allocation11 + $0x30] sm:$0xff]  ;;  %v3886_v9 = vld [vmem:[#allocation10 + $0x28] sm:$0xff]  ;;  %s3295_s6 = sshll.u32 %s3796_s4, 4  ;;  %s3797_s19 = smov [#allocation15]   ;;  %s3296_s6 = int_to_ptr.vmem [resolvable:$true] %s3295_s6 }
  0x23   :  { %v3869_v4 = vld [vmem:[#allocation11 + $0x38] sm:$0xff]  ;;  %244 = vmatpush.bf16.msra.mxu0 %v3867_v3  ;;  %716 = vmatpush.bf16.msra.mxu3 %v3867_v3  ;;  %v3888_v10 = vld [vmem:[#allocation11 + $0x28] sm:$0xff]  ;;  %v3892_v12 = vld [vmem:[#allocation13 + $0x20] sm:$0xff]  ;;  %s3306_s20 = sshll.u32 %s3797_s19, 4  ;;  %s3308_s3 = sshll.u32 %s5068_s8, 4  ;;  %s3307_s20 = int_to_ptr.vmem [resolvable:$true] %s3306_s20  ;;  %s3309_s3 = int_to_ptr.hbm [resolvable:$true] %s3308_s3 }
  0x24   :  { %305 = vmatpush.bf16.msra.mxu1 %v3869_v4  ;;  %v3896_v13 = vld [vmem:[#allocation10 + $0x20] sm:$0xff]  ;;  %v3902_v15 = vld [vmem:[#allocation13 + $0x18] sm:$0xff]  ;;  %v3912_v18 = vld [vmem:[#allocation13 + $0x10] sm:$0xff] }
  0x25   :  { %v3898_v14 = vld [vmem:[#allocation11 + $0x20] sm:$0xff]  ;;  %v3906_v16 = vld [vmem:[#allocation10 + $0x18] sm:$0xff]  ;;  %v3916_v19 = vld [vmem:[#allocation10 + $0x10] sm:$0xff] }
  0x26   :  { %367 = vmatpush.bf16.msra.mxu2 %v3872_v5  ;;  %v3908_v17 = vld [vmem:[#allocation11 + $0x18] sm:$0xff]  ;;  %v3918_v20 = vld [vmem:[#allocation11 + $0x10] sm:$0xff]  ;;  %v3922_v21 = vld [vmem:[#allocation13 + $0x8] sm:$0xff] }
  0x27   :  { %245 = vmatpush.bf16.msra.mxu0 %v3876_v6  ;;  %717 = vmatpush.bf16.msra.mxu3 %v3876_v6  ;;  %v137_v22 = vld [vmem:[#allocation2] sm:$0xff]  ;;  %v139_v23 = vld [vmem:[#allocation5] sm:$0xff]  ;;  %v3932_v27 = vld [vmem:[#allocation13] sm:$0xff] }
  0x28   :  { %306 = vmatpush.bf16.msra.mxu1 %v3878_v7  ;;  %v3926_v24 = vld [vmem:[#allocation10 + $0x8] sm:$0xff]  ;;  %v194_v26 = vadd.f32 %v139_v23, %v137_v22  ;;  %v3936_v28 = vld [vmem:[#allocation10] sm:$0xff]  ;;  %v192_v31 = vpack.c.bf16 %v137_v22, %v137_v22  ;;  %v193_v32 = vpack.c.bf16 %v139_v23, %v139_v23  ;;  %v1127_v36 = vld [vmem:[#allocation8 + $0x10] sm:$0xff] }
  0x29   :  { %v3928_v25 = vld [vmem:[#allocation11 + $0x8] sm:$0xff]  ;;  %v3938_v29 = vld [vmem:[#allocation11] sm:$0xff]  ;;  %v1495_v37 = vld [vmem:[#allocation8 + $0x18] sm:$0xff]  ;;  %v1128_v44 = vperm.slane %v1127_v36, 0  ;;  %v1130_v52 = vperm.slane %v1127_v36, 1 }
  0x2a   :  { %3516 = vset.pattern.permute.xlu0 %v3789_v11  ;;  %368 = vmatpush.bf16.msra.mxu2 %v3882_v8  ;;  %v195_v30 = vpack.c.bf16 %v194_v26, %v194_v26  ;;  %v382_v34 = vld [vmem:[#allocation8] sm:$0xff]  ;;  %v759_v35 = vld [vmem:[#allocation8 + $0x8] sm:$0xff]  ;;  %v2599_v40 = vld [vmem:[#allocation8 + $0x30] sm:$0xff]  ;;  %v1496_v45 = vperm.slane %v1495_v37, 0  ;;  %v1498_v53 = vperm.slane %v1495_v37, 1 }
  0x2b   :  { %391 = vperm.xlu0 %3516, %v189_v1   ;;  %246 = vmatpush.bf16.msra.mxu0 %v3886_v9  ;;  %v1863_v38 = vld [vmem:[#allocation8 + $0x20] sm:$0xff]  ;;  %v2231_v39 = vld [vmem:[#allocation8 + $0x28] sm:$0xff]  ;;  %v2967_v41 = vld [vmem:[#allocation8 + $0x38] sm:$0xff]  ;;  %v388_v42 = vperm.slane %v382_v34, 0  ;;  %v760_v43 = vperm.slane %v759_v35, 0  ;;  %v2600_v48 = vperm.slane %v2599_v40, 0 }
  0x2c   :  { %307 = vmatpush.bf16.msra.mxu1 %v3888_v10  ;;  %718 = vmatpush.bf16.msra.mxu3 %v3886_v9  ;;  %v1864_v46 = vperm.slane %v1863_v38, 0  ;;  %v2232_v47 = vperm.slane %v2231_v39, 0  ;;  %v2968_v49 = vperm.slane %v2967_v41, 0  ;;  %v394_v50 = vperm.slane %v382_v34, 1 }
  0x2d   :  { %v762_v51 = vperm.slane %v759_v35, 1  ;;  %v1866_v54 = vperm.slane %v1863_v38, 1  ;;  %v2234_v55 = vperm.slane %v2231_v39, 1  ;;  %v2602_v56 = vperm.slane %v2599_v40, 1 }
  0x2e   :  { %369 = vmatpush.bf16.msra.mxu2 %v3892_v12  ;;  %v2970_v57 = vperm.slane %v2967_v41, 1 }
  0x2f   :  { %247 = vmatpush.bf16.msra.mxu0 %v3896_v13 }
  0x30   :  { %308 = vmatpush.bf16.msra.mxu1 %v3898_v14  ;;  %719 = vmatpush.bf16.msra.mxu3 %v3896_v13 }
  0x32   :  { %370 = vmatpush.bf16.msra.mxu2 %v3902_v15 }
  0x33   :  { %248 = vmatpush.bf16.msra.mxu0 %v3906_v16 }
  0x34   :  { %309 = vmatpush.bf16.msra.mxu1 %v3908_v17  ;;  %720 = vmatpush.bf16.msra.mxu3 %v3906_v16 }
  0x36   :  { %371 = vmatpush.bf16.msra.mxu2 %v3912_v18 }
  0x37   :  { %249 = vmatpush.bf16.msra.mxu0 %v3916_v19 }
  0x38   :  { %310 = vmatpush.bf16.msra.mxu1 %v3918_v20  ;;  %721 = vmatpush.bf16.msra.mxu3 %v3916_v19 }
  0x3a   :  { %372 = vmatpush.bf16.msra.mxu2 %v3922_v21 }
  0x3b   :  { %250 = vmatpush.bf16.msra.mxu0 %v3926_v24 }
  0x3c   :  { %311 = vmatpush.bf16.msra.mxu1 %v3928_v25  ;;  %722 = vmatpush.bf16.msra.mxu3 %v3926_v24 }
  0x3e   :  { %373 = vmatpush.bf16.msra.mxu2 %v3932_v27 }
  0x3f   :  { %251 = vmatpush.bf16.msra.mxu0 %v3936_v28 }
  0x40   :  { %312 = vmatpush.bf16.msra.mxu1 %v3938_v29  ;;  %723 = vmatpush.bf16.msra.mxu3 %v3936_v28 }
  0x41   :  { %374 = vmatmul.bf16.vlgmr.msra.gmra.mxu2 %v195_v30 }
  0x42   :  { %252 = vmatmul.bf16.vlgmr.msra.gmra.mxu0 %v192_v31  ;;  %1084 = vmatpush.bf16.msrb.mxu2 %v3867_v3 }
  0x43   :  { %729 = vmatpush.bf16.msrb.mxu0 %v3869_v4  ;;  %313 = vmatmul.bf16.vlgmr.msra.gmra.mxu1 %v193_v32 }
  0x44   :  { %742 = vmatpush.bf16.msrb.mxu1 %v3865_v2  ;;  %1097 = vmatpush.bf16.msrb.mxu3 %v3869_v4 }
  0x46   :  { %1085 = vmatpush.bf16.msrb.mxu2 %v3876_v6 }
  0x47   :  { %730 = vmatpush.bf16.msrb.mxu0 %v3878_v7 }
  0x48   :  { %743 = vmatpush.bf16.msrb.mxu1 %v3872_v5  ;;  %1098 = vmatpush.bf16.msrb.mxu3 %v3878_v7 }
  0x4a   :  { %1086 = vmatpush.bf16.msrb.mxu2 %v3886_v9 }
  0x4b   :  { %731 = vmatpush.bf16.msrb.mxu0 %v3888_v10 }
  0x4c   :  { %744 = vmatpush.bf16.msrb.mxu1 %v3882_v8  ;;  %1099 = vmatpush.bf16.msrb.mxu3 %v3888_v10 }
  0x4e   :  { %1087 = vmatpush.bf16.msrb.mxu2 %v3896_v13 }
  0x4f   :  { %732 = vmatpush.bf16.msrb.mxu0 %v3898_v14 }
  0x50   :  { %745 = vmatpush.bf16.msrb.mxu1 %v3892_v12  ;;  %1100 = vmatpush.bf16.msrb.mxu3 %v3898_v14 }
  0x52   :  { %1088 = vmatpush.bf16.msrb.mxu2 %v3906_v16 }
  0x53   :  { %733 = vmatpush.bf16.msrb.mxu0 %v3908_v17 }
  0x54   :  { %746 = vmatpush.bf16.msrb.mxu1 %v3902_v15  ;;  %1101 = vmatpush.bf16.msrb.mxu3 %v3908_v17 }
  0x56   :  { %1089 = vmatpush.bf16.msrb.mxu2 %v3916_v19 }
  0x57   :  { %734 = vmatpush.bf16.msrb.mxu0 %v3918_v20 }
  0x58   :  { %747 = vmatpush.bf16.msrb.mxu1 %v3912_v18  ;;  %1102 = vmatpush.bf16.msrb.mxu3 %v3918_v20 }
  0x5a   :  { %1090 = vmatpush.bf16.msrb.mxu2 %v3926_v24 }
  0x5b   :  { %735 = vmatpush.bf16.msrb.mxu0 %v3928_v25 }
  0x5c   :  { %748 = vmatpush.bf16.msrb.mxu1 %v3922_v21  ;;  %1103 = vmatpush.bf16.msrb.mxu3 %v3928_v25 }
  0x5e   :  { %1091 = vmatpush.bf16.msrb.mxu2 %v3936_v28 }
  0x5f   :  { %736 = vmatpush.bf16.msrb.mxu0 %v3938_v29 }
  0x60   :  { %749 = vmatpush.bf16.msrb.mxu1 %v3932_v27  ;;  %1104 = vmatpush.bf16.msrb.mxu3 %v3938_v29 }
  0x62   :  { %1465 = vmatpush.bf16.msra.mxu2 %v3869_v4 }
  0x63   :  { %1110 = vmatpush.bf16.msra.mxu0 %v3865_v2 }
  0x64   :  { %1452 = vmatpush.bf16.msra.mxu1 %v3867_v3 }
  0x66   :  { %1466 = vmatpush.bf16.msra.mxu2 %v3878_v7 }
  0x67   :  { %1111 = vmatpush.bf16.msra.mxu0 %v3872_v5 }
  0x68   :  { %1453 = vmatpush.bf16.msra.mxu1 %v3876_v6 }
  0x6a   :  { %1467 = vmatpush.bf16.msra.mxu2 %v3888_v10 }
  0x6b   :  { %1112 = vmatpush.bf16.msra.mxu0 %v3882_v8 }
  0x6c   :  { %1454 = vmatpush.bf16.msra.mxu1 %v3886_v9 }
  0x6e   :  { %1468 = vmatpush.bf16.msra.mxu2 %v3898_v14 }
  0x6f   :  { %1113 = vmatpush.bf16.msra.mxu0 %v3892_v12 }
  0x70   :  { %1455 = vmatpush.bf16.msra.mxu1 %v3896_v13 }
  0x72   :  { %1469 = vmatpush.bf16.msra.mxu2 %v3908_v17 }
  0x73   :  { %1114 = vmatpush.bf16.msra.mxu0 %v3902_v15 }
  0x74   :  { %1456 = vmatpush.bf16.msra.mxu1 %v3906_v16 }
  0x76   :  { %1470 = vmatpush.bf16.msra.mxu2 %v3918_v20 }
  0x77   :  { %1115 = vmatpush.bf16.msra.mxu0 %v3912_v18 }
  0x78   :  { %1457 = vmatpush.bf16.msra.mxu1 %v3916_v19 }
  0x7a   :  { %1471 = vmatpush.bf16.msra.mxu2 %v3928_v25 }
  0x7b   :  { %1116 = vmatpush.bf16.msra.mxu0 %v3922_v21 }
  0x7c   :  { %1458 = vmatpush.bf16.msra.mxu1 %v3926_v24 }
  0x7e   :  { %1472 = vmatpush.bf16.msra.mxu2 %v3938_v29 }
  0x7f   :  { %1117 = vmatpush.bf16.msra.mxu0 %v3932_v27 }
  0x80   :  { %1459 = vmatpush.bf16.msra.mxu1 %v3936_v28 }
  0x94   :  { %v386_v33 = vpop.permute.xlu0 %385 }
  0x95   :  { %v389_v58 = vmul.f32 %v388_v42, %v386_v33  ;;  %v761_v59 = vmul.f32 %v760_v43, %v386_v33  ;;  %v1129_v60 = vmul.f32 %v1128_v44, %v386_v33  ;;  %v1497_v61 = vmul.f32 %v1496_v45, %v386_v33 }
  0x96   :  { %v1865_v62 = vmul.f32 %v1864_v46, %v386_v33  ;;  %v2233_v63 = vmul.f32 %v2232_v47, %v386_v33  ;;  %v2601_v1 = vmul.f32 %v2600_v48, %v386_v33  ;;  %v2969_v11 = vmul.f32 %v2968_v49, %v386_v33 }
  0x9d   :  { %v392_v22 = vpop.permute.xlu0 %391 }
  0x9e   :  { %v395_v23 = vmul.f32 %v394_v50, %v392_v22  ;;  %v763_v26 = vmul.f32 %v762_v51, %v392_v22  ;;  %v1131_v30 = vmul.f32 %v1130_v52, %v392_v22  ;;  %v1499_v31 = vmul.f32 %v1498_v53, %v392_v22 }
  0x9f   :  { %v1867_v32 = vmul.f32 %v1866_v54, %v392_v22  ;;  %v2235_v34 = vmul.f32 %v2234_v55, %v392_v22  ;;  %v2603_v35 = vmul.f32 %v2602_v56, %v392_v22  ;;  %v2971_v36 = vmul.f32 %v2970_v57, %v392_v22 }
  0xa0   :  { %v4001_v37 = vadd.f32 %v395_v23, %v389_v58  ;;  %v4003_v38 = vadd.f32 %v763_v26, %v761_v59  ;;  %v4005_v39 = vadd.f32 %v1131_v30, %v1129_v60  ;;  %v4007_v40 = vadd.f32 %v1499_v31, %v1497_v61 }
  0xa1   :  { %v4009_v41 = vadd.f32 %v1867_v32, %v1865_v62  ;;  %v4011_v33 = vadd.f32 %v2235_v34, %v2233_v63  ;;  %v4013_v42 = vadd.f32 %v2603_v35, %v2601_v1  ;;  %v4015_v43 = vadd.f32 %v2971_v36, %v2969_v11 }
  0xa2   :  { %5114 = vst [vmem:[#allocation23_spill] sm:$0xff] %v4003_v38  ;;  %v400_v44 = vand.u32 2139095040, %v4001_v37  ;;  %v5069_v50 = vand.u32 2147483647, %v4001_v37  ;;  %v5088_v53 = vmov 683565275  }
  0xa3   :  { %5115 = vst [vmem:[#allocation24_spill] sm:$0xff] %v4007_v40  ;;  %v5070_v56 = vmov 2475754826   ;;  %v5074_v59 = vmov 2131351028  }
  0xa4   :  { %5116 = vst [vmem:[#allocation25_spill] sm:$0xff] %v4009_v41  ;;  %v401_v45 = vshrl.u32 %v400_v44, 23  ;;  %v404_v55 = vand.u32 8388607, %v5069_v50  ;;  %v5072_v62 = vmov 2102212464  }
  0xa5   :  { %5117 = vst [vmem:[#allocation26_spill] sm:$0xff] %v4011_v33  ;;  %v5076_v11 = vmov 920167782   ;;  %v5078_v35 = vmov 1326507024  }
  0xa6   :  { %5118 = vst [vmem:[#allocation27_spill] sm:$0xff] %v4013_v42  ;;  %v3422_v46 = vadd.s32 4294967169, %v401_v45  ;;  %v405_v23 = vor.u32 8388608, %v404_v55 }
  0xa7   :  { %5119 = vst [vmem:[#allocation28_spill] sm:$0xff] %v4015_v43  ;;  %v5120_v43 = vmov 0  }
  0xa8   :  { %v407_v47 = vadd.s32 1, %v3422_v46 }
  0xaa   :  { %vm408_vm0 = vcmp.gt.s32.totalorder %v407_v47, 0 }
  0xab   :  { %v409_v48 = vsel %vm408_vm0, %v407_v47, 0  ;;  %vm399_vm0 = vcmp.lt.s32.totalorder %v4001_v37, 0 }
  0xac   :  { %v411_v49 = vand.u32 31, %v409_v48  ;;  %v4019_v52 = vshrl.u32 %v409_v48, 5  ;;  %v4042_v48 = vshll.u32 %v405_v23, 8 }
  0xae   :  { %v412_v51 = vsub.s32 32, %v411_v49  ;;  %v414_v54 = vshll.u32 %v5088_v53, %v411_v49  ;;  %v417_v58 = vshll.u32 %v5070_v56, %v411_v49  ;;  %v420_v60 = vshll.u32 %v5074_v59, %v411_v49 }
  0xaf   :  { %v423_v1 = vshll.u32 %v5072_v62, %v411_v49  ;;  %v426_v30 = vshll.u32 %v5076_v11, %v411_v49  ;;  %vm429_vm1 = vcmp.lt.s32.totalorder %v4019_v52, 1  ;;  %vm432_vm2 = vcmp.lt.s32.totalorder %v4019_v52, 4 }
  0xb0   :  { %v415_v57 = vshrl.u32 %v5070_v56, %v412_v51  ;;  %v418_v61 = vshrl.u32 %v5074_v59, %v412_v51  ;;  %v421_v63 = vshrl.u32 %v5072_v62, %v412_v51  ;;  %v424_v22 = vshrl.u32 %v5076_v11, %v412_v51 }
  0xb1   :  { %v427_v36 = vshrl.u32 %v5078_v35, %v412_v51  ;;  %vm431_vm3 = vcmp.lt.s32.totalorder %v4019_v52, 3  ;;  %vm430_vm4 = vcmp.lt.s32.totalorder %v4019_v52, 2 }
  0xb2   :  { %v416_v26 = vor.u32 %v415_v57, %v414_v54  ;;  %v419_v31 = vor.u32 %v418_v61, %v417_v58  ;;  %v422_v32 = vor.u32 %v421_v63, %v420_v60  ;;  %v425_v34 = vor.u32 %v424_v22, %v423_v1 }
  0xb3   :  { %v428_v44 = vor.u32 %v427_v36, %v426_v30  ;;  %v446_v58 = vand.u32 65535, %v4042_v48  ;;  %v447_v61 = vshrl.u32 %v4042_v48, 16 }
  0xb4   :  { %v437_v45 = vsel %vm429_vm1, %v416_v26, %v419_v31  ;;  %v438_v46 = vsel %vm432_vm2, %v425_v34, 920167782  ;;  %v441_v47 = vsel %vm429_vm1, %v419_v31, %v422_v32  ;;  %v434_v41 = vsel %vm432_vm2, %v422_v32, 2102212464 }
  0xb5   :  { %v439_v49 = vsel %vm431_vm3, %v422_v32, %v438_v46  ;;  %v442_v54 = vsel %vm432_vm2, %v428_v44, 1326507024  ;;  %v435_v32 = vsel %vm431_vm3, %v419_v31, %v434_v41 }
  0xb6   :  { %v440_v55 = vsel %vm430_vm4, %v437_v45, %v439_v49  ;;  %v443_v57 = vsel %vm431_vm3, %v425_v34, %v442_v54  ;;  %v768_v49 = vand.u32 2139095040, %v4003_v38  ;;  %vm540_vm3 = vweird.f32 %v4001_v37 }
  0xb7   :  { %v444_v60 = vsel %vm430_vm4, %v441_v47, %v443_v57  ;;  %v470_v63 = vand.u32 65535, %v440_v55  ;;  %v471_v1 = vshrl.u32 %v440_v55, 16  ;;  %v413_v47 = vshrl.u32 %v5088_v53, %v412_v51 }
  0xb8   :  { %v448_v22 = vand.u32 65535, %v444_v60  ;;  %v449_v23 = vshrl.u32 %v444_v60, 16 }
  0xb9   :  { %v473_v30 = vmul.u32 %v471_v1, %v446_v58  ;;  %v474_v36 = vmul.u32 %v470_v63, %v447_v61  ;;  %v472_v54 = vmul.u32 %v470_v63, %v446_v58  ;;  %v475_v59 = vmul.u32 %v471_v1, %v447_v61 }
  0xba   :  { %v451_v50 = vmul.u32 %v449_v23, %v446_v58  ;;  %v452_v45 = vmul.u32 %v448_v22, %v447_v61  ;;  %v450_v57 = vmul.u32 %v448_v22, %v446_v58  ;;  %v453_v55 = vmul.u32 %v449_v23, %v447_v61 }
  0xbb   :  { %v476_v56 = vshll.u32 %v473_v30, 16  ;;  %v478_v11 = vshll.u32 %v474_v36, 16  ;;  %v477_v1 = vshrl.u32 %v473_v30, 16 }
  0xbc   :  { %v454_v62 = vshll.u32 %v451_v50, 16  ;;  %v456_v35 = vshll.u32 %v452_v45, 16 }
  0xbd   :  { %vm480_vm5 = vc.u32 %v472_v54, %v476_v56  ;;  %v482_v60 = vadd.s32 %v476_v56, %v472_v54  ;;  %v433_v56 = vsel %vm429_vm1, %v413_v47, %v416_v26  ;;  %v455_v54 = vshrl.u32 %v451_v50, 16 }
  0xbe   :  { %vm458_vm6 = vc.u32 %v450_v57, %v454_v62  ;;  %v460_v0 = vadd.s32 %v454_v62, %v450_v57  ;;  %v481_v42 = vsel %vm480_vm5, 1, %v5120_v43  ;;  %v436_v26 = vsel %vm430_vm4, %v433_v56, %v435_v32 }
  0xbf   :  { %v253_v44 = vpop.f32.mrf.mxu0  ;;  %v459_v63 = vsel %vm458_vm6, 1, %v5120_v43  ;;  %v483_v40 = vadd.s32 %v481_v42, %v475_v59  ;;  %vm484_vm7 = vc.u32 %v482_v60, %v478_v11 }
  0xc0   :  { %v314_v46 = vpop.f32.mrf.mxu1  ;;  %v461_v58 = vadd.s32 %v459_v63, %v453_v55  ;;  %vm462_vm8 = vc.u32 %v460_v0, %v456_v35  ;;  %v485_v61 = vsel %vm484_vm7, 1, %v5120_v43  ;;  %v457_v35 = vshrl.u32 %v452_v45, 16 }
  0xc1   :  { %v4058_v34 = vsub.f32 %v253_v44, %v314_v46  ;;  %v463_v62 = vsel %vm462_vm8, 1, %v5120_v43  ;;  %v487_v22 = vadd.s32 %v485_v61, %v483_v40  ;;  %v769_v55 = vshrl.u32 %v768_v49, 23 }
  0xc2   :  { %v465_v42 = vadd.s32 %v463_v62, %v461_v58  ;;  %v486_v40 = vadd.s32 %v482_v60, %v478_v11 }
  0xc3   :  { %v488_v0 = vadd.s32 %v487_v22, %v477_v1  ;;  %v3428_v41 = vadd.s32 4294967169, %v769_v55 }
  0xc4   :  { %v375_v33 = vpop.f32.mrf.mxu2  ;;  %v466_v57 = vadd.s32 %v465_v42, %v455_v54 }
  0xc5   :  { %v380_v51 = vsub.f32 %v375_v33, %v253_v44  ;;  %v479_v44 = vshrl.u32 %v474_v36, 16  ;;  %v775_v36 = vadd.s32 1, %v3428_v41  ;;  %v5124_v41 = vmov 2102212464  }
  0xc6   :  { %v467_v30 = vadd.s32 %v466_v57, %v457_v35  ;;  %v5122_v57 = vmov 920167782  }
  0xc7   :  { %v4069_v23 = vsub.f32 %v380_v51, %v314_v46  ;;  %v255_v59 = vpop.f32.mrf.mxu0  ;;  %v489_v47 = vadd.s32 %v488_v0, %v479_v44  ;;  %v490_v51 = vmul.u32 %v4042_v48, %v436_v26  ;;  %vm776_vm10 = vcmp.gt.s32.totalorder %v775_v36, 0 }
  0xc8   :  { %v316_v33 = vpop.f32.mrf.mxu1  ;;  %vm492_vm9 = vc.u32 %v467_v30, %v486_v40  ;;  %v777_v49 = vsel %vm776_vm10, %v775_v36, 0  ;;  %v491_v32 = vadd.s32 %v486_v40, %v467_v30  ;;  %v5121_v0 = vmov 1326507024  }
  0xc9   :  { %v493_v46 = vadd.s32 1, %v489_v47  ;;  %v779_v60 = vand.u32 31, %v777_v49  ;;  %v4085_v26 = vshrl.u32 %v777_v49, 5  ;;  %v5123_v30 = vmov 2131351028  }
  0xca   :  { %v5125_v36 = vmov 2475754826  }
  0xcb   :  { %v494_v50 = vsel %vm492_vm9, %v493_v46, %v489_v47  ;;  %v4079_v48 = vsub.s32 32, %v779_v60  ;;  %v785_v49 = vshll.u32 %v5125_v36, %v779_v60  ;;  %vm800_vm13 = vcmp.lt.s32.totalorder %v4085_v26, 4 }
  0xcc   :  { %v377_v63 = vpop.f32.mrf.mxu2  ;;  %v495_v31 = vadd.s32 %v494_v50, %v490_v51  ;;  %v5087_v51 = vand.u32 2147483647, %v4003_v38  ;;  %vm797_vm14 = vcmp.lt.s32.totalorder %v4085_v26, 1  ;;  %vm799_vm15 = vcmp.lt.s32.totalorder %v4085_v26, 3 }
  0xcd   :  { %v795_v35 = vshrl.u32 %v5121_v0, %v4079_v48  ;;  %v792_v55 = vshrl.u32 %v5122_v57, %v4079_v48  ;;  %v794_v63 = vshll.u32 %v5122_v57, %v779_v60  ;;  %v786_v40 = vshrl.u32 %v5123_v30, %v4079_v48 }
  0xce   :  { %v496_v58 = vadd.s32 536870912, %v495_v31  ;;  %v789_v50 = vshrl.u32 %v5124_v41, %v4079_v48  ;;  %vm798_vm2 = vcmp.lt.s32.totalorder %v4085_v26, 2 }
  0xd0   :  { %v4076_v61 = vshrl.u32 %v496_v58, 30 }
  0xd2   :  { %v498_v45 = vshll.u32 %v4076_v61, 30 }
  0xd4   :  { %v499_v52 = vsub.s32 %v495_v31, %v498_v45  ;;  %v791_v31 = vshll.u32 %v5124_v41, %v779_v60  ;;  %v783_v45 = vshrl.u32 %v5125_v36, %v4079_v48 }
  0xd6   :  { %vm500_vm11 = vcmp.lt.s32.totalorder %v499_v52, 0  ;;  %v501_v56 = vsub.s32 0, %v499_v52 }
  0xd8   :  { %v502_v11 = vsel %vm500_vm11, %v501_v56, %v499_v52  ;;  %v788_v56 = vshll.u32 %v5123_v30, %v779_v60 }
  0xd9   :  { %v503_v62 = vclz %v502_v11  ;;  %v793_v11 = vor.u32 %v792_v55, %v791_v31 }
  0xdb   :  { %v3423_v1 = vadd.s32 4294967294, %v503_v62 }
  0xdd   :  { %vm3424_vm12 = vcmp.lt.s32.totalorder %v3423_v1, 0 }
  0xde   :  { %v506_v22 = vsel %vm3424_vm12, 0, %v3423_v1 }
  0xdf   :  { %v507_v54 = vsub.s32 32, %v506_v22  ;;  %v511_v42 = vsub.s32 4294967266, %v506_v22  ;;  %v508_v59 = vshll.u32 %v499_v52, %v506_v22  ;;  %v796_v52 = vor.u32 %v795_v35, %v794_v63 }
  0xe0   :  { %v782_v22 = vshll.u32 %v5088_v53, %v779_v60  ;;  %v806_v35 = vsel %vm800_vm13, %v793_v11, 920167782  ;;  %v5126_v63 = vand.u32 2147483647, %v4001_v37 }
  0xe1   :  { %v509_v33 = vshrl.u32 %v491_v32, %v507_v54  ;;  %v512_v44 = vadd.s32 127, %v511_v42  ;;  %v772_v32 = vand.u32 8388607, %v5087_v51  ;;  %v4101_v54 = vor.u32 %v786_v40, %v785_v49 }
  0xe2   :  { %v4103_v42 = vor.u32 %v789_v50, %v788_v56  ;;  %vm4123_vm1 = vcmp.le.f32.partialorder %v5126_v63, 0.7853982 }
  0xe3   :  { %v510_v47 = vor.u32 %v509_v33, %v508_v59  ;;  %v513_v46 = vshll.u32 %v512_v44, 23  ;;  %v4106_v33 = vor.u32 %v783_v45, %v782_v22  ;;  %v810_v44 = vsel %vm800_vm13, %v796_v52, 1326507024 }
  0xe4   :  { %v773_v60 = vor.u32 8388608, %v772_v32  ;;  %v521_v45 = vsub.s32 4, %v4076_v61 }
  0xe5   :  { %v514_v58 = vor.u32 4788187, %v513_v46  ;;  %v517_v1 = vcvt.s32.f32 %v510_v47  ;;  %v809_v47 = vsel %vm797_vm14, %v4101_v54, %v4103_v42  ;;  %v811_v46 = vsel %vm799_vm15, %v793_v11, %v810_v44 }
  0xe6   :  { %v805_v31 = vsel %vm797_vm14, %v4106_v33, %v4101_v54  ;;  %v812_v56 = vsel %vm798_vm2, %v809_v47, %v811_v46  ;;  %v522_v32 = vsel %vm399_vm0, %v521_v45, %v4076_v61 }
  0xe7   :  { %v515_v62 = vand.u32 2147483647, %v514_v58  ;;  %v807_v58 = vsel %vm799_vm15, %v4103_v42, %v806_v35  ;;  %v524_v47 = vsel %vm4123_vm1, 0, %v522_v32 }
  0xe8   :  { %v808_v11 = vsel %vm798_vm2, %v805_v31, %v807_v58  ;;  %v816_v31 = vand.u32 65535, %v812_v56  ;;  %v695_v45 = vadd.s32 3, %v524_v47  ;;  %v541_v30 = vand.u32 3, %v524_v47 }
  0xe9   :  { %v518_v59 = vmul.f32 %v517_v1, %v515_v62  ;;  %v4145_v62 = vshll.u32 %v773_v60, 8  ;;  %v838_v58 = vand.u32 65535, %v808_v11 }
  0xea   :  { %vm542_vm4 = vcmp.lt.s32.totalorder %v541_v30, 2  ;;  %vm543_vm6 = vcmp.eq.s32.totalorder %v541_v30, 0  ;;  %vm546_vm8 = vcmp.eq.s32.totalorder %v541_v30, 2 }
  0xeb   :  { %v519_v55 = vxor.u32 2147483648, %v518_v59  ;;  %v814_v63 = vand.u32 65535, %v4145_v62  ;;  %v815_v36 = vshrl.u32 %v4145_v62, 16 }
  0xed   :  { %v520_v50 = vsel %vm399_vm0, %v519_v55, %v518_v59  ;;  %v817_v59 = vshrl.u32 %v812_v56, 16  ;;  %v839_v55 = vshrl.u32 %v808_v11, 16  ;;  %v4158_v41 = vmul.u32 %v816_v31, %v815_v36 }
  0xee   :  { %v523_v52 = vsel %vm4123_vm1, %v4001_v37, %v520_v50  ;;  %v4161_v32 = vmul.u32 %v838_v58, %v815_v36  ;;  %v840_v57 = vmul.u32 %v838_v58, %v814_v63 }
  0xef   :  { %v525_v49 = vmul.f32 %v523_v52, %v523_v52  ;;  %v4153_v60 = vmul.u32 %v817_v59, %v814_v63  ;;  %v4156_v61 = vmul.u32 %v839_v55, %v814_v63 }
  0xf1   :  { %v526_v1 = vmul.f32 -0.001358992, %v525_v49  ;;  %v533_v22 = vmul.f32 -0.00019511016, %v525_v49  ;;  %v822_v40 = vshll.u32 %v4153_v60, 16  ;;  %v844_v11 = vshll.u32 %v4156_v61, 16 }
  0xf3   :  { %v527_v44 = vadd.f32 0.041655596, %v526_v1  ;;  %v534_v35 = vadd.f32 0.008332121, %v533_v22  ;;  %vm848_vm7 = vc.u32 %v840_v57, %v844_v11 }
  0xf5   :  { %v528_v46 = vmul.f32 %v527_v44, %v525_v49  ;;  %v535_v50 = vmul.f32 %v534_v35, %v525_v49  ;;  %v696_v35 = vand.u32 3, %v695_v45  ;;  %v850_v45 = vadd.s32 %v844_v11, %v840_v57 }
  0xf7   :  { %v529_v51 = vadd.f32 -0.4999988, %v528_v46  ;;  %v536_v53 = vadd.f32 -0.16666654, %v535_v50  ;;  %v818_v46 = vmul.u32 %v816_v31, %v814_v63  ;;  %v821_v50 = vmul.u32 %v817_v59, %v815_v36 }
  0xf8   :  { %vm697_vm9 = vcmp.lt.s32.totalorder %v696_v35, 2  ;;  %vm698_vm10 = vcmp.eq.s32.totalorder %v696_v35, 0  ;;  %vm701_vm11 = vcmp.eq.s32.totalorder %v696_v35, 2 }
  0xf9   :  { %v530_v1 = vmul.f32 %v529_v51, %v525_v49  ;;  %v537_v22 = vmul.f32 %v536_v53, %v525_v49  ;;  %v824_v53 = vshll.u32 %v4158_v41, 16  ;;  %v843_v49 = vmul.u32 %v839_v55, %v815_v36 }
  0xfa   :  { %vm4166_vm5 = vc.u32 %v818_v46, %v822_v40 }
  0xfb   :  { %v531_v56 = vadd.f32 1.0, %v530_v1  ;;  %v538_v44 = vadd.f32 1.0, %v537_v22  ;;  %v828_v1 = vadd.s32 %v822_v40, %v818_v46  ;;  %v846_v22 = vshll.u32 %v4161_v32, 16 }
  0xfc   :  { %v827_v58 = vsel %vm4166_vm5, 1, %v5120_v43  ;;  %v849_v40 = vsel %vm848_vm7, 1, %v5120_v43 }
  0xfd   :  { %v539_v0 = vmul.f32 %v538_v44, %v523_v52  ;;  %v547_v51 = vxor.u32 2147483648, %v531_v56  ;;  %vm830_vm12 = vc.u32 %v828_v1, %v824_v53  ;;  %vm852_vm0 = vc.u32 %v850_v45, %v846_v22 }
  0xfe   :  { %v851_v11 = vadd.s32 %v849_v40, %v843_v49  ;;  %v853_v47 = vsel %vm852_vm0, 1, %v5120_v43 }
  0xff   :  { %v544_v38 = vxor.u32 2147483648, %v539_v0  ;;  %v548_v59 = vsel %vm546_vm8, %v547_v51, %v539_v0  ;;  %v703_v36 = vsel %vm701_vm11, %v547_v51, %v539_v0  ;;  %v829_v51 = vadd.s32 %v827_v58, %v821_v50 }
 0x100   :  { %v855_v1 = vadd.s32 %v853_v47, %v851_v11 }
 0x101   :  { %v545_v52 = vsel %vm543_vm6, %v531_v56, %v544_v38  ;;  %v700_v63 = vsel %vm698_vm10, %v531_v56, %v544_v38 }
 0x102   :  { %v549_v55 = vsel %vm542_vm4, %v545_v52, %v548_v59  ;;  %v704_v31 = vsel %vm697_vm9, %v700_v63, %v703_v36  ;;  %v831_v52 = vsel %vm830_vm12, 1, %v5120_v43 }
 0x103   :  { %v550_v57 = vsel %vm540_vm3, nan, %v549_v55  ;;  %v705_v44 = vsel %vm540_vm3, nan, %v704_v31  ;;  %v833_v36 = vadd.s32 %v831_v52, %v829_v51  ;;  %v847_v55 = vshrl.u32 %v4161_v32, 16 }
 0x104   :  { %v706_v38 = vmul.f32 %v550_v57, %v4058_v34  ;;  %v707_v0 = vmul.f32 %v705_v44, %v4069_v23  ;;  %v709_v30 = vmul.f32 %v705_v44, %v4058_v34  ;;  %v710_v56 = vmul.f32 %v550_v57, %v4069_v23  ;;  %v5132_v44 = vld [vmem:[#allocation23_spill] sm:$0xff] }
 0x105   :  { %v845_v34 = vshrl.u32 %v4156_v61, 16  ;;  %v823_v23 = vshrl.u32 %v4153_v60, 16  ;;  %v825_v31 = vshrl.u32 %v4158_v41, 16  ;;  %v5131_v60 = vmov 683565275  }
 0x106   :  { %v711_v35 = vadd.f32 %v710_v56, %v709_v30  ;;  %v708_v46 = vsub.f32 %v706_v38, %v707_v0  ;;  %v781_v61 = vshrl.u32 %v5131_v60, %v4079_v48  ;;  %v854_v41 = vadd.s32 %v850_v45, %v846_v22 }
 0x107   :  { %v856_v50 = vadd.s32 %v855_v1, %v845_v34  ;;  %v834_v49 = vadd.s32 %v833_v36, %v823_v23  ;;  %vm767_vm1 = vcmp.lt.s32.totalorder %v5132_v44, 0  ;;  %v5133_v0 = vand.u32 2147483647, %v5132_v44 }
 0x108   :  { %v712_v37 = vpack.c.bf16 %v708_v46, %v708_v46  ;;  %v713_v59 = vpack.c.bf16 %v711_v35, %v711_v35  ;;  %v714_v53 = vadd.f32 %v711_v35, %v708_v46  ;;  %v1133_v23 = vand.u32 2147483647, %v4005_v39 }
 0x109   :  { %vm4237_vm3 = vcmp.le.f32.partialorder %v5133_v0, 0.7853982 }
 0x10a   :  { %724 = vmatmul.bf16.vlgmr.msra.gmra.mxu3 %v712_v37  ;;  %737 = vmatmul.bf16.vlgmr.msrb.gmra.mxu0 %v713_v59  ;;  %v715_v63 = vpack.c.bf16 %v714_v53, %v714_v53  ;;  %v5136_v37 = vmov 1326507024   ;;  %v5137_v53 = vmov 920167782  }
 0x10b   :  { %1478 = vmatpush.bf16.msra.mxu3 %v3865_v2  ;;  %1820 = vmatpush.bf16.msrb.mxu0 %v3867_v3  ;;  %v802_v2 = vsel %vm800_vm13, %v4103_v42, 2102212464  ;;  %v857_v3 = vadd.s32 %v856_v50, %v847_v55  ;;  %v5138_v50 = vmov 2131351028   ;;  %v5139_v55 = vmov 2102212464  }
 0x10c   :  { %750 = vmatmul.bf16.vlgmr.msrb.gmra.mxu1 %v715_v63 }
 0x10d   :  { %1833 = vmatpush.bf16.msrb.mxu1 %v3869_v4  ;;  %v835_v4 = vadd.s32 %v834_v49, %v825_v31  ;;  %v861_v42 = vadd.s32 1, %v857_v3 }
 0x10f   :  { %1479 = vmatpush.bf16.msra.mxu3 %v3872_v5  ;;  %1821 = vmatpush.bf16.msrb.mxu0 %v3876_v6  ;;  %v801_v5 = vsel %vm797_vm14, %v781_v61, %v4106_v33  ;;  %v803_v6 = vsel %vm799_vm15, %v4101_v54, %v802_v2  ;;  %vm860_vm13 = vc.u32 %v835_v4, %v854_v41  ;;  %v5140_v61 = vmov 2475754826  }
 0x111   :  { %1834 = vmatpush.bf16.msrb.mxu1 %v3878_v7  ;;  %v804_v7 = vsel %vm798_vm2, %v801_v5, %v803_v6 }
 0x113   :  { %1480 = vmatpush.bf16.msra.mxu3 %v3882_v8  ;;  %1822 = vmatpush.bf16.msrb.mxu0 %v3886_v9  ;;  %v862_v8 = vsel %vm860_vm13, %v861_v42, %v857_v3  ;;  %v858_v9 = vmul.u32 %v4145_v62, %v804_v7 }
 0x115   :  { %1835 = vmatpush.bf16.msrb.mxu1 %v3888_v10  ;;  %v863_v48 = vadd.s32 %v862_v8, %v858_v9  ;;  %v1140_v9 = vand.u32 8388607, %v1133_v23 }
 0x117   :  { %1481 = vmatpush.bf16.msra.mxu3 %v3892_v12  ;;  %1823 = vmatpush.bf16.msrb.mxu0 %v3896_v13  ;;  %v864_v10 = vadd.s32 536870912, %v863_v48 }
 0x119   :  { %1836 = vmatpush.bf16.msrb.mxu1 %v3898_v14  ;;  %v4224_v12 = vshrl.u32 %v864_v10, 30 }
 0x11b   :  { %1482 = vmatpush.bf16.msra.mxu3 %v3902_v15  ;;  %1824 = vmatpush.bf16.msrb.mxu0 %v3906_v16  ;;  %v866_v13 = vshll.u32 %v4224_v12, 30 }
 0x11d   :  { %1837 = vmatpush.bf16.msrb.mxu1 %v3908_v17  ;;  %v867_v14 = vsub.s32 %v863_v48, %v866_v13 }
 0x11f   :  { %1483 = vmatpush.bf16.msra.mxu3 %v3912_v18  ;;  %1825 = vmatpush.bf16.msrb.mxu0 %v3916_v19  ;;  %v869_v15 = vsub.s32 0, %v867_v14  ;;  %vm868_vm14 = vcmp.lt.s32.totalorder %v867_v14, 0 }
 0x121   :  { %1838 = vmatpush.bf16.msrb.mxu1 %v3918_v20  ;;  %v870_v16 = vsel %vm868_vm14, %v869_v15, %v867_v14 }
 0x122   :  { %v871_v17 = vclz %v870_v16  ;;  %v889_v16 = vsub.s32 4, %v4224_v12 }
 0x123   :  { %1484 = vmatpush.bf16.msra.mxu3 %v3922_v21  ;;  %1826 = vmatpush.bf16.msrb.mxu0 %v3926_v24 }
 0x124   :  { %v3429_v18 = vadd.s32 4294967294, %v871_v17 }
 0x125   :  { %1839 = vmatpush.bf16.msrb.mxu1 %v3928_v25  ;;  %v859_v25 = vadd.s32 %v854_v41, %v835_v4 }
 0x126   :  { %vm3430_vm15 = vcmp.lt.s32.totalorder %v3429_v18, 0 }
 0x127   :  { %1485 = vmatpush.bf16.msra.mxu3 %v3932_v27  ;;  %1827 = vmatpush.bf16.msrb.mxu0 %v3936_v28  ;;  %v874_v19 = vsel %vm3430_vm15, 0, %v3429_v18  ;;  %v1136_v28 = vand.u32 2139095040, %v4005_v39  ;;  %vm908_vm15 = vweird.f32 %v5132_v44 }
 0x128   :  { %v879_v20 = vsub.s32 4294967266, %v874_v19  ;;  %v875_v24 = vsub.s32 32, %v874_v19  ;;  %v876_v54 = vshll.u32 %v867_v14, %v874_v19  ;;  %v1141_v19 = vor.u32 8388608, %v1140_v9 }
 0x129   :  { %1840 = vmatpush.bf16.msrb.mxu1 %v3938_v29  ;;  %v1137_v29 = vshrl.u32 %v1136_v28, 23 }
 0x12a   :  { %v880_v21 = vadd.s32 127, %v879_v20  ;;  %v877_v27 = vshrl.u32 %v859_v25, %v875_v24 }
 0x12b   :  { %v3434_v45 = vadd.s32 4294967169, %v1137_v29 }
 0x12c   :  { %v881_v26 = vshll.u32 %v880_v21, 23  ;;  %v878_v62 = vor.u32 %v877_v27, %v876_v54  ;;  %v890_v27 = vsel %vm767_vm1, %v889_v16, %v4224_v12 }
 0x12d   :  { %v1143_v40 = vadd.s32 1, %v3434_v45  ;;  %v892_v29 = vsel %vm4237_vm3, 0, %v890_v27 }
 0x12e   :  { %v882_v33 = vor.u32 4788187, %v881_v26  ;;  %v885_v22 = vcvt.s32.f32 %v878_v62  ;;  %v4301_v62 = vshll.u32 %v1141_v19, 8 }
 0x12f   :  { %vm1144_vm2 = vcmp.gt.s32.totalorder %v1143_v40, 0 }
 0x130   :  { %v883_v32 = vand.u32 2147483647, %v882_v33  ;;  %v1145_v56 = vsel %vm1144_vm2, %v1143_v40, 0  ;;  %v1063_v40 = vadd.s32 3, %v892_v29  ;;  %v1182_v12 = vand.u32 65535, %v4301_v62 }
 0x131   :  { %v1147_v35 = vand.u32 31, %v1145_v56  ;;  %v4250_v63 = vshrl.u32 %v1145_v56, 5  ;;  %v1183_v0 = vshrl.u32 %v4301_v62, 16 }
 0x132   :  { %v886_v58 = vmul.f32 %v885_v22, %v883_v32 }
 0x133   :  { %v4244_v47 = vsub.s32 32, %v1147_v35  ;;  %v1162_v34 = vshll.u32 %v5137_v53, %v1147_v35  ;;  %v1159_v2 = vshll.u32 %v5139_v55, %v1147_v35  ;;  %v1153_v6 = vshll.u32 %v5140_v61, %v1147_v35 }
 0x134   :  { %v887_v57 = vxor.u32 2147483648, %v886_v58  ;;  %v1156_v41 = vshll.u32 %v5138_v50, %v1147_v35  ;;  %v1150_v8 = vshll.u32 %v5131_v60, %v1147_v35  ;;  %vm1168_vm4 = vcmp.lt.s32.totalorder %v4250_v63, 4 }
 0x135   :  { %v1163_v59 = vshrl.u32 %v5136_v37, %v4244_v47  ;;  %v1160_v1 = vshrl.u32 %v5137_v53, %v4244_v47  ;;  %v1154_v49 = vshrl.u32 %v5138_v50, %v4244_v47  ;;  %v1157_v31 = vshrl.u32 %v5139_v55, %v4244_v47 }
 0x136   :  { %v888_v38 = vsel %vm767_vm1, %v887_v57, %v886_v58  ;;  %v1151_v4 = vshrl.u32 %v5140_v61, %v4244_v47  ;;  %vm1165_vm5 = vcmp.lt.s32.totalorder %v4250_v63, 1  ;;  %vm1167_vm6 = vcmp.lt.s32.totalorder %v4250_v63, 3 }
 0x137   :  { %v891_v11 = vsel %vm4237_vm3, %v5132_v44, %v888_v38  ;;  %v1164_v5 = vor.u32 %v1163_v59, %v1162_v34  ;;  %v1161_v42 = vor.u32 %v1160_v1, %v1159_v2  ;;  %v4266_v48 = vor.u32 %v1154_v49, %v1153_v6 }
 0x138   :  { %v893_v46 = vmul.f32 %v891_v11, %v891_v11  ;;  %v4268_v10 = vor.u32 %v1157_v31, %v1156_v41  ;;  %v4271_v14 = vor.u32 %v1151_v4, %v1150_v8  ;;  %vm1166_vm7 = vcmp.lt.s32.totalorder %v4250_v63, 2  ;;  %v4398_v63 = vld [vmem:[#allocation10 + $0x18] sm:$0xff] }
 0x139   :  { %v1178_v15 = vsel %vm1168_vm4, %v1164_v5, 1326507024  ;;  %v1174_v17 = vsel %vm1168_vm4, %v1161_v42, 920167782  ;;  %v1064_v59 = vand.u32 3, %v1063_v40 }
 0x13a   :  { %v901_v51 = vmul.f32 -0.00019511016, %v893_v46  ;;  %v894_v36 = vmul.f32 -0.001358992, %v893_v46  ;;  %v1177_v20 = vsel %vm1165_vm5, %v4266_v48, %v4268_v10  ;;  %v1179_v21 = vsel %vm1167_vm6, %v1161_v42, %v1178_v15 }
 0x13b   :  { %v1173_v25 = vsel %vm1165_vm5, %v4271_v14, %v4266_v48  ;;  %v1175_v26 = vsel %vm1167_vm6, %v4268_v10, %v1174_v17  ;;  %v1180_v54 = vsel %vm1166_vm7, %v1177_v20, %v1179_v21  ;;  %vm1066_vm11 = vcmp.eq.s32.totalorder %v1064_v59, 0 }
 0x13c   :  { %v902_v52 = vadd.f32 0.008332121, %v901_v51  ;;  %v895_v7 = vadd.f32 0.041655596, %v894_v36  ;;  %v1176_v33 = vsel %vm1166_vm7, %v1173_v25, %v1175_v26  ;;  %v1185_v22 = vshrl.u32 %v1180_v54, 16 }
 0x13d   :  { %v1207_v58 = vshrl.u32 %v1176_v33, 16  ;;  %v1184_v57 = vand.u32 65535, %v1180_v54  ;;  %v909_v51 = vand.u32 3, %v892_v29  ;;  %vm1065_vm12 = vcmp.lt.s32.totalorder %v1064_v59, 2 }
 0x13e   :  { %v903_v3 = vmul.f32 %v902_v52, %v893_v46  ;;  %v896_v18 = vmul.f32 %v895_v7, %v893_v46  ;;  %v4307_v56 = vmul.u32 %v1185_v22, %v1182_v12  ;;  %vm1069_vm0 = vcmp.eq.s32.totalorder %v1064_v59, 2 }
 0x13f   :  { %v4309_v52 = vmul.u32 %v1207_v58, %v1182_v12  ;;  %v4311_v30 = vmul.u32 %v1184_v57, %v1183_v0  ;;  %vm910_vm8 = vcmp.lt.s32.totalorder %v909_v51, 2  ;;  %vm911_vm9 = vcmp.eq.s32.totalorder %v909_v51, 0 }
 0x140   :  { %v904_v13 = vadd.f32 -0.16666654, %v903_v3  ;;  %v897_v28 = vadd.f32 -0.4999988, %v896_v18  ;;  %v1190_v34 = vshll.u32 %v4307_v56, 16  ;;  %vm914_vm10 = vcmp.eq.s32.totalorder %v909_v51, 2 }
 0x141   :  { %v1212_v2 = vshll.u32 %v4309_v52, 16  ;;  %v1192_v3 = vshll.u32 %v4311_v30, 16  ;;  %v1189_v21 = vmul.u32 %v1185_v22, %v1183_v0 }
 0x142   :  { %v905_v24 = vmul.f32 %v904_v13, %v893_v46  ;;  %v898_v45 = vmul.f32 %v897_v28, %v893_v46  ;;  %v1206_v46 = vand.u32 65535, %v1176_v33 }
 0x144   :  { %v906_v32 = vadd.f32 1.0, %v905_v24  ;;  %v899_v35 = vadd.f32 1.0, %v898_v45  ;;  %v1208_v6 = vmul.u32 %v1206_v46, %v1182_v12  ;;  %v4316_v41 = vmul.u32 %v1206_v46, %v1183_v0 }
 0x146   :  { %v907_v38 = vmul.f32 %v906_v32, %v891_v11  ;;  %v915_v31 = vxor.u32 2147483648, %v899_v35  ;;  %v1186_v11 = vmul.u32 %v1184_v57, %v1182_v12  ;;  %vm1216_vm14 = vc.u32 %v1208_v6, %v1212_v2 }
 0x147   :  { %v4322_v15 = vadd.s32 %v1212_v2, %v1208_v6  ;;  %v1214_v24 = vshll.u32 %v4316_v41, 16  ;;  %v1217_v28 = vsel %vm1216_vm14, 1, %v5120_v43  ;;  %v1211_v32 = vmul.u32 %v1207_v58, %v1183_v0  ;;  %v4344_v2 = vld [vmem:[#allocation10 + $0x38] sm:$0xff] }
 0x148   :  { %v912_v36 = vxor.u32 2147483648, %v907_v38  ;;  %vm4318_vm13 = vc.u32 %v1186_v11, %v1190_v34  ;;  %v1196_v7 = vadd.s32 %v1190_v34, %v1186_v11  ;;  %v916_v9 = vsel %vm914_vm10, %v915_v31, %v907_v38  ;;  %v4341_v11 = vld [vmem:[#allocation13 + $0x38] sm:$0xff] }
 0x149   :  { %v1071_v13 = vsel %vm1069_vm0, %v915_v31, %v907_v38  ;;  %v1195_v26 = vsel %vm4318_vm13, 1, %v5120_v43  ;;  %vm1220_vm2 = vc.u32 %v4322_v15, %v1214_v24  ;;  %v1219_v12 = vadd.s32 %v1217_v28, %v1211_v32  ;;  %v4401_v28 = vld [vmem:[#allocation11 + $0x18] sm:$0xff]  ;;  %v4413_v32 = vld [vmem:[#allocation13 + $0x8] sm:$0xff] }
 0x14a   :  { %v913_v4 = vsel %vm911_vm9, %v899_v35, %v912_v36  ;;  %v1068_v5 = vsel %vm1066_vm11, %v899_v35, %v912_v36  ;;  %vm4330_vm1 = vc.u32 %v1196_v7, %v1192_v3  ;;  %v1197_v35 = vadd.s32 %v1195_v26, %v1189_v21  ;;  %v4355_v7 = vld [vmem:[#allocation10 + $0x30] sm:$0xff]  ;;  %v4391_v26 = vld [vmem:[#allocation11 + $0x20] sm:$0xff] }
 0x14b   :  { %v917_v18 = vsel %vm910_vm8, %v913_v4, %v916_v9  ;;  %v1072_v19 = vsel %vm1065_vm12, %v1068_v5, %v1071_v13  ;;  %v1221_v51 = vsel %vm1220_vm2, 1, %v5120_v43  ;;  %v1213_v31 = vshrl.u32 %v4309_v52, 16  ;;  %v4348_v5 = vld [vmem:[#allocation11 + $0x38] sm:$0xff]  ;;  %v4352_v52 = vld [vmem:[#allocation13 + $0x30] sm:$0xff] }
 0x14c   :  { %v918_v54 = vsel %vm908_vm15, nan, %v917_v18  ;;  %v1073_v33 = vsel %vm908_vm15, nan, %v1072_v19  ;;  %v1223_v0 = vadd.s32 %v1221_v51, %v1219_v12  ;;  %v1191_v3 = vshrl.u32 %v4307_v56, 16  ;;  %v4362_v13 = vld [vmem:[#allocation11 + $0x30] sm:$0xff]  ;;  %v4370_v18 = vld [vmem:[#allocation10 + $0x28] sm:$0xff]  ;;  %v4427_v12 = vld [vmem:[#allocation10] sm:$0xff] }
 0x14d   :  { %v1215_v42 = vshrl.u32 %v4316_v41, 16  ;;  %v1170_v56 = vsel %vm1168_vm4, %v4268_v10, 2102212464  ;;  %v1149_v41 = vshrl.u32 %v5131_v60, %v4244_v47  ;;  %v1222_v19 = vadd.s32 %v4322_v15, %v1214_v24  ;;  %v4395_v24 = vld [vmem:[#allocation13 + $0x18] sm:$0xff]  ;;  %5146 = vst [vmem:[#allocation29_spill] sm:$0xff] %v4427_v12 }
 0x14e   :  { %v1224_v4 = vadd.s32 %v1223_v0, %v1213_v31  ;;  %vm4440_vm8 = vcmp.le.f32.partialorder %v1133_v23, 0.7853982 }
 0x14f   :  { %v1169_v10 = vsel %vm1165_vm5, %v1149_v41, %v4271_v14  ;;  %v4388_v14 = vld [vmem:[#allocation10 + $0x20] sm:$0xff] }
 0x150   :  { %v1225_v9 = vadd.s32 %v1224_v4, %v1215_v42  ;;  %v5148_v4 = vld [vmem:[#allocation24_spill] sm:$0xff] }
 0x152   :  { %v1229_v47 = vadd.s32 1, %v1225_v9 }
 0x187   :  { %v738_v1 = vpop.f32.mrf.mxu0 }
 0x189   :  { %v751_v49 = vpop.f32.mrf.mxu1 }
 0x18d   :  { %v725_v8 = vpop.f32.mrf.mxu3 }
 0x18e   :  { %v755_v16 = vsub.f32 %v725_v8, %v738_v1  ;;  %v756_v17 = vsub.f32 %v751_v49, %v725_v8  ;;  %v1193_v8 = vshrl.u32 %v4311_v30, 16  ;;  %v1171_v30 = vsel %vm1167_vm6, %v4266_v48, %v1170_v56 }
 0x18f   :  { %v740_v20 = vpop.f32.mrf.mxu0  ;;  %v1172_v21 = vsel %vm1166_vm7, %v1169_v10, %v1171_v30  ;;  %vm1135_vm6 = vcmp.lt.s32.totalorder %v4005_v39, 0 }
 0x190   :  { %v757_v25 = vsub.f32 %v756_v17, %v738_v1  ;;  %v1074_v44 = vmul.f32 %v918_v54, %v755_v16  ;;  %v1077_v45 = vmul.f32 %v1073_v33, %v755_v16  ;;  %v1199_v1 = vsel %vm4330_vm1, 1, %v5120_v43  ;;  %v4367_v17 = vld [vmem:[#allocation13 + $0x28] sm:$0xff] }
 0x191   :  { %v753_v29 = vpop.f32.mrf.mxu1  ;;  %v1201_v49 = vadd.s32 %v1199_v1, %v1197_v35  ;;  %v4380_v20 = vld [vmem:[#allocation11 + $0x28] sm:$0xff]  ;;  %v1226_v15 = vmul.u32 %v4301_v62, %v1172_v21 }
 0x192   :  { %v1075_v22 = vmul.f32 %v1073_v33, %v757_v25  ;;  %v1078_v40 = vmul.f32 %v918_v54, %v757_v25  ;;  %v4385_v25 = vld [vmem:[#allocation13 + $0x20] sm:$0xff]  ;;  %v4404_v54 = vld [vmem:[#allocation13 + $0x10] sm:$0xff] }
 0x193   :  { %v1202_v6 = vadd.s32 %v1201_v49, %v1191_v3  ;;  %v4407_v33 = vld [vmem:[#allocation10 + $0x10] sm:$0xff] }
 0x194   :  { %v1076_v57 = vsub.f32 %v1074_v44, %v1075_v22  ;;  %v1079_v38 = vadd.f32 %v1078_v40, %v1077_v45  ;;  %v4410_v29 = vld [vmem:[#allocation11 + $0x10] sm:$0xff]  ;;  %v4416_v44 = vld [vmem:[#allocation10 + $0x8] sm:$0xff]  ;;  %v4424_v40 = vld [vmem:[#allocation13] sm:$0xff] }
 0x195   :  { %v727_v59 = vpop.f32.mrf.mxu3  ;;  %v1203_v16 = vadd.s32 %v1202_v6, %v1193_v8  ;;  %v4421_v45 = vld [vmem:[#allocation11 + $0x8] sm:$0xff]  ;;  %5145 = vst [vmem:[#allocation23_spill] sm:$0xff] %v4424_v40  ;;  %v1504_v6 = vand.u32 2139095040, %v5148_v4 }
 0x196   :  { %v1082_v36 = vadd.f32 %v1079_v38, %v1076_v57  ;;  %v1080_v46 = vpack.c.bf16 %v1076_v57, %v1076_v57  ;;  %v1081_v58 = vpack.c.bf16 %v1079_v38, %v1079_v38  ;;  %v4431_v38 = vld [vmem:[#allocation11] sm:$0xff] }
 0x197   :  { %vm1228_vm3 = vc.u32 %v1203_v16, %v1222_v19  ;;  %5147 = vst [vmem:[#allocation30_spill] sm:$0xff] %v4431_v38  ;;  %v1227_v49 = vadd.s32 %v1222_v19, %v1203_v16 }
 0x198   :  { %1092 = vmatmul.bf16.vlgmr.msrb.gmra.mxu2 %v1080_v46  ;;  %1105 = vmatmul.bf16.vlgmr.msrb.gmra.mxu3 %v1081_v58  ;;  %v1083_v34 = vpack.c.bf16 %v1082_v36, %v1082_v36  ;;  %v1230_v48 = vsel %vm1228_vm3, %v1229_v47, %v1225_v9  ;;  %v1505_v9 = vshrl.u32 %v1504_v6, 23 }
 0x199   :  { %1846 = vmatpush.bf16.msrb.mxu2 %v4341_v11  ;;  %2188 = vmatpush.bf16.msrb.mxu3 %v4344_v2  ;;  %v1231_v27 = vadd.s32 %v1230_v48, %v1226_v15 }
 0x19a   :  { %1118 = vmatmul.bf16.vlgmr.msra.gmra.mxu0 %v1083_v34  ;;  %v3440_v30 = vadd.s32 4294967169, %v1505_v9 }
 0x19b   :  { %2201 = vmatpush.bf16.msra.mxu0 %v4348_v5  ;;  %v1232_v62 = vadd.s32 536870912, %v1231_v27 }
 0x19c   :  { %v1511_v21 = vadd.s32 1, %v3440_v30 }
 0x19d   :  { %1847 = vmatpush.bf16.msrb.mxu2 %v4352_v52  ;;  %2189 = vmatpush.bf16.msrb.mxu3 %v4355_v7  ;;  %v4419_v22 = vshrl.u32 %v1232_v62, 30 }
 0x19e   :  { %vm1512_vm7 = vcmp.gt.s32.totalorder %v1511_v21, 0 }
 0x19f   :  { %2202 = vmatpush.bf16.msra.mxu0 %v4362_v13  ;;  %v1234_v57 = vshll.u32 %v4419_v22, 30  ;;  %v1513_v15 = vsel %vm1512_vm7, %v1511_v21, 0 }
 0x1a0   :  { %v1515_v62 = vand.u32 31, %v1513_v15 }
 0x1a1   :  { %1848 = vmatpush.bf16.msrb.mxu2 %v4367_v17  ;;  %2190 = vmatpush.bf16.msrb.mxu3 %v4370_v18  ;;  %v1235_v35 = vsub.s32 %v1231_v27, %v1234_v57 }
 0x1a3   :  { %2203 = vmatpush.bf16.msra.mxu0 %v4380_v20  ;;  %v1237_v51 = vsub.s32 0, %v1235_v35  ;;  %vm1236_vm4 = vcmp.lt.s32.totalorder %v1235_v35, 0 }
 0x1a5   :  { %1849 = vmatpush.bf16.msrb.mxu2 %v4385_v25  ;;  %2191 = vmatpush.bf16.msrb.mxu3 %v4388_v14  ;;  %v1238_v59 = vsel %vm1236_vm4, %v1237_v51, %v1235_v35  ;;  %v4447_v51 = vsub.s32 32, %v1515_v62 }
 0x1a6   :  { %v1239_v1 = vclz %v1238_v59 }
 0x1a7   :  { %2204 = vmatpush.bf16.msra.mxu0 %v4391_v26  ;;  %v1528_v23 = vshrl.u32 %v5137_v53, %v4447_v51  ;;  %v1519_v6 = vshrl.u32 %v5140_v61, %v4447_v51 }
 0x1a8   :  { %v3435_v36 = vadd.s32 4294967294, %v1239_v1  ;;  %v1531_v1 = vshrl.u32 %v5136_v37, %v4447_v51 }
 0x1a9   :  { %1850 = vmatpush.bf16.msrb.mxu2 %v4395_v24  ;;  %2192 = vmatpush.bf16.msrb.mxu3 %v4398_v63 }
 0x1aa   :  { %vm3436_vm5 = vcmp.lt.s32.totalorder %v3435_v36, 0 }
 0x1ab   :  { %2205 = vmatpush.bf16.msra.mxu0 %v4401_v28  ;;  %v1242_v46 = vsel %vm3436_vm5, 0, %v3435_v36  ;;  %v4453_v36 = vshrl.u32 %v1513_v15, 5  ;;  %vm1276_vm5 = vweird.f32 %v4005_v39 }
 0x1ac   :  { %v1247_v58 = vsub.s32 4294967266, %v1242_v46  ;;  %v1243_v34 = vsub.s32 32, %v1242_v46  ;;  %v1244_v42 = vshll.u32 %v1235_v35, %v1242_v46 }
 0x1ad   :  { %1851 = vmatpush.bf16.msrb.mxu2 %v4404_v54  ;;  %2193 = vmatpush.bf16.msrb.mxu3 %v4407_v33  ;;  %vm1536_vm9 = vcmp.lt.s32.totalorder %v4453_v36, 4  ;;  %vm1533_vm10 = vcmp.lt.s32.totalorder %v4453_v36, 1  ;;  %vm1535_vm11 = vcmp.lt.s32.totalorder %v4453_v36, 3  ;;  %vm1534_vm12 = vcmp.lt.s32.totalorder %v4453_v36, 2 }
 0x1ae   :  { %v1248_v0 = vadd.s32 127, %v1247_v58  ;;  %v1245_v3 = vshrl.u32 %v1227_v49, %v1243_v34  ;;  %v1530_v58 = vshll.u32 %v5137_v53, %v1515_v62  ;;  %v1522_v34 = vshrl.u32 %v5138_v50, %v4447_v51 }
 0x1af   :  { %2206 = vmatpush.bf16.msra.mxu0 %v4410_v29  ;;  %v1525_v49 = vshrl.u32 %v5139_v55, %v4447_v51 }
 0x1b0   :  { %v1249_v31 = vshll.u32 %v1248_v0, 23  ;;  %v1246_v56 = vor.u32 %v1245_v3, %v1244_v42  ;;  %v5096_v0 = vand.u32 2147483647, %v5148_v4  ;;  %v1532_v42 = vor.u32 %v1531_v1, %v1530_v58 }
 0x1b1   :  { %1852 = vmatpush.bf16.msrb.mxu2 %v4413_v32  ;;  %2194 = vmatpush.bf16.msrb.mxu3 %v4416_v44 }
 0x1b2   :  { %v1250_v8 = vor.u32 4788187, %v1249_v31  ;;  %v1253_v10 = vcvt.s32.f32 %v1246_v56  ;;  %v1527_v31 = vshll.u32 %v5139_v55, %v1515_v62  ;;  %v1524_v56 = vshll.u32 %v5138_v50, %v1515_v62 }
 0x1b3   :  { %2207 = vmatpush.bf16.msra.mxu0 %v4421_v45  ;;  %v1508_v30 = vand.u32 8388607, %v5096_v0  ;;  %v1546_v15 = vsel %vm1536_vm9, %v1532_v42, 1326507024 }
 0x1b4   :  { %v1251_v41 = vand.u32 2147483647, %v1250_v8  ;;  %v1521_v8 = vshll.u32 %v5140_v61, %v1515_v62  ;;  %v1529_v9 = vor.u32 %v1528_v23, %v1527_v31  ;;  %v4471_v21 = vor.u32 %v1525_v49, %v1524_v56 }
 0x1b5   :  { %1853 = vmatpush.bf16.msrb.mxu2 %v4424_v40  ;;  %2195 = vmatpush.bf16.msrb.mxu3 %v4427_v12  ;;  %v1509_v1 = vor.u32 8388608, %v1508_v30 }
 0x1b6   :  { %v1254_v47 = vmul.f32 %v1253_v10, %v1251_v41  ;;  %v1518_v10 = vshll.u32 %v5131_v60, %v1515_v62  ;;  %v1542_v62 = vsel %vm1536_vm9, %v1529_v9, 920167782 }
 0x1b7   :  { %2208 = vmatpush.bf16.msra.mxu0 %v4431_v38  ;;  %v1543_v49 = vsel %vm1535_vm11, %v4471_v21, %v1542_v62 }
 0x1b8   :  { %v1255_v48 = vxor.u32 2147483648, %v1254_v47 }
 0x1ba   :  { %v1256_v16 = vsel %vm1135_vm6, %v1255_v48, %v1254_v47  ;;  %v4469_v47 = vor.u32 %v1522_v34, %v1521_v8  ;;  %v4504_v8 = vshll.u32 %v1509_v1, 8 }
 0x1bb   :  { %v1259_v27 = vsel %vm4440_vm8, %v4005_v39, %v1256_v16  ;;  %v4474_v16 = vor.u32 %v1519_v6, %v1518_v10 }
 0x1bc   :  { %v1261_v57 = vmul.f32 %v1259_v27, %v1259_v27  ;;  %v1545_v23 = vsel %vm1533_vm10, %v4469_v47, %v4471_v21 }
 0x1bd   :  { %v1541_v34 = vsel %vm1533_vm10, %v4474_v16, %v4469_v47 }
 0x1be   :  { %v1269_v35 = vmul.f32 -0.00019511016, %v1261_v57  ;;  %v1262_v46 = vmul.f32 -0.001358992, %v1261_v57  ;;  %v1544_v42 = vsel %vm1534_vm12, %v1541_v34, %v1543_v49 }
 0x1bf   :  { %v1575_v30 = vshrl.u32 %v1544_v42, 16  ;;  %v1574_v49 = vand.u32 65535, %v1544_v42 }
 0x1c0   :  { %v1270_v59 = vadd.f32 0.008332121, %v1269_v35  ;;  %v1263_v41 = vadd.f32 0.041655596, %v1262_v46  ;;  %v1257_v35 = vsub.s32 4, %v4419_v22  ;;  %v1547_v46 = vsel %vm1535_vm11, %v1529_v9, %v1546_v15 }
 0x1c1   :  { %v1548_v6 = vsel %vm1534_vm12, %v1545_v23, %v1547_v46 }
 0x1c2   :  { %v1271_v3 = vmul.f32 %v1270_v59, %v1261_v57  ;;  %v1264_v59 = vmul.f32 %v1263_v41, %v1261_v57  ;;  %v1258_v31 = vsel %vm1135_vm6, %v1257_v35, %v4419_v22  ;;  %v1553_v41 = vshrl.u32 %v1548_v6, 16 }
 0x1c3   :  { %v1260_v56 = vsel %vm4440_vm8, 0, %v1258_v31  ;;  %v1550_v22 = vand.u32 65535, %v4504_v8  ;;  %v1552_v1 = vand.u32 65535, %v1548_v6 }
 0x1c4   :  { %v1272_v48 = vadd.f32 -0.16666654, %v1271_v3  ;;  %v1265_v3 = vadd.f32 -0.4999988, %v1264_v59  ;;  %v1277_v23 = vand.u32 3, %v1260_v56 }
 0x1c5   :  { %v4509_v35 = vmul.u32 %v1553_v41, %v1550_v22  ;;  %v4511_v59 = vmul.u32 %v1575_v30, %v1550_v22 }
 0x1c6   :  { %v1273_v58 = vmul.f32 %v1272_v48, %v1261_v57  ;;  %v1266_v10 = vmul.f32 %v1265_v3, %v1261_v57  ;;  %v1431_v48 = vadd.s32 3, %v1260_v56  ;;  %v1551_v57 = vshrl.u32 %v4504_v8, 16 }
 0x1c7   :  { %v1558_v19 = vshll.u32 %v4509_v35, 16  ;;  %v1580_v3 = vshll.u32 %v4511_v59, 16  ;;  %vm1278_vm0 = vcmp.lt.s32.totalorder %v1277_v23, 2  ;;  %vm1279_vm13 = vcmp.eq.s32.totalorder %v1277_v23, 0 }
 0x1c8   :  { %v1274_v9 = vadd.f32 1.0, %v1273_v58  ;;  %v1267_v62 = vadd.f32 1.0, %v1266_v10  ;;  %v1432_v46 = vand.u32 3, %v1431_v48  ;;  %vm1282_vm15 = vcmp.eq.s32.totalorder %v1277_v23, 2 }
 0x1c9   :  { %v1576_v56 = vmul.u32 %v1574_v49, %v1550_v22  ;;  %v4516_v6 = vmul.u32 %v1552_v1, %v1551_v57  ;;  %v4518_v61 = vmul.u32 %v1574_v49, %v1551_v57  ;;  %v1579_v39 = vmul.u32 %v1575_v30, %v1551_v57 }
 0x1ca   :  { %v1275_v15 = vmul.f32 %v1274_v9, %v1259_v27  ;;  %v1283_v31 = vxor.u32 2147483648, %v1267_v62  ;;  %vm1434_vm14 = vcmp.eq.s32.totalorder %v1432_v46, 0  ;;  %v1554_v27 = vmul.u32 %v1552_v1, %v1550_v22 }
 0x1cb   :  { %vm1433_vm1 = vcmp.lt.s32.totalorder %v1432_v46, 2  ;;  %vm1437_vm2 = vcmp.eq.s32.totalorder %v1432_v46, 2  ;;  %vm1584_vm4 = vc.u32 %v1576_v56, %v1580_v3  ;;  %v1586_v22 = vadd.s32 %v1580_v3, %v1576_v56 }
 0x1cc   :  { %v1280_v34 = vxor.u32 2147483648, %v1275_v15  ;;  %vm1562_vm3 = vc.u32 %v1554_v27, %v1558_v19  ;;  %v1284_v0 = vsel %vm1282_vm15, %v1283_v31, %v1275_v15  ;;  %v1439_v50 = vsel %vm1437_vm2, %v1283_v31, %v1275_v15 }
 0x1cd   :  { %v1560_v46 = vshll.u32 %v4516_v6, 16  ;;  %v1563_v1 = vsel %vm1562_vm3, 1, %v5120_v43  ;;  %v1582_v49 = vshll.u32 %v4518_v61, 16  ;;  %v1559_v30 = vshrl.u32 %v4509_v35, 16 }
 0x1ce   :  { %v1281_v9 = vsel %vm1279_vm13, %v1267_v62, %v1280_v34  ;;  %v1436_v10 = vsel %vm1434_vm14, %v1267_v62, %v1280_v34  ;;  %v1564_v34 = vadd.s32 %v1558_v19, %v1554_v27  ;;  %v1517_v35 = vshrl.u32 %v5131_v60, %v4447_v51 }
 0x1cf   :  { %v1285_v53 = vsel %vm1278_vm0, %v1281_v9, %v1284_v0  ;;  %v1440_v4 = vsel %vm1433_vm1, %v1436_v10, %v1439_v50  ;;  %v1557_v9 = vmul.u32 %v1553_v41, %v1551_v57  ;;  %vm1588_vm6 = vc.u32 %v1586_v22, %v1582_v49 }
 0x1d0   :  { %v1286_v38 = vsel %vm1276_vm5, nan, %v1285_v53  ;;  %v1441_v12 = vsel %vm1276_vm5, nan, %v1440_v4  ;;  %vm1566_vm7 = vc.u32 %v1564_v34, %v1560_v46  ;;  %v1581_v41 = vshrl.u32 %v4511_v59, 16 }
 0x1d1   :  { %v1565_v19 = vadd.s32 %v1563_v1, %v1557_v9  ;;  %v1583_v46 = vshrl.u32 %v4518_v61, 16  ;;  %v1561_v1 = vshrl.u32 %v4516_v6, 16  ;;  %v1538_v59 = vsel %vm1536_vm9, %v4471_v21, 2102212464 }
 0x1d2   :  { %v1537_v61 = vsel %vm1533_vm10, %v1517_v35, %v4474_v16  ;;  %v1539_v6 = vsel %vm1535_vm11, %v4469_v47, %v1538_v59  ;;  %v1590_v21 = vadd.s32 %v1586_v22, %v1582_v49  ;;  %v5152_v49 = vld [vmem:[#allocation30_spill] sm:$0xff]  ;;  %v5154_v59 = vld [vmem:[#allocation24_spill] sm:$0xff] }
 0x1d3   :  { %v1540_v51 = vsel %vm1534_vm12, %v1537_v61, %v1539_v6  ;;  %vm1503_vm11 = vcmp.lt.s32.totalorder %v5154_v59, 0 }
 0x1d4   :  { %v1594_v16 = vmul.u32 %v4504_v8, %v1540_v51  ;;  %v5151_v8 = vld [vmem:[#allocation29_spill] sm:$0xff] }
 0x217   :  { %v1119_v58 = vpop.f32.mrf.mxu0 }
 0x21b   :  { %v1093_v42 = vpop.f32.mrf.mxu2  ;;  %v1106_v48 = vpop.f32.mrf.mxu3 }
 0x21c   :  { %v1124_v55 = vsub.f32 %v1119_v58, %v1093_v42  ;;  %v1123_v37 = vsub.f32 %v1093_v42, %v1106_v48  ;;  %v1585_v58 = vsel %vm1584_vm4, 1, %v5120_v43 }
 0x21d   :  { %v1587_v53 = vadd.s32 %v1585_v58, %v1579_v39 }
 0x21e   :  { %v1125_v62 = vsub.f32 %v1124_v55, %v1106_v48  ;;  %v1442_v31 = vmul.f32 %v1286_v38, %v1123_v37  ;;  %v1445_v0 = vmul.f32 %v1441_v12, %v1123_v37  ;;  %v1589_v48 = vsel %vm1588_vm6, 1, %v5120_v43 }
 0x21f   :  { %v1121_v15 = vpop.f32.mrf.mxu0 }
 0x220   :  { %v1443_v23 = vmul.f32 %v1441_v12, %v1125_v62  ;;  %v1446_v50 = vmul.f32 %v1286_v38, %v1125_v62  ;;  %v1567_v15 = vsel %vm1566_vm7, 1, %v5120_v43  ;;  %v1591_v12 = vadd.s32 %v1589_v48, %v1587_v53 }
 0x221   :  { %v1569_v38 = vadd.s32 %v1567_v15, %v1565_v19 }
 0x222   :  { %v1444_v55 = vsub.f32 %v1442_v31, %v1443_v23  ;;  %v1447_v3 = vadd.f32 %v1446_v50, %v1445_v0  ;;  %v1592_v57 = vadd.s32 %v1591_v12, %v1581_v41  ;;  %v5153_v12 = vld [vmem:[#allocation25_spill] sm:$0xff] }
 0x223   :  { %v1095_v10 = vpop.f32.mrf.mxu2  ;;  %v1108_v56 = vpop.f32.mrf.mxu3  ;;  %v1570_v62 = vadd.s32 %v1569_v38, %v1559_v30  ;;  %v1872_v38 = vand.u32 2139095040, %v5153_v12 }
 0x224   :  { %v1450_v4 = vadd.f32 %v1447_v3, %v1444_v55  ;;  %v1448_v27 = vpack.c.bf16 %v1444_v55, %v1444_v55  ;;  %v1449_v42 = vpack.c.bf16 %v1447_v3, %v1447_v3  ;;  %v1593_v34 = vadd.s32 %v1592_v57, %v1583_v46 }
 0x225   :  { %v1571_v58 = vadd.s32 %v1570_v62, %v1561_v1  ;;  %v1873_v57 = vshrl.u32 %v1872_v38, 23 }
 0x226   :  { %1460 = vmatmul.bf16.vlgmr.msra.gmra.mxu1 %v1448_v27  ;;  %1473 = vmatmul.bf16.vlgmr.msra.gmra.mxu2 %v1449_v42  ;;  %v1451_v37 = vpack.c.bf16 %v1450_v4, %v1450_v4  ;;  %v1597_v31 = vadd.s32 1, %v1593_v34 }
 0x227   :  { %2214 = vmatpush.bf16.msra.mxu1 %v4341_v11  ;;  %2556 = vmatpush.bf16.msra.mxu2 %v4344_v2  ;;  %vm1596_vm8 = vc.u32 %v1571_v58, %v1590_v21  ;;  %v1595_v4 = vadd.s32 %v1590_v21, %v1571_v58  ;;  %v3446_v46 = vadd.s32 4294967169, %v1873_v57  ;;  %v5155_v58 = vand.u32 2147483647, %v5154_v59 }
 0x228   :  { %1486 = vmatmul.bf16.vlgmr.msra.gmra.mxu3 %v1451_v37  ;;  %v1598_v23 = vsel %vm1596_vm8, %v1597_v31, %v1593_v34  ;;  %vm1644_vm8 = vweird.f32 %v5154_v59 }
 0x229   :  { %2569 = vmatpush.bf16.msra.mxu3 %v4348_v5  ;;  %v1599_v47 = vadd.s32 %v1598_v23, %v1594_v16  ;;  %v1879_v34 = vadd.s32 1, %v3446_v46  ;;  %vm4579_vm12 = vcmp.le.f32.partialorder %v5155_v58, 0.7853982 }
 0x22b   :  { %2215 = vmatpush.bf16.msra.mxu1 %v4352_v52  ;;  %2557 = vmatpush.bf16.msra.mxu2 %v4355_v7  ;;  %v1600_v36 = vadd.s32 536870912, %v1599_v47  ;;  %vm1880_vm0 = vcmp.gt.s32.totalorder %v1879_v34, 0 }
 0x22c   :  { %v1881_v31 = vsel %vm1880_vm0, %v1879_v34, 0 }
 0x22d   :  { %2570 = vmatpush.bf16.msra.mxu3 %v4362_v13  ;;  %v4567_v22 = vshrl.u32 %v1600_v36, 30  ;;  %v1883_v51 = vand.u32 31, %v1881_v31 }
 0x22f   :  { %2216 = vmatpush.bf16.msra.mxu1 %v4367_v17  ;;  %2558 = vmatpush.bf16.msra.mxu2 %v4370_v18  ;;  %v1602_v0 = vshll.u32 %v4567_v22, 30  ;;  %v1625_v57 = vsub.s32 4, %v4567_v22 }
 0x231   :  { %2571 = vmatpush.bf16.msra.mxu3 %v4380_v20  ;;  %v1603_v50 = vsub.s32 %v1599_v47, %v1602_v0  ;;  %v4586_v47 = vsub.s32 32, %v1883_v51 }
 0x233   :  { %2217 = vmatpush.bf16.msra.mxu1 %v4385_v25  ;;  %2559 = vmatpush.bf16.msra.mxu2 %v4388_v14  ;;  %v1605_v9 = vsub.s32 0, %v1603_v50  ;;  %vm1604_vm9 = vcmp.lt.s32.totalorder %v1603_v50, 0 }
 0x235   :  { %2572 = vmatpush.bf16.msra.mxu3 %v4391_v26  ;;  %v1606_v39 = vsel %vm1604_vm9, %v1605_v9, %v1603_v50 }
 0x236   :  { %v1607_v55 = vclz %v1606_v39  ;;  %v5159_v39 = vmov 1326507024  }
 0x237   :  { %2218 = vmatpush.bf16.msra.mxu1 %v4395_v24  ;;  %2560 = vmatpush.bf16.msra.mxu2 %v4398_v63 }
 0x238   :  { %v3441_v3 = vadd.s32 4294967294, %v1607_v55  ;;  %v1899_v55 = vshrl.u32 %v5159_v39, %v4586_v47 }
 0x239   :  { %2573 = vmatpush.bf16.msra.mxu3 %v4401_v28 }
 0x23a   :  { %vm3442_vm10 = vcmp.lt.s32.totalorder %v3441_v3, 0 }
 0x23b   :  { %2219 = vmatpush.bf16.msra.mxu1 %v4404_v54  ;;  %2561 = vmatpush.bf16.msra.mxu2 %v4407_v33  ;;  %v1610_v10 = vsel %vm3442_vm10, 0, %v3441_v3 }
 0x23c   :  { %v1615_v56 = vsub.s32 4294967266, %v1610_v10  ;;  %v1611_v53 = vsub.s32 32, %v1610_v10  ;;  %v1612_v48 = vshll.u32 %v1603_v50, %v1610_v10  ;;  %v5158_v50 = vmov 920167782  }
 0x23d   :  { %2574 = vmatpush.bf16.msra.mxu3 %v4410_v29  ;;  %v1896_v9 = vshrl.u32 %v5158_v50, %v4586_v47  ;;  %v5107_v10 = vand.u32 2147483647, %v5153_v12 }
 0x23e   :  { %v1616_v19 = vadd.s32 127, %v1615_v56  ;;  %v1613_v42 = vshrl.u32 %v1595_v4, %v1611_v53  ;;  %v5160_v56 = vmov 2102212464   ;;  %v1898_v53 = vshll.u32 %v5158_v50, %v1883_v51 }
 0x23f   :  { %2220 = vmatpush.bf16.msra.mxu1 %v4413_v32  ;;  %2562 = vmatpush.bf16.msra.mxu2 %v4416_v44  ;;  %v4595_v4 = vshrl.u32 %v1881_v31, 5 }
 0x240   :  { %v1617_v27 = vshll.u32 %v1616_v19, 23  ;;  %v1614_v37 = vor.u32 %v1613_v42, %v1612_v48  ;;  %v1895_v19 = vshll.u32 %v5160_v56, %v1883_v51  ;;  %v5162_v48 = vmov 2131351028  }
 0x241   :  { %2575 = vmatpush.bf16.msra.mxu3 %v4421_v45  ;;  %vm1904_vm13 = vcmp.lt.s32.totalorder %v4595_v4, 4  ;;  %vm1901_vm14 = vcmp.lt.s32.totalorder %v4595_v4, 1  ;;  %vm1903_vm15 = vcmp.lt.s32.totalorder %v4595_v4, 3  ;;  %vm1902_vm1 = vcmp.lt.s32.totalorder %v4595_v4, 2 }
 0x242   :  { %v1618_v15 = vor.u32 4788187, %v1617_v27  ;;  %v1621_v30 = vcvt.s32.f32 %v1614_v37  ;;  %v5161_v27 = vmov 2475754826   ;;  %v1893_v37 = vshrl.u32 %v5160_v56, %v4586_v47 }
 0x243   :  { %2221 = vmatpush.bf16.msra.mxu1 %v4424_v40  ;;  %2563 = vmatpush.bf16.msra.mxu2 %v5151_v8  ;;  %v1887_v42 = vshrl.u32 %v5161_v27, %v4586_v47  ;;  %v1889_v46 = vshll.u32 %v5161_v27, %v1883_v51 }
 0x244   :  { %v1619_v41 = vand.u32 2147483647, %v1618_v15  ;;  %v1890_v15 = vshrl.u32 %v5162_v48, %v4586_v47 }
 0x245   :  { %2576 = vmatpush.bf16.msra.mxu3 %v5152_v49 }
 0x246   :  { %v1622_v62 = vmul.f32 %v1621_v30, %v1619_v41  ;;  %v1897_v41 = vor.u32 %v1896_v9, %v1895_v19  ;;  %v1900_v30 = vor.u32 %v1899_v55, %v1898_v53  ;;  %v4611_v31 = vor.u32 %v1890_v15, %v1889_v46 }
 0x248   :  { %v1623_v1 = vxor.u32 2147483648, %v1622_v62 }
 0x24a   :  { %v1624_v35 = vsel %vm1503_vm11, %v1623_v1, %v1622_v62  ;;  %v1886_v62 = vshll.u32 %v5131_v60, %v1883_v51  ;;  %v1892_v1 = vshll.u32 %v5162_v48, %v1883_v51  ;;  %v1626_v51 = vsel %vm1503_vm11, %v1625_v57, %v4567_v22 }
 0x24b   :  { %v1627_v6 = vsel %vm4579_vm12, %v5154_v59, %v1624_v35  ;;  %v1876_v35 = vand.u32 8388607, %v5107_v10 }
 0x24c   :  { %v1629_v21 = vmul.f32 %v1627_v6, %v1627_v6  ;;  %v4609_v58 = vor.u32 %v1887_v42, %v1886_v62  ;;  %v1628_v42 = vsel %vm4579_vm12, 0, %v1626_v51 }
 0x24d   :  { %v1877_v55 = vor.u32 8388608, %v1876_v35  ;;  %v1799_v57 = vadd.s32 3, %v1628_v42  ;;  %v1645_v35 = vand.u32 3, %v1628_v42 }
 0x24e   :  { %v1637_v23 = vmul.f32 -0.00019511016, %v1629_v21  ;;  %v1630_v36 = vmul.f32 -0.001358992, %v1629_v21 }
 0x24f   :  { %v4647_v62 = vshll.u32 %v1877_v55, 8  ;;  %vm1647_vm2 = vcmp.eq.s32.totalorder %v1645_v35, 0  ;;  %vm1646_vm4 = vcmp.lt.s32.totalorder %v1645_v35, 2  ;;  %vm1650_vm5 = vcmp.eq.s32.totalorder %v1645_v35, 2 }
 0x250   :  { %v1638_v16 = vadd.f32 0.008332121, %v1637_v23  ;;  %v1631_v3 = vadd.f32 0.041655596, %v1630_v36  ;;  %v4613_v23 = vor.u32 %v1893_v37, %v1892_v1  ;;  %v1910_v36 = vsel %vm1904_vm13, %v1897_v41, 920167782 }
 0x252   :  { %v1639_v0 = vmul.f32 %v1638_v16, %v1629_v21  ;;  %v1632_v34 = vmul.f32 %v1631_v3, %v1629_v21  ;;  %v1909_v3 = vsel %vm1901_vm14, %v4609_v58, %v4611_v31  ;;  %v1911_v19 = vsel %vm1903_vm15, %v4613_v23, %v1910_v36 }
 0x253   :  { %v1913_v22 = vsel %vm1901_vm14, %v4611_v31, %v4613_v23 }
 0x254   :  { %v1640_v38 = vadd.f32 -0.16666654, %v1639_v0  ;;  %v1914_v0 = vsel %vm1904_vm13, %v1900_v30, 1326507024  ;;  %v1633_v9 = vadd.f32 -0.4999988, %v1632_v34 }
 0x255   :  { %v1915_v53 = vsel %vm1903_vm15, %v1897_v41, %v1914_v0 }
 0x256   :  { %v1641_v16 = vmul.f32 %v1640_v38, %v1629_v21  ;;  %v1634_v37 = vmul.f32 %v1633_v9, %v1629_v21  ;;  %v1912_v38 = vsel %vm1902_vm1, %v1909_v3, %v1911_v19  ;;  %v4645_v30 = vsel %vm1902_vm1, %v1913_v22, %v1915_v53 }
 0x257   :  { %v1921_v41 = vshrl.u32 %v4645_v30, 16  ;;  %v1943_v1 = vshrl.u32 %v1912_v38, 16  ;;  %v1918_v21 = vand.u32 65535, %v4647_v62  ;;  %v1942_v36 = vand.u32 65535, %v1912_v38 }
 0x258   :  { %v1642_v15 = vadd.f32 1.0, %v1641_v16  ;;  %v1635_v34 = vadd.f32 1.0, %v1634_v37  ;;  %v1800_v16 = vand.u32 3, %v1799_v57  ;;  %v1920_v51 = vand.u32 65535, %v4645_v30 }
 0x259   :  { %v4652_v9 = vmul.u32 %v1921_v41, %v1918_v21  ;;  %v4654_v3 = vmul.u32 %v1943_v1, %v1918_v21  ;;  %v1944_v19 = vmul.u32 %v1942_v36, %v1918_v21 }
 0x25a   :  { %v1643_v46 = vmul.f32 %v1642_v15, %v1627_v6  ;;  %v1651_v55 = vxor.u32 2147483648, %v1635_v34  ;;  %vm1802_vm3 = vcmp.eq.s32.totalorder %v1800_v16, 0  ;;  %v1919_v6 = vshrl.u32 %v4647_v62, 16 }
 0x25b   :  { %v1922_v15 = vmul.u32 %v1920_v51, %v1918_v21  ;;  %vm1805_vm6 = vcmp.eq.s32.totalorder %v1800_v16, 2  ;;  %v1926_v37 = vshll.u32 %v4652_v9, 16  ;;  %v1948_v38 = vshll.u32 %v4654_v3, 16 }
 0x25c   :  { %v1648_v0 = vxor.u32 2147483648, %v1643_v46  ;;  %v1652_v30 = vsel %vm1650_vm5, %v1651_v55, %v1643_v46  ;;  %vm1801_vm7 = vcmp.lt.s32.totalorder %v1800_v16, 2  ;;  %v1807_v57 = vsel %vm1805_vm6, %v1651_v55, %v1643_v46 }
 0x25d   :  { %v4659_v56 = vmul.u32 %v1942_v36, %v1919_v6  ;;  %vm1930_vm9 = vc.u32 %v1922_v15, %v1926_v37  ;;  %vm1952_vm10 = vc.u32 %v1944_v19, %v1948_v38  ;;  %v1954_v21 = vadd.s32 %v1948_v38, %v1944_v19 }
 0x25e   :  { %v1649_v53 = vsel %vm1647_vm2, %v1635_v34, %v1648_v0  ;;  %v1804_v42 = vsel %vm1802_vm3, %v1635_v34, %v1648_v0  ;;  %v1924_v34 = vmul.u32 %v1920_v51, %v1919_v6  ;;  %v1932_v8 = vadd.s32 %v1926_v37, %v1922_v15 }
 0x25f   :  { %v1653_v50 = vsel %vm1646_vm4, %v1649_v53, %v1652_v30  ;;  %v1808_v39 = vsel %vm1801_vm7, %v1804_v42, %v1807_v57  ;;  %v1950_v46 = vshll.u32 %v4659_v56, 16  ;;  %v1953_v59 = vsel %vm1952_vm10, 1, %v5120_v43 }
 0x260   :  { %v1654_v0 = vsel %vm1644_vm8, nan, %v1653_v50  ;;  %v1809_v49 = vsel %vm1644_vm8, nan, %v1808_v39  ;;  %v1928_v53 = vshll.u32 %v1924_v34, 16  ;;  %v1947_v51 = vmul.u32 %v1943_v1, %v1919_v6 }
 0x261   :  { %vm1956_vm11 = vc.u32 %v1954_v21, %v1950_v46  ;;  %v1925_v50 = vmul.u32 %v1921_v41, %v1919_v6  ;;  %v1927_v6 = vshrl.u32 %v4652_v9, 16 }
 0x262   :  { %vm1934_vm12 = vc.u32 %v1932_v8, %v1928_v53  ;;  %v1955_v15 = vadd.s32 %v1953_v59, %v1947_v51  ;;  %v1949_v8 = vshrl.u32 %v4654_v3, 16 }
 0x263   :  { %v1935_v37 = vsel %vm1934_vm12, 1, %v5120_v43 }
 0x2a3   :  { %v1461_v61 = vpop.f32.mrf.mxu1 }
 0x2a9   :  { %v1474_v22 = vpop.f32.mrf.mxu2 }
 0x2aa   :  { %v1491_v48 = vsub.f32 %v1461_v61, %v1474_v22 }
 0x2ab   :  { %v1463_v10 = vpop.f32.mrf.mxu1  ;;  %v1487_v27 = vpop.f32.mrf.mxu3 }
 0x2ac   :  { %v1492_v12 = vsub.f32 %v1487_v27, %v1461_v61  ;;  %v1810_v10 = vmul.f32 %v1654_v0, %v1491_v48  ;;  %v1813_v16 = vmul.f32 %v1809_v49, %v1491_v48  ;;  %v1931_v27 = vsel %vm1930_vm9, 1, %v5120_v43 }
 0x2ad   :  { %v1933_v48 = vadd.s32 %v1931_v27, %v1925_v50 }
 0x2ae   :  { %v1493_v35 = vsub.f32 %v1492_v12, %v1474_v22 }
 0x2af   :  { %v1937_v41 = vadd.s32 %v1935_v37, %v1933_v48  ;;  %v5171_v37 = vmov 1326507024  }
 0x2b0   :  { %v1811_v36 = vmul.f32 %v1809_v49, %v1493_v35  ;;  %v1814_v55 = vmul.f32 %v1654_v0, %v1493_v35  ;;  %v1957_v49 = vsel %vm1956_vm11, 1, %v5120_v43  ;;  %v5166_v35 = vld [vmem:[#allocation26_spill] sm:$0xff] }
 0x2b1   :  { %v1476_v40 = vpop.f32.mrf.mxu2  ;;  %v1959_v1 = vadd.s32 %v1957_v49, %v1955_v15  ;;  %v1938_v30 = vadd.s32 %v1937_v41, %v1927_v6  ;;  %v5172_v41 = vmov 920167782  }
 0x2b2   :  { %v1812_v61 = vsub.f32 %v1810_v10, %v1811_v36  ;;  %v1815_v12 = vadd.f32 %v1814_v55, %v1813_v16 }
 0x2b3   :  { %v1489_v19 = vpop.f32.mrf.mxu3  ;;  %v1960_v38 = vadd.s32 %v1959_v1, %v1949_v8 }
 0x2b4   :  { %v1816_v39 = vpack.c.bf16 %v1812_v61, %v1812_v61  ;;  %v1817_v22 = vpack.c.bf16 %v1815_v12, %v1815_v12  ;;  %v1818_v42 = vadd.f32 %v1815_v12, %v1812_v61  ;;  %v5167_v12 = vld [vmem:[#allocation25_spill] sm:$0xff] }
 0x2b5   :  { %v5168_v19 = vand.u32 2147483647, %v5167_v12 }
 0x2b6   :  { %1828 = vmatmul.bf16.vlgmr.msrb.gmra.mxu0 %v1816_v39  ;;  %1841 = vmatmul.bf16.vlgmr.msrb.gmra.mxu1 %v1817_v22  ;;  %v1819_v40 = vpack.c.bf16 %v1818_v42, %v1818_v42 }
 0x2b7   :  { %2582 = vmatpush.bf16.msrb.mxu0 %v4341_v11  ;;  %2924 = vmatpush.bf16.msrb.mxu1 %v4344_v2  ;;  %v1951_v11 = vshrl.u32 %v4659_v56, 16  ;;  %v1929_v2 = vshrl.u32 %v1924_v34, 16  ;;  %vm4717_vm2 = vcmp.le.f32.partialorder %v5168_v19, 0.7853982 }
 0x2b8   :  { %1854 = vmatmul.bf16.vlgmr.msrb.gmra.mxu2 %v1819_v40 }
 0x2b9   :  { %2937 = vmatpush.bf16.msrb.mxu2 %v4348_v5  ;;  %v1906_v5 = vsel %vm1904_vm13, %v4613_v23, 2102212464  ;;  %v1961_v9 = vadd.s32 %v1960_v38, %v1951_v11  ;;  %v2237_v11 = vand.u32 2147483647, %v5166_v35 }
 0x2bb   :  { %2583 = vmatpush.bf16.msrb.mxu0 %v4352_v52  ;;  %2925 = vmatpush.bf16.msrb.mxu1 %v4355_v7  ;;  %v1885_v52 = vshrl.u32 %v5131_v60, %v4586_v47  ;;  %v1939_v7 = vadd.s32 %v1938_v30, %v1929_v2  ;;  %v1965_v56 = vadd.s32 1, %v1961_v9  ;;  %v5173_v2 = vmov 2131351028  }
 0x2bd   :  { %2938 = vmatpush.bf16.msrb.mxu2 %v4362_v13  ;;  %v1905_v13 = vsel %vm1901_vm14, %v1885_v52, %v4609_v58 }
 0x2bf   :  { %2584 = vmatpush.bf16.msrb.mxu0 %v4367_v17  ;;  %2926 = vmatpush.bf16.msrb.mxu1 %v4370_v18  ;;  %v1907_v17 = vsel %vm1903_vm15, %v4611_v31, %v1906_v5  ;;  %v1958_v18 = vadd.s32 %v1954_v21, %v1950_v46  ;;  %v2240_v21 = vand.u32 2139095040, %v5166_v35  ;;  %vm1871_vm15 = vcmp.lt.s32.totalorder %v5167_v12, 0 }
 0x2c1   :  { %2939 = vmatpush.bf16.msrb.mxu2 %v4380_v20  ;;  %vm1964_vm0 = vc.u32 %v1939_v7, %v1958_v18  ;;  %v1908_v20 = vsel %vm1902_vm1, %v1905_v13, %v1907_v17  ;;  %v1963_v3 = vadd.s32 %v1958_v18, %v1939_v7  ;;  %v2241_v16 = vshrl.u32 %v2240_v21, 23 }
 0x2c2   :  { %v1966_v47 = vsel %vm1964_vm0, %v1965_v56, %v1961_v9  ;;  %v1962_v58 = vmul.u32 %v4647_v62, %v1908_v20  ;;  %v5174_v9 = vmov 2102212464   ;;  %v5175_v17 = vmov 2475754826  }
 0x2c3   :  { %2585 = vmatpush.bf16.msrb.mxu0 %v4385_v25  ;;  %2927 = vmatpush.bf16.msrb.mxu1 %v4388_v14  ;;  %v3452_v53 = vadd.s32 4294967169, %v2241_v16 }
 0x2c4   :  { %v1967_v31 = vadd.s32 %v1966_v47, %v1962_v58 }
 0x2c5   :  { %2940 = vmatpush.bf16.msrb.mxu2 %v4391_v26  ;;  %v5163_v26 = vld [vmem:[#allocation23_spill] sm:$0xff]  ;;  %v2247_v59 = vadd.s32 1, %v3452_v53 }
 0x2c6   :  { %v1968_v25 = vadd.s32 536870912, %v1967_v31 }
 0x2c7   :  { %2586 = vmatpush.bf16.msrb.mxu0 %v4395_v24  ;;  %2928 = vmatpush.bf16.msrb.mxu1 %v4398_v63  ;;  %v5164_v24 = vld [vmem:[#allocation29_spill] sm:$0xff]  ;;  %v5165_v63 = vld [vmem:[#allocation30_spill] sm:$0xff]  ;;  %vm2248_vm1 = vcmp.gt.s32.totalorder %v2247_v59, 0 }
 0x2c8   :  { %v4705_v14 = vshrl.u32 %v1968_v25, 30  ;;  %v2249_v39 = vsel %vm2248_vm1, %v2247_v59, 0 }
 0x2c9   :  { %2941 = vmatpush.bf16.msrb.mxu2 %v4401_v28  ;;  %v2251_v42 = vand.u32 31, %v2249_v39  ;;  %v4730_v6 = vshrl.u32 %v2249_v39, 5 }
 0x2ca   :  { %v1970_v28 = vshll.u32 %v4705_v14, 30 }
 0x2cb   :  { %2587 = vmatpush.bf16.msrb.mxu0 %v4404_v54  ;;  %2929 = vmatpush.bf16.msrb.mxu1 %v4407_v33  ;;  %v4724_v49 = vsub.s32 32, %v2251_v42  ;;  %v2266_v30 = vshll.u32 %v5172_v41, %v2251_v42  ;;  %v2263_v7 = vshll.u32 %v5174_v9, %v2251_v42  ;;  %v2257_v20 = vshll.u32 %v5175_v17, %v2251_v42 }
 0x2cc   :  { %v1971_v54 = vsub.s32 %v1967_v31, %v1970_v28  ;;  %v2260_v47 = vshll.u32 %v5173_v2, %v2251_v42  ;;  %v2254_v25 = vshll.u32 %v5131_v60, %v2251_v42  ;;  %vm2272_vm3 = vcmp.lt.s32.totalorder %v4730_v6, 4 }
 0x2cd   :  { %2942 = vmatpush.bf16.msrb.mxu2 %v4410_v29  ;;  %v2267_v1 = vshrl.u32 %v5171_v37, %v4724_v49  ;;  %v2264_v8 = vshrl.u32 %v5172_v41, %v4724_v49  ;;  %v2258_v5 = vshrl.u32 %v5173_v2, %v4724_v49  ;;  %v2261_v52 = vshrl.u32 %v5174_v9, %v4724_v49 }
 0x2ce   :  { %v1973_v33 = vsub.s32 0, %v1971_v54  ;;  %vm1972_vm13 = vcmp.lt.s32.totalorder %v1971_v54, 0  ;;  %v2255_v18 = vshrl.u32 %v5175_v17, %v4724_v49  ;;  %vm2269_vm4 = vcmp.lt.s32.totalorder %v4730_v6, 1 }
 0x2cf   :  { %2588 = vmatpush.bf16.msrb.mxu0 %v4413_v32  ;;  %2930 = vmatpush.bf16.msrb.mxu1 %v4416_v44  ;;  %v2268_v56 = vor.u32 %v2267_v1, %v2266_v30  ;;  %v2265_v58 = vor.u32 %v2264_v8, %v2263_v7  ;;  %vm2271_vm5 = vcmp.lt.s32.totalorder %v4730_v6, 3  ;;  %vm2270_vm6 = vcmp.lt.s32.totalorder %v4730_v6, 2 }
 0x2d0   :  { %v1974_v29 = vsel %vm1972_vm13, %v1973_v33, %v1971_v54 }
 0x2d1   :  { %2943 = vmatpush.bf16.msrb.mxu2 %v4421_v45  ;;  %v1975_v4 = vclz %v1974_v29  ;;  %v2282_v33 = vsel %vm2272_vm3, %v2268_v56, 1326507024  ;;  %v1993_v29 = vsub.s32 4, %v4705_v14 }
 0x2d3   :  { %2589 = vmatpush.bf16.msrb.mxu0 %v5163_v26  ;;  %2931 = vmatpush.bf16.msrb.mxu1 %v5164_v24  ;;  %v3447_v32 = vadd.s32 4294967294, %v1975_v4  ;;  %v2244_v26 = vand.u32 8388607, %v2237_v11  ;;  %v4746_v24 = vor.u32 %v2258_v5, %v2257_v20  ;;  %v2278_v4 = vsel %vm2272_vm3, %v2265_v58, 920167782 }
 0x2d5   :  { %2944 = vmatpush.bf16.msrb.mxu2 %v5165_v63  ;;  %vm3448_vm14 = vcmp.lt.s32.totalorder %v3447_v32, 0  ;;  %v4748_v63 = vor.u32 %v2261_v52, %v2260_v47 }
 0x2d6   :  { %v1978_v44 = vsel %vm3448_vm14, 0, %v3447_v32  ;;  %vm2012_vm14 = vweird.f32 %v5167_v12 }
 0x2d7   :  { %v1983_v23 = vsub.s32 4294967266, %v1978_v44  ;;  %v1979_v62 = vsub.s32 32, %v1978_v44  ;;  %v1980_v0 = vshll.u32 %v1971_v54, %v1978_v44  ;;  %v4751_v54 = vor.u32 %v2255_v18, %v2254_v25 }
 0x2d8   :  { %v2245_v44 = vor.u32 8388608, %v2244_v26 }
 0x2d9   :  { %v1984_v45 = vadd.s32 127, %v1983_v23  ;;  %v1981_v34 = vshrl.u32 %v1963_v3, %v1979_v62  ;;  %v2281_v23 = vsel %vm2269_vm4, %v4746_v24, %v4748_v63  ;;  %v2277_v3 = vsel %vm2269_vm4, %v4751_v54, %v4746_v24 }
 0x2db   :  { %v1985_v57 = vshll.u32 %v1984_v45, 23  ;;  %v1982_v10 = vor.u32 %v1981_v34, %v1980_v0  ;;  %v2283_v45 = vsel %vm2271_vm5, %v2265_v58, %v2282_v33  ;;  %v1994_v34 = vsel %vm1871_vm15, %v1993_v29, %v4705_v14 }
 0x2dc   :  { %v2284_v0 = vsel %vm2270_vm6, %v2281_v23, %v2283_v45  ;;  %v1996_v16 = vsel %vm4717_vm2, 0, %v1994_v34 }
 0x2dd   :  { %v1986_v46 = vor.u32 4788187, %v1985_v57  ;;  %v1989_v55 = vcvt.s32.f32 %v1982_v10  ;;  %v2279_v57 = vsel %vm2271_vm5, %v4748_v63, %v2278_v4  ;;  %v4781_v10 = vshll.u32 %v2245_v44, 8 }
 0x2de   :  { %v2167_v59 = vadd.s32 3, %v1996_v16  ;;  %v2013_v8 = vand.u32 3, %v1996_v16 }
 0x2df   :  { %v1987_v36 = vand.u32 2147483647, %v1986_v46  ;;  %v2280_v46 = vsel %vm2270_vm6, %v2277_v3, %v2279_v57  ;;  %v2286_v14 = vand.u32 65535, %v4781_v10  ;;  %v2287_v30 = vshrl.u32 %v4781_v10, 16 }
 0x2e0   :  { %v2168_v50 = vand.u32 3, %v2167_v59  ;;  %vm2014_vm7 = vcmp.lt.s32.totalorder %v2013_v8, 2  ;;  %vm2015_vm8 = vcmp.eq.s32.totalorder %v2013_v8, 0  ;;  %vm2018_vm10 = vcmp.eq.s32.totalorder %v2013_v8, 2 }
 0x2e1   :  { %v1990_v27 = vmul.f32 %v1989_v55, %v1987_v36  ;;  %v2289_v55 = vshrl.u32 %v2284_v0, 16 }
 0x2e2   :  { %vm2170_vm9 = vcmp.eq.s32.totalorder %v2168_v50, 0  ;;  %vm2169_vm11 = vcmp.lt.s32.totalorder %v2168_v50, 2  ;;  %vm2173_vm12 = vcmp.eq.s32.totalorder %v2168_v50, 2 }
 0x2e3   :  { %v1991_v61 = vxor.u32 2147483648, %v1990_v27  ;;  %v4786_v39 = vmul.u32 %v2289_v55, %v2286_v14  ;;  %v2293_v45 = vmul.u32 %v2289_v55, %v2287_v30 }
 0x2e5   :  { %v1992_v51 = vsel %vm1871_vm15, %v1991_v61, %v1990_v27  ;;  %v2311_v27 = vshrl.u32 %v2280_v46, 16 }
 0x2e6   :  { %v1995_v22 = vsel %vm4717_vm2, %v5167_v12, %v1992_v51 }
 0x2e7   :  { %v1997_v15 = vmul.f32 %v1995_v22, %v1995_v22  ;;  %v4788_v1 = vmul.u32 %v2311_v27, %v2286_v14 }
 0x2e9   :  { %v2005_v48 = vmul.f32 -0.00019511016, %v1997_v15  ;;  %v1998_v38 = vmul.f32 -0.001358992, %v1997_v15 }
 0x2eb   :  { %v2006_v40 = vadd.f32 0.008332121, %v2005_v48  ;;  %v1999_v31 = vadd.f32 0.041655596, %v1998_v38  ;;  %v2288_v48 = vand.u32 65535, %v2284_v0 }
 0x2ed   :  { %v2007_v13 = vmul.f32 %v2006_v40, %v1997_v15  ;;  %v2000_v32 = vmul.f32 %v1999_v31, %v1997_v15  ;;  %v2310_v40 = vand.u32 65535, %v2280_v46  ;;  %v2290_v52 = vmul.u32 %v2288_v48, %v2286_v14 }
 0x2ef   :  { %v2008_v28 = vadd.f32 -0.16666654, %v2007_v13  ;;  %v2001_v21 = vadd.f32 -0.4999988, %v2000_v32  ;;  %v2312_v7 = vmul.u32 %v2310_v40, %v2286_v14  ;;  %v4793_v13 = vmul.u32 %v2288_v48, %v2287_v30 }
 0x2f0   :  { %v4795_v20 = vmul.u32 %v2310_v40, %v2287_v30 }
 0x2f1   :  { %v2009_v62 = vmul.f32 %v2008_v28, %v1997_v15  ;;  %v2002_v53 = vmul.f32 %v2001_v21, %v1997_v15  ;;  %v2294_v15 = vshll.u32 %v4786_v39, 16  ;;  %v2315_v21 = vmul.u32 %v2311_v27, %v2287_v30 }
 0x2f2   :  { %v2318_v3 = vshll.u32 %v4795_v20, 16 }
 0x2f3   :  { %v2010_v36 = vadd.f32 1.0, %v2009_v62  ;;  %v2003_v42 = vadd.f32 1.0, %v2002_v53  ;;  %vm4797_vm0 = vc.u32 %v2290_v52, %v2294_v15  ;;  %v2300_v25 = vadd.s32 %v2294_v15, %v2290_v52 }
 0x2f4   :  { %v2296_v62 = vshll.u32 %v4793_v13, 16  ;;  %v2299_v34 = vsel %vm4797_vm0, 1, %v5120_v43  ;;  %v2317_v15 = vshrl.u32 %v4788_v1, 16  ;;  %v2295_v52 = vshrl.u32 %v4786_v39, 16 }
 0x2f5   :  { %v2011_v61 = vmul.f32 %v2010_v36, %v1995_v22  ;;  %v2019_v5 = vxor.u32 2147483648, %v2003_v42  ;;  %v2316_v22 = vshll.u32 %v4788_v1, 16  ;;  %v2253_v1 = vshrl.u32 %v5131_v60, %v4724_v49 }
 0x2f6   :  { %vm2302_vm15 = vc.u32 %v2300_v25, %v2296_v62 }
 0x2f7   :  { %v2016_v38 = vxor.u32 2147483648, %v2011_v61  ;;  %v2020_v26 = vsel %vm2018_vm10, %v2019_v5, %v2011_v61  ;;  %v2175_v28 = vsel %vm2173_vm12, %v2019_v5, %v2011_v61  ;;  %vm2320_vm13 = vc.u32 %v2312_v7, %v2316_v22  ;;  %v3541_v5 = vld [vmem:[#allocation13 + $0x38] sm:$0xff] }
 0x2f8   :  { %v2322_v29 = vadd.s32 %v2316_v22, %v2312_v7  ;;  %v2321_v0 = vsel %vm2320_vm13, 1, %v5120_v43  ;;  %v2303_v48 = vsel %vm2302_vm15, 1, %v5120_v43  ;;  %v2273_v39 = vsel %vm2269_vm4, %v2253_v1, %v4751_v54 }
 0x2f9   :  { %v2017_v18 = vsel %vm2015_vm8, %v2003_v42, %v2016_v38  ;;  %v2172_v56 = vsel %vm2170_vm9, %v2003_v42, %v2016_v38  ;;  %v2323_v59 = vadd.s32 %v2321_v0, %v2315_v21 }
 0x2fa   :  { %v2021_v32 = vsel %vm2014_vm7, %v2017_v18, %v2020_v26  ;;  %v2176_v44 = vsel %vm2169_vm11, %v2172_v56, %v2175_v28  ;;  %vm2324_vm1 = vc.u32 %v2322_v29, %v2318_v3  ;;  %v2319_v18 = vshrl.u32 %v4795_v20, 16  ;;  %v3542_v56 = vld [vmem:[#allocation13 + $0x30] sm:$0xff]  ;;  %v3543_v26 = vld [vmem:[#allocation13 + $0x28] sm:$0xff] }
 0x2fb   :  { %v2022_v46 = vsel %vm2012_vm14, nan, %v2021_v32  ;;  %v2177_v16 = vsel %vm2012_vm14, nan, %v2176_v44  ;;  %v3545_v32 = vld [vmem:[#allocation13 + $0x18] sm:$0xff]  ;;  %vm4838_vm7 = vcmp.le.f32.partialorder %v2237_v11, 0.7853982 }
 0x333   :  { %v1829_v51 = vpop.f32.mrf.mxu0  ;;  %v1842_v19 = vpop.f32.mrf.mxu1 }
 0x334   :  { %v1859_v4 = vsub.f32 %v1829_v51, %v1842_v19 }
 0x336   :  { %v2178_v36 = vmul.f32 %v2022_v46, %v1859_v4  ;;  %v2181_v53 = vmul.f32 %v2177_v16, %v1859_v4 }
 0x33b   :  { %v1831_v47 = vpop.f32.mrf.mxu0  ;;  %v1844_v58 = vpop.f32.mrf.mxu1 }
 0x33c   :  { %v1855_v33 = vpop.f32.mrf.mxu2  ;;  %v2297_v47 = vshrl.u32 %v4793_v13, 16  ;;  %v2274_v58 = vsel %vm2272_vm3, %v4748_v63, 2102212464  ;;  %v2326_v13 = vadd.s32 %v2322_v29, %v2318_v3  ;;  %v3548_v29 = vld [vmem:[#allocation13] sm:$0xff] }
 0x33d   :  { %v1860_v23 = vsub.f32 %v1855_v33, %v1829_v51  ;;  %v2301_v51 = vadd.s32 %v2299_v34, %v2293_v45  ;;  %v2275_v20 = vsel %vm2271_vm5, %v4746_v24, %v2274_v58  ;;  %v3544_v33 = vld [vmem:[#allocation13 + $0x20] sm:$0xff]  ;;  %v3547_v45 = vld [vmem:[#allocation13 + $0x8] sm:$0xff]  ;;  %vm2239_vm5 = vcmp.lt.s32.totalorder %v5166_v35, 0 }
 0x33e   :  { %v2276_v63 = vsel %vm2270_vm6, %v2273_v39, %v2275_v20 }
 0x33f   :  { %v1861_v57 = vsub.f32 %v1860_v23, %v1842_v19  ;;  %v2325_v19 = vsel %vm2324_vm1, 1, %v5120_v43  ;;  %v2305_v30 = vadd.s32 %v2303_v48, %v2301_v51  ;;  %v2330_v4 = vmul.u32 %v4781_v10, %v2276_v63  ;;  %v3546_v23 = vld [vmem:[#allocation13 + $0x10] sm:$0xff] }
 0x340   :  { %v2327_v50 = vadd.s32 %v2325_v19, %v2323_v59 }
 0x341   :  { %v2179_v12 = vmul.f32 %v2177_v16, %v1861_v57  ;;  %v2182_v55 = vmul.f32 %v2022_v46, %v1861_v57  ;;  %v2306_v22 = vadd.s32 %v2305_v30, %v2295_v52 }
 0x342   :  { %v2328_v7 = vadd.s32 %v2327_v50, %v2317_v15 }
 0x343   :  { %v2180_v14 = vsub.f32 %v2178_v36, %v2179_v12  ;;  %v2183_v61 = vadd.f32 %v2182_v55, %v2181_v53  ;;  %v2307_v25 = vadd.s32 %v2306_v22, %v2297_v47  ;;  %v5178_v55 = vld [vmem:[#allocation27_spill] sm:$0xff] }
 0x344   :  { %v1857_v42 = vpop.f32.mrf.mxu2  ;;  %v2329_v31 = vadd.s32 %v2328_v7, %v2319_v18  ;;  %v2608_v59 = vand.u32 2139095040, %v5178_v55 }
 0x345   :  { %v2184_v27 = vpack.c.bf16 %v2180_v14, %v2180_v14  ;;  %v2185_v40 = vpack.c.bf16 %v2183_v61, %v2183_v61  ;;  %v2186_v8 = vadd.f32 %v2183_v61, %v2180_v14  ;;  %vm2332_vm2 = vc.u32 %v2307_v25, %v2326_v13 }
 0x346   :  { %v2333_v28 = vadd.s32 1, %v2329_v31  ;;  %v2331_v36 = vadd.s32 %v2326_v13, %v2307_v25  ;;  %v2609_v19 = vshrl.u32 %v2608_v59, 23  ;;  %v2605_v25 = vand.u32 2147483647, %v5178_v55 }
 0x347   :  { %2196 = vmatmul.bf16.vlgmr.msrb.gmra.mxu3 %v2184_v27  ;;  %2209 = vmatmul.bf16.vlgmr.msra.gmra.mxu0 %v2185_v40  ;;  %v2187_v38 = vpack.c.bf16 %v2186_v8, %v2186_v8 }
 0x348   :  { %2950 = vmatpush.bf16.msrb.mxu3 %v3541_v5  ;;  %v2334_v49 = vsel %vm2332_vm2, %v2333_v28, %v2329_v31  ;;  %v3458_v27 = vadd.s32 4294967169, %v2609_v19 }
 0x349   :  { %2222 = vmatmul.bf16.vlgmr.msra.gmra.mxu1 %v2187_v38  ;;  %v2335_v44 = vadd.s32 %v2334_v49, %v2330_v4 }
 0x34a   :  { %v2615_v8 = vadd.s32 1, %v3458_v27 }
 0x34b   :  { %v2336_v54 = vadd.s32 536870912, %v2335_v44 }
 0x34c   :  { %2951 = vmatpush.bf16.msrb.mxu3 %v3542_v56  ;;  %vm2616_vm6 = vcmp.gt.s32.totalorder %v2615_v8, 0 }
 0x34d   :  { %v4829_v24 = vshrl.u32 %v2336_v54, 30  ;;  %v2617_v15 = vsel %vm2616_vm6, %v2615_v8, 0 }
 0x34e   :  { %v2619_v52 = vand.u32 31, %v2617_v15  ;;  %v4851_v58 = vshrl.u32 %v2617_v15, 5 }
 0x34f   :  { %v2338_v6 = vshll.u32 %v4829_v24, 30 }
 0x350   :  { %2952 = vmatpush.bf16.msrb.mxu3 %v3543_v26  ;;  %v4845_v18 = vsub.s32 32, %v2619_v52  ;;  %v2634_v1 = vshll.u32 %v5172_v41, %v2619_v52  ;;  %v2631_v20 = vshll.u32 %v5174_v9, %v2619_v52  ;;  %v2628_v49 = vshll.u32 %v5173_v2, %v2619_v52 }
 0x351   :  { %v2339_v62 = vsub.s32 %v2335_v44, %v2338_v6  ;;  %v2622_v44 = vshll.u32 %v5131_v60, %v2619_v52  ;;  %vm2640_vm8 = vcmp.lt.s32.totalorder %v4851_v58, 4  ;;  %vm2637_vm9 = vcmp.lt.s32.totalorder %v4851_v58, 1 }
 0x352   :  { %v2635_v47 = vshrl.u32 %v5171_v37, %v4845_v18  ;;  %v2632_v11 = vshrl.u32 %v5172_v41, %v4845_v18  ;;  %v2626_v26 = vshrl.u32 %v5173_v2, %v4845_v18  ;;  %v2629_v39 = vshrl.u32 %v5174_v9, %v4845_v18 }
 0x353   :  { %v2341_v3 = vsub.s32 0, %v2339_v62  ;;  %vm2340_vm3 = vcmp.lt.s32.totalorder %v2339_v62, 0  ;;  %v2623_v28 = vshrl.u32 %v5175_v17, %v4845_v18  ;;  %vm2639_vm10 = vcmp.lt.s32.totalorder %v4851_v58, 3 }
 0x354   :  { %2953 = vmatpush.bf16.msrb.mxu3 %v3544_v33  ;;  %v2636_v63 = vor.u32 %v2635_v47, %v2634_v1  ;;  %v2625_v33 = vshll.u32 %v5175_v17, %v2619_v52  ;;  %v2633_v4 = vor.u32 %v2632_v11, %v2631_v20  ;;  %vm2638_vm11 = vcmp.lt.s32.totalorder %v4851_v58, 2 }
 0x355   :  { %v2342_v57 = vsel %vm2340_vm3, %v2341_v3, %v2339_v62  ;;  %v4872_v6 = vor.u32 %v2623_v28, %v2622_v44  ;;  %v2361_v3 = vsub.s32 4, %v4829_v24 }
 0x356   :  { %v2343_v34 = vclz %v2342_v57  ;;  %v4867_v54 = vor.u32 %v2626_v26, %v2625_v33  ;;  %v2646_v57 = vsel %vm2640_vm8, %v2633_v4, 920167782 }
 0x358   :  { %2954 = vmatpush.bf16.msrb.mxu3 %v3545_v32  ;;  %v3453_v10 = vadd.s32 4294967294, %v2343_v34 }
 0x35a   :  { %vm3454_vm4 = vcmp.lt.s32.totalorder %v3453_v10, 0 }
 0x35b   :  { %v2346_v21 = vsel %vm3454_vm4, 0, %v3453_v10  ;;  %vm2380_vm4 = vweird.f32 %v5166_v35 }
 0x35c   :  { %2955 = vmatpush.bf16.msrb.mxu3 %v3546_v23  ;;  %v2351_v0 = vsub.s32 4294967266, %v2346_v21  ;;  %v2347_v16 = vsub.s32 32, %v2346_v21  ;;  %v2348_v14 = vshll.u32 %v2339_v62, %v2346_v21  ;;  %v2612_v23 = vand.u32 8388607, %v2605_v25 }
 0x35d   :  { %v2650_v62 = vsel %vm2640_vm8, %v2636_v63, 1326507024 }
 0x35e   :  { %v2352_v46 = vadd.s32 127, %v2351_v0  ;;  %v2349_v12 = vshrl.u32 %v2331_v36, %v2347_v16  ;;  %v2613_v10 = vor.u32 8388608, %v2612_v23  ;;  %v2651_v0 = vsel %vm2639_vm10, %v2633_v4, %v2650_v62 }
 0x35f   :  { %v2645_v16 = vsel %vm2637_vm9, %v4872_v6, %v4867_v54 }
 0x360   :  { %2956 = vmatpush.bf16.msrb.mxu3 %v3547_v45  ;;  %v2353_v53 = vshll.u32 %v2352_v46, 23  ;;  %v2350_v51 = vor.u32 %v2349_v12, %v2348_v14  ;;  %v4869_v45 = vor.u32 %v2629_v39, %v2628_v49 }
 0x362   :  { %v2354_v61 = vor.u32 4788187, %v2353_v53  ;;  %v2357_v48 = vcvt.s32.f32 %v2350_v51  ;;  %v2649_v21 = vsel %vm2637_vm9, %v4867_v54, %v4869_v45  ;;  %v2647_v36 = vsel %vm2639_vm10, %v4869_v45, %v2646_v57 }
 0x363   :  { %v2362_v53 = vsel %vm2239_vm5, %v2361_v3, %v4829_v24  ;;  %v2652_v59 = vsel %vm2638_vm11, %v2649_v21, %v2651_v0  ;;  %v2648_v14 = vsel %vm2638_vm11, %v2645_v16, %v2647_v36 }
 0x364   :  { %2957 = vmatpush.bf16.msrb.mxu3 %v3548_v29  ;;  %v2355_v42 = vand.u32 2147483647, %v2354_v61  ;;  %v4902_v61 = vshll.u32 %v2613_v10, 8  ;;  %v2364_v51 = vsel %vm4838_vm7, 0, %v2362_v53  ;;  %v2679_v27 = vshrl.u32 %v2648_v14, 16 }
 0x365   :  { %v2656_v15 = vand.u32 65535, %v2652_v59  ;;  %v2678_v52 = vand.u32 65535, %v2648_v14 }
 0x366   :  { %v2358_v40 = vmul.f32 %v2357_v48, %v2355_v42  ;;  %v2657_v42 = vshrl.u32 %v2652_v59, 16  ;;  %v2654_v24 = vand.u32 65535, %v4902_v61 }
 0x368   :  { %v2359_v50 = vxor.u32 2147483648, %v2358_v40  ;;  %v2658_v39 = vmul.u32 %v2656_v15, %v2654_v24  ;;  %v2680_v20 = vmul.u32 %v2678_v52, %v2654_v24 }
 0x36a   :  { %v2360_v38 = vsel %vm2239_vm5, %v2359_v50, %v2358_v40  ;;  %v2535_v40 = vadd.s32 3, %v2364_v51  ;;  %v4907_v50 = vmul.u32 %v2657_v42, %v2654_v24 }
 0x36b   :  { %v2363_v5 = vsel %vm4838_vm7, %v5166_v35, %v2360_v38 }
 0x36c   :  { %v2365_v7 = vmul.f32 %v2363_v5, %v2363_v5  ;;  %v2536_v47 = vand.u32 3, %v2535_v40 }
 0x36e   :  { %v2373_v22 = vmul.f32 -0.00019511016, %v2365_v7  ;;  %v2366_v31 = vmul.f32 -0.001358992, %v2365_v7  ;;  %vm2538_vm13 = vcmp.eq.s32.totalorder %v2536_v47, 0  ;;  %vm2537_vm15 = vcmp.lt.s32.totalorder %v2536_v47, 2 }
 0x36f   :  { %vm2541_vm1 = vcmp.eq.s32.totalorder %v2536_v47, 2 }
 0x370   :  { %v2374_v56 = vadd.f32 0.008332121, %v2373_v22  ;;  %v2367_v32 = vadd.f32 0.041655596, %v2366_v31  ;;  %v4909_v22 = vmul.u32 %v2679_v27, %v2654_v24  ;;  %v2655_v31 = vshrl.u32 %v4902_v61, 16 }
 0x372   :  { %v2375_v13 = vmul.f32 %v2374_v56, %v2365_v7  ;;  %v2368_v34 = vmul.f32 %v2367_v32, %v2365_v7  ;;  %v2381_v56 = vand.u32 3, %v2364_v51  ;;  %v2682_v33 = vmul.u32 %v2678_v52, %v2655_v31 }
 0x373   :  { %v2661_v21 = vmul.u32 %v2657_v42, %v2655_v31  ;;  %v2683_v53 = vmul.u32 %v2679_v27, %v2655_v31 }
 0x374   :  { %v2376_v29 = vadd.f32 -0.16666654, %v2375_v13  ;;  %v2369_v12 = vadd.f32 -0.4999988, %v2368_v34  ;;  %vm2382_vm12 = vcmp.lt.s32.totalorder %v2381_v56, 2  ;;  %vm2383_vm0 = vcmp.eq.s32.totalorder %v2381_v56, 0 }
 0x375   :  { %v2660_v13 = vmul.u32 %v2656_v15, %v2655_v31  ;;  %vm2386_vm14 = vcmp.eq.s32.totalorder %v2381_v56, 2 }
 0x376   :  { %v2377_v46 = vmul.f32 %v2376_v29, %v2365_v7  ;;  %v2370_v48 = vmul.f32 %v2369_v12, %v2365_v7  ;;  %v2662_v7 = vshll.u32 %v4907_v50, 16 }
 0x377   :  { %v2664_v0 = vshll.u32 %v2660_v13, 16 }
 0x378   :  { %v2378_v19 = vadd.f32 1.0, %v2377_v46  ;;  %v2371_v38 = vadd.f32 1.0, %v2370_v48  ;;  %vm4914_vm2 = vc.u32 %v2658_v39, %v2662_v7  ;;  %v2668_v4 = vadd.s32 %v2662_v7, %v2658_v39 }
 0x379   :  { %v2686_v46 = vshll.u32 %v2682_v33, 16  ;;  %v2667_v36 = vsel %vm4914_vm2, 1, %v5120_v43 }
 0x37a   :  { %v2379_v8 = vmul.f32 %v2378_v19, %v2363_v5  ;;  %v2387_v26 = vxor.u32 2147483648, %v2371_v38  ;;  %v2684_v5 = vshll.u32 %v4909_v22, 16  ;;  %vm2670_vm5 = vc.u32 %v2668_v4, %v2664_v0 }
 0x37b   :  { %v2671_v27 = vsel %vm2670_vm5, 1, %v5120_v43  ;;  %v2621_v4 = vshrl.u32 %v5131_v60, %v4845_v18 }
 0x37c   :  { %v2384_v30 = vxor.u32 2147483648, %v2379_v8  ;;  %v2388_v44 = vsel %vm2386_vm14, %v2387_v26, %v2379_v8  ;;  %v2543_v23 = vsel %vm2541_vm1, %v2387_v26, %v2379_v8  ;;  %vm2688_vm3 = vc.u32 %v2680_v20, %v2684_v5 }
 0x37d   :  { %v2690_v29 = vadd.s32 %v2684_v5, %v2680_v20  ;;  %v2689_v12 = vsel %vm2688_vm3, 1, %v5120_v43  ;;  %v2663_v26 = vshrl.u32 %v4907_v50, 16  ;;  %v2687_v5 = vshrl.u32 %v2682_v33, 16 }
 0x37e   :  { %v2385_v28 = vsel %vm2383_vm0, %v2371_v38, %v2384_v30  ;;  %v2540_v63 = vsel %vm2538_vm13, %v2371_v38, %v2384_v30  ;;  %v2691_v42 = vadd.s32 %v2689_v12, %v2683_v53  ;;  %v2669_v38 = vadd.s32 %v2667_v36, %v2661_v21  ;;  %v5183_v53 = vld [vmem:[#allocation28_spill] sm:$0xff] }
 0x37f   :  { %v2389_v57 = vsel %vm2382_vm12, %v2385_v28, %v2388_v44  ;;  %v2544_v34 = vsel %vm2537_vm15, %v2540_v63, %v2543_v23  ;;  %vm2692_vm6 = vc.u32 %v2690_v29, %v2686_v46  ;;  %v2665_v28 = vshrl.u32 %v2660_v13, 16 }
 0x380   :  { %v2390_v59 = vsel %vm2380_vm4, nan, %v2389_v57  ;;  %v2545_v14 = vsel %vm2380_vm4, nan, %v2544_v34  ;;  %v2693_v15 = vsel %vm2692_vm6, 1, %v5120_v43  ;;  %v2673_v7 = vadd.s32 %v2671_v27, %v2669_v38 }
 0x381   :  { %v2695_v30 = vadd.s32 %v2693_v15, %v2691_v42  ;;  %v2642_v63 = vsel %vm2640_vm8, %v4869_v45, 2102212464  ;;  %v2694_v44 = vadd.s32 %v2690_v29, %v2686_v46  ;;  %v2976_v12 = vand.u32 2139095040, %v5183_v53 }
 0x382   :  { %v2674_v20 = vadd.s32 %v2673_v7, %v2663_v26  ;;  %v2643_v50 = vsel %vm2639_vm10, %v4867_v54, %v2642_v63  ;;  %vm2607_vm10 = vcmp.lt.s32.totalorder %v5178_v55, 0  ;;  %vm4951_vm12 = vcmp.le.f32.partialorder %v2605_v25, 0.7853982 }
 0x3c4   :  { %v2210_v11 = vpop.f32.mrf.mxu0 }
 0x3c6   :  { %v2223_v1 = vpop.f32.mrf.mxu1 }
 0x3ca   :  { %v2197_v32 = vpop.f32.mrf.mxu3 }
 0x3cb   :  { %v2227_v62 = vsub.f32 %v2197_v32, %v2210_v11  ;;  %v2228_v3 = vsub.f32 %v2223_v1, %v2197_v32  ;;  %v2685_v1 = vshrl.u32 %v4909_v22, 16  ;;  %v2675_v32 = vadd.s32 %v2674_v20, %v2665_v28 }
 0x3cc   :  { %v2212_v10 = vpop.f32.mrf.mxu0  ;;  %v2641_v22 = vsel %vm2637_vm9, %v2621_v4, %v4872_v6  ;;  %v2973_v20 = vand.u32 2147483647, %v5183_v53 }
 0x3cd   :  { %v2229_v16 = vsub.f32 %v2228_v3, %v2210_v11  ;;  %v2546_v19 = vmul.f32 %v2390_v59, %v2227_v62  ;;  %v2549_v35 = vmul.f32 %v2545_v14, %v2227_v62  ;;  %v2696_v39 = vadd.s32 %v2695_v30, %v2685_v1 }
 0x3ce   :  { %v2225_v51 = vpop.f32.mrf.mxu1  ;;  %vm2700_vm7 = vc.u32 %v2675_v32, %v2694_v44  ;;  %v2644_v13 = vsel %vm2638_vm11, %v2641_v22, %v2643_v50 }
 0x3cf   :  { %v2547_v48 = vmul.f32 %v2545_v14, %v2229_v16  ;;  %v2550_v40 = vmul.f32 %v2390_v59, %v2229_v16  ;;  %v2697_v49 = vadd.s32 %v2696_v39, %v2687_v5  ;;  %v2698_v23 = vmul.u32 %v4902_v61, %v2644_v13 }
 0x3d0   :  { %v2699_v16 = vadd.s32 %v2694_v44, %v2675_v32 }
 0x3d1   :  { %v2548_v24 = vsub.f32 %v2546_v19, %v2547_v48  ;;  %v2551_v8 = vadd.f32 %v2550_v40, %v2549_v35  ;;  %v2701_v33 = vadd.s32 1, %v2697_v49  ;;  %v2977_v19 = vshrl.u32 %v2976_v12, 23 }
 0x3d2   :  { %v2199_v52 = vpop.f32.mrf.mxu3 }
 0x3d3   :  { %v2554_v56 = vadd.f32 %v2551_v8, %v2548_v24  ;;  %v2552_v47 = vpack.c.bf16 %v2548_v24, %v2548_v24  ;;  %v2553_v11 = vpack.c.bf16 %v2551_v8, %v2551_v8  ;;  %v2702_v45 = vsel %vm2700_vm7, %v2701_v33, %v2697_v49 }
 0x3d4   :  { %v2703_v62 = vadd.s32 %v2702_v45, %v2698_v23  ;;  %v3464_v40 = vadd.s32 4294967169, %v2977_v19  ;;  %v2980_v33 = vand.u32 8388607, %v2973_v20 }
 0x3d5   :  { %2564 = vmatmul.bf16.vlgmr.msra.gmra.mxu2 %v2552_v47  ;;  %2577 = vmatmul.bf16.vlgmr.msra.gmra.mxu3 %v2553_v11  ;;  %v2555_v31 = vpack.c.bf16 %v2554_v56, %v2554_v56 }
 0x3d6   :  { %v2704_v18 = vadd.s32 536870912, %v2703_v62  ;;  %v2983_v24 = vadd.s32 1, %v3464_v40 }
 0x3d7   :  { %2590 = vmatmul.bf16.vlgmr.msrb.gmra.mxu0 %v2555_v31 }
 0x3d8   :  { %v4942_v3 = vshrl.u32 %v2704_v18, 30  ;;  %vm2984_vm11 = vcmp.gt.s32.totalorder %v2983_v24, 0 }
 0x3d9   :  { %v2985_v52 = vsel %vm2984_vm11, %v2983_v24, 0 }
 0x3da   :  { %v2706_v57 = vshll.u32 %v4942_v3, 30  ;;  %v2987_v56 = vand.u32 31, %v2985_v52  ;;  %v4964_v1 = vshrl.u32 %v2985_v52, 5 }
 0x3dc   :  { %v2707_v6 = vsub.s32 %v2703_v62, %v2706_v57  ;;  %v4958_v30 = vsub.s32 32, %v2987_v56  ;;  %v3002_v39 = vshll.u32 %v5172_v41, %v2987_v56  ;;  %v2999_v63 = vshll.u32 %v5174_v9, %v2987_v56 }
 0x3dd   :  { %v2993_v32 = vshll.u32 %v5175_v17, %v2987_v56  ;;  %v2996_v22 = vshll.u32 %v5173_v2, %v2987_v56  ;;  %v2990_v44 = vshll.u32 %v5131_v60, %v2987_v56  ;;  %vm3008_vm0 = vcmp.lt.s32.totalorder %v4964_v1, 4 }
 0x3de   :  { %v2709_v34 = vsub.s32 0, %v2707_v6  ;;  %vm2708_vm8 = vcmp.lt.s32.totalorder %v2707_v6, 0  ;;  %v3003_v7 = vshrl.u32 %v5171_v37, %v4958_v30  ;;  %v3000_v25 = vshrl.u32 %v5172_v41, %v4958_v30 }
 0x3df   :  { %v2994_v5 = vshrl.u32 %v5173_v2, %v4958_v30  ;;  %v2997_v28 = vshrl.u32 %v5174_v9, %v4958_v30  ;;  %v2991_v37 = vshrl.u32 %v5175_v17, %v4958_v30  ;;  %v2729_v2 = vsub.s32 4, %v4942_v3 }
 0x3e0   :  { %v2710_v10 = vsel %vm2708_vm8, %v2709_v34, %v2707_v6  ;;  %v3004_v4 = vor.u32 %v3003_v7, %v3002_v39  ;;  %v3001_v41 = vor.u32 %v3000_v25, %v2999_v63  ;;  %vm3005_vm13 = vcmp.lt.s32.totalorder %v4964_v1, 1 }
 0x3e1   :  { %v2711_v54 = vclz %v2710_v10  ;;  %v4980_v13 = vor.u32 %v2994_v5, %v2993_v32  ;;  %v4982_v45 = vor.u32 %v2997_v28, %v2996_v22  ;;  %v4985_v23 = vor.u32 %v2991_v37, %v2990_v44 }
 0x3e2   :  { %v3018_v17 = vsel %vm3008_vm0, %v3004_v4, 1326507024  ;;  %v3014_v62 = vsel %vm3008_vm0, %v3001_v41, 920167782  ;;  %vm3007_vm14 = vcmp.lt.s32.totalorder %v4964_v1, 3  ;;  %v2981_v57 = vor.u32 8388608, %v2980_v33 }
 0x3e3   :  { %v3459_v29 = vadd.s32 4294967294, %v2711_v54  ;;  %v3019_v34 = vsel %vm3007_vm14, %v3001_v41, %v3018_v17  ;;  %v3013_v54 = vsel %vm3005_vm13, %v4985_v23, %v4980_v13  ;;  %vm3006_vm15 = vcmp.lt.s32.totalorder %v4964_v1, 2 }
 0x3e5   :  { %vm3460_vm9 = vcmp.lt.s32.totalorder %v3459_v29, 0 }
 0x3e6   :  { %v2714_v21 = vsel %vm3460_vm9, 0, %v3459_v29  ;;  %v3015_v29 = vsel %vm3007_vm14, %v4982_v45, %v3014_v62  ;;  %vm2748_vm9 = vweird.f32 %v5178_v55 }
 0x3e7   :  { %v2719_v0 = vsub.s32 4294967266, %v2714_v21  ;;  %v2715_v46 = vsub.s32 32, %v2714_v21  ;;  %v2716_v59 = vshll.u32 %v2707_v6, %v2714_v21  ;;  %v3017_v6 = vsel %vm3005_vm13, %v4980_v13, %v4982_v45 }
 0x3e8   :  { %v2730_v21 = vsel %vm2607_vm10, %v2729_v2, %v4942_v3 }
 0x3e9   :  { %v2720_v58 = vadd.s32 127, %v2719_v0  ;;  %v2717_v61 = vshrl.u32 %v2699_v16, %v2715_v46  ;;  %v3016_v46 = vsel %vm3006_vm15, %v3013_v54, %v3015_v29  ;;  %v5015_v16 = vshll.u32 %v2981_v57, 8 }
 0x3ea   :  { %v3046_v52 = vand.u32 65535, %v3016_v46 }
 0x3eb   :  { %v2721_v36 = vshll.u32 %v2720_v58, 23  ;;  %v2718_v51 = vor.u32 %v2717_v61, %v2716_v59  ;;  %v3020_v58 = vsel %vm3006_vm15, %v3017_v6, %v3019_v34  ;;  %v3022_v3 = vand.u32 65535, %v5015_v16 }
 0x3ec   :  { %v3025_v12 = vshrl.u32 %v3020_v58, 16 }
 0x3ed   :  { %v2722_v14 = vor.u32 4788187, %v2721_v36  ;;  %v2725_v35 = vcvt.s32.f32 %v2718_v51  ;;  %v2732_v36 = vsel %vm4951_vm12, 0, %v2730_v21 }
 0x3ee   :  { %v2903_v51 = vadd.s32 3, %v2732_v36 }
 0x3ef   :  { %v2723_v48 = vand.u32 2147483647, %v2722_v14  ;;  %v3047_v14 = vshrl.u32 %v3016_v46, 16 }
 0x3f0   :  { %v2904_v24 = vand.u32 3, %v2903_v51 }
 0x3f1   :  { %v2726_v42 = vmul.f32 %v2725_v35, %v2723_v48  ;;  %v5020_v48 = vmul.u32 %v3025_v12, %v3022_v3  ;;  %v5022_v40 = vmul.u32 %v3047_v14, %v3022_v3 }
 0x3f2   :  { %vm2906_vm3 = vcmp.eq.s32.totalorder %v2904_v24, 0  ;;  %vm2905_vm5 = vcmp.lt.s32.totalorder %v2904_v24, 2  ;;  %vm2909_vm6 = vcmp.eq.s32.totalorder %v2904_v24, 2 }
 0x3f3   :  { %v2727_v8 = vxor.u32 2147483648, %v2726_v42  ;;  %v3030_v15 = vshll.u32 %v5020_v48, 16 }
 0x3f5   :  { %v2728_v38 = vsel %vm2607_vm10, %v2727_v8, %v2726_v42  ;;  %v2749_v42 = vand.u32 3, %v2732_v36  ;;  %v3024_v8 = vand.u32 65535, %v3020_v58 }
 0x3f6   :  { %v2731_v27 = vsel %vm4951_vm12, %v5178_v55, %v2728_v38 }
 0x3f7   :  { %v2733_v47 = vmul.f32 %v2731_v27, %v2731_v27  ;;  %vm2750_vm1 = vcmp.lt.s32.totalorder %v2749_v42, 2  ;;  %vm2751_vm2 = vcmp.eq.s32.totalorder %v2749_v42, 0  ;;  %vm2754_vm4 = vcmp.eq.s32.totalorder %v2749_v42, 2 }
 0x3f9   :  { %v2741_v11 = vmul.f32 -0.00019511016, %v2733_v47  ;;  %v2734_v26 = vmul.f32 -0.001358992, %v2733_v47 }
 0x3fb   :  { %v2742_v31 = vadd.f32 0.008332121, %v2741_v11  ;;  %v2735_v50 = vadd.f32 0.041655596, %v2734_v26  ;;  %v3048_v26 = vmul.u32 %v3046_v52, %v3022_v3 }
 0x3fd   :  { %v2743_v49 = vmul.f32 %v2742_v31, %v2733_v47  ;;  %v2736_v18 = vmul.f32 %v2735_v50, %v2733_v47  ;;  %v3052_v31 = vshll.u32 %v5022_v40, 16 }
 0x3ff   :  { %v2744_v9 = vadd.f32 -0.16666654, %v2743_v49  ;;  %v2737_v0 = vadd.f32 -0.4999988, %v2736_v18  ;;  %vm3056_vm8 = vc.u32 %v3048_v26, %v3052_v31  ;;  %v3058_v50 = vadd.s32 %v3052_v31, %v3048_v26 }
 0x400   :  { %v3057_v6 = vsel %vm3056_vm8, 1, %v5120_v43 }
 0x401   :  { %v2745_v10 = vmul.f32 %v2744_v9, %v2733_v47  ;;  %v2738_v59 = vmul.f32 %v2737_v0, %v2733_v47  ;;  %v3023_v47 = vshrl.u32 %v5015_v16, 16 }
 0x403   :  { %v2746_v61 = vadd.f32 1.0, %v2745_v10  ;;  %v2739_v35 = vadd.f32 1.0, %v2738_v59  ;;  %v3028_v39 = vmul.u32 %v3024_v8, %v3023_v47  ;;  %v3050_v37 = vmul.u32 %v3046_v52, %v3023_v47 }
 0x404   :  { %v3029_v21 = vmul.u32 %v3025_v12, %v3023_v47  ;;  %v3051_v0 = vmul.u32 %v3047_v14, %v3023_v47  ;;  %v3010_v47 = vsel %vm3008_vm0, %v4982_v45, 2102212464 }
 0x405   :  { %v2747_v19 = vmul.f32 %v2746_v61, %v2731_v27  ;;  %v2755_v11 = vxor.u32 2147483648, %v2739_v35  ;;  %v3026_v27 = vmul.u32 %v3024_v8, %v3022_v3  ;;  %v3032_v33 = vshll.u32 %v3028_v39, 16 }
 0x406   :  { %v3054_v57 = vshll.u32 %v3050_v37, 16  ;;  %v3059_v59 = vadd.s32 %v3057_v6, %v3051_v0  ;;  %v3053_v8 = vshrl.u32 %v5022_v40, 16 }
 0x407   :  { %v2752_v38 = vxor.u32 2147483648, %v2747_v19  ;;  %vm3034_vm7 = vc.u32 %v3026_v27, %v3030_v15  ;;  %v2756_v63 = vsel %vm2754_vm4, %v2755_v11, %v2747_v19  ;;  %v2911_v49 = vsel %vm2909_vm6, %v2755_v11, %v2747_v19 }
 0x408   :  { %v3035_v9 = vsel %vm3034_vm7, 1, %v5120_v43  ;;  %v3036_v17 = vadd.s32 %v3030_v15, %v3026_v27  ;;  %vm3060_vm10 = vc.u32 %v3058_v50, %v3054_v57  ;;  %v3033_v11 = vshrl.u32 %v3028_v39, 16 }
 0x409   :  { %v2753_v7 = vsel %vm2751_vm2, %v2739_v35, %v2752_v38  ;;  %v2908_v25 = vsel %vm2906_vm3, %v2739_v35, %v2752_v38  ;;  %v3037_v61 = vadd.s32 %v3035_v9, %v3029_v21  ;;  %v3061_v35 = vsel %vm3060_vm10, 1, %v5120_v43 }
 0x40a   :  { %v2757_v22 = vsel %vm2750_vm1, %v2753_v7, %v2756_v63  ;;  %v2912_v41 = vsel %vm2905_vm5, %v2908_v25, %v2911_v49  ;;  %vm3038_vm11 = vc.u32 %v3036_v17, %v3032_v33  ;;  %v3063_v12 = vadd.s32 %v3061_v35, %v3059_v59 }
 0x40b   :  { %v2758_v2 = vsel %vm2748_vm9, nan, %v2757_v22  ;;  %v2913_v62 = vsel %vm2748_vm9, nan, %v2912_v41  ;;  %v3039_v42 = vsel %vm3038_vm11, 1, %v5120_v43  ;;  %v3031_v38 = vshrl.u32 %v5020_v48, 16 }
 0x40c   :  { %v3041_v14 = vadd.s32 %v3039_v42, %v3037_v61  ;;  %v3064_v52 = vadd.s32 %v3063_v12, %v3053_v8  ;;  %v2989_v43 = vshrl.u32 %v5131_v60, %v4958_v30  ;;  %v3011_v48 = vsel %vm3007_vm14, %v4980_v13, %v3010_v47 }
 0x40d   :  { %v3062_v40 = vadd.s32 %v3058_v50, %v3054_v57  ;;  %vm2975_vm14 = vcmp.lt.s32.totalorder %v5183_v53, 0  ;;  %vm3116_vm7 = vweird.f32 %v5183_v53 }
 0x40e   :  { %v3042_v15 = vadd.s32 %v3041_v14, %v3031_v38  ;;  %v3009_v7 = vsel %vm3005_vm13, %v2989_v43, %v4985_v23 }
 0x40f   :  { %v3012_v26 = vsel %vm3006_vm15, %v3009_v7, %v3011_v48  ;;  %vm2974_vm15 = vcmp.le.f32.partialorder %v2973_v20, 0.7853982 }
 0x410   :  { %v3043_v27 = vadd.s32 %v3042_v15, %v3033_v11  ;;  %v3066_v39 = vmul.u32 %v5015_v16, %v3012_v26 }
 0x412   :  { %vm3068_vm12 = vc.u32 %v3043_v27, %v3062_v40  ;;  %v3067_v1 = vadd.s32 %v3062_v40, %v3043_v27 }
 0x454   :  { %v2591_v56 = vpop.f32.mrf.mxu0 }
 0x458   :  { %v2565_v5 = vpop.f32.mrf.mxu2  ;;  %v2578_v28 = vpop.f32.mrf.mxu3 }
 0x459   :  { %v2596_v4 = vsub.f32 %v2591_v56, %v2565_v5  ;;  %v2595_v32 = vsub.f32 %v2565_v5, %v2578_v28  ;;  %v3055_v56 = vshrl.u32 %v3050_v37, 16 }
 0x45b   :  { %v2597_v44 = vsub.f32 %v2596_v4, %v2578_v28  ;;  %v2914_v34 = vmul.f32 %v2758_v2, %v2595_v32  ;;  %v2917_v54 = vmul.f32 %v2913_v62, %v2595_v32  ;;  %v3065_v31 = vadd.s32 %v3064_v52, %v3055_v56 }
 0x45c   :  { %v2593_v18 = vpop.f32.mrf.mxu0 }
 0x45d   :  { %v2915_v10 = vmul.f32 %v2913_v62, %v2597_v44  ;;  %v2918_v29 = vmul.f32 %v2758_v2, %v2597_v44  ;;  %v3069_v25 = vadd.s32 1, %v3065_v31 }
 0x45f   :  { %v2916_v55 = vsub.f32 %v2914_v34, %v2915_v10  ;;  %v2919_v58 = vadd.f32 %v2918_v29, %v2917_v54  ;;  %v3070_v45 = vsel %vm3068_vm12, %v3069_v25, %v3065_v31 }
 0x460   :  { %v2567_v46 = vpop.f32.mrf.mxu2  ;;  %v2580_v36 = vpop.f32.mrf.mxu3  ;;  %v3071_v5 = vadd.s32 %v3070_v45, %v3066_v39 }
 0x461   :  { %v2922_v51 = vadd.f32 %v2919_v58, %v2916_v55  ;;  %v2920_v3 = vpack.c.bf16 %v2916_v55, %v2916_v55  ;;  %v2921_v19 = vpack.c.bf16 %v2919_v58, %v2919_v58 }
 0x462   :  { %v3072_v60 = vadd.s32 536870912, %v3071_v5 }
 0x463   :  { %2932 = vmatmul.bf16.vlgmr.msrb.gmra.mxu1 %v2920_v3  ;;  %2945 = vmatmul.bf16.vlgmr.msrb.gmra.mxu2 %v2921_v19  ;;  %v2923_v24 = vpack.c.bf16 %v2922_v51, %v2922_v51 }
 0x464   :  { %v3073_v30 = vshrl.u32 %v3072_v60, 30 }
 0x465   :  { %2958 = vmatmul.bf16.vlgmr.msrb.gmra.mxu3 %v2923_v24 }
 0x466   :  { %v3074_v28 = vshll.u32 %v3073_v30, 30  ;;  %v3097_v58 = vsub.s32 4, %v3073_v30 }
 0x468   :  { %v3075_v63 = vsub.s32 %v3071_v5, %v3074_v28  ;;  %v3098_v61 = vsel %vm2975_vm14, %v3097_v58, %v3073_v30 }
 0x469   :  { %v3100_v51 = vsel %vm2974_vm15, 0, %v3098_v61 }
 0x46a   :  { %v3077_v49 = vsub.s32 0, %v3075_v63  ;;  %vm3076_vm0 = vcmp.lt.s32.totalorder %v3075_v63, 0  ;;  %v3271_v35 = vadd.s32 3, %v3100_v51  ;;  %v3117_v12 = vand.u32 3, %v3100_v51 }
 0x46c   :  { %v3078_v23 = vsel %vm3076_vm0, %v3077_v49, %v3075_v63  ;;  %v3272_v14 = vand.u32 3, %v3271_v35  ;;  %vm3119_vm1 = vcmp.eq.s32.totalorder %v3117_v12, 0  ;;  %vm3122_vm3 = vcmp.eq.s32.totalorder %v3117_v12, 2 }
 0x46d   :  { %v3079_v37 = vclz %v3078_v23  ;;  %vm3118_vm5 = vcmp.lt.s32.totalorder %v3117_v12, 2 }
 0x46e   :  { %vm3274_vm2 = vcmp.eq.s32.totalorder %v3272_v14, 0  ;;  %vm3277_vm4 = vcmp.eq.s32.totalorder %v3272_v14, 2  ;;  %vm3273_vm6 = vcmp.lt.s32.totalorder %v3272_v14, 2 }
 0x46f   :  { %v3465_v4 = vadd.s32 4294967294, %v3079_v37 }
 0x471   :  { %vm3466_vm13 = vcmp.lt.s32.totalorder %v3465_v4, 0 }
 0x472   :  { %v3082_v13 = vsel %vm3466_vm13, 0, %v3465_v4 }
 0x473   :  { %v3087_v32 = vsub.s32 4294967266, %v3082_v13  ;;  %v3083_v41 = vsub.s32 32, %v3082_v13  ;;  %v3084_v33 = vshll.u32 %v3075_v63, %v3082_v13 }
 0x475   :  { %v3088_v22 = vadd.s32 127, %v3087_v32  ;;  %v3085_v44 = vshrl.u32 %v3067_v1, %v3083_v41 }
 0x477   :  { %v3089_v50 = vshll.u32 %v3088_v22, 23  ;;  %v3086_v9 = vor.u32 %v3085_v44, %v3084_v33 }
 0x479   :  { %v3090_v16 = vor.u32 4788187, %v3089_v50  ;;  %v3093_v2 = vcvt.s32.f32 %v3086_v9 }
 0x47b   :  { %v3091_v17 = vand.u32 2147483647, %v3090_v16 }
 0x47d   :  { %v3094_v62 = vmul.f32 %v3093_v2, %v3091_v17 }
 0x47f   :  { %v3095_v18 = vxor.u32 2147483648, %v3094_v62 }
 0x481   :  { %v3096_v57 = vsel %vm2975_vm14, %v3095_v18, %v3094_v62 }
 0x482   :  { %v3099_v6 = vsel %vm2974_vm15, %v5183_v53, %v3096_v57 }
 0x483   :  { %v3101_v34 = vmul.f32 %v3099_v6, %v3099_v6 }
 0x485   :  { %v3109_v10 = vmul.f32 -0.00019511016, %v3101_v34  ;;  %v3102_v29 = vmul.f32 -0.001358992, %v3101_v34 }
 0x487   :  { %v3110_v54 = vadd.f32 0.008332121, %v3109_v10  ;;  %v3103_v0 = vadd.f32 0.041655596, %v3102_v29 }
 0x489   :  { %v3111_v21 = vmul.f32 %v3110_v54, %v3101_v34  ;;  %v3104_v46 = vmul.f32 %v3103_v0, %v3101_v34 }
 0x48b   :  { %v3112_v55 = vadd.f32 -0.16666654, %v3111_v21  ;;  %v3105_v59 = vadd.f32 -0.4999988, %v3104_v46 }
 0x48d   :  { %v3113_v36 = vmul.f32 %v3112_v55, %v3101_v34  ;;  %v3106_v19 = vmul.f32 %v3105_v59, %v3101_v34 }
 0x48f   :  { %v3114_v3 = vadd.f32 1.0, %v3113_v36  ;;  %v3107_v24 = vadd.f32 1.0, %v3106_v19 }
 0x491   :  { %v3115_v42 = vmul.f32 %v3114_v3, %v3099_v6  ;;  %v3123_v38 = vxor.u32 2147483648, %v3107_v24 }
 0x493   :  { %v3120_v8 = vxor.u32 2147483648, %v3115_v42  ;;  %v3124_v11 = vsel %vm3122_vm3, %v3123_v38, %v3115_v42  ;;  %v3279_v47 = vsel %vm3277_vm4, %v3123_v38, %v3115_v42 }
 0x495   :  { %v3121_v15 = vsel %vm3119_vm1, %v3107_v24, %v3120_v8  ;;  %v3276_v56 = vsel %vm3274_vm2, %v3107_v24, %v3120_v8 }
 0x496   :  { %v3125_v7 = vsel %vm3118_vm5, %v3121_v15, %v3124_v11  ;;  %v3280_v48 = vsel %vm3273_vm6, %v3276_v56, %v3279_v47 }
 0x497   :  { %v3126_v26 = vsel %vm3116_vm7, nan, %v3125_v7  ;;  %v3281_v45 = vsel %vm3116_vm7, nan, %v3280_v48 }
 0x4e0   :  { %v2933_v20 = vpop.f32.mrf.mxu1 }
 0x4e6   :  { %v2946_v52 = vpop.f32.mrf.mxu2 }
 0x4e7   :  { %v2963_v27 = vsub.f32 %v2933_v20, %v2946_v52 }
 0x4e8   :  { %v2935_v31 = vpop.f32.mrf.mxu1  ;;  %v2959_v43 = vpop.f32.mrf.mxu3 }
 0x4e9   :  { %v2964_v40 = vsub.f32 %v2959_v43, %v2933_v20  ;;  %v3282_v39 = vmul.f32 %v3126_v26, %v2963_v27  ;;  %v3285_v5 = vmul.f32 %v3281_v45, %v2963_v27 }
 0x4eb   :  { %v2965_v25 = vsub.f32 %v2964_v40, %v2946_v52 }
 0x4ed   :  { %v3283_v60 = vmul.f32 %v3281_v45, %v2965_v25  ;;  %v3286_v30 = vmul.f32 %v3126_v26, %v2965_v25 }
 0x4ee   :  { %v2948_v53 = vpop.f32.mrf.mxu2 }
 0x4ef   :  { %v3284_v28 = vsub.f32 %v3282_v39, %v3283_v60  ;;  %v3287_v63 = vadd.f32 %v3286_v30, %v3285_v5 }
 0x4f0   :  { %v2961_v49 = vpop.f32.mrf.mxu3 }
 0x4f1   :  { %3288 = vst [vmem:[#allocation14] sm:$0xff] %v3284_v28 }
 0x4f2   :  { %3289 = vst [vmem:[#allocation15] sm:$0xff] %v3287_v63  ;;  %3300 = dma.vmem_to_hbm [thread:$0]  %s3296_s6, 128, %s3298_s1, [#allocation4]  }
 0x4f3   :  { %3311 = dma.vmem_to_hbm [thread:$0]  %s3307_s20, 128, %s3309_s3, [#allocation16]  }
 0x4f4   :  { %3773 = dma.done.wait [#allocation4], 128  }
 0x4f5   :  { %3774 = vsyncadd [#allocation4], 4294967168 }
 0x4f6   :  { %3775 = dma.done.wait [#allocation16], 128  }
 0x4f7   :  { %3776 = vsyncadd [#allocation16], 4294967168 }
 0x4f8   :  { %3320 = vsyncpa [#allocation3], 1 }
 0x4f9   :  { %3321 = vsyncpa [#allocation6], 1 }
 0x4fa   :  { %3322 = vsyncpa [#allocation9], 1 }
 0x4fb   :  { %3323 = vsyncpa [#allocation12], 1 }
 0x4fc   :  { %3324 = vsyncpa [#allocation4], 1 }
 0x4fd   :  { %3325 = vsyncpa [#allocation16], 1 }

</bundles_post_ra>
